<compile_context>
chip_gen: v6e
topology: v6e:2x2x1
jax: 0.10.0
libtpu: 0.0.40
codegen_flags: <defaults>
</compile_context>

<pallas_src>
import jax
import jax.numpy as jnp
import numpy as np
from jax.experimental import pallas as pl
from jax.experimental.pallas import tpu as pltpu

B = 2                       # real batch
BP = 8                      # batch padded to a full sublane group
H, W, CIN, COUT = 8, 8, 13, 64
HW = H * W                  # 64
PATCH = 9 * CIN             # 117
PATCH_PAD = 128             # zero-padded patch dim -> clean 128-wide MXU K pass
FLAT = HW * COUT            # 4096, NHWC flatten order: index = hw*64 + c
HID1, HID2 = 1024, 512
TH1 = 512                   # fc1 output-column tile width  -> G = 2 grid steps
G = HID1 // TH1
EPS = 1e-5


# ------------------------------ Pallas kernel --------------------------------
def fused_forward_kernel(patches_ref, wc_ref, bc_ref, w1_ref, b1_ref,
                         w2_ref, b2_ref, w3_ref, b3_ref, o_ref,
                         h_scr, h2_acc):
    j = pl.program_id(0)

    @pl.when(j == 0)
    def _():
        # conv1 + folded bn1 + relu as one im2col matmul: (HW*BP,128)@(128,64)
        cv = jnp.dot(patches_ref[...], wc_ref[...],
                     preferred_element_type=jnp.float32)
        cv = jnp.maximum(cv + bc_ref[...], 0.0).astype(jnp.bfloat16)
        # Scatter rows (hw-major, BP rows per hw) into NHWC-flat lanes of h_scr.
        # Two hw positions (2*64 lanes) per iteration so every store is a full
        # 128-lane / 8-sublane aligned tile: no masked stores, no lane merge.
        for t in range(HW // 2):
            pair = jnp.concatenate(
                [cv[(2 * t) * BP:(2 * t + 1) * BP, :],
                 cv[(2 * t + 1) * BP:(2 * t + 2) * BP, :]], axis=1)   # (8, 128)
            h_scr[:, (2 * t) * COUT:(2 * t + 2) * COUT] = pair
        h2_acc[...] = jnp.zeros_like(h2_acc)

    # fc1 column block (+ folded bn2) + relu                         (BP, TH1)
    h1 = jnp.maximum(
        jnp.dot(h_scr[...], w1_ref[...], preferred_element_type=jnp.float32)
        + b1_ref[...], 0.0)
    # partial fc2 contraction over this HID1 block
    h2_acc[...] += jnp.dot(h1.astype(jnp.bfloat16), w2_ref[...],
                           preferred_element_type=jnp.float32)

    @pl.when(j == pl.num_programs(0) - 1)
    def _():
        h2 = jnp.maximum(h2_acc[...] + b2_ref[...], 0.0)    # fc2 + bn3 + relu
        # dropout: identity at inference. fc3 as multiply + lane-reduce
        # (w3 stored lane-dense as (1, HID2)).
        logits = jnp.sum(h2 * w3_ref[...], axis=-1, keepdims=True) + b3_ref[...]
        o_ref[...] = jax.nn.sigmoid(logits[:B, :])


def fused_forward(patches, f):
    return pl.pallas_call(
        fused_forward_kernel,
        out_shape=jax.ShapeDtypeStruct((B, 1), jnp.float32),
        grid=(G,),
        in_specs=[
            pl.BlockSpec((HW * BP, PATCH_PAD), lambda j: (0, 0)),  # patches (resident)
            pl.BlockSpec((PATCH_PAD, COUT), lambda j: (0, 0)),     # conv w  (resident)
            pl.BlockSpec((1, COUT), lambda j: (0, 0)),             # conv+bn1 bias
            pl.BlockSpec((FLAT, TH1), lambda j: (0, j)),           # fc1 column block (bf16)
            pl.BlockSpec((1, TH1), lambda j: (0, j)),              # fc1+bn2 bias block
            pl.BlockSpec((TH1, HID2), lambda j: (j, 0)),           # fc2 row block (bf16)
            pl.BlockSpec((1, HID2), lambda j: (0, 0)),             # fc2+bn3 bias (resident)
            pl.BlockSpec((1, HID2), lambda j: (0, 0)),             # fc3 w, lane-dense (resident)
            pl.BlockSpec((1, 1), lambda j: (0, 0)),                # fc3 bias (resident)
        ],
        out_specs=pl.BlockSpec((B, 1), lambda j: (0, 0)),
        scratch_shapes=[pltpu.VMEM((BP, FLAT), jnp.bfloat16),      # flattened conv output
                        pltpu.VMEM((BP, HID2), jnp.float32)],      # fc2 accumulator
        compiler_params=pltpu.CompilerParams(
            dimension_semantics=("arbitrary",),        # accumulator/scratch-carrying axis
            vmem_limit_bytes=32 * 1024 * 1024),        # keep explicit: v5e default is 16 MiB
    )(patches, f["wc"], f["bc"], f["w1"], f["b1"], f["w2"], f["b2"],
      f["w3"], f["b3"])


# ------------------------------ glue / params --------------------------------
def im2col_hw_major(x):
    # x: (B, 8, 8, 13) f32 -> patches (HW*BP, 128) bf16, row = hw*BP + b,
    # patch column = (kh*3+kw)*13 + cin.  Batch is zero-padded B->BP so every
    # per-hw row group is an aligned 8-sublane slab inside the kernel.
    xp = jnp.pad(x, ((0, BP - B), (1, 1), (1, 1), (0, 0)))
    cols = [xp[:, dh:dh + H, dw:dw + W, :] for dh in range(3) for dw in range(3)]
    p = jnp.stack(cols, axis=3).reshape(BP, HW, PATCH)          # (8, 64, 117)
    p = p.transpose(1, 0, 2).reshape(HW * BP, PATCH)            # hw-major rows
    p = jnp.pad(p, ((0, 0), (0, PATCH_PAD - PATCH)))
    return p.astype(jnp.bfloat16)


def init_params():
    key = jax.random.PRNGKey(42)
    ks = jax.random.split(key, 24)
    u = lambda k, s, lo=-0.1, hi=0.1: jax.random.uniform(k, s, jnp.float32, lo, hi)
    p = {}
    # conv1 + bn1
    p["conv_w"] = u(ks[0], (COUT, CIN, 3, 3))
    p["conv_b"] = u(ks[1], (COUT,))
    p["bn1_g"] = u(ks[2], (COUT,), 0.5, 1.5)
    p["bn1_b"] = u(ks[3], (COUT,))
    p["bn1_m"] = u(ks[4], (COUT,))
    p["bn1_v"] = u(ks[5], (COUT,), 0.5, 1.5)
    # fc1 + bn2
    p["fc1_w"] = u(ks[6], (HID1, FLAT))
    p["fc1_b"] = u(ks[7], (HID1,))
    p["bn2_g"] = u(ks[8], (HID1,), 0.5, 1.5)
    p["bn2_b"] = u(ks[9], (HID1,))
    p["bn2_m"] = u(ks[10], (HID1,))
    p["bn2_v"] = u(ks[11], (HID1,), 0.5, 1.5)
    # fc2 + bn3
    p["fc2_w"] = u(ks[12], (HID2, HID1))
    p["fc2_b"] = u(ks[13], (HID2,))
    p["bn3_g"] = u(ks[14], (HID2,), 0.5, 1.5)
    p["bn3_b"] = u(ks[15], (HID2,))
    p["bn3_m"] = u(ks[16], (HID2,))
    p["bn3_v"] = u(ks[17], (HID2,), 0.5, 1.5)
    # fc3
    p["fc3_w"] = u(ks[18], (1, HID2))
    p["fc3_b"] = u(ks[19], (1,))
    return p


def fuse_params(p):
    """One-time weight prep (outside the per-forward path): fold eval-mode BN
    into the preceding matmuls, permute fc1 rows to the NHWC flatten order
    (torch index c*HW+hw -> ours hw*COUT+c), zero-pad the conv weight rows to
    128, and cast the large matrices to bf16 (f32 accumulation in-kernel)."""
    # conv + bn1
    s1 = p["bn1_g"] / jnp.sqrt(p["bn1_v"] + EPS)
    wc = p["conv_w"].transpose(2, 3, 1, 0).reshape(PATCH, COUT) * s1[None, :]
    wc = jnp.pad(wc, ((0, PATCH_PAD - PATCH), (0, 0))).astype(jnp.bfloat16)
    bc = ((p["conv_b"] - p["bn1_m"]) * s1 + p["bn1_b"]).reshape(1, COUT)
    # fc1 + bn2
    w1t = p["fc1_w"].T.reshape(COUT, HW, HID1).transpose(1, 0, 2).reshape(FLAT, HID1)
    s2 = p["bn2_g"] / jnp.sqrt(p["bn2_v"] + EPS)
    w1 = (w1t * s2[None, :]).astype(jnp.bfloat16)
    b1 = ((p["fc1_b"] - p["bn2_m"]) * s2 + p["bn2_b"]).reshape(1, HID1)
    # fc2 + bn3
    s3 = p["bn3_g"] / jnp.sqrt(p["bn3_v"] + EPS)
    w2 = (p["fc2_w"].T * s3[None, :]).astype(jnp.bfloat16)
    b2 = ((p["fc2_b"] - p["bn3_m"]) * s3 + p["bn3_b"]).reshape(1, HID2)
    # fc3: keep lane-dense (1, HID2) f32 (applied as mul + lane-reduce in-kernel)
    w3 = p["fc3_w"].reshape(1, HID2)
    b3 = p["fc3_b"].reshape(1, 1)
    return dict(wc=wc, bc=bc, w1=w1, b1=b1, w2=w2, b2=b2, w3=w3, b3=b3)


@jax.jit
def chess_value_forward(x, fused):
    patches = im2col_hw_major(x)             # (HW*BP, 128) bf16, tiny
    return fused_forward(patches, fused)     # (B, 1) f32


# --------------------------- pure-JAX reference -------------------------------
@jax.jit
def reference_forward(x, p):
    out = jax.lax.conv_general_dilated(
        x, p["conv_w"].transpose(2, 3, 1, 0), (1, 1), "SAME",
        dimension_numbers=("NHWC", "HWIO", "NHWC")) + p["conv_b"]
    s1 = p["bn1_g"] / jnp.sqrt(p["bn1_v"] + EPS)
    out = jnp.maximum((out - p["bn1_m"]) * s1 + p["bn1_b"], 0.0)
    flat = out.transpose(0, 3, 1, 2).reshape(B, FLAT)          # torch NCHW flatten
    s2 = p["bn2_g"] / jnp.sqrt(p["bn2_v"] + EPS)
    h1 = jnp.maximum((flat @ p["fc1_w"].T + p["fc1_b"] - p["bn2_m"]) * s2 + p["bn2_b"], 0.0)
    s3 = p["bn3_g"] / jnp.sqrt(p["bn3_v"] + EPS)
    h2 = jnp.maximum((h1 @ p["fc2_w"].T + p["fc2_b"] - p["bn3_m"]) * s3 + p["bn3_b"], 0.0)
    return jax.nn.sigmoid(h2 @ p["fc3_w"].T + p["fc3_b"])


if __name__ == "__main__":
    params = init_params()
    fused = fuse_params(params)        # BN fold / permute / bf16 cast done ONCE
    x = jax.random.uniform(jax.random.PRNGKey(0), (B, H, W, CIN), jnp.float32)

    out = jax.block_until_ready(chess_value_forward(x, fused))
    ref = jax.block_until_ready(reference_forward(x, params))

    assert out.shape == (B, 1) and out.dtype == jnp.float32
    np.testing.assert_allclose(np.asarray(out), np.asarray(ref), atol=1e-2, rtol=1e-2)
    print("KERNEL_OK")
</pallas_src>

<mosaic_0001>
module attributes {stable_mosaic.version = 11 : i64} {
  func.func @fused_forward_kernel(%arg0: i32, %arg1: memref<512x128xbf16, #tpu.memory_space<vmem>>, %arg2: memref<128x64xbf16, #tpu.memory_space<vmem>>, %arg3: memref<1x64xf32, #tpu.memory_space<vmem>>, %arg4: memref<4096x512xbf16, #tpu.memory_space<vmem>>, %arg5: memref<1x512xf32, #tpu.memory_space<vmem>>, %arg6: memref<512x512xbf16, #tpu.memory_space<vmem>>, %arg7: memref<1x512xf32, #tpu.memory_space<vmem>>, %arg8: memref<1x512xf32, #tpu.memory_space<vmem>>, %arg9: memref<1x1xf32, #tpu.memory_space<vmem>>, %arg10: memref<2x1xf32, #tpu.memory_space<vmem>>, %arg11: memref<8x4096xbf16, #tpu.memory_space<vmem>>, %arg12: memref<8x512xf32, #tpu.memory_space<vmem>>) attributes {dimension_semantics = [#tpu.dimension_semantics<arbitrary>], iteration_bounds = array<i64: 2>, scalar_prefetch = 0 : i64, scratch_operands = 2 : i64, tpu.core_type = #tpu.core_type<tc>, window_params = [{pipeline_mode = #tpu.pipeline_mode<synchronous>, transform_indices = @transform_0, window_bounds = array<i64: 512, 128>}, {pipeline_mode = #tpu.pipeline_mode<synchronous>, transform_indices = @transform_1, window_bounds = array<i64: 128, 64>}, {pipeline_mode = #tpu.pipeline_mode<synchronous>, transform_indices = @transform_2, window_bounds = array<i64: 1, 64>}, {transform_indices = @transform_3, window_bounds = array<i64: 4096, 512>}, {transform_indices = @transform_4, window_bounds = array<i64: 1, 512>}, {transform_indices = @transform_5, window_bounds = array<i64: 512, 512>}, {pipeline_mode = #tpu.pipeline_mode<synchronous>, transform_indices = @transform_6, window_bounds = array<i64: 1, 512>}, {pipeline_mode = #tpu.pipeline_mode<synchronous>, transform_indices = @transform_7, window_bounds = array<i64: 1, 512>}, {pipeline_mode = #tpu.pipeline_mode<synchronous>, transform_indices = @transform_8, window_bounds = array<i64: 1, 1>}, {pipeline_mode = #tpu.pipeline_mode<synchronous>, transform_indices = @transform_9, window_bounds = array<i64: 2, 1>}]} {
    %c0_i32 = arith.constant 0 : i32
    %0 = arith.cmpi eq, %arg0, %c0_i32 : i32
    %1 = arith.extui %0 : i1 to i32
    %c0_i32_0 = arith.constant 0 : i32
    %2 = arith.cmpi ne, %1, %c0_i32_0 : i32
    scf.if %2 {
      %c0_15 = arith.constant 0 : index
      %c0_16 = arith.constant 0 : index
      %20 = vector.load %arg1[%c0_15, %c0_16] : memref<512x128xbf16, #tpu.memory_space<vmem>>, vector<512x128xbf16>
      %c0_17 = arith.constant 0 : index
      %c0_18 = arith.constant 0 : index
      %21 = vector.load %arg2[%c0_17, %c0_18] : memref<128x64xbf16, #tpu.memory_space<vmem>>, vector<128x64xbf16>
      %cst_19 = arith.constant dense<0.000000e+00> : vector<512x64xf32>
      %22 = tpu.matmul %20, %21, %cst_19 {dimension_numbers = #tpu.dot_dimension_numbers<[1], [0], [0], [1], [0, 0, 1, 1], [], []>} : vector<512x128xbf16>, vector<128x64xbf16>, vector<512x64xf32> -> vector<512x64xf32>
      %c0_20 = arith.constant 0 : index
      %c0_21 = arith.constant 0 : index
      %23 = vector.load %arg3[%c0_20, %c0_21] : memref<1x64xf32, #tpu.memory_space<vmem>>, vector<1x64xf32>
      %24 = vector.broadcast %23 : vector<1x64xf32> to vector<512x64xf32>
      %25 = arith.addf %22, %24 : vector<512x64xf32>
      %cst_22 = arith.constant 0.000000e+00 : f32
      %26 = vector.broadcast %cst_22 : f32 to vector<512x64xf32>
      %27 = arith.maximumf %25, %26 : vector<512x64xf32>
      %28 = arith.truncf %27 : vector<512x64xf32> to vector<512x64xbf16>
      %29 = vector.extract_strided_slice %28 {offsets = [0, 0], sizes = [8, 64], strides = [1, 1]} : vector<512x64xbf16> to vector<8x64xbf16>
      %30 = vector.extract_strided_slice %28 {offsets = [8, 0], sizes = [8, 64], strides = [1, 1]} : vector<512x64xbf16> to vector<8x64xbf16>
      %31 = tpu.concatenate %29, %30 in 1 : vector<8x64xbf16>, vector<8x64xbf16> -> vector<8x128xbf16>
      %c0_23 = arith.constant 0 : index
      %c0_24 = arith.constant 0 : index
      %32 = vector.load %arg11[%c0_23, %c0_24] : memref<8x4096xbf16, #tpu.memory_space<vmem>>, vector<8x128xbf16>
      tpu.vector_store %arg11[%c0_23, %c0_24], %31 {strides = array<i32>} : memref<8x4096xbf16, #tpu.memory_space<vmem>>, vector<8x128xbf16>,
      %33 = vector.extract_strided_slice %28 {offsets = [16, 0], sizes = [8, 64], strides = [1, 1]} : vector<512x64xbf16> to vector<8x64xbf16>
      %34 = vector.extract_strided_slice %28 {offsets = [24, 0], sizes = [8, 64], strides = [1, 1]} : vector<512x64xbf16> to vector<8x64xbf16>
      %35 = tpu.concatenate %33, %34 in 1 : vector<8x64xbf16>, vector<8x64xbf16> -> vector<8x128xbf16>
      %c0_25 = arith.constant 0 : index
      %c128 = arith.constant 128 : index
      %36 = vector.load %arg11[%c0_25, %c128] : memref<8x4096xbf16, #tpu.memory_space<vmem>>, vector<8x128xbf16>
      tpu.vector_store %arg11[%c0_25, %c128], %35 {strides = array<i32>} : memref<8x4096xbf16, #tpu.memory_space<vmem>>, vector<8x128xbf16>,
      %37 = vector.extract_strided_slice %28 {offsets = [32, 0], sizes = [8, 64], strides = [1, 1]} : vector<512x64xbf16> to vector<8x64xbf16>
      %38 = vector.extract_strided_slice %28 {offsets = [40, 0], sizes = [8, 64], strides = [1, 1]} : vector<512x64xbf16> to vector<8x64xbf16>
      %39 = tpu.concatenate %37, %38 in 1 : vector<8x64xbf16>, vector<8x64xbf16> -> vector<8x128xbf16>
      %c0_26 = arith.constant 0 : index
      %c256 = arith.constant 256 : index
      %40 = vector.load %arg11[%c0_26, %c256] : memref<8x4096xbf16, #tpu.memory_space<vmem>>, vector<8x128xbf16>
      tpu.vector_store %arg11[%c0_26, %c256], %39 {strides = array<i32>} : memref<8x4096xbf16, #tpu.memory_space<vmem>>, vector<8x128xbf16>,
      %41 = vector.extract_strided_slice %28 {offsets = [48, 0], sizes = [8, 64], strides = [1, 1]} : vector<512x64xbf16> to vector<8x64xbf16>
      %42 = vector.extract_strided_slice %28 {offsets = [56, 0], sizes = [8, 64], strides = [1, 1]} : vector<512x64xbf16> to vector<8x64xbf16>
      %43 = tpu.concatenate %41, %42 in 1 : vector<8x64xbf16>, vector<8x64xbf16> -> vector<8x128xbf16>
      %c0_27 = arith.constant 0 : index
      %c384 = arith.constant 384 : index
      %44 = vector.load %arg11[%c0_27, %c384] : memref<8x4096xbf16, #tpu.memory_space<vmem>>, vector<8x128xbf16>
      tpu.vector_store %arg11[%c0_27, %c384], %43 {strides = array<i32>} : memref<8x4096xbf16, #tpu.memory_space<vmem>>, vector<8x128xbf16>,
      %45 = vector.extract_strided_slice %28 {offsets = [64, 0], sizes = [8, 64], strides = [1, 1]} : vector<512x64xbf16> to vector<8x64xbf16>
      %46 = vector.extract_strided_slice %28 {offsets = [72, 0], sizes = [8, 64], strides = [1, 1]} : vector<512x64xbf16> to vector<8x64xbf16>
      %47 = tpu.concatenate %45, %46 in 1 : vector<8x64xbf16>, vector<8x64xbf16> -> vector<8x128xbf16>
      %c0_28 = arith.constant 0 : index
      %c512 = arith.constant 512 : index
      %48 = vector.load %arg11[%c0_28, %c512] : memref<8x4096xbf16, #tpu.memory_space<vmem>>, vector<8x128xbf16>
      tpu.vector_store %arg11[%c0_28, %c512], %47 {strides = array<i32>} : memref<8x4096xbf16, #tpu.memory_space<vmem>>, vector<8x128xbf16>,
      %49 = vector.extract_strided_slice %28 {offsets = [80, 0], sizes = [8, 64], strides = [1, 1]} : vector<512x64xbf16> to vector<8x64xbf16>
      %50 = vector.extract_strided_slice %28 {offsets = [88, 0], sizes = [8, 64], strides = [1, 1]} : vector<512x64xbf16> to vector<8x64xbf16>
      %51 = tpu.concatenate %49, %50 in 1 : vector<8x64xbf16>, vector<8x64xbf16> -> vector<8x128xbf16>
      %c0_29 = arith.constant 0 : index
      %c640 = arith.constant 640 : index
      %52 = vector.load %arg11[%c0_29, %c640] : memref<8x4096xbf16, #tpu.memory_space<vmem>>, vector<8x128xbf16>
      tpu.vector_store %arg11[%c0_29, %c640], %51 {strides = array<i32>} : memref<8x4096xbf16, #tpu.memory_space<vmem>>, vector<8x128xbf16>,
      %53 = vector.extract_strided_slice %28 {offsets = [96, 0], sizes = [8, 64], strides = [1, 1]} : vector<512x64xbf16> to vector<8x64xbf16>
      %54 = vector.extract_strided_slice %28 {offsets = [104, 0], sizes = [8, 64], strides = [1, 1]} : vector<512x64xbf16> to vector<8x64xbf16>
      %55 = tpu.concatenate %53, %54 in 1 : vector<8x64xbf16>, vector<8x64xbf16> -> vector<8x128xbf16>
      %c0_30 = arith.constant 0 : index
      %c768 = arith.constant 768 : index
      %56 = vector.load %arg11[%c0_30, %c768] : memref<8x4096xbf16, #tpu.memory_space<vmem>>, vector<8x128xbf16>
      tpu.vector_store %arg11[%c0_30, %c768], %55 {strides = array<i32>} : memref<8x4096xbf16, #tpu.memory_space<vmem>>, vector<8x128xbf16>,
      %57 = vector.extract_strided_slice %28 {offsets = [112, 0], sizes = [8, 64], strides = [1, 1]} : vector<512x64xbf16> to vector<8x64xbf16>
      %58 = vector.extract_strided_slice %28 {offsets = [120, 0], sizes = [8, 64], strides = [1, 1]} : vector<512x64xbf16> to vector<8x64xbf16>
      %59 = tpu.concatenate %57, %58 in 1 : vector<8x64xbf16>, vector<8x64xbf16> -> vector<8x128xbf16>
      %c0_31 = arith.constant 0 : index
      %c896 = arith.constant 896 : index
      %60 = vector.load %arg11[%c0_31, %c896] : memref<8x4096xbf16, #tpu.memory_space<vmem>>, vector<8x128xbf16>
      tpu.vector_store %arg11[%c0_31, %c896], %59 {strides = array<i32>} : memref<8x4096xbf16, #tpu.memory_space<vmem>>, vector<8x128xbf16>,
      %61 = vector.extract_strided_slice %28 {offsets = [128, 0], sizes = [8, 64], strides = [1, 1]} : vector<512x64xbf16> to vector<8x64xbf16>
      %62 = vector.extract_strided_slice %28 {offsets = [136, 0], sizes = [8, 64], strides = [1, 1]} : vector<512x64xbf16> to vector<8x64xbf16>
      %63 = tpu.concatenate %61, %62 in 1 : vector<8x64xbf16>, vector<8x64xbf16> -> vector<8x128xbf16>
      %c0_32 = arith.constant 0 : index
      %c1024 = arith.constant 1024 : index
      %64 = vector.load %arg11[%c0_32, %c1024] : memref<8x4096xbf16, #tpu.memory_space<vmem>>, vector<8x128xbf16>
      tpu.vector_store %arg11[%c0_32, %c1024], %63 {strides = array<i32>} : memref<8x4096xbf16, #tpu.memory_space<vmem>>, vector<8x128xbf16>,
      %65 = vector.extract_strided_slice %28 {offsets = [144, 0], sizes = [8, 64], strides = [1, 1]} : vector<512x64xbf16> to vector<8x64xbf16>
      %66 = vector.extract_strided_slice %28 {offsets = [152, 0], sizes = [8, 64], strides = [1, 1]} : vector<512x64xbf16> to vector<8x64xbf16>
      %67 = tpu.concatenate %65, %66 in 1 : vector<8x64xbf16>, vector<8x64xbf16> -> vector<8x128xbf16>
      %c0_33 = arith.constant 0 : index
      %c1152 = arith.constant 1152 : index
      %68 = vector.load %arg11[%c0_33, %c1152] : memref<8x4096xbf16, #tpu.memory_space<vmem>>, vector<8x128xbf16>
      tpu.vector_store %arg11[%c0_33, %c1152], %67 {strides = array<i32>} : memref<8x4096xbf16, #tpu.memory_space<vmem>>, vector<8x128xbf16>,
      %69 = vector.extract_strided_slice %28 {offsets = [160, 0], sizes = [8, 64], strides = [1, 1]} : vector<512x64xbf16> to vector<8x64xbf16>
      %70 = vector.extract_strided_slice %28 {offsets = [168, 0], sizes = [8, 64], strides = [1, 1]} : vector<512x64xbf16> to vector<8x64xbf16>
      %71 = tpu.concatenate %69, %70 in 1 : vector<8x64xbf16>, vector<8x64xbf16> -> vector<8x128xbf16>
      %c0_34 = arith.constant 0 : index
      %c1280 = arith.constant 1280 : index
      %72 = vector.load %arg11[%c0_34, %c1280] : memref<8x4096xbf16, #tpu.memory_space<vmem>>, vector<8x128xbf16>
      tpu.vector_store %arg11[%c0_34, %c1280], %71 {strides = array<i32>} : memref<8x4096xbf16, #tpu.memory_space<vmem>>, vector<8x128xbf16>,
      %73 = vector.extract_strided_slice %28 {offsets = [176, 0], sizes = [8, 64], strides = [1, 1]} : vector<512x64xbf16> to vector<8x64xbf16>
      %74 = vector.extract_strided_slice %28 {offsets = [184, 0], sizes = [8, 64], strides = [1, 1]} : vector<512x64xbf16> to vector<8x64xbf16>
      %75 = tpu.concatenate %73, %74 in 1 : vector<8x64xbf16>, vector<8x64xbf16> -> vector<8x128xbf16>
      %c0_35 = arith.constant 0 : index
      %c1408 = arith.constant 1408 : index
      %76 = vector.load %arg11[%c0_35, %c1408] : memref<8x4096xbf16, #tpu.memory_space<vmem>>, vector<8x128xbf16>
      tpu.vector_store %arg11[%c0_35, %c1408], %75 {strides = array<i32>} : memref<8x4096xbf16, #tpu.memory_space<vmem>>, vector<8x128xbf16>,
      %77 = vector.extract_strided_slice %28 {offsets = [192, 0], sizes = [8, 64], strides = [1, 1]} : vector<512x64xbf16> to vector<8x64xbf16>
      %78 = vector.extract_strided_slice %28 {offsets = [200, 0], sizes = [8, 64], strides = [1, 1]} : vector<512x64xbf16> to vector<8x64xbf16>
      %79 = tpu.concatenate %77, %78 in 1 : vector<8x64xbf16>, vector<8x64xbf16> -> vector<8x128xbf16>
      %c0_36 = arith.constant 0 : index
      %c1536 = arith.constant 1536 : index
      %80 = vector.load %arg11[%c0_36, %c1536] : memref<8x4096xbf16, #tpu.memory_space<vmem>>, vector<8x128xbf16>
      tpu.vector_store %arg11[%c0_36, %c1536], %79 {strides = array<i32>} : memref<8x4096xbf16, #tpu.memory_space<vmem>>, vector<8x128xbf16>,
      %81 = vector.extract_strided_slice %28 {offsets = [208, 0], sizes = [8, 64], strides = [1, 1]} : vector<512x64xbf16> to vector<8x64xbf16>
      %82 = vector.extract_strided_slice %28 {offsets = [216, 0], sizes = [8, 64], strides = [1, 1]} : vector<512x64xbf16> to vector<8x64xbf16>
      %83 = tpu.concatenate %81, %82 in 1 : vector<8x64xbf16>, vector<8x64xbf16> -> vector<8x128xbf16>
      %c0_37 = arith.constant 0 : index
      %c1664 = arith.constant 1664 : index
      %84 = vector.load %arg11[%c0_37, %c1664] : memref<8x4096xbf16, #tpu.memory_space<vmem>>, vector<8x128xbf16>
      tpu.vector_store %arg11[%c0_37, %c1664], %83 {strides = array<i32>} : memref<8x4096xbf16, #tpu.memory_space<vmem>>, vector<8x128xbf16>,
      %85 = vector.extract_strided_slice %28 {offsets = [224, 0], sizes = [8, 64], strides = [1, 1]} : vector<512x64xbf16> to vector<8x64xbf16>
      %86 = vector.extract_strided_slice %28 {offsets = [232, 0], sizes = [8, 64], strides = [1, 1]} : vector<512x64xbf16> to vector<8x64xbf16>
      %87 = tpu.concatenate %85, %86 in 1 : vector<8x64xbf16>, vector<8x64xbf16> -> vector<8x128xbf16>
      %c0_38 = arith.constant 0 : index
      %c1792 = arith.constant 1792 : index
      %88 = vector.load %arg11[%c0_38, %c1792] : memref<8x4096xbf16, #tpu.memory_space<vmem>>, vector<8x128xbf16>
      tpu.vector_store %arg11[%c0_38, %c1792], %87 {strides = array<i32>} : memref<8x4096xbf16, #tpu.memory_space<vmem>>, vector<8x128xbf16>,
      %89 = vector.extract_strided_slice %28 {offsets = [240, 0], sizes = [8, 64], strides = [1, 1]} : vector<512x64xbf16> to vector<8x64xbf16>
      %90 = vector.extract_strided_slice %28 {offsets = [248, 0], sizes = [8, 64], strides = [1, 1]} : vector<512x64xbf16> to vector<8x64xbf16>
      %91 = tpu.concatenate %89, %90 in 1 : vector<8x64xbf16>, vector<8x64xbf16> -> vector<8x128xbf16>
      %c0_39 = arith.constant 0 : index
      %c1920 = arith.constant 1920 : index
      %92 = vector.load %arg11[%c0_39, %c1920] : memref<8x4096xbf16, #tpu.memory_space<vmem>>, vector<8x128xbf16>
      tpu.vector_store %arg11[%c0_39, %c1920], %91 {strides = array<i32>} : memref<8x4096xbf16, #tpu.memory_space<vmem>>, vector<8x128xbf16>,
      %93 = vector.extract_strided_slice %28 {offsets = [256, 0], sizes = [8, 64], strides = [1, 1]} : vector<512x64xbf16> to vector<8x64xbf16>
      %94 = vector.extract_strided_slice %28 {offsets = [264, 0], sizes = [8, 64], strides = [1, 1]} : vector<512x64xbf16> to vector<8x64xbf16>
      %95 = tpu.concatenate %93, %94 in 1 : vector<8x64xbf16>, vector<8x64xbf16> -> vector<8x128xbf16>
      %c0_40 = arith.constant 0 : index
      %c2048 = arith.constant 2048 : index
      %96 = vector.load %arg11[%c0_40, %c2048] : memref<8x4096xbf16, #tpu.memory_space<vmem>>, vector<8x128xbf16>
      tpu.vector_store %arg11[%c0_40, %c2048], %95 {strides = array<i32>} : memref<8x4096xbf16, #tpu.memory_space<vmem>>, vector<8x128xbf16>,
      %97 = vector.extract_strided_slice %28 {offsets = [272, 0], sizes = [8, 64], strides = [1, 1]} : vector<512x64xbf16> to vector<8x64xbf16>
      %98 = vector.extract_strided_slice %28 {offsets = [280, 0], sizes = [8, 64], strides = [1, 1]} : vector<512x64xbf16> to vector<8x64xbf16>
      %99 = tpu.concatenate %97, %98 in 1 : vector<8x64xbf16>, vector<8x64xbf16> -> vector<8x128xbf16>
      %c0_41 = arith.constant 0 : index
      %c2176 = arith.constant 2176 : index
      %100 = vector.load %arg11[%c0_41, %c2176] : memref<8x4096xbf16, #tpu.memory_space<vmem>>, vector<8x128xbf16>
      tpu.vector_store %arg11[%c0_41, %c2176], %99 {strides = array<i32>} : memref<8x4096xbf16, #tpu.memory_space<vmem>>, vector<8x128xbf16>,
      %101 = vector.extract_strided_slice %28 {offsets = [288, 0], sizes = [8, 64], strides = [1, 1]} : vector<512x64xbf16> to vector<8x64xbf16>
      %102 = vector.extract_strided_slice %28 {offsets = [296, 0], sizes = [8, 64], strides = [1, 1]} : vector<512x64xbf16> to vector<8x64xbf16>
      %103 = tpu.concatenate %101, %102 in 1 : vector<8x64xbf16>, vector<8x64xbf16> -> vector<8x128xbf16>
      %c0_42 = arith.constant 0 : index
      %c2304 = arith.constant 2304 : index
      %104 = vector.load %arg11[%c0_42, %c2304] : memref<8x4096xbf16, #tpu.memory_space<vmem>>, vector<8x128xbf16>
      tpu.vector_store %arg11[%c0_42, %c2304], %103 {strides = array<i32>} : memref<8x4096xbf16, #tpu.memory_space<vmem>>, vector<8x128xbf16>,
      %105 = vector.extract_strided_slice %28 {offsets = [304, 0], sizes = [8, 64], strides = [1, 1]} : vector<512x64xbf16> to vector<8x64xbf16>
      %106 = vector.extract_strided_slice %28 {offsets = [312, 0], sizes = [8, 64], strides = [1, 1]} : vector<512x64xbf16> to vector<8x64xbf16>
      %107 = tpu.concatenate %105, %106 in 1 : vector<8x64xbf16>, vector<8x64xbf16> -> vector<8x128xbf16>
      %c0_43 = arith.constant 0 : index
      %c2432 = arith.constant 2432 : index
      %108 = vector.load %arg11[%c0_43, %c2432] : memref<8x4096xbf16, #tpu.memory_space<vmem>>, vector<8x128xbf16>
      tpu.vector_store %arg11[%c0_43, %c2432], %107 {strides = array<i32>} : memref<8x4096xbf16, #tpu.memory_space<vmem>>, vector<8x128xbf16>,
      %109 = vector.extract_strided_slice %28 {offsets = [320, 0], sizes = [8, 64], strides = [1, 1]} : vector<512x64xbf16> to vector<8x64xbf16>
      %110 = vector.extract_strided_slice %28 {offsets = [328, 0], sizes = [8, 64], strides = [1, 1]} : vector<512x64xbf16> to vector<8x64xbf16>
      %111 = tpu.concatenate %109, %110 in 1 : vector<8x64xbf16>, vector<8x64xbf16> -> vector<8x128xbf16>
      %c0_44 = arith.constant 0 : index
      %c2560 = arith.constant 2560 : index
      %112 = vector.load %arg11[%c0_44, %c2560] : memref<8x4096xbf16, #tpu.memory_space<vmem>>, vector<8x128xbf16>
      tpu.vector_store %arg11[%c0_44, %c2560], %111 {strides = array<i32>} : memref<8x4096xbf16, #tpu.memory_space<vmem>>, vector<8x128xbf16>,
      %113 = vector.extract_strided_slice %28 {offsets = [336, 0], sizes = [8, 64], strides = [1, 1]} : vector<512x64xbf16> to vector<8x64xbf16>
      %114 = vector.extract_strided_slice %28 {offsets = [344, 0], sizes = [8, 64], strides = [1, 1]} : vector<512x64xbf16> to vector<8x64xbf16>
      %115 = tpu.concatenate %113, %114 in 1 : vector<8x64xbf16>, vector<8x64xbf16> -> vector<8x128xbf16>
      %c0_45 = arith.constant 0 : index
      %c2688 = arith.constant 2688 : index
      %116 = vector.load %arg11[%c0_45, %c2688] : memref<8x4096xbf16, #tpu.memory_space<vmem>>, vector<8x128xbf16>
      tpu.vector_store %arg11[%c0_45, %c2688], %115 {strides = array<i32>} : memref<8x4096xbf16, #tpu.memory_space<vmem>>, vector<8x128xbf16>,
      %117 = vector.extract_strided_slice %28 {offsets = [352, 0], sizes = [8, 64], strides = [1, 1]} : vector<512x64xbf16> to vector<8x64xbf16>
      %118 = vector.extract_strided_slice %28 {offsets = [360, 0], sizes = [8, 64], strides = [1, 1]} : vector<512x64xbf16> to vector<8x64xbf16>
      %119 = tpu.concatenate %117, %118 in 1 : vector<8x64xbf16>, vector<8x64xbf16> -> vector<8x128xbf16>
      %c0_46 = arith.constant 0 : index
      %c2816 = arith.constant 2816 : index
      %120 = vector.load %arg11[%c0_46, %c2816] : memref<8x4096xbf16, #tpu.memory_space<vmem>>, vector<8x128xbf16>
      tpu.vector_store %arg11[%c0_46, %c2816], %119 {strides = array<i32>} : memref<8x4096xbf16, #tpu.memory_space<vmem>>, vector<8x128xbf16>,
      %121 = vector.extract_strided_slice %28 {offsets = [368, 0], sizes = [8, 64], strides = [1, 1]} : vector<512x64xbf16> to vector<8x64xbf16>
      %122 = vector.extract_strided_slice %28 {offsets = [376, 0], sizes = [8, 64], strides = [1, 1]} : vector<512x64xbf16> to vector<8x64xbf16>
      %123 = tpu.concatenate %121, %122 in 1 : vector<8x64xbf16>, vector<8x64xbf16> -> vector<8x128xbf16>
      %c0_47 = arith.constant 0 : index
      %c2944 = arith.constant 2944 : index
      %124 = vector.load %arg11[%c0_47, %c2944] : memref<8x4096xbf16, #tpu.memory_space<vmem>>, vector<8x128xbf16>
      tpu.vector_store %arg11[%c0_47, %c2944], %123 {strides = array<i32>} : memref<8x4096xbf16, #tpu.memory_space<vmem>>, vector<8x128xbf16>,
      %125 = vector.extract_strided_slice %28 {offsets = [384, 0], sizes = [8, 64], strides = [1, 1]} : vector<512x64xbf16> to vector<8x64xbf16>
      %126 = vector.extract_strided_slice %28 {offsets = [392, 0], sizes = [8, 64], strides = [1, 1]} : vector<512x64xbf16> to vector<8x64xbf16>
      %127 = tpu.concatenate %125, %126 in 1 : vector<8x64xbf16>, vector<8x64xbf16> -> vector<8x128xbf16>
      %c0_48 = arith.constant 0 : index
      %c3072 = arith.constant 3072 : index
      %128 = vector.load %arg11[%c0_48, %c3072] : memref<8x4096xbf16, #tpu.memory_space<vmem>>, vector<8x128xbf16>
      tpu.vector_store %arg11[%c0_48, %c3072], %127 {strides = array<i32>} : memref<8x4096xbf16, #tpu.memory_space<vmem>>, vector<8x128xbf16>,
      %129 = vector.extract_strided_slice %28 {offsets = [400, 0], sizes = [8, 64], strides = [1, 1]} : vector<512x64xbf16> to vector<8x64xbf16>
      %130 = vector.extract_strided_slice %28 {offsets = [408, 0], sizes = [8, 64], strides = [1, 1]} : vector<512x64xbf16> to vector<8x64xbf16>
      %131 = tpu.concatenate %129, %130 in 1 : vector<8x64xbf16>, vector<8x64xbf16> -> vector<8x128xbf16>
      %c0_49 = arith.constant 0 : index
      %c3200 = arith.constant 3200 : index
      %132 = vector.load %arg11[%c0_49, %c3200] : memref<8x4096xbf16, #tpu.memory_space<vmem>>, vector<8x128xbf16>
      tpu.vector_store %arg11[%c0_49, %c3200], %131 {strides = array<i32>} : memref<8x4096xbf16, #tpu.memory_space<vmem>>, vector<8x128xbf16>,
      %133 = vector.extract_strided_slice %28 {offsets = [416, 0], sizes = [8, 64], strides = [1, 1]} : vector<512x64xbf16> to vector<8x64xbf16>
      %134 = vector.extract_strided_slice %28 {offsets = [424, 0], sizes = [8, 64], strides = [1, 1]} : vector<512x64xbf16> to vector<8x64xbf16>
      %135 = tpu.concatenate %133, %134 in 1 : vector<8x64xbf16>, vector<8x64xbf16> -> vector<8x128xbf16>
      %c0_50 = arith.constant 0 : index
      %c3328 = arith.constant 3328 : index
      %136 = vector.load %arg11[%c0_50, %c3328] : memref<8x4096xbf16, #tpu.memory_space<vmem>>, vector<8x128xbf16>
      tpu.vector_store %arg11[%c0_50, %c3328], %135 {strides = array<i32>} : memref<8x4096xbf16, #tpu.memory_space<vmem>>, vector<8x128xbf16>,
      %137 = vector.extract_strided_slice %28 {offsets = [432, 0], sizes = [8, 64], strides = [1, 1]} : vector<512x64xbf16> to vector<8x64xbf16>
      %138 = vector.extract_strided_slice %28 {offsets = [440, 0], sizes = [8, 64], strides = [1, 1]} : vector<512x64xbf16> to vector<8x64xbf16>
      %139 = tpu.concatenate %137, %138 in 1 : vector<8x64xbf16>, vector<8x64xbf16> -> vector<8x128xbf16>
      %c0_51 = arith.constant 0 : index
      %c3456 = arith.constant 3456 : index
      %140 = vector.load %arg11[%c0_51, %c3456] : memref<8x4096xbf16, #tpu.memory_space<vmem>>, vector<8x128xbf16>
      tpu.vector_store %arg11[%c0_51, %c3456], %139 {strides = array<i32>} : memref<8x4096xbf16, #tpu.memory_space<vmem>>, vector<8x128xbf16>,
      %141 = vector.extract_strided_slice %28 {offsets = [448, 0], sizes = [8, 64], strides = [1, 1]} : vector<512x64xbf16> to vector<8x64xbf16>
      %142 = vector.extract_strided_slice %28 {offsets = [456, 0], sizes = [8, 64], strides = [1, 1]} : vector<512x64xbf16> to vector<8x64xbf16>
      %143 = tpu.concatenate %141, %142 in 1 : vector<8x64xbf16>, vector<8x64xbf16> -> vector<8x128xbf16>
      %c0_52 = arith.constant 0 : index
      %c3584 = arith.constant 3584 : index
      %144 = vector.load %arg11[%c0_52, %c3584] : memref<8x4096xbf16, #tpu.memory_space<vmem>>, vector<8x128xbf16>
      tpu.vector_store %arg11[%c0_52, %c3584], %143 {strides = array<i32>} : memref<8x4096xbf16, #tpu.memory_space<vmem>>, vector<8x128xbf16>,
      %145 = vector.extract_strided_slice %28 {offsets = [464, 0], sizes = [8, 64], strides = [1, 1]} : vector<512x64xbf16> to vector<8x64xbf16>
      %146 = vector.extract_strided_slice %28 {offsets = [472, 0], sizes = [8, 64], strides = [1, 1]} : vector<512x64xbf16> to vector<8x64xbf16>
      %147 = tpu.concatenate %145, %146 in 1 : vector<8x64xbf16>, vector<8x64xbf16> -> vector<8x128xbf16>
      %c0_53 = arith.constant 0 : index
      %c3712 = arith.constant 3712 : index
      %148 = vector.load %arg11[%c0_53, %c3712] : memref<8x4096xbf16, #tpu.memory_space<vmem>>, vector<8x128xbf16>
      tpu.vector_store %arg11[%c0_53, %c3712], %147 {strides = array<i32>} : memref<8x4096xbf16, #tpu.memory_space<vmem>>, vector<8x128xbf16>,
      %149 = vector.extract_strided_slice %28 {offsets = [480, 0], sizes = [8, 64], strides = [1, 1]} : vector<512x64xbf16> to vector<8x64xbf16>
      %150 = vector.extract_strided_slice %28 {offsets = [488, 0], sizes = [8, 64], strides = [1, 1]} : vector<512x64xbf16> to vector<8x64xbf16>
      %151 = tpu.concatenate %149, %150 in 1 : vector<8x64xbf16>, vector<8x64xbf16> -> vector<8x128xbf16>
      %c0_54 = arith.constant 0 : index
      %c3840 = arith.constant 3840 : index
      %152 = vector.load %arg11[%c0_54, %c3840] : memref<8x4096xbf16, #tpu.memory_space<vmem>>, vector<8x128xbf16>
      tpu.vector_store %arg11[%c0_54, %c3840], %151 {strides = array<i32>} : memref<8x4096xbf16, #tpu.memory_space<vmem>>, vector<8x128xbf16>,
      %153 = vector.extract_strided_slice %28 {offsets = [496, 0], sizes = [8, 64], strides = [1, 1]} : vector<512x64xbf16> to vector<8x64xbf16>
      %154 = vector.extract_strided_slice %28 {offsets = [504, 0], sizes = [8, 64], strides = [1, 1]} : vector<512x64xbf16> to vector<8x64xbf16>
      %155 = tpu.concatenate %153, %154 in 1 : vector<8x64xbf16>, vector<8x64xbf16> -> vector<8x128xbf16>
      %c0_55 = arith.constant 0 : index
      %c3968 = arith.constant 3968 : index
      %156 = vector.load %arg11[%c0_55, %c3968] : memref<8x4096xbf16, #tpu.memory_space<vmem>>, vector<8x128xbf16>
      tpu.vector_store %arg11[%c0_55, %c3968], %155 {strides = array<i32>} : memref<8x4096xbf16, #tpu.memory_space<vmem>>, vector<8x128xbf16>,
      %cst_56 = arith.constant 0.000000e+00 : f32
      %157 = vector.broadcast %cst_56 : f32 to vector<8x512xf32>
      %c0_57 = arith.constant 0 : index
      %c0_58 = arith.constant 0 : index
      %158 = vector.load %arg12[%c0_57, %c0_58] : memref<8x512xf32, #tpu.memory_space<vmem>>, vector<8x512xf32>
      tpu.vector_store %arg12[%c0_57, %c0_58], %157 {strides = array<i32>} : memref<8x512xf32, #tpu.memory_space<vmem>>, vector<8x512xf32>,
    } else {
    }
    %c0 = arith.constant 0 : index
    %c0_1 = arith.constant 0 : index
    %3 = vector.load %arg11[%c0, %c0_1] : memref<8x4096xbf16, #tpu.memory_space<vmem>>, vector<8x4096xbf16>
    %c0_2 = arith.constant 0 : index
    %c0_3 = arith.constant 0 : index
    %4 = vector.load %arg4[%c0_2, %c0_3] : memref<4096x512xbf16, #tpu.memory_space<vmem>>, vector<4096x512xbf16>
    %cst = arith.constant dense<0.000000e+00> : vector<8x512xf32>
    %5 = tpu.matmul %3, %4, %cst {dimension_numbers = #tpu.dot_dimension_numbers<[1], [0], [0], [1], [0, 0, 1, 1], [], []>} : vector<8x4096xbf16>, vector<4096x512xbf16>, vector<8x512xf32> -> vector<8x512xf32>
    %c0_4 = arith.constant 0 : index
    %c0_5 = arith.constant 0 : index
    %6 = vector.load %arg5[%c0_4, %c0_5] : memref<1x512xf32, #tpu.memory_space<vmem>>, vector<1x512xf32>
    %7 = vector.broadcast %6 : vector<1x512xf32> to vector<8x512xf32>
    %8 = arith.addf %5, %7 : vector<8x512xf32>
    %cst_6 = arith.constant 0.000000e+00 : f32
    %9 = vector.broadcast %cst_6 : f32 to vector<8x512xf32>
    %10 = arith.maximumf %8, %9 : vector<8x512xf32>
    %c0_7 = arith.constant 0 : index
    %c0_8 = arith.constant 0 : index
    %11 = vector.load %arg12[%c0_7, %c0_8] : memref<8x512xf32, #tpu.memory_space<vmem>>, vector<8x512xf32>
    %12 = arith.truncf %10 : vector<8x512xf32> to vector<8x512xbf16>
    %c0_9 = arith.constant 0 : index
    %c0_10 = arith.constant 0 : index
    %13 = vector.load %arg6[%c0_9, %c0_10] : memref<512x512xbf16, #tpu.memory_space<vmem>>, vector<512x512xbf16>
    %cst_11 = arith.constant dense<0.000000e+00> : vector<8x512xf32>
    %14 = tpu.matmul %12, %13, %cst_11 {dimension_numbers = #tpu.dot_dimension_numbers<[1], [0], [0], [1], [0, 0, 1, 1], [], []>} : vector<8x512xbf16>, vector<512x512xbf16>, vector<8x512xf32> -> vector<8x512xf32>
    %15 = arith.addf %11, %14 : vector<8x512xf32>
    %c0_12 = arith.constant 0 : index
    %c0_13 = arith.constant 0 : index
    %16 = vector.load %arg12[%c0_12, %c0_13] : memref<8x512xf32, #tpu.memory_space<vmem>>, vector<8x512xf32>
    tpu.vector_store %arg12[%c0_12, %c0_13], %15 {strides = array<i32>} : memref<8x512xf32, #tpu.memory_space<vmem>>, vector<8x512xf32>,
    %c1_i32 = arith.constant 1 : i32
    %17 = arith.cmpi eq, %arg0, %c1_i32 : i32
    %18 = arith.extui %17 : i1 to i32
    %c0_i32_14 = arith.constant 0 : i32
    %19 = arith.cmpi ne, %18, %c0_i32_14 : i32
    scf.if %19 {
      %c0_15 = arith.constant 0 : index
      %c0_16 = arith.constant 0 : index
      %20 = vector.load %arg12[%c0_15, %c0_16] : memref<8x512xf32, #tpu.memory_space<vmem>>, vector<8x512xf32>
      %c0_17 = arith.constant 0 : index
      %c0_18 = arith.constant 0 : index
      %21 = vector.load %arg7[%c0_17, %c0_18] : memref<1x512xf32, #tpu.memory_space<vmem>>, vector<1x512xf32>
      %22 = vector.broadcast %21 : vector<1x512xf32> to vector<8x512xf32>
      %23 = arith.addf %20, %22 : vector<8x512xf32>
      %cst_19 = arith.constant 0.000000e+00 : f32
      %24 = vector.broadcast %cst_19 : f32 to vector<8x512xf32>
      %25 = arith.maximumf %23, %24 : vector<8x512xf32>
      %c0_20 = arith.constant 0 : index
      %c0_21 = arith.constant 0 : index
      %26 = vector.load %arg8[%c0_20, %c0_21] : memref<1x512xf32, #tpu.memory_space<vmem>>, vector<1x512xf32>
      %27 = vector.broadcast %26 : vector<1x512xf32> to vector<8x512xf32>
      %28 = arith.mulf %25, %27 : vector<8x512xf32>
      %cst_22 = arith.constant dense<0.000000e+00> : vector<8xf32>
      %29 = vector.multi_reduction <add>, %28, %cst_22 [1] : vector<8x512xf32> to vector<8xf32>
      %30 = vector.shape_cast %29 : vector<8xf32> to vector<8x1xf32>
      %c0_23 = arith.constant 0 : index
      %c0_24 = arith.constant 0 : index
      %31 = vector.load %arg9[%c0_23, %c0_24] : memref<1x1xf32, #tpu.memory_space<vmem>>, vector<1x1xf32>
      %32 = vector.broadcast %31 : vector<1x1xf32> to vector<8x1xf32>
      %33 = arith.addf %30, %32 : vector<8x1xf32>
      %34 = vector.extract_strided_slice %33 {offsets = [0, 0], sizes = [2, 1], strides = [1, 1]} : vector<8x1xf32> to vector<2x1xf32>
      %35 = arith.negf %34 : vector<2x1xf32>
      %36 = math.exp %35 : vector<2x1xf32>
      %cst_25 = arith.constant 1.000000e+00 : f32
      %37 = vector.broadcast %cst_25 : f32 to vector<2x1xf32>
      %38 = arith.addf %37, %36 : vector<2x1xf32>
      %39 = arith.divf %37, %38 : vector<2x1xf32>
      %c0_26 = arith.constant 0 : index
      %c0_27 = arith.constant 0 : index
      %40 = vector.load %arg10[%c0_26, %c0_27] : memref<2x1xf32, #tpu.memory_space<vmem>>, vector<2x1xf32>
      tpu.vector_store %arg10[%c0_26, %c0_27], %39 {strides = array<i32>} : memref<2x1xf32, #tpu.memory_space<vmem>>, vector<2x1xf32>,
    } else {
    }
    return
  }
  func.func @transform_0(%arg0: i32) -> (i32, i32) {
    %c0_i32 = arith.constant 0 : i32
    %c0_i32_0 = arith.constant 0 : i32
    %c0_i32_1 = arith.constant 0 : i32
    return %c0_i32, %c0_i32_0 : i32, i32
  }
  func.func @transform_1(%arg0: i32) -> (i32, i32) {
    %c0_i32 = arith.constant 0 : i32
    %c0_i32_0 = arith.constant 0 : i32
    %c0_i32_1 = arith.constant 0 : i32
    return %c0_i32, %c0_i32_0 : i32, i32
  }
  func.func @transform_2(%arg0: i32) -> (i32, i32) {
    %c0_i32 = arith.constant 0 : i32
    %c0_i32_0 = arith.constant 0 : i32
    %c0_i32_1 = arith.constant 0 : i32
    return %c0_i32, %c0_i32_0 : i32, i32
  }
  func.func @transform_3(%arg0: i32) -> (i32, i32) {
    %c0_i32 = arith.constant 0 : i32
    %c0_i32_0 = arith.constant 0 : i32
    return %c0_i32, %arg0 : i32, i32
  }
  func.func @transform_4(%arg0: i32) -> (i32, i32) {
    %c0_i32 = arith.constant 0 : i32
    %c0_i32_0 = arith.constant 0 : i32
    return %c0_i32, %arg0 : i32, i32
  }
  func.func @transform_5(%arg0: i32) -> (i32, i32) {
    %c0_i32 = arith.constant 0 : i32
    %c0_i32_0 = arith.constant 0 : i32
    return %arg0, %c0_i32 : i32, i32
  }
  func.func @transform_6(%arg0: i32) -> (i32, i32) {
    %c0_i32 = arith.constant 0 : i32
    %c0_i32_0 = arith.constant 0 : i32
    %c0_i32_1 = arith.constant 0 : i32
    return %c0_i32, %c0_i32_0 : i32, i32
  }
  func.func @transform_7(%arg0: i32) -> (i32, i32) {
    %c0_i32 = arith.constant 0 : i32
    %c0_i32_0 = arith.constant 0 : i32
    %c0_i32_1 = arith.constant 0 : i32
    return %c0_i32, %c0_i32_0 : i32, i32
  }
  func.func @transform_8(%arg0: i32) -> (i32, i32) {
    %c0_i32 = arith.constant 0 : i32
    %c0_i32_0 = arith.constant 0 : i32
    %c0_i32_1 = arith.constant 0 : i32
    return %c0_i32, %c0_i32_0 : i32, i32
  }
  func.func @transform_9(%arg0: i32) -> (i32, i32) {
    %c0_i32 = arith.constant 0 : i32
    %c0_i32_0 = arith.constant 0 : i32
    %c0_i32_1 = arith.constant 0 : i32
    return %c0_i32, %c0_i32_0 : i32, i32
  }
}

</mosaic_0001>

<bundles_post_ra>
// kernel: chess_value_forward.1
= control target key start
LH: loop header
LB: loop body
LE: loop exit
PB: predicated region body
PF: predicated region fallthrough
CT: control target
= control target key end

     0   :  { %s19730_s0 = inlined_call_operand.vmem [shape: bf16[512,128], index: 0, kind: input, shape index: {}]   ;;  %s19731_s1 = inlined_call_operand.vmem [shape: bf16[128,64], index: 1, kind: input, shape index: {}]   ;;  %s19732_s2 = inlined_call_operand.vmem [shape: f32[1,64], index: 2, kind: input, shape index: {}]   ;;  %s19733_s3 = inlined_call_operand.vmem [shape: bf16[4096,1024], index: 3, kind: input, shape index: {}]   ;;  %s19734_s4 = inlined_call_operand.vmem [shape: f32[1,1024], index: 4, kind: input, shape index: {}]   ;;  %s19735_s5 = inlined_call_operand.hbm [shape: bf16[1024,512], index: 5, kind: input, shape index: {}]   ;;  %s19736_s6 = inlined_call_operand.vmem [shape: f32[1,512], index: 6, kind: input, shape index: {}]   ;;  %s19737_s7 = inlined_call_operand.vmem [shape: f32[1,512], index: 7, kind: input, shape index: {}]   ;;  %s19738_s8 = inlined_call_operand.<no memory space> [shape: f32[1,1], index: 8, kind: input, shape index: {}]   ;;  %s19739_s9 = inlined_call_operand.vmem [shape: f32[2,1], index: 9, kind: output, shape index: {}]  }
   0x1   :  { %19740 = sst [smem:[#allocation10_spill]] %s19733_s3  ;;  %v14_v0 = vstv %s19738_s8 }
   0x2   :  { %15 = vst [vmem:[#allocation4] sm:$0x1] %v14_v0 }
   0x3   :  { %16 = vsyncpa [#allocation7], 0 }
   0x4   :  { %18 = vsyncpa [#allocation7 + $0x1], 0  ;;  %s16662_s11 = smov 0   ;;  %s16664_s12 = smov 0  }
   0x5   :  { %s16666_s13 = smov 0   ;;  %s16668_s14 = smov 0  }
   0x6 LB: > { %s16681_s8 = sadd.s32 4294967295, %s16586_s14   ;;  %s16684_s15 = sadd.s32 1, %s16586_s14   ;;  %s16586_s14 = sphi %s16668_s14, %s19754_s14   ;;  %s16582_s13 = sphi %s16666_s13, %s19753_s13   ;;  %s16578_s12 = sphi %s16664_s12, %s19752_s12   ;;  %s16574_s11 = sphi %s16662_s11, %s19751_s11  }
   0x7   : > { %s91_s16 = ssub.s32 %s16586_s14, %s16684_s15  ;;  %s94_s17 = sadd.s32 1, %s16582_s13 }
   0x8   : > { %p92_p0 = scmp.eq.s32.totalorder %s91_s16, 0  ;;  %p101_p1 = scmp.ne.s32.totalorder %s16582_s13, %s16578_s12 }
   0x9   : > { %p102_p2 = scmp.eq.s32.totalorder %s16586_s14, 0  ;;  %p159_p3 = scmp.ne.s32.totalorder %s16578_s12, %s16574_s11 }
   0xa   : > { %s16694_s18 = scalar_select %p92_p0, %s16582_s13, %s94_s17  }
   0xb   : > { %p16696_p4 = por %p102_p2, %p101_p1  ;;  %p160_p5 = scmp.eq.s32.totalorder %s16681_s8, 0 }
   0xc   : > { %19741 = sst [smem:[#allocation9_spill]] %s16694_s18  ;;  %p13251_p7 = scmp.ge.s32.totalorder %s16586_s14, 2 }
   0xd   : > { %p16701_p6 = por %p160_p5, %p159_p3 }
   0xe   : > { %281 = sbr.rel (%p13251_p7) target bundleno = 567 (0x237), region = 40 }
  0x13   : > { %284 = sbr.rel (!%p16696_p4) target bundleno = 542 (0x21e), region = 44  ;;  %s286_s21 = sand.u32 (%p16696_p4), 1, %s16582_s13  }
  0x14   : > { %s14496_s22 = sshll.u32 (%p16696_p4), %s16586_s14, 4  ;;  %s16710_s23 = sshll.u32 (%p16696_p4), %s286_s21, 13 }
  0x15   : > { %s19744_s3 = sld [smem:[#allocation10_spill]] (%p16696_p4)  ;;  %s288_s27 = scalar_lea.vmem (%p16696_p4), [#allocation5], %s16710_s23  }
  0x16   : > { %s19745_s28 = smov (%p16696_p4), %s288_s27  ;;  %s16725_s30 = smov (%p16696_p4), 0  }
  0x17   : > { %s16727_s10 = smov (%p16696_p4), 0  }
  0x1b   : > { %s16715_s26 = scalar_lea.vmem %s19744_s3, %s14496_s22  }
  0x1c   : > { %s19746_s29 = smov %s16715_s26 }
  0x1d LB: >> { %v307_v1 = vld [vmem:[%s16594_s29] sm:$0xff]  ;;  %s1331_s11 = sadd.s32 1, %s16598_s30  ;;  %s303_s10 = sadd.s32 1, %s16602_s10   ;;  %s16602_s10 = sphi %s16727_s10, %s303_s10   ;;  %s16598_s30 = sphi %s16725_s30, %s19749_s30   ;;  %s16594_s29 = sphi %s19746_s29, %s19748_s29   ;;  %s16590_s28 = sphi %s19745_s28, %s19747_s28  }
  0x1e   : >> { %v309_v2 = vld [vmem:[%s16594_s29 + $0x20] sm:$0xff]  ;;  %308 = vst [vmem:[%s16590_s28] sm:$0xff] %v307_v1  ;;  %p1332_p8 = scmp.ge.s32.totalorder %s1331_s11, 2  ;;  %p300_p9 = scmp.ge.s32.totalorder %s303_s10, 2  }
  0x1f   : >> { %v311_v3 = vld [vmem:[%s16594_s29 + $0x40] sm:$0xff]  ;;  %310 = vst [vmem:[%s16590_s28 + $0x10] sm:$0xff] %v309_v2 }
  0x20   : >> { %312 = vst [vmem:[%s16590_s28 + $0x20] sm:$0xff] %v311_v3  ;;  %v313_v4 = vld [vmem:[%s16594_s29 + $0x60] sm:$0xff]  ;;  %s19756_s11 = smov (%p1332_p8, %s1331_s11), 0 }
  0x21   : >> { %v315_v5 = vld [vmem:[%s16594_s29 + $0x80] sm:$0xff]  ;;  %314 = vst [vmem:[%s16590_s28 + $0x30] sm:$0xff] %v313_v4  ;;  %s13255_s16 = sshll.u32 %s19756_s11, 3  ;;  %s19749_s30 = smov %s19756_s11 }
  0x22   : >> { %v317_v6 = vld [vmem:[%s16594_s29 + $0xa0] sm:$0xff]  ;;  %316 = vst [vmem:[%s16590_s28 + $0x40] sm:$0xff] %v315_v5  ;;  %s17007_s17 = scalar_lea.vmem %s16715_s26, %s13255_s16   ;;  %s17011_s21 = scalar_lea.vmem %s288_s27, %s13255_s16 [#allocation5]  }
  0x23   : >> { %318 = vst [vmem:[%s16590_s28 + $0x50] sm:$0xff] %v317_v6  ;;  %v319_v7 = vld [vmem:[%s16594_s29 + $0xc0] sm:$0xff] }
  0x24   : >> { %v321_v8 = vld [vmem:[%s16594_s29 + $0xe0] sm:$0xff]  ;;  %320 = vst [vmem:[%s16590_s28 + $0x60] sm:$0xff] %v319_v7 }
  0x25   : >> { %v323_v9 = vld [vmem:[%s16594_s29 + $0x100] sm:$0xff]  ;;  %322 = vst [vmem:[%s16590_s28 + $0x70] sm:$0xff] %v321_v8 }
  0x26   : >> { %324 = vst [vmem:[%s16590_s28 + $0x80] sm:$0xff] %v323_v9  ;;  %v325_v10 = vld [vmem:[%s16594_s29 + $0x120] sm:$0xff] }
  0x27   : >> { %v327_v11 = vld [vmem:[%s16594_s29 + $0x140] sm:$0xff]  ;;  %326 = vst [vmem:[%s16590_s28 + $0x90] sm:$0xff] %v325_v10 }
  0x28   : >> { %v329_v12 = vld [vmem:[%s16594_s29 + $0x160] sm:$0xff]  ;;  %328 = vst [vmem:[%s16590_s28 + $0xa0] sm:$0xff] %v327_v11 }
  0x29   : >> { %330 = vst [vmem:[%s16590_s28 + $0xb0] sm:$0xff] %v329_v12  ;;  %v331_v13 = vld [vmem:[%s16594_s29 + $0x180] sm:$0xff] }
  0x2a   : >> { %v333_v14 = vld [vmem:[%s16594_s29 + $0x1a0] sm:$0xff]  ;;  %332 = vst [vmem:[%s16590_s28 + $0xc0] sm:$0xff] %v331_v13 }
  0x2b   : >> { %v335_v15 = vld [vmem:[%s16594_s29 + $0x1c0] sm:$0xff]  ;;  %334 = vst [vmem:[%s16590_s28 + $0xd0] sm:$0xff] %v333_v14 }
  0x2c   : >> { %336 = vst [vmem:[%s16590_s28 + $0xe0] sm:$0xff] %v335_v15  ;;  %v337_v16 = vld [vmem:[%s16594_s29 + $0x1e0] sm:$0xff] }
  0x2d   : >> { %v339_v17 = vld [vmem:[%s16594_s29 + $0x200] sm:$0xff]  ;;  %338 = vst [vmem:[%s16590_s28 + $0xf0] sm:$0xff] %v337_v16 }
  0x2e   : >> { %v341_v18 = vld [vmem:[%s16594_s29 + $0x220] sm:$0xff]  ;;  %340 = vst [vmem:[%s16590_s28 + $0x100] sm:$0xff] %v339_v17 }
  0x2f   : >> { %342 = vst [vmem:[%s16590_s28 + $0x110] sm:$0xff] %v341_v18  ;;  %v343_v19 = vld [vmem:[%s16594_s29 + $0x240] sm:$0xff] }
  0x30   : >> { %v345_v20 = vld [vmem:[%s16594_s29 + $0x260] sm:$0xff]  ;;  %344 = vst [vmem:[%s16590_s28 + $0x120] sm:$0xff] %v343_v19 }
  0x31   : >> { %v347_v21 = vld [vmem:[%s16594_s29 + $0x280] sm:$0xff]  ;;  %346 = vst [vmem:[%s16590_s28 + $0x130] sm:$0xff] %v345_v20 }
  0x32   : >> { %348 = vst [vmem:[%s16590_s28 + $0x140] sm:$0xff] %v347_v21  ;;  %v349_v22 = vld [vmem:[%s16594_s29 + $0x2a0] sm:$0xff] }
  0x33   : >> { %v351_v23 = vld [vmem:[%s16594_s29 + $0x2c0] sm:$0xff]  ;;  %350 = vst [vmem:[%s16590_s28 + $0x150] sm:$0xff] %v349_v22 }
  0x34   : >> { %v353_v24 = vld [vmem:[%s16594_s29 + $0x2e0] sm:$0xff]  ;;  %352 = vst [vmem:[%s16590_s28 + $0x160] sm:$0xff] %v351_v23 }
  0x35   : >> { %354 = vst [vmem:[%s16590_s28 + $0x170] sm:$0xff] %v353_v24  ;;  %v355_v25 = vld [vmem:[%s16594_s29 + $0x300] sm:$0xff] }
  0x36   : >> { %v357_v26 = vld [vmem:[%s16594_s29 + $0x320] sm:$0xff]  ;;  %356 = vst [vmem:[%s16590_s28 + $0x180] sm:$0xff] %v355_v25 }
  0x37   : >> { %v359_v27 = vld [vmem:[%s16594_s29 + $0x340] sm:$0xff]  ;;  %358 = vst [vmem:[%s16590_s28 + $0x190] sm:$0xff] %v357_v26 }
  0x38   : >> { %360 = vst [vmem:[%s16590_s28 + $0x1a0] sm:$0xff] %v359_v27  ;;  %v361_v28 = vld [vmem:[%s16594_s29 + $0x360] sm:$0xff] }
  0x39   : >> { %v363_v29 = vld [vmem:[%s16594_s29 + $0x380] sm:$0xff]  ;;  %362 = vst [vmem:[%s16590_s28 + $0x1b0] sm:$0xff] %v361_v28 }
  0x3a   : >> { %v365_v30 = vld [vmem:[%s16594_s29 + $0x3a0] sm:$0xff]  ;;  %364 = vst [vmem:[%s16590_s28 + $0x1c0] sm:$0xff] %v363_v29 }
  0x3b   : >> { %366 = vst [vmem:[%s16590_s28 + $0x1d0] sm:$0xff] %v365_v30  ;;  %v367_v31 = vld [vmem:[%s16594_s29 + $0x3c0] sm:$0xff] }
  0x3c   : >> { %v369_v32 = vld [vmem:[%s16594_s29 + $0x3e0] sm:$0xff]  ;;  %368 = vst [vmem:[%s16590_s28 + $0x1e0] sm:$0xff] %v367_v31 }
  0x3d   : >> { %v371_v33 = vld [vmem:[%s16594_s29 + $0x400] sm:$0xff]  ;;  %370 = vst [vmem:[%s16590_s28 + $0x1f0] sm:$0xff] %v369_v32 }
  0x3e   : >> { %372 = vst [vmem:[%s16590_s28 + $0x200] sm:$0xff] %v371_v33  ;;  %v373_v34 = vld [vmem:[%s16594_s29 + $0x420] sm:$0xff] }
  0x3f   : >> { %v375_v35 = vld [vmem:[%s16594_s29 + $0x440] sm:$0xff]  ;;  %374 = vst [vmem:[%s16590_s28 + $0x210] sm:$0xff] %v373_v34 }
  0x40   : >> { %v377_v36 = vld [vmem:[%s16594_s29 + $0x460] sm:$0xff]  ;;  %376 = vst [vmem:[%s16590_s28 + $0x220] sm:$0xff] %v375_v35 }
  0x41   : >> { %378 = vst [vmem:[%s16590_s28 + $0x230] sm:$0xff] %v377_v36  ;;  %v379_v37 = vld [vmem:[%s16594_s29 + $0x480] sm:$0xff] }
  0x42   : >> { %v381_v38 = vld [vmem:[%s16594_s29 + $0x4a0] sm:$0xff]  ;;  %380 = vst [vmem:[%s16590_s28 + $0x240] sm:$0xff] %v379_v37 }
  0x43   : >> { %v383_v39 = vld [vmem:[%s16594_s29 + $0x4c0] sm:$0xff]  ;;  %382 = vst [vmem:[%s16590_s28 + $0x250] sm:$0xff] %v381_v38 }
  0x44   : >> { %384 = vst [vmem:[%s16590_s28 + $0x260] sm:$0xff] %v383_v39  ;;  %v385_v40 = vld [vmem:[%s16594_s29 + $0x4e0] sm:$0xff] }
  0x45   : >> { %v387_v41 = vld [vmem:[%s16594_s29 + $0x500] sm:$0xff]  ;;  %386 = vst [vmem:[%s16590_s28 + $0x270] sm:$0xff] %v385_v40 }
  0x46   : >> { %v389_v42 = vld [vmem:[%s16594_s29 + $0x520] sm:$0xff]  ;;  %388 = vst [vmem:[%s16590_s28 + $0x280] sm:$0xff] %v387_v41 }
  0x47   : >> { %390 = vst [vmem:[%s16590_s28 + $0x290] sm:$0xff] %v389_v42  ;;  %v391_v43 = vld [vmem:[%s16594_s29 + $0x540] sm:$0xff] }
  0x48   : >> { %v393_v44 = vld [vmem:[%s16594_s29 + $0x560] sm:$0xff]  ;;  %392 = vst [vmem:[%s16590_s28 + $0x2a0] sm:$0xff] %v391_v43 }
  0x49   : >> { %v395_v45 = vld [vmem:[%s16594_s29 + $0x580] sm:$0xff]  ;;  %394 = vst [vmem:[%s16590_s28 + $0x2b0] sm:$0xff] %v393_v44 }
  0x4a   : >> { %396 = vst [vmem:[%s16590_s28 + $0x2c0] sm:$0xff] %v395_v45  ;;  %v397_v46 = vld [vmem:[%s16594_s29 + $0x5a0] sm:$0xff] }
  0x4b   : >> { %v399_v47 = vld [vmem:[%s16594_s29 + $0x5c0] sm:$0xff]  ;;  %398 = vst [vmem:[%s16590_s28 + $0x2d0] sm:$0xff] %v397_v46 }
  0x4c   : >> { %v401_v48 = vld [vmem:[%s16594_s29 + $0x5e0] sm:$0xff]  ;;  %400 = vst [vmem:[%s16590_s28 + $0x2e0] sm:$0xff] %v399_v47 }
  0x4d   : >> { %402 = vst [vmem:[%s16590_s28 + $0x2f0] sm:$0xff] %v401_v48  ;;  %v403_v49 = vld [vmem:[%s16594_s29 + $0x600] sm:$0xff] }
  0x4e   : >> { %v405_v50 = vld [vmem:[%s16594_s29 + $0x620] sm:$0xff]  ;;  %404 = vst [vmem:[%s16590_s28 + $0x300] sm:$0xff] %v403_v49 }
  0x4f   : >> { %v407_v51 = vld [vmem:[%s16594_s29 + $0x640] sm:$0xff]  ;;  %406 = vst [vmem:[%s16590_s28 + $0x310] sm:$0xff] %v405_v50 }
  0x50   : >> { %408 = vst [vmem:[%s16590_s28 + $0x320] sm:$0xff] %v407_v51  ;;  %v409_v52 = vld [vmem:[%s16594_s29 + $0x660] sm:$0xff] }
  0x51   : >> { %v411_v53 = vld [vmem:[%s16594_s29 + $0x680] sm:$0xff]  ;;  %410 = vst [vmem:[%s16590_s28 + $0x330] sm:$0xff] %v409_v52 }
  0x52   : >> { %v413_v54 = vld [vmem:[%s16594_s29 + $0x6a0] sm:$0xff]  ;;  %412 = vst [vmem:[%s16590_s28 + $0x340] sm:$0xff] %v411_v53 }
  0x53   : >> { %414 = vst [vmem:[%s16590_s28 + $0x350] sm:$0xff] %v413_v54  ;;  %v415_v55 = vld [vmem:[%s16594_s29 + $0x6c0] sm:$0xff] }
  0x54   : >> { %v417_v56 = vld [vmem:[%s16594_s29 + $0x6e0] sm:$0xff]  ;;  %416 = vst [vmem:[%s16590_s28 + $0x360] sm:$0xff] %v415_v55 }
  0x55   : >> { %v419_v57 = vld [vmem:[%s16594_s29 + $0x700] sm:$0xff]  ;;  %418 = vst [vmem:[%s16590_s28 + $0x370] sm:$0xff] %v417_v56 }
  0x56   : >> { %420 = vst [vmem:[%s16590_s28 + $0x380] sm:$0xff] %v419_v57  ;;  %v421_v58 = vld [vmem:[%s16594_s29 + $0x720] sm:$0xff] }
  0x57   : >> { %v423_v59 = vld [vmem:[%s16594_s29 + $0x740] sm:$0xff]  ;;  %422 = vst [vmem:[%s16590_s28 + $0x390] sm:$0xff] %v421_v58 }
  0x58   : >> { %v425_v60 = vld [vmem:[%s16594_s29 + $0x760] sm:$0xff]  ;;  %424 = vst [vmem:[%s16590_s28 + $0x3a0] sm:$0xff] %v423_v59 }
  0x59   : >> { %426 = vst [vmem:[%s16590_s28 + $0x3b0] sm:$0xff] %v425_v60  ;;  %v427_v61 = vld [vmem:[%s16594_s29 + $0x780] sm:$0xff] }
  0x5a   : >> { %v429_v62 = vld [vmem:[%s16594_s29 + $0x7a0] sm:$0xff]  ;;  %428 = vst [vmem:[%s16590_s28 + $0x3c0] sm:$0xff] %v427_v61 }
  0x5b   : >> { %v431_v63 = vld [vmem:[%s16594_s29 + $0x7c0] sm:$0xff]  ;;  %430 = vst [vmem:[%s16590_s28 + $0x3d0] sm:$0xff] %v429_v62 }
  0x5c   : >> { %432 = vst [vmem:[%s16590_s28 + $0x3e0] sm:$0xff] %v431_v63  ;;  %v433_v0 = vld [vmem:[%s16594_s29 + $0x7e0] sm:$0xff] }
  0x5d   : >> { %v435_v1 = vld [vmem:[%s16594_s29 + $0x800] sm:$0xff]  ;;  %434 = vst [vmem:[%s16590_s28 + $0x3f0] sm:$0xff] %v433_v0 }
  0x5e   : >> { %v437_v2 = vld [vmem:[%s16594_s29 + $0x820] sm:$0xff]  ;;  %436 = vst [vmem:[%s16590_s28 + $0x400] sm:$0xff] %v435_v1 }
  0x5f   : >> { %438 = vst [vmem:[%s16590_s28 + $0x410] sm:$0xff] %v437_v2  ;;  %v439_v3 = vld [vmem:[%s16594_s29 + $0x840] sm:$0xff] }
  0x60   : >> { %v441_v4 = vld [vmem:[%s16594_s29 + $0x860] sm:$0xff]  ;;  %440 = vst [vmem:[%s16590_s28 + $0x420] sm:$0xff] %v439_v3 }
  0x61   : >> { %v443_v5 = vld [vmem:[%s16594_s29 + $0x880] sm:$0xff]  ;;  %442 = vst [vmem:[%s16590_s28 + $0x430] sm:$0xff] %v441_v4 }
  0x62   : >> { %444 = vst [vmem:[%s16590_s28 + $0x440] sm:$0xff] %v443_v5  ;;  %v445_v6 = vld [vmem:[%s16594_s29 + $0x8a0] sm:$0xff] }
  0x63   : >> { %v447_v7 = vld [vmem:[%s16594_s29 + $0x8c0] sm:$0xff]  ;;  %446 = vst [vmem:[%s16590_s28 + $0x450] sm:$0xff] %v445_v6 }
  0x64   : >> { %v449_v8 = vld [vmem:[%s16594_s29 + $0x8e0] sm:$0xff]  ;;  %448 = vst [vmem:[%s16590_s28 + $0x460] sm:$0xff] %v447_v7 }
  0x65   : >> { %450 = vst [vmem:[%s16590_s28 + $0x470] sm:$0xff] %v449_v8  ;;  %v451_v9 = vld [vmem:[%s16594_s29 + $0x900] sm:$0xff] }
  0x66   : >> { %v453_v10 = vld [vmem:[%s16594_s29 + $0x920] sm:$0xff]  ;;  %452 = vst [vmem:[%s16590_s28 + $0x480] sm:$0xff] %v451_v9 }
  0x67   : >> { %v455_v11 = vld [vmem:[%s16594_s29 + $0x940] sm:$0xff]  ;;  %454 = vst [vmem:[%s16590_s28 + $0x490] sm:$0xff] %v453_v10 }
  0x68   : >> { %456 = vst [vmem:[%s16590_s28 + $0x4a0] sm:$0xff] %v455_v11  ;;  %v457_v12 = vld [vmem:[%s16594_s29 + $0x960] sm:$0xff] }
  0x69   : >> { %v459_v13 = vld [vmem:[%s16594_s29 + $0x980] sm:$0xff]  ;;  %458 = vst [vmem:[%s16590_s28 + $0x4b0] sm:$0xff] %v457_v12 }
  0x6a   : >> { %v461_v14 = vld [vmem:[%s16594_s29 + $0x9a0] sm:$0xff]  ;;  %460 = vst [vmem:[%s16590_s28 + $0x4c0] sm:$0xff] %v459_v13 }
  0x6b   : >> { %462 = vst [vmem:[%s16590_s28 + $0x4d0] sm:$0xff] %v461_v14  ;;  %v463_v15 = vld [vmem:[%s16594_s29 + $0x9c0] sm:$0xff] }
  0x6c   : >> { %v465_v16 = vld [vmem:[%s16594_s29 + $0x9e0] sm:$0xff]  ;;  %464 = vst [vmem:[%s16590_s28 + $0x4e0] sm:$0xff] %v463_v15 }
  0x6d   : >> { %v467_v17 = vld [vmem:[%s16594_s29 + $0xa00] sm:$0xff]  ;;  %466 = vst [vmem:[%s16590_s28 + $0x4f0] sm:$0xff] %v465_v16 }
  0x6e   : >> { %468 = vst [vmem:[%s16590_s28 + $0x500] sm:$0xff] %v467_v17  ;;  %v469_v18 = vld [vmem:[%s16594_s29 + $0xa20] sm:$0xff] }
  0x6f   : >> { %v471_v19 = vld [vmem:[%s16594_s29 + $0xa40] sm:$0xff]  ;;  %470 = vst [vmem:[%s16590_s28 + $0x510] sm:$0xff] %v469_v18 }
  0x70   : >> { %v473_v20 = vld [vmem:[%s16594_s29 + $0xa60] sm:$0xff]  ;;  %472 = vst [vmem:[%s16590_s28 + $0x520] sm:$0xff] %v471_v19 }
  0x71   : >> { %474 = vst [vmem:[%s16590_s28 + $0x530] sm:$0xff] %v473_v20  ;;  %v475_v21 = vld [vmem:[%s16594_s29 + $0xa80] sm:$0xff] }
  0x72   : >> { %v477_v22 = vld [vmem:[%s16594_s29 + $0xaa0] sm:$0xff]  ;;  %476 = vst [vmem:[%s16590_s28 + $0x540] sm:$0xff] %v475_v21 }
  0x73   : >> { %v479_v23 = vld [vmem:[%s16594_s29 + $0xac0] sm:$0xff]  ;;  %478 = vst [vmem:[%s16590_s28 + $0x550] sm:$0xff] %v477_v22 }
  0x74   : >> { %480 = vst [vmem:[%s16590_s28 + $0x560] sm:$0xff] %v479_v23  ;;  %v481_v24 = vld [vmem:[%s16594_s29 + $0xae0] sm:$0xff] }
  0x75   : >> { %v483_v25 = vld [vmem:[%s16594_s29 + $0xb00] sm:$0xff]  ;;  %482 = vst [vmem:[%s16590_s28 + $0x570] sm:$0xff] %v481_v24 }
  0x76   : >> { %v485_v26 = vld [vmem:[%s16594_s29 + $0xb20] sm:$0xff]  ;;  %484 = vst [vmem:[%s16590_s28 + $0x580] sm:$0xff] %v483_v25 }
  0x77   : >> { %486 = vst [vmem:[%s16590_s28 + $0x590] sm:$0xff] %v485_v26  ;;  %v487_v27 = vld [vmem:[%s16594_s29 + $0xb40] sm:$0xff] }
  0x78   : >> { %v489_v28 = vld [vmem:[%s16594_s29 + $0xb60] sm:$0xff]  ;;  %488 = vst [vmem:[%s16590_s28 + $0x5a0] sm:$0xff] %v487_v27 }
  0x79   : >> { %v491_v29 = vld [vmem:[%s16594_s29 + $0xb80] sm:$0xff]  ;;  %490 = vst [vmem:[%s16590_s28 + $0x5b0] sm:$0xff] %v489_v28 }
  0x7a   : >> { %492 = vst [vmem:[%s16590_s28 + $0x5c0] sm:$0xff] %v491_v29  ;;  %v493_v30 = vld [vmem:[%s16594_s29 + $0xba0] sm:$0xff] }
  0x7b   : >> { %v495_v31 = vld [vmem:[%s16594_s29 + $0xbc0] sm:$0xff]  ;;  %494 = vst [vmem:[%s16590_s28 + $0x5d0] sm:$0xff] %v493_v30 }
  0x7c   : >> { %v497_v32 = vld [vmem:[%s16594_s29 + $0xbe0] sm:$0xff]  ;;  %496 = vst [vmem:[%s16590_s28 + $0x5e0] sm:$0xff] %v495_v31 }
  0x7d   : >> { %498 = vst [vmem:[%s16590_s28 + $0x5f0] sm:$0xff] %v497_v32  ;;  %v499_v33 = vld [vmem:[%s16594_s29 + $0xc00] sm:$0xff] }
  0x7e   : >> { %v501_v34 = vld [vmem:[%s16594_s29 + $0xc20] sm:$0xff]  ;;  %500 = vst [vmem:[%s16590_s28 + $0x600] sm:$0xff] %v499_v33 }
  0x7f   : >> { %v503_v35 = vld [vmem:[%s16594_s29 + $0xc40] sm:$0xff]  ;;  %502 = vst [vmem:[%s16590_s28 + $0x610] sm:$0xff] %v501_v34 }
  0x80   : >> { %504 = vst [vmem:[%s16590_s28 + $0x620] sm:$0xff] %v503_v35  ;;  %v505_v36 = vld [vmem:[%s16594_s29 + $0xc60] sm:$0xff] }
  0x81   : >> { %v507_v37 = vld [vmem:[%s16594_s29 + $0xc80] sm:$0xff]  ;;  %506 = vst [vmem:[%s16590_s28 + $0x630] sm:$0xff] %v505_v36 }
  0x82   : >> { %v509_v38 = vld [vmem:[%s16594_s29 + $0xca0] sm:$0xff]  ;;  %508 = vst [vmem:[%s16590_s28 + $0x640] sm:$0xff] %v507_v37 }
  0x83   : >> { %510 = vst [vmem:[%s16590_s28 + $0x650] sm:$0xff] %v509_v38  ;;  %v511_v39 = vld [vmem:[%s16594_s29 + $0xcc0] sm:$0xff] }
  0x84   : >> { %v513_v40 = vld [vmem:[%s16594_s29 + $0xce0] sm:$0xff]  ;;  %512 = vst [vmem:[%s16590_s28 + $0x660] sm:$0xff] %v511_v39 }
  0x85   : >> { %v515_v41 = vld [vmem:[%s16594_s29 + $0xd00] sm:$0xff]  ;;  %514 = vst [vmem:[%s16590_s28 + $0x670] sm:$0xff] %v513_v40 }
  0x86   : >> { %516 = vst [vmem:[%s16590_s28 + $0x680] sm:$0xff] %v515_v41  ;;  %v517_v42 = vld [vmem:[%s16594_s29 + $0xd20] sm:$0xff] }
  0x87   : >> { %v519_v43 = vld [vmem:[%s16594_s29 + $0xd40] sm:$0xff]  ;;  %518 = vst [vmem:[%s16590_s28 + $0x690] sm:$0xff] %v517_v42 }
  0x88   : >> { %v521_v44 = vld [vmem:[%s16594_s29 + $0xd60] sm:$0xff]  ;;  %520 = vst [vmem:[%s16590_s28 + $0x6a0] sm:$0xff] %v519_v43 }
  0x89   : >> { %522 = vst [vmem:[%s16590_s28 + $0x6b0] sm:$0xff] %v521_v44  ;;  %v523_v45 = vld [vmem:[%s16594_s29 + $0xd80] sm:$0xff] }
  0x8a   : >> { %v525_v46 = vld [vmem:[%s16594_s29 + $0xda0] sm:$0xff]  ;;  %524 = vst [vmem:[%s16590_s28 + $0x6c0] sm:$0xff] %v523_v45 }
  0x8b   : >> { %v527_v47 = vld [vmem:[%s16594_s29 + $0xdc0] sm:$0xff]  ;;  %526 = vst [vmem:[%s16590_s28 + $0x6d0] sm:$0xff] %v525_v46 }
  0x8c   : >> { %528 = vst [vmem:[%s16590_s28 + $0x6e0] sm:$0xff] %v527_v47  ;;  %v529_v48 = vld [vmem:[%s16594_s29 + $0xde0] sm:$0xff] }
  0x8d   : >> { %v531_v49 = vld [vmem:[%s16594_s29 + $0xe00] sm:$0xff]  ;;  %530 = vst [vmem:[%s16590_s28 + $0x6f0] sm:$0xff] %v529_v48 }
  0x8e   : >> { %v533_v50 = vld [vmem:[%s16594_s29 + $0xe20] sm:$0xff]  ;;  %532 = vst [vmem:[%s16590_s28 + $0x700] sm:$0xff] %v531_v49 }
  0x8f   : >> { %534 = vst [vmem:[%s16590_s28 + $0x710] sm:$0xff] %v533_v50  ;;  %v535_v51 = vld [vmem:[%s16594_s29 + $0xe40] sm:$0xff] }
  0x90   : >> { %v537_v52 = vld [vmem:[%s16594_s29 + $0xe60] sm:$0xff]  ;;  %536 = vst [vmem:[%s16590_s28 + $0x720] sm:$0xff] %v535_v51 }
  0x91   : >> { %v539_v53 = vld [vmem:[%s16594_s29 + $0xe80] sm:$0xff]  ;;  %538 = vst [vmem:[%s16590_s28 + $0x730] sm:$0xff] %v537_v52 }
  0x92   : >> { %540 = vst [vmem:[%s16590_s28 + $0x740] sm:$0xff] %v539_v53  ;;  %v541_v54 = vld [vmem:[%s16594_s29 + $0xea0] sm:$0xff] }
  0x93   : >> { %v543_v55 = vld [vmem:[%s16594_s29 + $0xec0] sm:$0xff]  ;;  %542 = vst [vmem:[%s16590_s28 + $0x750] sm:$0xff] %v541_v54 }
  0x94   : >> { %v545_v56 = vld [vmem:[%s16594_s29 + $0xee0] sm:$0xff]  ;;  %544 = vst [vmem:[%s16590_s28 + $0x760] sm:$0xff] %v543_v55 }
  0x95   : >> { %546 = vst [vmem:[%s16590_s28 + $0x770] sm:$0xff] %v545_v56  ;;  %v547_v57 = vld [vmem:[%s16594_s29 + $0xf00] sm:$0xff] }
  0x96   : >> { %v549_v58 = vld [vmem:[%s16594_s29 + $0xf20] sm:$0xff]  ;;  %548 = vst [vmem:[%s16590_s28 + $0x780] sm:$0xff] %v547_v57 }
  0x97   : >> { %v551_v59 = vld [vmem:[%s16594_s29 + $0xf40] sm:$0xff]  ;;  %550 = vst [vmem:[%s16590_s28 + $0x790] sm:$0xff] %v549_v58 }
  0x98   : >> { %552 = vst [vmem:[%s16590_s28 + $0x7a0] sm:$0xff] %v551_v59  ;;  %v553_v60 = vld [vmem:[%s16594_s29 + $0xf60] sm:$0xff] }
  0x99   : >> { %v555_v61 = vld [vmem:[%s16594_s29 + $0xf80] sm:$0xff]  ;;  %554 = vst [vmem:[%s16590_s28 + $0x7b0] sm:$0xff] %v553_v60 }
  0x9a   : >> { %v557_v62 = vld [vmem:[%s16594_s29 + $0xfa0] sm:$0xff]  ;;  %556 = vst [vmem:[%s16590_s28 + $0x7c0] sm:$0xff] %v555_v61 }
  0x9b   : >> { %558 = vst [vmem:[%s16590_s28 + $0x7d0] sm:$0xff] %v557_v62  ;;  %v559_v63 = vld [vmem:[%s16594_s29 + $0xfc0] sm:$0xff] }
  0x9c   : >> { %v561_v0 = vld [vmem:[%s16594_s29 + $0xfe0] sm:$0xff]  ;;  %560 = vst [vmem:[%s16590_s28 + $0x7e0] sm:$0xff] %v559_v63 }
  0x9d   : >> { %v563_v1 = vld [vmem:[%s16594_s29 + $0x1000] sm:$0xff]  ;;  %562 = vst [vmem:[%s16590_s28 + $0x7f0] sm:$0xff] %v561_v0 }
  0x9e   : >> { %564 = vst [vmem:[%s16590_s28 + $0x800] sm:$0xff] %v563_v1  ;;  %v565_v2 = vld [vmem:[%s16594_s29 + $0x1020] sm:$0xff] }
  0x9f   : >> { %v567_v3 = vld [vmem:[%s16594_s29 + $0x1040] sm:$0xff]  ;;  %566 = vst [vmem:[%s16590_s28 + $0x810] sm:$0xff] %v565_v2 }
  0xa0   : >> { %v569_v4 = vld [vmem:[%s16594_s29 + $0x1060] sm:$0xff]  ;;  %568 = vst [vmem:[%s16590_s28 + $0x820] sm:$0xff] %v567_v3 }
  0xa1   : >> { %570 = vst [vmem:[%s16590_s28 + $0x830] sm:$0xff] %v569_v4  ;;  %v571_v5 = vld [vmem:[%s16594_s29 + $0x1080] sm:$0xff] }
  0xa2   : >> { %v573_v6 = vld [vmem:[%s16594_s29 + $0x10a0] sm:$0xff]  ;;  %572 = vst [vmem:[%s16590_s28 + $0x840] sm:$0xff] %v571_v5 }
  0xa3   : >> { %v575_v7 = vld [vmem:[%s16594_s29 + $0x10c0] sm:$0xff]  ;;  %574 = vst [vmem:[%s16590_s28 + $0x850] sm:$0xff] %v573_v6 }
  0xa4   : >> { %576 = vst [vmem:[%s16590_s28 + $0x860] sm:$0xff] %v575_v7  ;;  %v577_v8 = vld [vmem:[%s16594_s29 + $0x10e0] sm:$0xff] }
  0xa5   : >> { %v579_v9 = vld [vmem:[%s16594_s29 + $0x1100] sm:$0xff]  ;;  %578 = vst [vmem:[%s16590_s28 + $0x870] sm:$0xff] %v577_v8 }
  0xa6   : >> { %v581_v10 = vld [vmem:[%s16594_s29 + $0x1120] sm:$0xff]  ;;  %580 = vst [vmem:[%s16590_s28 + $0x880] sm:$0xff] %v579_v9 }
  0xa7   : >> { %582 = vst [vmem:[%s16590_s28 + $0x890] sm:$0xff] %v581_v10  ;;  %v583_v11 = vld [vmem:[%s16594_s29 + $0x1140] sm:$0xff] }
  0xa8   : >> { %v585_v12 = vld [vmem:[%s16594_s29 + $0x1160] sm:$0xff]  ;;  %584 = vst [vmem:[%s16590_s28 + $0x8a0] sm:$0xff] %v583_v11 }
  0xa9   : >> { %v587_v13 = vld [vmem:[%s16594_s29 + $0x1180] sm:$0xff]  ;;  %586 = vst [vmem:[%s16590_s28 + $0x8b0] sm:$0xff] %v585_v12 }
  0xaa   : >> { %588 = vst [vmem:[%s16590_s28 + $0x8c0] sm:$0xff] %v587_v13  ;;  %v589_v14 = vld [vmem:[%s16594_s29 + $0x11a0] sm:$0xff] }
  0xab   : >> { %v591_v15 = vld [vmem:[%s16594_s29 + $0x11c0] sm:$0xff]  ;;  %590 = vst [vmem:[%s16590_s28 + $0x8d0] sm:$0xff] %v589_v14 }
  0xac   : >> { %v593_v16 = vld [vmem:[%s16594_s29 + $0x11e0] sm:$0xff]  ;;  %592 = vst [vmem:[%s16590_s28 + $0x8e0] sm:$0xff] %v591_v15 }
  0xad   : >> { %594 = vst [vmem:[%s16590_s28 + $0x8f0] sm:$0xff] %v593_v16  ;;  %v595_v17 = vld [vmem:[%s16594_s29 + $0x1200] sm:$0xff] }
  0xae   : >> { %v597_v18 = vld [vmem:[%s16594_s29 + $0x1220] sm:$0xff]  ;;  %596 = vst [vmem:[%s16590_s28 + $0x900] sm:$0xff] %v595_v17 }
  0xaf   : >> { %v599_v19 = vld [vmem:[%s16594_s29 + $0x1240] sm:$0xff]  ;;  %598 = vst [vmem:[%s16590_s28 + $0x910] sm:$0xff] %v597_v18 }
  0xb0   : >> { %600 = vst [vmem:[%s16590_s28 + $0x920] sm:$0xff] %v599_v19  ;;  %v601_v20 = vld [vmem:[%s16594_s29 + $0x1260] sm:$0xff] }
  0xb1   : >> { %v603_v21 = vld [vmem:[%s16594_s29 + $0x1280] sm:$0xff]  ;;  %602 = vst [vmem:[%s16590_s28 + $0x930] sm:$0xff] %v601_v20 }
  0xb2   : >> { %v605_v22 = vld [vmem:[%s16594_s29 + $0x12a0] sm:$0xff]  ;;  %604 = vst [vmem:[%s16590_s28 + $0x940] sm:$0xff] %v603_v21 }
  0xb3   : >> { %606 = vst [vmem:[%s16590_s28 + $0x950] sm:$0xff] %v605_v22  ;;  %v607_v23 = vld [vmem:[%s16594_s29 + $0x12c0] sm:$0xff] }
  0xb4   : >> { %v609_v24 = vld [vmem:[%s16594_s29 + $0x12e0] sm:$0xff]  ;;  %608 = vst [vmem:[%s16590_s28 + $0x960] sm:$0xff] %v607_v23 }
  0xb5   : >> { %v611_v25 = vld [vmem:[%s16594_s29 + $0x1300] sm:$0xff]  ;;  %610 = vst [vmem:[%s16590_s28 + $0x970] sm:$0xff] %v609_v24 }
  0xb6   : >> { %612 = vst [vmem:[%s16590_s28 + $0x980] sm:$0xff] %v611_v25  ;;  %v613_v26 = vld [vmem:[%s16594_s29 + $0x1320] sm:$0xff] }
  0xb7   : >> { %v615_v27 = vld [vmem:[%s16594_s29 + $0x1340] sm:$0xff]  ;;  %614 = vst [vmem:[%s16590_s28 + $0x990] sm:$0xff] %v613_v26 }
  0xb8   : >> { %v617_v28 = vld [vmem:[%s16594_s29 + $0x1360] sm:$0xff]  ;;  %616 = vst [vmem:[%s16590_s28 + $0x9a0] sm:$0xff] %v615_v27 }
  0xb9   : >> { %618 = vst [vmem:[%s16590_s28 + $0x9b0] sm:$0xff] %v617_v28  ;;  %v619_v29 = vld [vmem:[%s16594_s29 + $0x1380] sm:$0xff] }
  0xba   : >> { %v621_v30 = vld [vmem:[%s16594_s29 + $0x13a0] sm:$0xff]  ;;  %620 = vst [vmem:[%s16590_s28 + $0x9c0] sm:$0xff] %v619_v29 }
  0xbb   : >> { %v623_v31 = vld [vmem:[%s16594_s29 + $0x13c0] sm:$0xff]  ;;  %622 = vst [vmem:[%s16590_s28 + $0x9d0] sm:$0xff] %v621_v30 }
  0xbc   : >> { %624 = vst [vmem:[%s16590_s28 + $0x9e0] sm:$0xff] %v623_v31  ;;  %v625_v32 = vld [vmem:[%s16594_s29 + $0x13e0] sm:$0xff] }
  0xbd   : >> { %v627_v33 = vld [vmem:[%s16594_s29 + $0x1400] sm:$0xff]  ;;  %626 = vst [vmem:[%s16590_s28 + $0x9f0] sm:$0xff] %v625_v32 }
  0xbe   : >> { %v629_v34 = vld [vmem:[%s16594_s29 + $0x1420] sm:$0xff]  ;;  %628 = vst [vmem:[%s16590_s28 + $0xa00] sm:$0xff] %v627_v33 }
  0xbf   : >> { %630 = vst [vmem:[%s16590_s28 + $0xa10] sm:$0xff] %v629_v34  ;;  %v631_v35 = vld [vmem:[%s16594_s29 + $0x1440] sm:$0xff] }
  0xc0   : >> { %v633_v36 = vld [vmem:[%s16594_s29 + $0x1460] sm:$0xff]  ;;  %632 = vst [vmem:[%s16590_s28 + $0xa20] sm:$0xff] %v631_v35 }
  0xc1   : >> { %v635_v37 = vld [vmem:[%s16594_s29 + $0x1480] sm:$0xff]  ;;  %634 = vst [vmem:[%s16590_s28 + $0xa30] sm:$0xff] %v633_v36 }
  0xc2   : >> { %636 = vst [vmem:[%s16590_s28 + $0xa40] sm:$0xff] %v635_v37  ;;  %v637_v38 = vld [vmem:[%s16594_s29 + $0x14a0] sm:$0xff] }
  0xc3   : >> { %v639_v39 = vld [vmem:[%s16594_s29 + $0x14c0] sm:$0xff]  ;;  %638 = vst [vmem:[%s16590_s28 + $0xa50] sm:$0xff] %v637_v38 }
  0xc4   : >> { %v641_v40 = vld [vmem:[%s16594_s29 + $0x14e0] sm:$0xff]  ;;  %640 = vst [vmem:[%s16590_s28 + $0xa60] sm:$0xff] %v639_v39 }
  0xc5   : >> { %642 = vst [vmem:[%s16590_s28 + $0xa70] sm:$0xff] %v641_v40  ;;  %v643_v41 = vld [vmem:[%s16594_s29 + $0x1500] sm:$0xff] }
  0xc6   : >> { %v645_v42 = vld [vmem:[%s16594_s29 + $0x1520] sm:$0xff]  ;;  %644 = vst [vmem:[%s16590_s28 + $0xa80] sm:$0xff] %v643_v41 }
  0xc7   : >> { %v647_v43 = vld [vmem:[%s16594_s29 + $0x1540] sm:$0xff]  ;;  %646 = vst [vmem:[%s16590_s28 + $0xa90] sm:$0xff] %v645_v42 }
  0xc8   : >> { %648 = vst [vmem:[%s16590_s28 + $0xaa0] sm:$0xff] %v647_v43  ;;  %v649_v44 = vld [vmem:[%s16594_s29 + $0x1560] sm:$0xff] }
  0xc9   : >> { %v651_v45 = vld [vmem:[%s16594_s29 + $0x1580] sm:$0xff]  ;;  %650 = vst [vmem:[%s16590_s28 + $0xab0] sm:$0xff] %v649_v44 }
  0xca   : >> { %v653_v46 = vld [vmem:[%s16594_s29 + $0x15a0] sm:$0xff]  ;;  %652 = vst [vmem:[%s16590_s28 + $0xac0] sm:$0xff] %v651_v45 }
  0xcb   : >> { %654 = vst [vmem:[%s16590_s28 + $0xad0] sm:$0xff] %v653_v46  ;;  %v655_v47 = vld [vmem:[%s16594_s29 + $0x15c0] sm:$0xff] }
  0xcc   : >> { %v657_v48 = vld [vmem:[%s16594_s29 + $0x15e0] sm:$0xff]  ;;  %656 = vst [vmem:[%s16590_s28 + $0xae0] sm:$0xff] %v655_v47 }
  0xcd   : >> { %v659_v49 = vld [vmem:[%s16594_s29 + $0x1600] sm:$0xff]  ;;  %658 = vst [vmem:[%s16590_s28 + $0xaf0] sm:$0xff] %v657_v48 }
  0xce   : >> { %660 = vst [vmem:[%s16590_s28 + $0xb00] sm:$0xff] %v659_v49  ;;  %v661_v50 = vld [vmem:[%s16594_s29 + $0x1620] sm:$0xff] }
  0xcf   : >> { %v663_v51 = vld [vmem:[%s16594_s29 + $0x1640] sm:$0xff]  ;;  %662 = vst [vmem:[%s16590_s28 + $0xb10] sm:$0xff] %v661_v50 }
  0xd0   : >> { %v665_v52 = vld [vmem:[%s16594_s29 + $0x1660] sm:$0xff]  ;;  %664 = vst [vmem:[%s16590_s28 + $0xb20] sm:$0xff] %v663_v51 }
  0xd1   : >> { %666 = vst [vmem:[%s16590_s28 + $0xb30] sm:$0xff] %v665_v52  ;;  %v667_v53 = vld [vmem:[%s16594_s29 + $0x1680] sm:$0xff] }
  0xd2   : >> { %v669_v54 = vld [vmem:[%s16594_s29 + $0x16a0] sm:$0xff]  ;;  %668 = vst [vmem:[%s16590_s28 + $0xb40] sm:$0xff] %v667_v53 }
  0xd3   : >> { %v671_v55 = vld [vmem:[%s16594_s29 + $0x16c0] sm:$0xff]  ;;  %670 = vst [vmem:[%s16590_s28 + $0xb50] sm:$0xff] %v669_v54 }
  0xd4   : >> { %672 = vst [vmem:[%s16590_s28 + $0xb60] sm:$0xff] %v671_v55  ;;  %v673_v56 = vld [vmem:[%s16594_s29 + $0x16e0] sm:$0xff] }
  0xd5   : >> { %v675_v57 = vld [vmem:[%s16594_s29 + $0x1700] sm:$0xff]  ;;  %674 = vst [vmem:[%s16590_s28 + $0xb70] sm:$0xff] %v673_v56 }
  0xd6   : >> { %v677_v58 = vld [vmem:[%s16594_s29 + $0x1720] sm:$0xff]  ;;  %676 = vst [vmem:[%s16590_s28 + $0xb80] sm:$0xff] %v675_v57 }
  0xd7   : >> { %678 = vst [vmem:[%s16590_s28 + $0xb90] sm:$0xff] %v677_v58  ;;  %v679_v59 = vld [vmem:[%s16594_s29 + $0x1740] sm:$0xff] }
  0xd8   : >> { %v681_v60 = vld [vmem:[%s16594_s29 + $0x1760] sm:$0xff]  ;;  %680 = vst [vmem:[%s16590_s28 + $0xba0] sm:$0xff] %v679_v59 }
  0xd9   : >> { %v683_v61 = vld [vmem:[%s16594_s29 + $0x1780] sm:$0xff]  ;;  %682 = vst [vmem:[%s16590_s28 + $0xbb0] sm:$0xff] %v681_v60 }
  0xda   : >> { %684 = vst [vmem:[%s16590_s28 + $0xbc0] sm:$0xff] %v683_v61  ;;  %v685_v62 = vld [vmem:[%s16594_s29 + $0x17a0] sm:$0xff] }
  0xdb   : >> { %v687_v63 = vld [vmem:[%s16594_s29 + $0x17c0] sm:$0xff]  ;;  %686 = vst [vmem:[%s16590_s28 + $0xbd0] sm:$0xff] %v685_v62 }
  0xdc   : >> { %v689_v0 = vld [vmem:[%s16594_s29 + $0x17e0] sm:$0xff]  ;;  %688 = vst [vmem:[%s16590_s28 + $0xbe0] sm:$0xff] %v687_v63 }
  0xdd   : >> { %690 = vst [vmem:[%s16590_s28 + $0xbf0] sm:$0xff] %v689_v0  ;;  %v691_v1 = vld [vmem:[%s16594_s29 + $0x1800] sm:$0xff] }
  0xde   : >> { %v693_v2 = vld [vmem:[%s16594_s29 + $0x1820] sm:$0xff]  ;;  %692 = vst [vmem:[%s16590_s28 + $0xc00] sm:$0xff] %v691_v1 }
  0xdf   : >> { %v695_v3 = vld [vmem:[%s16594_s29 + $0x1840] sm:$0xff]  ;;  %694 = vst [vmem:[%s16590_s28 + $0xc10] sm:$0xff] %v693_v2 }
  0xe0   : >> { %696 = vst [vmem:[%s16590_s28 + $0xc20] sm:$0xff] %v695_v3  ;;  %v697_v4 = vld [vmem:[%s16594_s29 + $0x1860] sm:$0xff] }
  0xe1   : >> { %v699_v5 = vld [vmem:[%s16594_s29 + $0x1880] sm:$0xff]  ;;  %698 = vst [vmem:[%s16590_s28 + $0xc30] sm:$0xff] %v697_v4 }
  0xe2   : >> { %v701_v6 = vld [vmem:[%s16594_s29 + $0x18a0] sm:$0xff]  ;;  %700 = vst [vmem:[%s16590_s28 + $0xc40] sm:$0xff] %v699_v5 }
  0xe3   : >> { %702 = vst [vmem:[%s16590_s28 + $0xc50] sm:$0xff] %v701_v6  ;;  %v703_v7 = vld [vmem:[%s16594_s29 + $0x18c0] sm:$0xff] }
  0xe4   : >> { %v705_v8 = vld [vmem:[%s16594_s29 + $0x18e0] sm:$0xff]  ;;  %704 = vst [vmem:[%s16590_s28 + $0xc60] sm:$0xff] %v703_v7 }
  0xe5   : >> { %v707_v9 = vld [vmem:[%s16594_s29 + $0x1900] sm:$0xff]  ;;  %706 = vst [vmem:[%s16590_s28 + $0xc70] sm:$0xff] %v705_v8 }
  0xe6   : >> { %708 = vst [vmem:[%s16590_s28 + $0xc80] sm:$0xff] %v707_v9  ;;  %v709_v10 = vld [vmem:[%s16594_s29 + $0x1920] sm:$0xff] }
  0xe7   : >> { %v711_v11 = vld [vmem:[%s16594_s29 + $0x1940] sm:$0xff]  ;;  %710 = vst [vmem:[%s16590_s28 + $0xc90] sm:$0xff] %v709_v10 }
  0xe8   : >> { %v713_v12 = vld [vmem:[%s16594_s29 + $0x1960] sm:$0xff]  ;;  %712 = vst [vmem:[%s16590_s28 + $0xca0] sm:$0xff] %v711_v11 }
  0xe9   : >> { %714 = vst [vmem:[%s16590_s28 + $0xcb0] sm:$0xff] %v713_v12  ;;  %v715_v13 = vld [vmem:[%s16594_s29 + $0x1980] sm:$0xff] }
  0xea   : >> { %v717_v14 = vld [vmem:[%s16594_s29 + $0x19a0] sm:$0xff]  ;;  %716 = vst [vmem:[%s16590_s28 + $0xcc0] sm:$0xff] %v715_v13 }
  0xeb   : >> { %v719_v15 = vld [vmem:[%s16594_s29 + $0x19c0] sm:$0xff]  ;;  %718 = vst [vmem:[%s16590_s28 + $0xcd0] sm:$0xff] %v717_v14 }
  0xec   : >> { %720 = vst [vmem:[%s16590_s28 + $0xce0] sm:$0xff] %v719_v15  ;;  %v721_v16 = vld [vmem:[%s16594_s29 + $0x19e0] sm:$0xff] }
  0xed   : >> { %v723_v17 = vld [vmem:[%s16594_s29 + $0x1a00] sm:$0xff]  ;;  %722 = vst [vmem:[%s16590_s28 + $0xcf0] sm:$0xff] %v721_v16 }
  0xee   : >> { %v725_v18 = vld [vmem:[%s16594_s29 + $0x1a20] sm:$0xff]  ;;  %724 = vst [vmem:[%s16590_s28 + $0xd00] sm:$0xff] %v723_v17 }
  0xef   : >> { %726 = vst [vmem:[%s16590_s28 + $0xd10] sm:$0xff] %v725_v18  ;;  %v727_v19 = vld [vmem:[%s16594_s29 + $0x1a40] sm:$0xff] }
  0xf0   : >> { %v729_v20 = vld [vmem:[%s16594_s29 + $0x1a60] sm:$0xff]  ;;  %728 = vst [vmem:[%s16590_s28 + $0xd20] sm:$0xff] %v727_v19 }
  0xf1   : >> { %v731_v21 = vld [vmem:[%s16594_s29 + $0x1a80] sm:$0xff]  ;;  %730 = vst [vmem:[%s16590_s28 + $0xd30] sm:$0xff] %v729_v20 }
  0xf2   : >> { %732 = vst [vmem:[%s16590_s28 + $0xd40] sm:$0xff] %v731_v21  ;;  %v733_v22 = vld [vmem:[%s16594_s29 + $0x1aa0] sm:$0xff] }
  0xf3   : >> { %v735_v23 = vld [vmem:[%s16594_s29 + $0x1ac0] sm:$0xff]  ;;  %734 = vst [vmem:[%s16590_s28 + $0xd50] sm:$0xff] %v733_v22 }
  0xf4   : >> { %v737_v24 = vld [vmem:[%s16594_s29 + $0x1ae0] sm:$0xff]  ;;  %736 = vst [vmem:[%s16590_s28 + $0xd60] sm:$0xff] %v735_v23 }
  0xf5   : >> { %738 = vst [vmem:[%s16590_s28 + $0xd70] sm:$0xff] %v737_v24  ;;  %v739_v25 = vld [vmem:[%s16594_s29 + $0x1b00] sm:$0xff] }
  0xf6   : >> { %v741_v26 = vld [vmem:[%s16594_s29 + $0x1b20] sm:$0xff]  ;;  %740 = vst [vmem:[%s16590_s28 + $0xd80] sm:$0xff] %v739_v25 }
  0xf7   : >> { %v743_v27 = vld [vmem:[%s16594_s29 + $0x1b40] sm:$0xff]  ;;  %742 = vst [vmem:[%s16590_s28 + $0xd90] sm:$0xff] %v741_v26 }
  0xf8   : >> { %744 = vst [vmem:[%s16590_s28 + $0xda0] sm:$0xff] %v743_v27  ;;  %v745_v28 = vld [vmem:[%s16594_s29 + $0x1b60] sm:$0xff] }
  0xf9   : >> { %v747_v29 = vld [vmem:[%s16594_s29 + $0x1b80] sm:$0xff]  ;;  %746 = vst [vmem:[%s16590_s28 + $0xdb0] sm:$0xff] %v745_v28 }
  0xfa   : >> { %v749_v30 = vld [vmem:[%s16594_s29 + $0x1ba0] sm:$0xff]  ;;  %748 = vst [vmem:[%s16590_s28 + $0xdc0] sm:$0xff] %v747_v29 }
  0xfb   : >> { %750 = vst [vmem:[%s16590_s28 + $0xdd0] sm:$0xff] %v749_v30  ;;  %v751_v31 = vld [vmem:[%s16594_s29 + $0x1bc0] sm:$0xff] }
  0xfc   : >> { %v753_v32 = vld [vmem:[%s16594_s29 + $0x1be0] sm:$0xff]  ;;  %752 = vst [vmem:[%s16590_s28 + $0xde0] sm:$0xff] %v751_v31 }
  0xfd   : >> { %v755_v33 = vld [vmem:[%s16594_s29 + $0x1c00] sm:$0xff]  ;;  %754 = vst [vmem:[%s16590_s28 + $0xdf0] sm:$0xff] %v753_v32 }
  0xfe   : >> { %756 = vst [vmem:[%s16590_s28 + $0xe00] sm:$0xff] %v755_v33  ;;  %v757_v34 = vld [vmem:[%s16594_s29 + $0x1c20] sm:$0xff] }
  0xff   : >> { %v759_v35 = vld [vmem:[%s16594_s29 + $0x1c40] sm:$0xff]  ;;  %758 = vst [vmem:[%s16590_s28 + $0xe10] sm:$0xff] %v757_v34 }
 0x100   : >> { %v761_v36 = vld [vmem:[%s16594_s29 + $0x1c60] sm:$0xff]  ;;  %760 = vst [vmem:[%s16590_s28 + $0xe20] sm:$0xff] %v759_v35 }
 0x101   : >> { %762 = vst [vmem:[%s16590_s28 + $0xe30] sm:$0xff] %v761_v36  ;;  %v763_v37 = vld [vmem:[%s16594_s29 + $0x1c80] sm:$0xff] }
 0x102   : >> { %v765_v38 = vld [vmem:[%s16594_s29 + $0x1ca0] sm:$0xff]  ;;  %764 = vst [vmem:[%s16590_s28 + $0xe40] sm:$0xff] %v763_v37 }
 0x103   : >> { %v767_v39 = vld [vmem:[%s16594_s29 + $0x1cc0] sm:$0xff]  ;;  %766 = vst [vmem:[%s16590_s28 + $0xe50] sm:$0xff] %v765_v38 }
 0x104   : >> { %768 = vst [vmem:[%s16590_s28 + $0xe60] sm:$0xff] %v767_v39  ;;  %v769_v40 = vld [vmem:[%s16594_s29 + $0x1ce0] sm:$0xff] }
 0x105   : >> { %v771_v41 = vld [vmem:[%s16594_s29 + $0x1d00] sm:$0xff]  ;;  %770 = vst [vmem:[%s16590_s28 + $0xe70] sm:$0xff] %v769_v40 }
 0x106   : >> { %v773_v42 = vld [vmem:[%s16594_s29 + $0x1d20] sm:$0xff]  ;;  %772 = vst [vmem:[%s16590_s28 + $0xe80] sm:$0xff] %v771_v41 }
 0x107   : >> { %774 = vst [vmem:[%s16590_s28 + $0xe90] sm:$0xff] %v773_v42  ;;  %v775_v43 = vld [vmem:[%s16594_s29 + $0x1d40] sm:$0xff] }
 0x108   : >> { %v777_v44 = vld [vmem:[%s16594_s29 + $0x1d60] sm:$0xff]  ;;  %776 = vst [vmem:[%s16590_s28 + $0xea0] sm:$0xff] %v775_v43 }
 0x109   : >> { %v779_v45 = vld [vmem:[%s16594_s29 + $0x1d80] sm:$0xff]  ;;  %778 = vst [vmem:[%s16590_s28 + $0xeb0] sm:$0xff] %v777_v44 }
 0x10a   : >> { %780 = vst [vmem:[%s16590_s28 + $0xec0] sm:$0xff] %v779_v45  ;;  %v781_v46 = vld [vmem:[%s16594_s29 + $0x1da0] sm:$0xff] }
 0x10b   : >> { %v783_v47 = vld [vmem:[%s16594_s29 + $0x1dc0] sm:$0xff]  ;;  %782 = vst [vmem:[%s16590_s28 + $0xed0] sm:$0xff] %v781_v46 }
 0x10c   : >> { %v785_v48 = vld [vmem:[%s16594_s29 + $0x1de0] sm:$0xff]  ;;  %784 = vst [vmem:[%s16590_s28 + $0xee0] sm:$0xff] %v783_v47 }
 0x10d   : >> { %786 = vst [vmem:[%s16590_s28 + $0xef0] sm:$0xff] %v785_v48  ;;  %v787_v49 = vld [vmem:[%s16594_s29 + $0x1e00] sm:$0xff] }
 0x10e   : >> { %v789_v50 = vld [vmem:[%s16594_s29 + $0x1e20] sm:$0xff]  ;;  %788 = vst [vmem:[%s16590_s28 + $0xf00] sm:$0xff] %v787_v49 }
 0x10f   : >> { %v791_v51 = vld [vmem:[%s16594_s29 + $0x1e40] sm:$0xff]  ;;  %790 = vst [vmem:[%s16590_s28 + $0xf10] sm:$0xff] %v789_v50 }
 0x110   : >> { %792 = vst [vmem:[%s16590_s28 + $0xf20] sm:$0xff] %v791_v51  ;;  %v793_v52 = vld [vmem:[%s16594_s29 + $0x1e60] sm:$0xff] }
 0x111   : >> { %v795_v53 = vld [vmem:[%s16594_s29 + $0x1e80] sm:$0xff]  ;;  %794 = vst [vmem:[%s16590_s28 + $0xf30] sm:$0xff] %v793_v52 }
 0x112   : >> { %v797_v54 = vld [vmem:[%s16594_s29 + $0x1ea0] sm:$0xff]  ;;  %796 = vst [vmem:[%s16590_s28 + $0xf40] sm:$0xff] %v795_v53 }
 0x113   : >> { %798 = vst [vmem:[%s16590_s28 + $0xf50] sm:$0xff] %v797_v54  ;;  %v799_v55 = vld [vmem:[%s16594_s29 + $0x1ec0] sm:$0xff] }
 0x114   : >> { %v801_v56 = vld [vmem:[%s16594_s29 + $0x1ee0] sm:$0xff]  ;;  %800 = vst [vmem:[%s16590_s28 + $0xf60] sm:$0xff] %v799_v55 }
 0x115   : >> { %v803_v57 = vld [vmem:[%s16594_s29 + $0x1f00] sm:$0xff]  ;;  %802 = vst [vmem:[%s16590_s28 + $0xf70] sm:$0xff] %v801_v56 }
 0x116   : >> { %804 = vst [vmem:[%s16590_s28 + $0xf80] sm:$0xff] %v803_v57  ;;  %v805_v58 = vld [vmem:[%s16594_s29 + $0x1f20] sm:$0xff] }
 0x117   : >> { %v807_v59 = vld [vmem:[%s16594_s29 + $0x1f40] sm:$0xff]  ;;  %806 = vst [vmem:[%s16590_s28 + $0xf90] sm:$0xff] %v805_v58 }
 0x118   : >> { %v809_v60 = vld [vmem:[%s16594_s29 + $0x1f60] sm:$0xff]  ;;  %808 = vst [vmem:[%s16590_s28 + $0xfa0] sm:$0xff] %v807_v59 }
 0x119   : >> { %810 = vst [vmem:[%s16590_s28 + $0xfb0] sm:$0xff] %v809_v60  ;;  %v811_v61 = vld [vmem:[%s16594_s29 + $0x1f80] sm:$0xff] }
 0x11a   : >> { %v813_v62 = vld [vmem:[%s16594_s29 + $0x1fa0] sm:$0xff]  ;;  %812 = vst [vmem:[%s16590_s28 + $0xfc0] sm:$0xff] %v811_v61 }
 0x11b   : >> { %v815_v63 = vld [vmem:[%s16594_s29 + $0x1fc0] sm:$0xff]  ;;  %814 = vst [vmem:[%s16590_s28 + $0xfd0] sm:$0xff] %v813_v62 }
 0x11c   : >> { %816 = vst [vmem:[%s16590_s28 + $0xfe0] sm:$0xff] %v815_v63  ;;  %v817_v0 = vld [vmem:[%s16594_s29 + $0x1fe0] sm:$0xff] }
 0x11d   : >> { %v819_v1 = vld [vmem:[%s16594_s29 + $0x2000] sm:$0xff]  ;;  %818 = vst [vmem:[%s16590_s28 + $0xff0] sm:$0xff] %v817_v0 }
 0x11e   : >> { %v821_v2 = vld [vmem:[%s16594_s29 + $0x2020] sm:$0xff]  ;;  %820 = vst [vmem:[%s16590_s28 + $0x1000] sm:$0xff] %v819_v1 }
 0x11f   : >> { %822 = vst [vmem:[%s16590_s28 + $0x1010] sm:$0xff] %v821_v2  ;;  %v823_v3 = vld [vmem:[%s16594_s29 + $0x2040] sm:$0xff] }
 0x120   : >> { %v825_v4 = vld [vmem:[%s16594_s29 + $0x2060] sm:$0xff]  ;;  %824 = vst [vmem:[%s16590_s28 + $0x1020] sm:$0xff] %v823_v3 }
 0x121   : >> { %v827_v5 = vld [vmem:[%s16594_s29 + $0x2080] sm:$0xff]  ;;  %826 = vst [vmem:[%s16590_s28 + $0x1030] sm:$0xff] %v825_v4 }
 0x122   : >> { %828 = vst [vmem:[%s16590_s28 + $0x1040] sm:$0xff] %v827_v5  ;;  %v829_v6 = vld [vmem:[%s16594_s29 + $0x20a0] sm:$0xff] }
 0x123   : >> { %v831_v7 = vld [vmem:[%s16594_s29 + $0x20c0] sm:$0xff]  ;;  %830 = vst [vmem:[%s16590_s28 + $0x1050] sm:$0xff] %v829_v6 }
 0x124   : >> { %v833_v8 = vld [vmem:[%s16594_s29 + $0x20e0] sm:$0xff]  ;;  %832 = vst [vmem:[%s16590_s28 + $0x1060] sm:$0xff] %v831_v7 }
 0x125   : >> { %834 = vst [vmem:[%s16590_s28 + $0x1070] sm:$0xff] %v833_v8  ;;  %v835_v9 = vld [vmem:[%s16594_s29 + $0x2100] sm:$0xff] }
 0x126   : >> { %v837_v10 = vld [vmem:[%s16594_s29 + $0x2120] sm:$0xff]  ;;  %836 = vst [vmem:[%s16590_s28 + $0x1080] sm:$0xff] %v835_v9 }
 0x127   : >> { %v839_v11 = vld [vmem:[%s16594_s29 + $0x2140] sm:$0xff]  ;;  %838 = vst [vmem:[%s16590_s28 + $0x1090] sm:$0xff] %v837_v10 }
 0x128   : >> { %840 = vst [vmem:[%s16590_s28 + $0x10a0] sm:$0xff] %v839_v11  ;;  %v841_v12 = vld [vmem:[%s16594_s29 + $0x2160] sm:$0xff] }
 0x129   : >> { %v843_v13 = vld [vmem:[%s16594_s29 + $0x2180] sm:$0xff]  ;;  %842 = vst [vmem:[%s16590_s28 + $0x10b0] sm:$0xff] %v841_v12 }
 0x12a   : >> { %v845_v14 = vld [vmem:[%s16594_s29 + $0x21a0] sm:$0xff]  ;;  %844 = vst [vmem:[%s16590_s28 + $0x10c0] sm:$0xff] %v843_v13 }
 0x12b   : >> { %846 = vst [vmem:[%s16590_s28 + $0x10d0] sm:$0xff] %v845_v14  ;;  %v847_v15 = vld [vmem:[%s16594_s29 + $0x21c0] sm:$0xff] }
 0x12c   : >> { %v849_v16 = vld [vmem:[%s16594_s29 + $0x21e0] sm:$0xff]  ;;  %848 = vst [vmem:[%s16590_s28 + $0x10e0] sm:$0xff] %v847_v15 }
 0x12d   : >> { %v851_v17 = vld [vmem:[%s16594_s29 + $0x2200] sm:$0xff]  ;;  %850 = vst [vmem:[%s16590_s28 + $0x10f0] sm:$0xff] %v849_v16 }
 0x12e   : >> { %852 = vst [vmem:[%s16590_s28 + $0x1100] sm:$0xff] %v851_v17  ;;  %v853_v18 = vld [vmem:[%s16594_s29 + $0x2220] sm:$0xff] }
 0x12f   : >> { %v855_v19 = vld [vmem:[%s16594_s29 + $0x2240] sm:$0xff]  ;;  %854 = vst [vmem:[%s16590_s28 + $0x1110] sm:$0xff] %v853_v18 }
 0x130   : >> { %v857_v20 = vld [vmem:[%s16594_s29 + $0x2260] sm:$0xff]  ;;  %856 = vst [vmem:[%s16590_s28 + $0x1120] sm:$0xff] %v855_v19 }
 0x131   : >> { %858 = vst [vmem:[%s16590_s28 + $0x1130] sm:$0xff] %v857_v20  ;;  %v859_v21 = vld [vmem:[%s16594_s29 + $0x2280] sm:$0xff] }
 0x132   : >> { %v861_v22 = vld [vmem:[%s16594_s29 + $0x22a0] sm:$0xff]  ;;  %860 = vst [vmem:[%s16590_s28 + $0x1140] sm:$0xff] %v859_v21 }
 0x133   : >> { %v863_v23 = vld [vmem:[%s16594_s29 + $0x22c0] sm:$0xff]  ;;  %862 = vst [vmem:[%s16590_s28 + $0x1150] sm:$0xff] %v861_v22 }
 0x134   : >> { %864 = vst [vmem:[%s16590_s28 + $0x1160] sm:$0xff] %v863_v23  ;;  %v865_v24 = vld [vmem:[%s16594_s29 + $0x22e0] sm:$0xff] }
 0x135   : >> { %v867_v25 = vld [vmem:[%s16594_s29 + $0x2300] sm:$0xff]  ;;  %866 = vst [vmem:[%s16590_s28 + $0x1170] sm:$0xff] %v865_v24 }
 0x136   : >> { %v869_v26 = vld [vmem:[%s16594_s29 + $0x2320] sm:$0xff]  ;;  %868 = vst [vmem:[%s16590_s28 + $0x1180] sm:$0xff] %v867_v25 }
 0x137   : >> { %870 = vst [vmem:[%s16590_s28 + $0x1190] sm:$0xff] %v869_v26  ;;  %v871_v27 = vld [vmem:[%s16594_s29 + $0x2340] sm:$0xff] }
 0x138   : >> { %v873_v28 = vld [vmem:[%s16594_s29 + $0x2360] sm:$0xff]  ;;  %872 = vst [vmem:[%s16590_s28 + $0x11a0] sm:$0xff] %v871_v27 }
 0x139   : >> { %v875_v29 = vld [vmem:[%s16594_s29 + $0x2380] sm:$0xff]  ;;  %874 = vst [vmem:[%s16590_s28 + $0x11b0] sm:$0xff] %v873_v28 }
 0x13a   : >> { %876 = vst [vmem:[%s16590_s28 + $0x11c0] sm:$0xff] %v875_v29  ;;  %v877_v30 = vld [vmem:[%s16594_s29 + $0x23a0] sm:$0xff] }
 0x13b   : >> { %v879_v31 = vld [vmem:[%s16594_s29 + $0x23c0] sm:$0xff]  ;;  %878 = vst [vmem:[%s16590_s28 + $0x11d0] sm:$0xff] %v877_v30 }
 0x13c   : >> { %v881_v32 = vld [vmem:[%s16594_s29 + $0x23e0] sm:$0xff]  ;;  %880 = vst [vmem:[%s16590_s28 + $0x11e0] sm:$0xff] %v879_v31 }
 0x13d   : >> { %882 = vst [vmem:[%s16590_s28 + $0x11f0] sm:$0xff] %v881_v32  ;;  %v883_v33 = vld [vmem:[%s16594_s29 + $0x2400] sm:$0xff] }
 0x13e   : >> { %v885_v34 = vld [vmem:[%s16594_s29 + $0x2420] sm:$0xff]  ;;  %884 = vst [vmem:[%s16590_s28 + $0x1200] sm:$0xff] %v883_v33 }
 0x13f   : >> { %v887_v35 = vld [vmem:[%s16594_s29 + $0x2440] sm:$0xff]  ;;  %886 = vst [vmem:[%s16590_s28 + $0x1210] sm:$0xff] %v885_v34 }
 0x140   : >> { %888 = vst [vmem:[%s16590_s28 + $0x1220] sm:$0xff] %v887_v35  ;;  %v889_v36 = vld [vmem:[%s16594_s29 + $0x2460] sm:$0xff] }
 0x141   : >> { %v891_v37 = vld [vmem:[%s16594_s29 + $0x2480] sm:$0xff]  ;;  %890 = vst [vmem:[%s16590_s28 + $0x1230] sm:$0xff] %v889_v36 }
 0x142   : >> { %v893_v38 = vld [vmem:[%s16594_s29 + $0x24a0] sm:$0xff]  ;;  %892 = vst [vmem:[%s16590_s28 + $0x1240] sm:$0xff] %v891_v37 }
 0x143   : >> { %894 = vst [vmem:[%s16590_s28 + $0x1250] sm:$0xff] %v893_v38  ;;  %v895_v39 = vld [vmem:[%s16594_s29 + $0x24c0] sm:$0xff] }
 0x144   : >> { %v897_v40 = vld [vmem:[%s16594_s29 + $0x24e0] sm:$0xff]  ;;  %896 = vst [vmem:[%s16590_s28 + $0x1260] sm:$0xff] %v895_v39 }
 0x145   : >> { %v899_v41 = vld [vmem:[%s16594_s29 + $0x2500] sm:$0xff]  ;;  %898 = vst [vmem:[%s16590_s28 + $0x1270] sm:$0xff] %v897_v40 }
 0x146   : >> { %900 = vst [vmem:[%s16590_s28 + $0x1280] sm:$0xff] %v899_v41  ;;  %v901_v42 = vld [vmem:[%s16594_s29 + $0x2520] sm:$0xff] }
 0x147   : >> { %v903_v43 = vld [vmem:[%s16594_s29 + $0x2540] sm:$0xff]  ;;  %902 = vst [vmem:[%s16590_s28 + $0x1290] sm:$0xff] %v901_v42 }
 0x148   : >> { %v905_v44 = vld [vmem:[%s16594_s29 + $0x2560] sm:$0xff]  ;;  %904 = vst [vmem:[%s16590_s28 + $0x12a0] sm:$0xff] %v903_v43 }
 0x149   : >> { %906 = vst [vmem:[%s16590_s28 + $0x12b0] sm:$0xff] %v905_v44  ;;  %v907_v45 = vld [vmem:[%s16594_s29 + $0x2580] sm:$0xff] }
 0x14a   : >> { %v909_v46 = vld [vmem:[%s16594_s29 + $0x25a0] sm:$0xff]  ;;  %908 = vst [vmem:[%s16590_s28 + $0x12c0] sm:$0xff] %v907_v45 }
 0x14b   : >> { %v911_v47 = vld [vmem:[%s16594_s29 + $0x25c0] sm:$0xff]  ;;  %910 = vst [vmem:[%s16590_s28 + $0x12d0] sm:$0xff] %v909_v46 }
 0x14c   : >> { %912 = vst [vmem:[%s16590_s28 + $0x12e0] sm:$0xff] %v911_v47  ;;  %v913_v48 = vld [vmem:[%s16594_s29 + $0x25e0] sm:$0xff] }
 0x14d   : >> { %v915_v49 = vld [vmem:[%s16594_s29 + $0x2600] sm:$0xff]  ;;  %914 = vst [vmem:[%s16590_s28 + $0x12f0] sm:$0xff] %v913_v48 }
 0x14e   : >> { %v917_v50 = vld [vmem:[%s16594_s29 + $0x2620] sm:$0xff]  ;;  %916 = vst [vmem:[%s16590_s28 + $0x1300] sm:$0xff] %v915_v49 }
 0x14f   : >> { %918 = vst [vmem:[%s16590_s28 + $0x1310] sm:$0xff] %v917_v50  ;;  %v919_v51 = vld [vmem:[%s16594_s29 + $0x2640] sm:$0xff] }
 0x150   : >> { %v921_v52 = vld [vmem:[%s16594_s29 + $0x2660] sm:$0xff]  ;;  %920 = vst [vmem:[%s16590_s28 + $0x1320] sm:$0xff] %v919_v51 }
 0x151   : >> { %v923_v53 = vld [vmem:[%s16594_s29 + $0x2680] sm:$0xff]  ;;  %922 = vst [vmem:[%s16590_s28 + $0x1330] sm:$0xff] %v921_v52 }
 0x152   : >> { %924 = vst [vmem:[%s16590_s28 + $0x1340] sm:$0xff] %v923_v53  ;;  %v925_v54 = vld [vmem:[%s16594_s29 + $0x26a0] sm:$0xff] }
 0x153   : >> { %v927_v55 = vld [vmem:[%s16594_s29 + $0x26c0] sm:$0xff]  ;;  %926 = vst [vmem:[%s16590_s28 + $0x1350] sm:$0xff] %v925_v54 }
 0x154   : >> { %v929_v56 = vld [vmem:[%s16594_s29 + $0x26e0] sm:$0xff]  ;;  %928 = vst [vmem:[%s16590_s28 + $0x1360] sm:$0xff] %v927_v55 }
 0x155   : >> { %930 = vst [vmem:[%s16590_s28 + $0x1370] sm:$0xff] %v929_v56  ;;  %v931_v57 = vld [vmem:[%s16594_s29 + $0x2700] sm:$0xff] }
 0x156   : >> { %v933_v58 = vld [vmem:[%s16594_s29 + $0x2720] sm:$0xff]  ;;  %932 = vst [vmem:[%s16590_s28 + $0x1380] sm:$0xff] %v931_v57 }
 0x157   : >> { %v935_v59 = vld [vmem:[%s16594_s29 + $0x2740] sm:$0xff]  ;;  %934 = vst [vmem:[%s16590_s28 + $0x1390] sm:$0xff] %v933_v58 }
 0x158   : >> { %936 = vst [vmem:[%s16590_s28 + $0x13a0] sm:$0xff] %v935_v59  ;;  %v937_v60 = vld [vmem:[%s16594_s29 + $0x2760] sm:$0xff] }
 0x159   : >> { %v939_v61 = vld [vmem:[%s16594_s29 + $0x2780] sm:$0xff]  ;;  %938 = vst [vmem:[%s16590_s28 + $0x13b0] sm:$0xff] %v937_v60 }
 0x15a   : >> { %v941_v62 = vld [vmem:[%s16594_s29 + $0x27a0] sm:$0xff]  ;;  %940 = vst [vmem:[%s16590_s28 + $0x13c0] sm:$0xff] %v939_v61 }
 0x15b   : >> { %942 = vst [vmem:[%s16590_s28 + $0x13d0] sm:$0xff] %v941_v62  ;;  %v943_v63 = vld [vmem:[%s16594_s29 + $0x27c0] sm:$0xff] }
 0x15c   : >> { %v945_v0 = vld [vmem:[%s16594_s29 + $0x27e0] sm:$0xff]  ;;  %944 = vst [vmem:[%s16590_s28 + $0x13e0] sm:$0xff] %v943_v63 }
 0x15d   : >> { %v947_v1 = vld [vmem:[%s16594_s29 + $0x2800] sm:$0xff]  ;;  %946 = vst [vmem:[%s16590_s28 + $0x13f0] sm:$0xff] %v945_v0 }
 0x15e   : >> { %948 = vst [vmem:[%s16590_s28 + $0x1400] sm:$0xff] %v947_v1  ;;  %v949_v2 = vld [vmem:[%s16594_s29 + $0x2820] sm:$0xff] }
 0x15f   : >> { %v951_v3 = vld [vmem:[%s16594_s29 + $0x2840] sm:$0xff]  ;;  %950 = vst [vmem:[%s16590_s28 + $0x1410] sm:$0xff] %v949_v2 }
 0x160   : >> { %v953_v4 = vld [vmem:[%s16594_s29 + $0x2860] sm:$0xff]  ;;  %952 = vst [vmem:[%s16590_s28 + $0x1420] sm:$0xff] %v951_v3 }
 0x161   : >> { %954 = vst [vmem:[%s16590_s28 + $0x1430] sm:$0xff] %v953_v4  ;;  %v955_v5 = vld [vmem:[%s16594_s29 + $0x2880] sm:$0xff] }
 0x162   : >> { %v957_v6 = vld [vmem:[%s16594_s29 + $0x28a0] sm:$0xff]  ;;  %956 = vst [vmem:[%s16590_s28 + $0x1440] sm:$0xff] %v955_v5 }
 0x163   : >> { %v959_v7 = vld [vmem:[%s16594_s29 + $0x28c0] sm:$0xff]  ;;  %958 = vst [vmem:[%s16590_s28 + $0x1450] sm:$0xff] %v957_v6 }
 0x164   : >> { %960 = vst [vmem:[%s16590_s28 + $0x1460] sm:$0xff] %v959_v7  ;;  %v961_v8 = vld [vmem:[%s16594_s29 + $0x28e0] sm:$0xff] }
 0x165   : >> { %v963_v9 = vld [vmem:[%s16594_s29 + $0x2900] sm:$0xff]  ;;  %962 = vst [vmem:[%s16590_s28 + $0x1470] sm:$0xff] %v961_v8 }
 0x166   : >> { %v965_v10 = vld [vmem:[%s16594_s29 + $0x2920] sm:$0xff]  ;;  %964 = vst [vmem:[%s16590_s28 + $0x1480] sm:$0xff] %v963_v9 }
 0x167   : >> { %966 = vst [vmem:[%s16590_s28 + $0x1490] sm:$0xff] %v965_v10  ;;  %v967_v11 = vld [vmem:[%s16594_s29 + $0x2940] sm:$0xff] }
 0x168   : >> { %v969_v12 = vld [vmem:[%s16594_s29 + $0x2960] sm:$0xff]  ;;  %968 = vst [vmem:[%s16590_s28 + $0x14a0] sm:$0xff] %v967_v11 }
 0x169   : >> { %v971_v13 = vld [vmem:[%s16594_s29 + $0x2980] sm:$0xff]  ;;  %970 = vst [vmem:[%s16590_s28 + $0x14b0] sm:$0xff] %v969_v12 }
 0x16a   : >> { %972 = vst [vmem:[%s16590_s28 + $0x14c0] sm:$0xff] %v971_v13  ;;  %v973_v14 = vld [vmem:[%s16594_s29 + $0x29a0] sm:$0xff] }
 0x16b   : >> { %v975_v15 = vld [vmem:[%s16594_s29 + $0x29c0] sm:$0xff]  ;;  %974 = vst [vmem:[%s16590_s28 + $0x14d0] sm:$0xff] %v973_v14 }
 0x16c   : >> { %v977_v16 = vld [vmem:[%s16594_s29 + $0x29e0] sm:$0xff]  ;;  %976 = vst [vmem:[%s16590_s28 + $0x14e0] sm:$0xff] %v975_v15 }
 0x16d   : >> { %978 = vst [vmem:[%s16590_s28 + $0x14f0] sm:$0xff] %v977_v16  ;;  %v979_v17 = vld [vmem:[%s16594_s29 + $0x2a00] sm:$0xff] }
 0x16e   : >> { %v981_v18 = vld [vmem:[%s16594_s29 + $0x2a20] sm:$0xff]  ;;  %980 = vst [vmem:[%s16590_s28 + $0x1500] sm:$0xff] %v979_v17 }
 0x16f   : >> { %v983_v19 = vld [vmem:[%s16594_s29 + $0x2a40] sm:$0xff]  ;;  %982 = vst [vmem:[%s16590_s28 + $0x1510] sm:$0xff] %v981_v18 }
 0x170   : >> { %984 = vst [vmem:[%s16590_s28 + $0x1520] sm:$0xff] %v983_v19  ;;  %v985_v20 = vld [vmem:[%s16594_s29 + $0x2a60] sm:$0xff] }
 0x171   : >> { %v987_v21 = vld [vmem:[%s16594_s29 + $0x2a80] sm:$0xff]  ;;  %986 = vst [vmem:[%s16590_s28 + $0x1530] sm:$0xff] %v985_v20 }
 0x172   : >> { %v989_v22 = vld [vmem:[%s16594_s29 + $0x2aa0] sm:$0xff]  ;;  %988 = vst [vmem:[%s16590_s28 + $0x1540] sm:$0xff] %v987_v21 }
 0x173   : >> { %990 = vst [vmem:[%s16590_s28 + $0x1550] sm:$0xff] %v989_v22  ;;  %v991_v23 = vld [vmem:[%s16594_s29 + $0x2ac0] sm:$0xff] }
 0x174   : >> { %v993_v24 = vld [vmem:[%s16594_s29 + $0x2ae0] sm:$0xff]  ;;  %992 = vst [vmem:[%s16590_s28 + $0x1560] sm:$0xff] %v991_v23 }
 0x175   : >> { %v995_v25 = vld [vmem:[%s16594_s29 + $0x2b00] sm:$0xff]  ;;  %994 = vst [vmem:[%s16590_s28 + $0x1570] sm:$0xff] %v993_v24 }
 0x176   : >> { %996 = vst [vmem:[%s16590_s28 + $0x1580] sm:$0xff] %v995_v25  ;;  %v997_v26 = vld [vmem:[%s16594_s29 + $0x2b20] sm:$0xff] }
 0x177   : >> { %v999_v27 = vld [vmem:[%s16594_s29 + $0x2b40] sm:$0xff]  ;;  %998 = vst [vmem:[%s16590_s28 + $0x1590] sm:$0xff] %v997_v26 }
 0x178   : >> { %v1001_v28 = vld [vmem:[%s16594_s29 + $0x2b60] sm:$0xff]  ;;  %1000 = vst [vmem:[%s16590_s28 + $0x15a0] sm:$0xff] %v999_v27 }
 0x179   : >> { %1002 = vst [vmem:[%s16590_s28 + $0x15b0] sm:$0xff] %v1001_v28  ;;  %v1003_v29 = vld [vmem:[%s16594_s29 + $0x2b80] sm:$0xff] }
 0x17a   : >> { %v1005_v30 = vld [vmem:[%s16594_s29 + $0x2ba0] sm:$0xff]  ;;  %1004 = vst [vmem:[%s16590_s28 + $0x15c0] sm:$0xff] %v1003_v29 }
 0x17b   : >> { %v1007_v31 = vld [vmem:[%s16594_s29 + $0x2bc0] sm:$0xff]  ;;  %1006 = vst [vmem:[%s16590_s28 + $0x15d0] sm:$0xff] %v1005_v30 }
 0x17c   : >> { %1008 = vst [vmem:[%s16590_s28 + $0x15e0] sm:$0xff] %v1007_v31  ;;  %v1009_v32 = vld [vmem:[%s16594_s29 + $0x2be0] sm:$0xff] }
 0x17d   : >> { %v1011_v33 = vld [vmem:[%s16594_s29 + $0x2c00] sm:$0xff]  ;;  %1010 = vst [vmem:[%s16590_s28 + $0x15f0] sm:$0xff] %v1009_v32 }
 0x17e   : >> { %v1013_v34 = vld [vmem:[%s16594_s29 + $0x2c20] sm:$0xff]  ;;  %1012 = vst [vmem:[%s16590_s28 + $0x1600] sm:$0xff] %v1011_v33 }
 0x17f   : >> { %1014 = vst [vmem:[%s16590_s28 + $0x1610] sm:$0xff] %v1013_v34  ;;  %v1015_v35 = vld [vmem:[%s16594_s29 + $0x2c40] sm:$0xff] }
 0x180   : >> { %v1017_v36 = vld [vmem:[%s16594_s29 + $0x2c60] sm:$0xff]  ;;  %1016 = vst [vmem:[%s16590_s28 + $0x1620] sm:$0xff] %v1015_v35 }
 0x181   : >> { %v1019_v37 = vld [vmem:[%s16594_s29 + $0x2c80] sm:$0xff]  ;;  %1018 = vst [vmem:[%s16590_s28 + $0x1630] sm:$0xff] %v1017_v36 }
 0x182   : >> { %1020 = vst [vmem:[%s16590_s28 + $0x1640] sm:$0xff] %v1019_v37  ;;  %v1021_v38 = vld [vmem:[%s16594_s29 + $0x2ca0] sm:$0xff] }
 0x183   : >> { %v1023_v39 = vld [vmem:[%s16594_s29 + $0x2cc0] sm:$0xff]  ;;  %1022 = vst [vmem:[%s16590_s28 + $0x1650] sm:$0xff] %v1021_v38 }
 0x184   : >> { %v1025_v40 = vld [vmem:[%s16594_s29 + $0x2ce0] sm:$0xff]  ;;  %1024 = vst [vmem:[%s16590_s28 + $0x1660] sm:$0xff] %v1023_v39 }
 0x185   : >> { %1026 = vst [vmem:[%s16590_s28 + $0x1670] sm:$0xff] %v1025_v40  ;;  %v1027_v41 = vld [vmem:[%s16594_s29 + $0x2d00] sm:$0xff] }
 0x186   : >> { %v1029_v42 = vld [vmem:[%s16594_s29 + $0x2d20] sm:$0xff]  ;;  %1028 = vst [vmem:[%s16590_s28 + $0x1680] sm:$0xff] %v1027_v41 }
 0x187   : >> { %v1031_v43 = vld [vmem:[%s16594_s29 + $0x2d40] sm:$0xff]  ;;  %1030 = vst [vmem:[%s16590_s28 + $0x1690] sm:$0xff] %v1029_v42 }
 0x188   : >> { %1032 = vst [vmem:[%s16590_s28 + $0x16a0] sm:$0xff] %v1031_v43  ;;  %v1033_v44 = vld [vmem:[%s16594_s29 + $0x2d60] sm:$0xff] }
 0x189   : >> { %v1035_v45 = vld [vmem:[%s16594_s29 + $0x2d80] sm:$0xff]  ;;  %1034 = vst [vmem:[%s16590_s28 + $0x16b0] sm:$0xff] %v1033_v44 }
 0x18a   : >> { %v1037_v46 = vld [vmem:[%s16594_s29 + $0x2da0] sm:$0xff]  ;;  %1036 = vst [vmem:[%s16590_s28 + $0x16c0] sm:$0xff] %v1035_v45 }
 0x18b   : >> { %1038 = vst [vmem:[%s16590_s28 + $0x16d0] sm:$0xff] %v1037_v46  ;;  %v1039_v47 = vld [vmem:[%s16594_s29 + $0x2dc0] sm:$0xff] }
 0x18c   : >> { %v1041_v48 = vld [vmem:[%s16594_s29 + $0x2de0] sm:$0xff]  ;;  %1040 = vst [vmem:[%s16590_s28 + $0x16e0] sm:$0xff] %v1039_v47 }
 0x18d   : >> { %v1043_v49 = vld [vmem:[%s16594_s29 + $0x2e00] sm:$0xff]  ;;  %1042 = vst [vmem:[%s16590_s28 + $0x16f0] sm:$0xff] %v1041_v48 }
 0x18e   : >> { %1044 = vst [vmem:[%s16590_s28 + $0x1700] sm:$0xff] %v1043_v49  ;;  %v1045_v50 = vld [vmem:[%s16594_s29 + $0x2e20] sm:$0xff] }
 0x18f   : >> { %v1047_v51 = vld [vmem:[%s16594_s29 + $0x2e40] sm:$0xff]  ;;  %1046 = vst [vmem:[%s16590_s28 + $0x1710] sm:$0xff] %v1045_v50 }
 0x190   : >> { %v1049_v52 = vld [vmem:[%s16594_s29 + $0x2e60] sm:$0xff]  ;;  %1048 = vst [vmem:[%s16590_s28 + $0x1720] sm:$0xff] %v1047_v51 }
 0x191   : >> { %1050 = vst [vmem:[%s16590_s28 + $0x1730] sm:$0xff] %v1049_v52  ;;  %v1051_v53 = vld [vmem:[%s16594_s29 + $0x2e80] sm:$0xff] }
 0x192   : >> { %v1053_v54 = vld [vmem:[%s16594_s29 + $0x2ea0] sm:$0xff]  ;;  %1052 = vst [vmem:[%s16590_s28 + $0x1740] sm:$0xff] %v1051_v53 }
 0x193   : >> { %v1055_v55 = vld [vmem:[%s16594_s29 + $0x2ec0] sm:$0xff]  ;;  %1054 = vst [vmem:[%s16590_s28 + $0x1750] sm:$0xff] %v1053_v54 }
 0x194   : >> { %1056 = vst [vmem:[%s16590_s28 + $0x1760] sm:$0xff] %v1055_v55  ;;  %v1057_v56 = vld [vmem:[%s16594_s29 + $0x2ee0] sm:$0xff] }
 0x195   : >> { %v1059_v57 = vld [vmem:[%s16594_s29 + $0x2f00] sm:$0xff]  ;;  %1058 = vst [vmem:[%s16590_s28 + $0x1770] sm:$0xff] %v1057_v56 }
 0x196   : >> { %v1061_v58 = vld [vmem:[%s16594_s29 + $0x2f20] sm:$0xff]  ;;  %1060 = vst [vmem:[%s16590_s28 + $0x1780] sm:$0xff] %v1059_v57 }
 0x197   : >> { %1062 = vst [vmem:[%s16590_s28 + $0x1790] sm:$0xff] %v1061_v58  ;;  %v1063_v59 = vld [vmem:[%s16594_s29 + $0x2f40] sm:$0xff] }
 0x198   : >> { %v1065_v60 = vld [vmem:[%s16594_s29 + $0x2f60] sm:$0xff]  ;;  %1064 = vst [vmem:[%s16590_s28 + $0x17a0] sm:$0xff] %v1063_v59 }
 0x199   : >> { %v1067_v61 = vld [vmem:[%s16594_s29 + $0x2f80] sm:$0xff]  ;;  %1066 = vst [vmem:[%s16590_s28 + $0x17b0] sm:$0xff] %v1065_v60 }
 0x19a   : >> { %1068 = vst [vmem:[%s16590_s28 + $0x17c0] sm:$0xff] %v1067_v61  ;;  %v1069_v62 = vld [vmem:[%s16594_s29 + $0x2fa0] sm:$0xff] }
 0x19b   : >> { %v1071_v63 = vld [vmem:[%s16594_s29 + $0x2fc0] sm:$0xff]  ;;  %1070 = vst [vmem:[%s16590_s28 + $0x17d0] sm:$0xff] %v1069_v62 }
 0x19c   : >> { %v1073_v0 = vld [vmem:[%s16594_s29 + $0x2fe0] sm:$0xff]  ;;  %1072 = vst [vmem:[%s16590_s28 + $0x17e0] sm:$0xff] %v1071_v63 }
 0x19d   : >> { %1074 = vst [vmem:[%s16590_s28 + $0x17f0] sm:$0xff] %v1073_v0  ;;  %v1075_v1 = vld [vmem:[%s16594_s29 + $0x3000] sm:$0xff] }
 0x19e   : >> { %v1077_v2 = vld [vmem:[%s16594_s29 + $0x3020] sm:$0xff]  ;;  %1076 = vst [vmem:[%s16590_s28 + $0x1800] sm:$0xff] %v1075_v1 }
 0x19f   : >> { %v1079_v3 = vld [vmem:[%s16594_s29 + $0x3040] sm:$0xff]  ;;  %1078 = vst [vmem:[%s16590_s28 + $0x1810] sm:$0xff] %v1077_v2 }
 0x1a0   : >> { %1080 = vst [vmem:[%s16590_s28 + $0x1820] sm:$0xff] %v1079_v3  ;;  %v1081_v4 = vld [vmem:[%s16594_s29 + $0x3060] sm:$0xff] }
 0x1a1   : >> { %v1083_v5 = vld [vmem:[%s16594_s29 + $0x3080] sm:$0xff]  ;;  %1082 = vst [vmem:[%s16590_s28 + $0x1830] sm:$0xff] %v1081_v4 }
 0x1a2   : >> { %v1085_v6 = vld [vmem:[%s16594_s29 + $0x30a0] sm:$0xff]  ;;  %1084 = vst [vmem:[%s16590_s28 + $0x1840] sm:$0xff] %v1083_v5 }
 0x1a3   : >> { %1086 = vst [vmem:[%s16590_s28 + $0x1850] sm:$0xff] %v1085_v6  ;;  %v1087_v7 = vld [vmem:[%s16594_s29 + $0x30c0] sm:$0xff] }
 0x1a4   : >> { %v1089_v8 = vld [vmem:[%s16594_s29 + $0x30e0] sm:$0xff]  ;;  %1088 = vst [vmem:[%s16590_s28 + $0x1860] sm:$0xff] %v1087_v7 }
 0x1a5   : >> { %v1091_v9 = vld [vmem:[%s16594_s29 + $0x3100] sm:$0xff]  ;;  %1090 = vst [vmem:[%s16590_s28 + $0x1870] sm:$0xff] %v1089_v8 }
 0x1a6   : >> { %1092 = vst [vmem:[%s16590_s28 + $0x1880] sm:$0xff] %v1091_v9  ;;  %v1093_v10 = vld [vmem:[%s16594_s29 + $0x3120] sm:$0xff] }
 0x1a7   : >> { %v1095_v11 = vld [vmem:[%s16594_s29 + $0x3140] sm:$0xff]  ;;  %1094 = vst [vmem:[%s16590_s28 + $0x1890] sm:$0xff] %v1093_v10 }
 0x1a8   : >> { %v1097_v12 = vld [vmem:[%s16594_s29 + $0x3160] sm:$0xff]  ;;  %1096 = vst [vmem:[%s16590_s28 + $0x18a0] sm:$0xff] %v1095_v11 }
 0x1a9   : >> { %1098 = vst [vmem:[%s16590_s28 + $0x18b0] sm:$0xff] %v1097_v12  ;;  %v1099_v13 = vld [vmem:[%s16594_s29 + $0x3180] sm:$0xff] }
 0x1aa   : >> { %v1101_v14 = vld [vmem:[%s16594_s29 + $0x31a0] sm:$0xff]  ;;  %1100 = vst [vmem:[%s16590_s28 + $0x18c0] sm:$0xff] %v1099_v13 }
 0x1ab   : >> { %v1103_v15 = vld [vmem:[%s16594_s29 + $0x31c0] sm:$0xff]  ;;  %1102 = vst [vmem:[%s16590_s28 + $0x18d0] sm:$0xff] %v1101_v14 }
 0x1ac   : >> { %1104 = vst [vmem:[%s16590_s28 + $0x18e0] sm:$0xff] %v1103_v15  ;;  %v1105_v16 = vld [vmem:[%s16594_s29 + $0x31e0] sm:$0xff] }
 0x1ad   : >> { %v1107_v17 = vld [vmem:[%s16594_s29 + $0x3200] sm:$0xff]  ;;  %1106 = vst [vmem:[%s16590_s28 + $0x18f0] sm:$0xff] %v1105_v16 }
 0x1ae   : >> { %v1109_v18 = vld [vmem:[%s16594_s29 + $0x3220] sm:$0xff]  ;;  %1108 = vst [vmem:[%s16590_s28 + $0x1900] sm:$0xff] %v1107_v17 }
 0x1af   : >> { %1110 = vst [vmem:[%s16590_s28 + $0x1910] sm:$0xff] %v1109_v18  ;;  %v1111_v19 = vld [vmem:[%s16594_s29 + $0x3240] sm:$0xff] }
 0x1b0   : >> { %v1113_v20 = vld [vmem:[%s16594_s29 + $0x3260] sm:$0xff]  ;;  %1112 = vst [vmem:[%s16590_s28 + $0x1920] sm:$0xff] %v1111_v19 }
 0x1b1   : >> { %v1115_v21 = vld [vmem:[%s16594_s29 + $0x3280] sm:$0xff]  ;;  %1114 = vst [vmem:[%s16590_s28 + $0x1930] sm:$0xff] %v1113_v20 }
 0x1b2   : >> { %1116 = vst [vmem:[%s16590_s28 + $0x1940] sm:$0xff] %v1115_v21  ;;  %v1117_v22 = vld [vmem:[%s16594_s29 + $0x32a0] sm:$0xff] }
 0x1b3   : >> { %v1119_v23 = vld [vmem:[%s16594_s29 + $0x32c0] sm:$0xff]  ;;  %1118 = vst [vmem:[%s16590_s28 + $0x1950] sm:$0xff] %v1117_v22 }
 0x1b4   : >> { %v1121_v24 = vld [vmem:[%s16594_s29 + $0x32e0] sm:$0xff]  ;;  %1120 = vst [vmem:[%s16590_s28 + $0x1960] sm:$0xff] %v1119_v23 }
 0x1b5   : >> { %1122 = vst [vmem:[%s16590_s28 + $0x1970] sm:$0xff] %v1121_v24  ;;  %v1123_v25 = vld [vmem:[%s16594_s29 + $0x3300] sm:$0xff] }
 0x1b6   : >> { %v1125_v26 = vld [vmem:[%s16594_s29 + $0x3320] sm:$0xff]  ;;  %1124 = vst [vmem:[%s16590_s28 + $0x1980] sm:$0xff] %v1123_v25 }
 0x1b7   : >> { %v1127_v27 = vld [vmem:[%s16594_s29 + $0x3340] sm:$0xff]  ;;  %1126 = vst [vmem:[%s16590_s28 + $0x1990] sm:$0xff] %v1125_v26 }
 0x1b8   : >> { %1128 = vst [vmem:[%s16590_s28 + $0x19a0] sm:$0xff] %v1127_v27  ;;  %v1129_v28 = vld [vmem:[%s16594_s29 + $0x3360] sm:$0xff] }
 0x1b9   : >> { %v1131_v29 = vld [vmem:[%s16594_s29 + $0x3380] sm:$0xff]  ;;  %1130 = vst [vmem:[%s16590_s28 + $0x19b0] sm:$0xff] %v1129_v28 }
 0x1ba   : >> { %v1133_v30 = vld [vmem:[%s16594_s29 + $0x33a0] sm:$0xff]  ;;  %1132 = vst [vmem:[%s16590_s28 + $0x19c0] sm:$0xff] %v1131_v29 }
 0x1bb   : >> { %1134 = vst [vmem:[%s16590_s28 + $0x19d0] sm:$0xff] %v1133_v30  ;;  %v1135_v31 = vld [vmem:[%s16594_s29 + $0x33c0] sm:$0xff] }
 0x1bc   : >> { %v1137_v32 = vld [vmem:[%s16594_s29 + $0x33e0] sm:$0xff]  ;;  %1136 = vst [vmem:[%s16590_s28 + $0x19e0] sm:$0xff] %v1135_v31 }
 0x1bd   : >> { %v1139_v33 = vld [vmem:[%s16594_s29 + $0x3400] sm:$0xff]  ;;  %1138 = vst [vmem:[%s16590_s28 + $0x19f0] sm:$0xff] %v1137_v32 }
 0x1be   : >> { %1140 = vst [vmem:[%s16590_s28 + $0x1a00] sm:$0xff] %v1139_v33  ;;  %v1141_v34 = vld [vmem:[%s16594_s29 + $0x3420] sm:$0xff] }
 0x1bf   : >> { %v1143_v35 = vld [vmem:[%s16594_s29 + $0x3440] sm:$0xff]  ;;  %1142 = vst [vmem:[%s16590_s28 + $0x1a10] sm:$0xff] %v1141_v34 }
 0x1c0   : >> { %v1145_v36 = vld [vmem:[%s16594_s29 + $0x3460] sm:$0xff]  ;;  %1144 = vst [vmem:[%s16590_s28 + $0x1a20] sm:$0xff] %v1143_v35 }
 0x1c1   : >> { %1146 = vst [vmem:[%s16590_s28 + $0x1a30] sm:$0xff] %v1145_v36  ;;  %v1147_v37 = vld [vmem:[%s16594_s29 + $0x3480] sm:$0xff] }
 0x1c2   : >> { %v1149_v38 = vld [vmem:[%s16594_s29 + $0x34a0] sm:$0xff]  ;;  %1148 = vst [vmem:[%s16590_s28 + $0x1a40] sm:$0xff] %v1147_v37 }
 0x1c3   : >> { %v1151_v39 = vld [vmem:[%s16594_s29 + $0x34c0] sm:$0xff]  ;;  %1150 = vst [vmem:[%s16590_s28 + $0x1a50] sm:$0xff] %v1149_v38 }
 0x1c4   : >> { %1152 = vst [vmem:[%s16590_s28 + $0x1a60] sm:$0xff] %v1151_v39  ;;  %v1153_v40 = vld [vmem:[%s16594_s29 + $0x34e0] sm:$0xff] }
 0x1c5   : >> { %v1155_v41 = vld [vmem:[%s16594_s29 + $0x3500] sm:$0xff]  ;;  %1154 = vst [vmem:[%s16590_s28 + $0x1a70] sm:$0xff] %v1153_v40 }
 0x1c6   : >> { %v1157_v42 = vld [vmem:[%s16594_s29 + $0x3520] sm:$0xff]  ;;  %1156 = vst [vmem:[%s16590_s28 + $0x1a80] sm:$0xff] %v1155_v41 }
 0x1c7   : >> { %1158 = vst [vmem:[%s16590_s28 + $0x1a90] sm:$0xff] %v1157_v42  ;;  %v1159_v43 = vld [vmem:[%s16594_s29 + $0x3540] sm:$0xff] }
 0x1c8   : >> { %v1161_v44 = vld [vmem:[%s16594_s29 + $0x3560] sm:$0xff]  ;;  %1160 = vst [vmem:[%s16590_s28 + $0x1aa0] sm:$0xff] %v1159_v43 }
 0x1c9   : >> { %v1163_v45 = vld [vmem:[%s16594_s29 + $0x3580] sm:$0xff]  ;;  %1162 = vst [vmem:[%s16590_s28 + $0x1ab0] sm:$0xff] %v1161_v44 }
 0x1ca   : >> { %1164 = vst [vmem:[%s16590_s28 + $0x1ac0] sm:$0xff] %v1163_v45  ;;  %v1165_v46 = vld [vmem:[%s16594_s29 + $0x35a0] sm:$0xff] }
 0x1cb   : >> { %v1167_v47 = vld [vmem:[%s16594_s29 + $0x35c0] sm:$0xff]  ;;  %1166 = vst [vmem:[%s16590_s28 + $0x1ad0] sm:$0xff] %v1165_v46 }
 0x1cc   : >> { %v1169_v48 = vld [vmem:[%s16594_s29 + $0x35e0] sm:$0xff]  ;;  %1168 = vst [vmem:[%s16590_s28 + $0x1ae0] sm:$0xff] %v1167_v47 }
 0x1cd   : >> { %1170 = vst [vmem:[%s16590_s28 + $0x1af0] sm:$0xff] %v1169_v48  ;;  %v1171_v49 = vld [vmem:[%s16594_s29 + $0x3600] sm:$0xff] }
 0x1ce   : >> { %v1173_v50 = vld [vmem:[%s16594_s29 + $0x3620] sm:$0xff]  ;;  %1172 = vst [vmem:[%s16590_s28 + $0x1b00] sm:$0xff] %v1171_v49 }
 0x1cf   : >> { %v1175_v51 = vld [vmem:[%s16594_s29 + $0x3640] sm:$0xff]  ;;  %1174 = vst [vmem:[%s16590_s28 + $0x1b10] sm:$0xff] %v1173_v50 }
 0x1d0   : >> { %1176 = vst [vmem:[%s16590_s28 + $0x1b20] sm:$0xff] %v1175_v51  ;;  %v1177_v52 = vld [vmem:[%s16594_s29 + $0x3660] sm:$0xff] }
 0x1d1   : >> { %v1179_v53 = vld [vmem:[%s16594_s29 + $0x3680] sm:$0xff]  ;;  %1178 = vst [vmem:[%s16590_s28 + $0x1b30] sm:$0xff] %v1177_v52 }
 0x1d2   : >> { %v1181_v54 = vld [vmem:[%s16594_s29 + $0x36a0] sm:$0xff]  ;;  %1180 = vst [vmem:[%s16590_s28 + $0x1b40] sm:$0xff] %v1179_v53 }
 0x1d3   : >> { %1182 = vst [vmem:[%s16590_s28 + $0x1b50] sm:$0xff] %v1181_v54  ;;  %v1183_v55 = vld [vmem:[%s16594_s29 + $0x36c0] sm:$0xff] }
 0x1d4   : >> { %v1185_v56 = vld [vmem:[%s16594_s29 + $0x36e0] sm:$0xff]  ;;  %1184 = vst [vmem:[%s16590_s28 + $0x1b60] sm:$0xff] %v1183_v55 }
 0x1d5   : >> { %v1187_v57 = vld [vmem:[%s16594_s29 + $0x3700] sm:$0xff]  ;;  %1186 = vst [vmem:[%s16590_s28 + $0x1b70] sm:$0xff] %v1185_v56 }
 0x1d6   : >> { %1188 = vst [vmem:[%s16590_s28 + $0x1b80] sm:$0xff] %v1187_v57  ;;  %v1189_v58 = vld [vmem:[%s16594_s29 + $0x3720] sm:$0xff] }
 0x1d7   : >> { %v1191_v59 = vld [vmem:[%s16594_s29 + $0x3740] sm:$0xff]  ;;  %1190 = vst [vmem:[%s16590_s28 + $0x1b90] sm:$0xff] %v1189_v58 }
 0x1d8   : >> { %v1193_v60 = vld [vmem:[%s16594_s29 + $0x3760] sm:$0xff]  ;;  %1192 = vst [vmem:[%s16590_s28 + $0x1ba0] sm:$0xff] %v1191_v59 }
 0x1d9   : >> { %1194 = vst [vmem:[%s16590_s28 + $0x1bb0] sm:$0xff] %v1193_v60  ;;  %v1195_v61 = vld [vmem:[%s16594_s29 + $0x3780] sm:$0xff] }
 0x1da   : >> { %v1197_v62 = vld [vmem:[%s16594_s29 + $0x37a0] sm:$0xff]  ;;  %1196 = vst [vmem:[%s16590_s28 + $0x1bc0] sm:$0xff] %v1195_v61 }
 0x1db   : >> { %v1199_v63 = vld [vmem:[%s16594_s29 + $0x37c0] sm:$0xff]  ;;  %1198 = vst [vmem:[%s16590_s28 + $0x1bd0] sm:$0xff] %v1197_v62 }
 0x1dc   : >> { %1200 = vst [vmem:[%s16590_s28 + $0x1be0] sm:$0xff] %v1199_v63  ;;  %v1201_v0 = vld [vmem:[%s16594_s29 + $0x37e0] sm:$0xff] }
 0x1dd   : >> { %v1203_v1 = vld [vmem:[%s16594_s29 + $0x3800] sm:$0xff]  ;;  %1202 = vst [vmem:[%s16590_s28 + $0x1bf0] sm:$0xff] %v1201_v0 }
 0x1de   : >> { %v1205_v2 = vld [vmem:[%s16594_s29 + $0x3820] sm:$0xff]  ;;  %1204 = vst [vmem:[%s16590_s28 + $0x1c00] sm:$0xff] %v1203_v1 }
 0x1df   : >> { %1206 = vst [vmem:[%s16590_s28 + $0x1c10] sm:$0xff] %v1205_v2  ;;  %v1207_v3 = vld [vmem:[%s16594_s29 + $0x3840] sm:$0xff] }
 0x1e0   : >> { %v1209_v4 = vld [vmem:[%s16594_s29 + $0x3860] sm:$0xff]  ;;  %1208 = vst [vmem:[%s16590_s28 + $0x1c20] sm:$0xff] %v1207_v3 }
 0x1e1   : >> { %v1211_v5 = vld [vmem:[%s16594_s29 + $0x3880] sm:$0xff]  ;;  %1210 = vst [vmem:[%s16590_s28 + $0x1c30] sm:$0xff] %v1209_v4 }
 0x1e2   : >> { %1212 = vst [vmem:[%s16590_s28 + $0x1c40] sm:$0xff] %v1211_v5  ;;  %v1213_v6 = vld [vmem:[%s16594_s29 + $0x38a0] sm:$0xff] }
 0x1e3   : >> { %v1215_v7 = vld [vmem:[%s16594_s29 + $0x38c0] sm:$0xff]  ;;  %1214 = vst [vmem:[%s16590_s28 + $0x1c50] sm:$0xff] %v1213_v6 }
 0x1e4   : >> { %v1217_v8 = vld [vmem:[%s16594_s29 + $0x38e0] sm:$0xff]  ;;  %1216 = vst [vmem:[%s16590_s28 + $0x1c60] sm:$0xff] %v1215_v7 }
 0x1e5   : >> { %1218 = vst [vmem:[%s16590_s28 + $0x1c70] sm:$0xff] %v1217_v8  ;;  %v1219_v9 = vld [vmem:[%s16594_s29 + $0x3900] sm:$0xff] }
 0x1e6   : >> { %v1221_v10 = vld [vmem:[%s16594_s29 + $0x3920] sm:$0xff]  ;;  %1220 = vst [vmem:[%s16590_s28 + $0x1c80] sm:$0xff] %v1219_v9 }
 0x1e7   : >> { %v1223_v11 = vld [vmem:[%s16594_s29 + $0x3940] sm:$0xff]  ;;  %1222 = vst [vmem:[%s16590_s28 + $0x1c90] sm:$0xff] %v1221_v10 }
 0x1e8   : >> { %1224 = vst [vmem:[%s16590_s28 + $0x1ca0] sm:$0xff] %v1223_v11  ;;  %v1225_v12 = vld [vmem:[%s16594_s29 + $0x3960] sm:$0xff] }
 0x1e9   : >> { %v1227_v13 = vld [vmem:[%s16594_s29 + $0x3980] sm:$0xff]  ;;  %1226 = vst [vmem:[%s16590_s28 + $0x1cb0] sm:$0xff] %v1225_v12 }
 0x1ea   : >> { %v1229_v14 = vld [vmem:[%s16594_s29 + $0x39a0] sm:$0xff]  ;;  %1228 = vst [vmem:[%s16590_s28 + $0x1cc0] sm:$0xff] %v1227_v13 }
 0x1eb   : >> { %1230 = vst [vmem:[%s16590_s28 + $0x1cd0] sm:$0xff] %v1229_v14  ;;  %v1231_v15 = vld [vmem:[%s16594_s29 + $0x39c0] sm:$0xff] }
 0x1ec   : >> { %v1233_v16 = vld [vmem:[%s16594_s29 + $0x39e0] sm:$0xff]  ;;  %1232 = vst [vmem:[%s16590_s28 + $0x1ce0] sm:$0xff] %v1231_v15 }
 0x1ed   : >> { %v1235_v17 = vld [vmem:[%s16594_s29 + $0x3a00] sm:$0xff]  ;;  %1234 = vst [vmem:[%s16590_s28 + $0x1cf0] sm:$0xff] %v1233_v16 }
 0x1ee   : >> { %1236 = vst [vmem:[%s16590_s28 + $0x1d00] sm:$0xff] %v1235_v17  ;;  %v1237_v18 = vld [vmem:[%s16594_s29 + $0x3a20] sm:$0xff] }
 0x1ef   : >> { %v1239_v19 = vld [vmem:[%s16594_s29 + $0x3a40] sm:$0xff]  ;;  %1238 = vst [vmem:[%s16590_s28 + $0x1d10] sm:$0xff] %v1237_v18 }
 0x1f0   : >> { %v1241_v20 = vld [vmem:[%s16594_s29 + $0x3a60] sm:$0xff]  ;;  %1240 = vst [vmem:[%s16590_s28 + $0x1d20] sm:$0xff] %v1239_v19 }
 0x1f1   : >> { %1242 = vst [vmem:[%s16590_s28 + $0x1d30] sm:$0xff] %v1241_v20  ;;  %v1243_v21 = vld [vmem:[%s16594_s29 + $0x3a80] sm:$0xff] }
 0x1f2   : >> { %v1245_v22 = vld [vmem:[%s16594_s29 + $0x3aa0] sm:$0xff]  ;;  %1244 = vst [vmem:[%s16590_s28 + $0x1d40] sm:$0xff] %v1243_v21 }
 0x1f3   : >> { %v1247_v23 = vld [vmem:[%s16594_s29 + $0x3ac0] sm:$0xff]  ;;  %1246 = vst [vmem:[%s16590_s28 + $0x1d50] sm:$0xff] %v1245_v22 }
 0x1f4   : >> { %1248 = vst [vmem:[%s16590_s28 + $0x1d60] sm:$0xff] %v1247_v23  ;;  %v1249_v24 = vld [vmem:[%s16594_s29 + $0x3ae0] sm:$0xff] }
 0x1f5   : >> { %v1251_v25 = vld [vmem:[%s16594_s29 + $0x3b00] sm:$0xff]  ;;  %1250 = vst [vmem:[%s16590_s28 + $0x1d70] sm:$0xff] %v1249_v24 }
 0x1f6   : >> { %v1253_v26 = vld [vmem:[%s16594_s29 + $0x3b20] sm:$0xff]  ;;  %1252 = vst [vmem:[%s16590_s28 + $0x1d80] sm:$0xff] %v1251_v25 }
 0x1f7   : >> { %1254 = vst [vmem:[%s16590_s28 + $0x1d90] sm:$0xff] %v1253_v26  ;;  %v1255_v27 = vld [vmem:[%s16594_s29 + $0x3b40] sm:$0xff] }
 0x1f8   : >> { %v1257_v28 = vld [vmem:[%s16594_s29 + $0x3b60] sm:$0xff]  ;;  %1256 = vst [vmem:[%s16590_s28 + $0x1da0] sm:$0xff] %v1255_v27 }
 0x1f9   : >> { %v1259_v29 = vld [vmem:[%s16594_s29 + $0x3b80] sm:$0xff]  ;;  %1258 = vst [vmem:[%s16590_s28 + $0x1db0] sm:$0xff] %v1257_v28 }
 0x1fa   : >> { %1260 = vst [vmem:[%s16590_s28 + $0x1dc0] sm:$0xff] %v1259_v29  ;;  %v1261_v30 = vld [vmem:[%s16594_s29 + $0x3ba0] sm:$0xff] }
 0x1fb   : >> { %v1263_v31 = vld [vmem:[%s16594_s29 + $0x3bc0] sm:$0xff]  ;;  %1262 = vst [vmem:[%s16590_s28 + $0x1dd0] sm:$0xff] %v1261_v30 }
 0x1fc   : >> { %v1265_v32 = vld [vmem:[%s16594_s29 + $0x3be0] sm:$0xff]  ;;  %1264 = vst [vmem:[%s16590_s28 + $0x1de0] sm:$0xff] %v1263_v31 }
 0x1fd   : >> { %1266 = vst [vmem:[%s16590_s28 + $0x1df0] sm:$0xff] %v1265_v32  ;;  %v1267_v33 = vld [vmem:[%s16594_s29 + $0x3c00] sm:$0xff] }
 0x1fe   : >> { %v1269_v34 = vld [vmem:[%s16594_s29 + $0x3c20] sm:$0xff]  ;;  %1268 = vst [vmem:[%s16590_s28 + $0x1e00] sm:$0xff] %v1267_v33 }
 0x1ff   : >> { %v1271_v35 = vld [vmem:[%s16594_s29 + $0x3c40] sm:$0xff]  ;;  %1270 = vst [vmem:[%s16590_s28 + $0x1e10] sm:$0xff] %v1269_v34 }
 0x200   : >> { %1272 = vst [vmem:[%s16590_s28 + $0x1e20] sm:$0xff] %v1271_v35  ;;  %v1273_v36 = vld [vmem:[%s16594_s29 + $0x3c60] sm:$0xff] }
 0x201   : >> { %v1275_v37 = vld [vmem:[%s16594_s29 + $0x3c80] sm:$0xff]  ;;  %1274 = vst [vmem:[%s16590_s28 + $0x1e30] sm:$0xff] %v1273_v36 }
 0x202   : >> { %v1277_v38 = vld [vmem:[%s16594_s29 + $0x3ca0] sm:$0xff]  ;;  %1276 = vst [vmem:[%s16590_s28 + $0x1e40] sm:$0xff] %v1275_v37 }
 0x203   : >> { %1278 = vst [vmem:[%s16590_s28 + $0x1e50] sm:$0xff] %v1277_v38  ;;  %v1279_v39 = vld [vmem:[%s16594_s29 + $0x3cc0] sm:$0xff] }
 0x204   : >> { %v1281_v40 = vld [vmem:[%s16594_s29 + $0x3ce0] sm:$0xff]  ;;  %1280 = vst [vmem:[%s16590_s28 + $0x1e60] sm:$0xff] %v1279_v39 }
 0x205   : >> { %v1283_v41 = vld [vmem:[%s16594_s29 + $0x3d00] sm:$0xff]  ;;  %1282 = vst [vmem:[%s16590_s28 + $0x1e70] sm:$0xff] %v1281_v40 }
 0x206   : >> { %1284 = vst [vmem:[%s16590_s28 + $0x1e80] sm:$0xff] %v1283_v41  ;;  %v1285_v42 = vld [vmem:[%s16594_s29 + $0x3d20] sm:$0xff] }
 0x207   : >> { %v1287_v43 = vld [vmem:[%s16594_s29 + $0x3d40] sm:$0xff]  ;;  %1286 = vst [vmem:[%s16590_s28 + $0x1e90] sm:$0xff] %v1285_v42 }
 0x208   : >> { %v1289_v44 = vld [vmem:[%s16594_s29 + $0x3d60] sm:$0xff]  ;;  %1288 = vst [vmem:[%s16590_s28 + $0x1ea0] sm:$0xff] %v1287_v43 }
 0x209   : >> { %1290 = vst [vmem:[%s16590_s28 + $0x1eb0] sm:$0xff] %v1289_v44  ;;  %v1291_v45 = vld [vmem:[%s16594_s29 + $0x3d80] sm:$0xff] }
 0x20a   : >> { %v1293_v46 = vld [vmem:[%s16594_s29 + $0x3da0] sm:$0xff]  ;;  %1292 = vst [vmem:[%s16590_s28 + $0x1ec0] sm:$0xff] %v1291_v45 }
 0x20b   : >> { %v1295_v47 = vld [vmem:[%s16594_s29 + $0x3dc0] sm:$0xff]  ;;  %1294 = vst [vmem:[%s16590_s28 + $0x1ed0] sm:$0xff] %v1293_v46 }
 0x20c   : >> { %1296 = vst [vmem:[%s16590_s28 + $0x1ee0] sm:$0xff] %v1295_v47  ;;  %v1297_v48 = vld [vmem:[%s16594_s29 + $0x3de0] sm:$0xff] }
 0x20d   : >> { %v1299_v49 = vld [vmem:[%s16594_s29 + $0x3e00] sm:$0xff]  ;;  %1298 = vst [vmem:[%s16590_s28 + $0x1ef0] sm:$0xff] %v1297_v48 }
 0x20e   : >> { %v1301_v50 = vld [vmem:[%s16594_s29 + $0x3e20] sm:$0xff]  ;;  %1300 = vst [vmem:[%s16590_s28 + $0x1f00] sm:$0xff] %v1299_v49 }
 0x20f   : >> { %1302 = vst [vmem:[%s16590_s28 + $0x1f10] sm:$0xff] %v1301_v50  ;;  %v1303_v51 = vld [vmem:[%s16594_s29 + $0x3e40] sm:$0xff] }
 0x210   : >> { %v1305_v52 = vld [vmem:[%s16594_s29 + $0x3e60] sm:$0xff]  ;;  %1304 = vst [vmem:[%s16590_s28 + $0x1f20] sm:$0xff] %v1303_v51 }
 0x211   : >> { %v1307_v53 = vld [vmem:[%s16594_s29 + $0x3e80] sm:$0xff]  ;;  %1306 = vst [vmem:[%s16590_s28 + $0x1f30] sm:$0xff] %v1305_v52 }
 0x212   : >> { %1308 = vst [vmem:[%s16590_s28 + $0x1f40] sm:$0xff] %v1307_v53  ;;  %v1309_v54 = vld [vmem:[%s16594_s29 + $0x3ea0] sm:$0xff] }
 0x213   : >> { %v1311_v55 = vld [vmem:[%s16594_s29 + $0x3ec0] sm:$0xff]  ;;  %1310 = vst [vmem:[%s16590_s28 + $0x1f50] sm:$0xff] %v1309_v54 }
 0x214   : >> { %v1313_v56 = vld [vmem:[%s16594_s29 + $0x3ee0] sm:$0xff]  ;;  %1312 = vst [vmem:[%s16590_s28 + $0x1f60] sm:$0xff] %v1311_v55 }
 0x215   : >> { %1314 = vst [vmem:[%s16590_s28 + $0x1f70] sm:$0xff] %v1313_v56  ;;  %v1315_v57 = vld [vmem:[%s16594_s29 + $0x3f00] sm:$0xff] }
 0x216   : >> { %v1317_v58 = vld [vmem:[%s16594_s29 + $0x3f20] sm:$0xff]  ;;  %1316 = vst [vmem:[%s16590_s28 + $0x1f80] sm:$0xff] %v1315_v57 }
 0x217   : >> { %v1319_v59 = vld [vmem:[%s16594_s29 + $0x3f40] sm:$0xff]  ;;  %1318 = vst [vmem:[%s16590_s28 + $0x1f90] sm:$0xff] %v1317_v58 }
 0x218   : >> { %1320 = vst [vmem:[%s16590_s28 + $0x1fa0] sm:$0xff] %v1319_v59  ;;  %v1321_v60 = vld [vmem:[%s16594_s29 + $0x3f60] sm:$0xff] }
 0x219   : >> { %v1323_v61 = vld [vmem:[%s16594_s29 + $0x3f80] sm:$0xff]  ;;  %1322 = vst [vmem:[%s16590_s28 + $0x1fb0] sm:$0xff] %v1321_v60  ;;  %302 = sbr.rel (!%p300_p9) target bundleno = 29 (0x1d), region = 150 }
 0x21a   : >> { %v1325_v62 = vld [vmem:[%s16594_s29 + $0x3fa0] sm:$0xff]  ;;  %1324 = vst [vmem:[%s16590_s28 + $0x1fc0] sm:$0xff] %v1323_v61 }
 0x21b   : >> { %1326 = vst [vmem:[%s16590_s28 + $0x1fd0] sm:$0xff] %v1325_v62  ;;  %v1327_v63 = vld [vmem:[%s16594_s29 + $0x3fc0] sm:$0xff] }
 0x21c   : >> { %v1329_v0 = vld [vmem:[%s16594_s29 + $0x3fe0] sm:$0xff]  ;;  %1328 = vst [vmem:[%s16590_s28 + $0x1fe0] sm:$0xff] %v1327_v63  ;;  %s19748_s29 = smov %s17007_s17 }
 0x21d   : >> { %1330 = vst [vmem:[%s16590_s28 + $0x1ff0] sm:$0xff] %v1329_v0  ;;  %s19747_s28 = smov %s17011_s21 }
 0x21e PF: > { %s3430_s22 = sand.u32 1, %s16582_s13   ;;  %s14498_s24 = sshll.u32 %s16586_s14, 14 }
 0x21f   : > { %s13257_s25 = sshll.u32 %s3430_s22, 10  ;;  %s17793_s18 = scalar_lea.hbm %s19735_s5, %s14498_s24 }
 0x220   : > { %s3434_s17 = scalar_lea.vmem [#allocation6], %s13257_s25  ;;  %s17797_s10 = scalar_lea.sflag [#allocation7], %s3430_s22 }
 0x221   : > { %s3442_s11 = sshll.u32 %s3434_s17, 4  ;;  %s16510_s23 = scalar_lea.hbm %s17793_s18, 16384  ;;  %s17795_s11 = int_to_ptr.vmem [resolvable:$true] %s3442_s11 }
 0x222   : > { %p16511_p10 = scmp.ne.s32.totalorder %s17793_s18, %s16510_s23  ;;  %s16514_s3 = scalar_lea.hbm %s19735_s5, 32768 }
 0x223   : > { %p16515_p13 = scmp.lt.s32.totalorder %s17793_s18, %s19735_s5  ;;  %p16516_p0 = scmp.lt.s32.totalorder %s16514_s3, %s16510_s23 }
 0x224   : > { %p16512_p11 = pnand %p16511_p10, %p16696_p4 }
 0x225   : > { %p16517_p1 = por %p16516_p0, %p16515_p13 }
 0x226   : > { %p16513_p12 = pneg %p16512_p11 }
 0x228   : > { %p16518_p2 = pnand %p16517_p1, %p16513_p12 }
 0x22a   : > { %16521 = shalt.err (!%p16518_p2)
}
 0x22b   : > { %s16522_s30 = scalar_lea.vmem %s17795_s11, 16384  ;;  %s16604_s21 = smov [#allocation6]  }
 0x22c   : > { %p16523_p3 = scmp.ne.s32.totalorder %s17795_s11, %s16522_s30  ;;  %s16526_s22 = sshll.u32 %s16604_s21, 4  ;;  %s16527_s22 = int_to_ptr.vmem [resolvable:$false] %s16526_s22 }
 0x22d   : > { %s16528_s24 = scalar_lea.vmem %s16527_s22, 32768  ;;  %p16529_p8 = scmp.lt.s32.totalorder %s17795_s11, %s16527_s22 }
 0x22e   : > { %p16524_p5 = pnand %p16523_p3, %p16696_p4  ;;  %p16530_p9 = scmp.lt.s32.totalorder %s16528_s24, %s16522_s30 }
 0x230   : > { %p16525_p7 = pneg %p16524_p5  ;;  %p16531_p10 = por %p16530_p9, %p16529_p8 }
 0x232   : > { %p16532_p11 = pnand %p16531_p10, %p16525_p7 }
 0x234   : > { %16535 = shalt.err (!%p16532_p11)
}
 0x235   : > { %s16605_s25 = smov 256   ;;  %s16606_s16 = smov 16  }
 0x236   : > { %14635 = dma.hbm_to_vmem [thread:$0]  (%p16696_p4), %s17793_s18, 16384, %s17795_s11, %s17797_s10, %s16605_s25, %s16605_s25, %s16606_s16  }
 0x237 PF: > { %p13261_p12 = scmp.ge.s32.totalorder %s16586_s14, 1  ;;  %p3450_p13 = scmp.lt.s32.totalorder %s16586_s14, 3 }
 0x239   : > { %p3451_p0 = pnand %p13261_p12, %p3450_p13 }
 0x23a   : > { %s3457_s17 = sand.u32 (!%p3451_p0), 1, %s16578_s12  }
 0x23b   : > { %3454 = sbr.rel (%p3451_p0) target bundleno = 2685 (0xa7d), region = 89  ;;  %s13262_s23 = sshll.u32 (!%p3451_p0), %s3457_s17, 13 }
 0x23c   : > { %s13263_s26 = sshll.u32 (!%p3451_p0), %s3457_s17, 10  ;;  %s17823_s27 = scalar_lea.vmem (!%p3451_p0), [#allocation5], %s13262_s23 }
 0x23d   : > { %s3464_s3 = scalar_lea.sflag (!%p3451_p0), [#allocation7], %s3457_s17  ;;  %s17825_s28 = scalar_lea.vmem (!%p3451_p0), [#allocation6], %s13263_s26 }
 0x240   : > { %16569 = dma.done.wait (%p16701_p6), %s3464_s3, 16384  }
 0x241   : > { %16571 = vsyncadd (%p16701_p6), %s3464_s3, 4294950912  ;;  %s13264_s18 = sshll.u32 %s16681_s8, 2  ;;  %p13265_p1 = scmp.ne.s32.totalorder %s16681_s8, 0 }
 0x242   : > { %p3507_p4 = scmp.lt.s32.totalorder %s13264_s18, 7  ;;  %s16607_s30 = smov (!%p13265_p1), 64  }
 0x243   : > { %3516 = sbr.rel (%p13265_p1) target bundleno = 1003 (0x3eb), region = 101 }
 0x244   : > { %s19758_s18 = smov (!%p3507_p4, %s13264_s18), 7 }
 0x245   : > { %s17835_s11 = scalar_lea.vmem %s19734_s4, %s19758_s18 }
 0x248   : > { %v14705_v1 = vld [vmem:[%s19731_s1 + $0x38] sm:$0xff]   ;;  %v14706_v2 = vld [vmem:[%s19731_s1 + $0x30] sm:$0xff]   ;;  %v14707_v3 = vld [vmem:[%s19731_s1 + $0x28] sm:$0xff]   ;;  %vm4233_vm0 = vcmask 523264  }
 0x249   : > { %14539 = vmatprep.subr.bf16.mxu0 %v14705_v1  ;;  %14619 = vmatprep.subr.bf16.mxu1 %v14705_v1  ;;  %v14708_v4 = vld [vmem:[%s19731_s1 + $0x20] sm:$0xff]   ;;  %v14709_v7 = vld [vmem:[%s19731_s1 + $0x18] sm:$0xff]   ;;  %v14710_v8 = vld [vmem:[%s19731_s1 + $0x10] sm:$0xff]  }
 0x24a   : > { %14540 = vmatpush3.bf16.msra.mxu0 %v14705_v1  ;;  %14627 = vmatpush3.bf16.msra.mxu1 %v14705_v1  ;;  %v14713_v5 = vld [vmem:[%s19730_s0] sm:$0xff]   ;;  %v14711_v9 = vld [vmem:[%s19731_s1 + $0x8] sm:$0xff]   ;;  %v14717_v13 = vld [vmem:[%s19730_s0 + $0x10] sm:$0xff]  }
 0x24b   : > { %14541 = vmatprep.subr.bf16.mxu0 %v14706_v2  ;;  %14620 = vmatprep.subr.bf16.mxu1 %v14706_v2  ;;  %v14714_v6 = vld [vmem:[%s19730_s0 + $0x80] sm:$0xff]   ;;  %v14715_v11 = vld [vmem:[%s19730_s0 + $0x8] sm:$0xff]   ;;  %v14718_v14 = vld [vmem:[%s19730_s0 + $0x90] sm:$0xff]  }
 0x24c   : > { %14555 = vmatprep.mubr.bf16.mxu0 %v14713_v5  ;;  %14587 = vmatprep.mubr.bf16.mxu1 %v14714_v6  ;;  %v14712_v10 = vld [vmem:[%s19731_s1] sm:$0xff]   ;;  %v14716_v12 = vld [vmem:[%s19730_s0 + $0x88] sm:$0xff]   ;;  %v14719_v15 = vld [vmem:[%s19730_s0 + $0x18] sm:$0xff]  }
 0x24d   : > { %v14720_v16 = vld [vmem:[%s19730_s0 + $0x98] sm:$0xff]   ;;  %v14721_v17 = vld [vmem:[%s19730_s0 + $0x20] sm:$0xff]   ;;  %v14723_v19 = vld [vmem:[%s19730_s0 + $0x28] sm:$0xff]  }
 0x24e   : > { %14542 = vmatpush3.bf16.msra.mxu0 %v14706_v2  ;;  %14628 = vmatpush3.bf16.msra.mxu1 %v14706_v2  ;;  %v14722_v18 = vld [vmem:[%s19730_s0 + $0xa0] sm:$0xff]   ;;  %v14724_v20 = vld [vmem:[%s19730_s0 + $0xa8] sm:$0xff]   ;;  %v14725_v21 = vld [vmem:[%s19730_s0 + $0x30] sm:$0xff]  }
 0x24f   : > { %14543 = vmatprep.subr.bf16.mxu0 %v14707_v3  ;;  %14621 = vmatprep.subr.bf16.mxu1 %v14707_v3  ;;  %v14726_v22 = vld [vmem:[%s19730_s0 + $0xb0] sm:$0xff]   ;;  %v14727_v23 = vld [vmem:[%s19730_s0 + $0x38] sm:$0xff]   ;;  %v14729_v25 = vld [vmem:[%s19730_s0 + $0x40] sm:$0xff]  }
 0x250   : > { %v14728_v24 = vld [vmem:[%s19730_s0 + $0xb8] sm:$0xff]   ;;  %v14730_v26 = vld [vmem:[%s19730_s0 + $0xc0] sm:$0xff]   ;;  %v14731_v27 = vld [vmem:[%s19730_s0 + $0x48] sm:$0xff]  }
 0x251   : > { %v14732_v28 = vld [vmem:[%s19730_s0 + $0xc8] sm:$0xff]   ;;  %v14733_v29 = vld [vmem:[%s19730_s0 + $0x50] sm:$0xff]   ;;  %v14735_v31 = vld [vmem:[%s19730_s0 + $0x58] sm:$0xff]  }
 0x252   : > { %14544 = vmatpush3.bf16.msra.mxu0 %v14707_v3  ;;  %14629 = vmatpush3.bf16.msra.mxu1 %v14707_v3  ;;  %v14734_v30 = vld [vmem:[%s19730_s0 + $0xd0] sm:$0xff]   ;;  %v14736_v32 = vld [vmem:[%s19730_s0 + $0xd8] sm:$0xff]   ;;  %v14737_v33 = vld [vmem:[%s19730_s0 + $0x60] sm:$0xff]  }
 0x253   : > { %14545 = vmatprep.subr.bf16.mxu0 %v14708_v4  ;;  %14622 = vmatprep.subr.bf16.mxu1 %v14708_v4  ;;  %v14738_v34 = vld [vmem:[%s19730_s0 + $0xe0] sm:$0xff]   ;;  %v14739_v35 = vld [vmem:[%s19730_s0 + $0x68] sm:$0xff]   ;;  %v14741_v37 = vld [vmem:[%s19730_s0 + $0x70] sm:$0xff]  }
 0x254   : > { %v14740_v36 = vld [vmem:[%s19730_s0 + $0xe8] sm:$0xff]   ;;  %v14742_v38 = vld [vmem:[%s19730_s0 + $0xf0] sm:$0xff]   ;;  %v14743_v39 = vld [vmem:[%s19730_s0 + $0x78] sm:$0xff]  }
 0x255   : > { %v14744_v40 = vld [vmem:[%s19730_s0 + $0xf8] sm:$0xff]   ;;  %v17961_v41 = vld [vmem:[%s19732_s2] ss:$0 sm:$0xff] }
 0x256   : > { %14546 = vmatpush3.bf16.msra.mxu0 %v14708_v4  ;;  %14630 = vmatpush3.bf16.msra.mxu1 %v14708_v4 }
 0x257   : > { %14547 = vmatprep.subr.bf16.mxu0 %v14709_v7  ;;  %14623 = vmatprep.subr.bf16.mxu1 %v14709_v7 }
 0x25a   : > { %14548 = vmatpush3.bf16.msra.mxu0 %v14709_v7  ;;  %14631 = vmatpush3.bf16.msra.mxu1 %v14709_v7 }
 0x25b   : > { %14549 = vmatprep.subr.bf16.mxu0 %v14710_v8  ;;  %14624 = vmatprep.subr.bf16.mxu1 %v14710_v8 }
 0x25e   : > { %14550 = vmatpush3.bf16.msra.mxu0 %v14710_v8  ;;  %14632 = vmatpush3.bf16.msra.mxu1 %v14710_v8 }
 0x25f   : > { %14551 = vmatprep.subr.bf16.mxu0 %v14711_v9  ;;  %14625 = vmatprep.subr.bf16.mxu1 %v14711_v9 }
 0x262   : > { %14552 = vmatpush3.bf16.msra.mxu0 %v14711_v9  ;;  %14633 = vmatpush3.bf16.msra.mxu1 %v14711_v9 }
 0x263   : > { %14553 = vmatprep.subr.bf16.mxu0 %v14712_v10  ;;  %14626 = vmatprep.subr.bf16.mxu1 %v14712_v10 }
 0x266   : > { %14554 = vmatpush3.bf16.msra.mxu0 %v14712_v10  ;;  %14634 = vmatpush3.bf16.msra.mxu1 %v14712_v10 }
 0x269   : > { %14556 = vmatmul.mubr.bf16.vlgmr.msra.gmra.mxu0 %v14715_v11  ;;  %14588 = vmatmul.mubr.bf16.vlgmr.msra.gmra.mxu1 %v14716_v12 }
 0x26a   : > { %14559 = vmatprep.mubr.bf16.mxu0 %v14717_v13  ;;  %14591 = vmatprep.mubr.bf16.mxu1 %v14718_v14 }
 0x271   : > { %14560 = vmatmul.mubr.bf16.gmra.mxu0 %v14719_v15  ;;  %14592 = vmatmul.mubr.bf16.gmra.mxu1 %v14720_v16 }
 0x272   : > { %14563 = vmatprep.mubr.bf16.mxu0 %v14721_v17  ;;  %14595 = vmatprep.mubr.bf16.mxu1 %v14722_v18 }
 0x279   : > { %14564 = vmatmul.mubr.bf16.gmra.mxu0 %v14723_v19  ;;  %14596 = vmatmul.mubr.bf16.gmra.mxu1 %v14724_v20 }
 0x27a   : > { %14567 = vmatprep.mubr.bf16.mxu0 %v14725_v21  ;;  %14599 = vmatprep.mubr.bf16.mxu1 %v14726_v22 }
 0x281   : > { %14568 = vmatmul.mubr.bf16.gmra.mxu0 %v14727_v23  ;;  %14600 = vmatmul.mubr.bf16.gmra.mxu1 %v14728_v24 }
 0x282   : > { %14571 = vmatprep.mubr.bf16.mxu0 %v14729_v25  ;;  %14603 = vmatprep.mubr.bf16.mxu1 %v14730_v26 }
 0x289   : > { %14572 = vmatmul.mubr.bf16.gmra.mxu0 %v14731_v27  ;;  %14604 = vmatmul.mubr.bf16.gmra.mxu1 %v14732_v28 }
 0x28a   : > { %14575 = vmatprep.mubr.bf16.mxu0 %v14733_v29  ;;  %14607 = vmatprep.mubr.bf16.mxu1 %v14734_v30 }
 0x291   : > { %14576 = vmatmul.mubr.bf16.gmra.mxu0 %v14735_v31  ;;  %14608 = vmatmul.mubr.bf16.gmra.mxu1 %v14736_v32 }
 0x292   : > { %14579 = vmatprep.mubr.bf16.mxu0 %v14737_v33  ;;  %14611 = vmatprep.mubr.bf16.mxu1 %v14738_v34 }
 0x299   : > { %14580 = vmatmul.mubr.bf16.gmra.mxu0 %v14739_v35  ;;  %14612 = vmatmul.mubr.bf16.gmra.mxu1 %v14740_v36 }
 0x29a   : > { %14583 = vmatprep.mubr.bf16.mxu0 %v14741_v37  ;;  %14615 = vmatprep.mubr.bf16.mxu1 %v14742_v38 }
 0x2a1   : > { %14584 = vmatmul.mubr.bf16.gmra.mxu0 %v14743_v39  ;;  %14616 = vmatmul.mubr.bf16.gmra.mxu1 %v14744_v40 }
 0x329   : > { %v14557_v42 = vpop.f32.mrf.mxu0  ;;  %v14589_v43 = vpop.f32.mrf.mxu1 }
 0x32a   : > { %v4015_v44 = vadd.f32 %v14589_v43, %v17961_v41  ;;  %v3887_v45 = vadd.f32 %v14557_v42, %v17961_v41 }
 0x32b   : > { %v3878_v46 = vpop.f32.mrf.mxu0  ;;  %v4006_v47 = vpop.f32.mrf.mxu1 }
 0x32c   : > { %v4167_v50 = vmax.f32 %v4015_v44, 0.0  ;;  %v4135_v53 = vmax.f32 %v3887_v45, 0.0  ;;  %v3879_v54 = vadd.f32 %v17961_v41, %v3878_v46  ;;  %v4007_v63 = vadd.f32 %v17961_v41, %v4006_v47 }
 0x32d   : > { %v14558_v48 = vpop.f32.mrf.mxu0  ;;  %v14590_v49 = vpop.f32.mrf.mxu1 }
 0x32e   : > { %v3890_v51 = vadd.f32 %v14558_v48, %v17961_v41  ;;  %v4018_v52 = vadd.f32 %v14590_v49, %v17961_v41  ;;  %v4133_v3 = vmax.f32 %v3879_v54, 0.0  ;;  %v4165_v14 = vmax.f32 %v4007_v63, 0.0 }
 0x32f   : > { %v3881_v55 = vpop.f32.mrf.mxu0  ;;  %v4009_v56 = vpop.f32.mrf.mxu1 }
 0x330   : > { %v4136_v57 = vmax.f32 %v3890_v51, 0.0  ;;  %v4168_v58 = vmax.f32 %v4018_v52, 0.0  ;;  %v3882_v59 = vadd.f32 %v17961_v41, %v3881_v55  ;;  %v4010_v60 = vadd.f32 %v17961_v41, %v4009_v56 }
 0x331   : > { %v14561_v61 = vpop.f32.mrf.mxu0  ;;  %v14593_v62 = vpop.f32.mrf.mxu1 }
 0x332   : > { %v17971_v0 = vpack.c.bf16 %v4136_v57, %v4135_v53  ;;  %v17973_v1 = vpack.c.bf16 %v4168_v58, %v4167_v50  ;;  %v4134_v2 = vmax.f32 %v3882_v59, 0.0  ;;  %v4166_v6 = vmax.f32 %v4010_v60, 0.0 }
 0x333   : > { %v3894_v4 = vpop.f32.mrf.mxu0  ;;  %v4022_v5 = vpop.f32.mrf.mxu1  ;;  %v3903_v7 = vadd.f32 %v14561_v61, %v17961_v41  ;;  %v4031_v9 = vadd.f32 %v14593_v62, %v17961_v41 }
 0x334   : > { %v17976_v8 = vpack.c.bf16 %v4134_v2, %v4133_v3  ;;  %v4384_v12 = vrot.slane %v17973_v1, 4  ;;  %v4240_v13 = vrot.slane %v17971_v0, 4  ;;  %v4023_v17 = vadd.f32 %v17961_v41, %v4022_v5 }
 0x335   : > { %v14562_v10 = vpop.f32.mrf.mxu0  ;;  %v14594_v11 = vpop.f32.mrf.mxu1  ;;  %v17986_v20 = vpack.c.bf16 %v4166_v6, %v4165_v14  ;;  %v4139_v21 = vmax.f32 %v3903_v7, 0.0  ;;  %v4171_v24 = vmax.f32 %v4031_v9, 0.0  ;;  %v3895_v32 = vadd.f32 %v17961_v41, %v3894_v4 }
 0x336   : > { %v3906_v15 = vadd.f32 %v14562_v10, %v17961_v41  ;;  %v4034_v16 = vadd.f32 %v14594_v11, %v17961_v41  ;;  %4385 = vrot.lane.b32.xlu1 %v4384_v12, %s16607_s30  ;;  %4241 = vrot.lane.b32.xlu0 %v4240_v13, %s16607_s30  ;;  %v4230_v29 = vrot.slane %v17976_v8, 4  ;;  %v4169_v33 = vmax.f32 %v4023_v17, 0.0 }
 0x337   : > { %v3897_v18 = vpop.f32.mrf.mxu0  ;;  %v4025_v19 = vpop.f32.mrf.mxu1  ;;  %v4375_v36 = vrot.slane %v17986_v20, 4  ;;  %v4137_v46 = vmax.f32 %v3895_v32, 0.0 }
 0x338   : > { %v4140_v22 = vmax.f32 %v3906_v15, 0.0  ;;  %v4026_v23 = vadd.f32 %v17961_v41, %v4025_v19  ;;  %v4172_v25 = vmax.f32 %v4034_v16, 0.0  ;;  %v3898_v26 = vadd.f32 %v17961_v41, %v3897_v18 }
 0x339   : > { %v14565_v27 = vpop.f32.mrf.mxu0  ;;  %v14597_v28 = vpop.f32.mrf.mxu1 }
 0x33a   : > { %v17991_v30 = vpack.c.bf16 %v4140_v22, %v4139_v21  ;;  %v4170_v31 = vmax.f32 %v4026_v23, 0.0  ;;  %4231 = vrot.lane.b32.xlu0 %v4230_v29, %s16607_s30  ;;  %v17996_v37 = vpack.c.bf16 %v4172_v25, %v4171_v24  ;;  %v4138_v38 = vmax.f32 %v3898_v26, 0.0 }
 0x33b   : > { %v3910_v34 = vpop.f32.mrf.mxu0  ;;  %v4038_v35 = vpop.f32.mrf.mxu1  ;;  %v3919_v47 = vadd.f32 %v14565_v27, %v17961_v41  ;;  %v4047_v51 = vadd.f32 %v14597_v28, %v17961_v41 }
 0x33c   : > { %v17998_v39 = vpack.c.bf16 %v4170_v31, %v4169_v33  ;;  %v4258_v43 = vrot.slane %v17991_v30, 4  ;;  %v3911_v44 = vadd.f32 %v17961_v41, %v3910_v34  ;;  %v4039_v48 = vadd.f32 %v17961_v41, %v4038_v35 }
 0x33d   : > { %v14566_v40 = vpop.f32.mrf.mxu0  ;;  %v14598_v42 = vpop.f32.mrf.mxu1  ;;  %v18011_v55 = vpack.c.bf16 %v4138_v38, %v4137_v46  ;;  %v4402_v59 = vrot.slane %v17996_v37, 4  ;;  %v4143_v63 = vmax.f32 %v3919_v47, 0.0  ;;  %v4175_v6 = vmax.f32 %v4047_v51, 0.0 }
 0x33e   : > { %v3922_v45 = vadd.f32 %v14566_v40, %v17961_v41  ;;  %4259 = vrot.lane.b32.xlu1 %v4258_v43, %s16607_s30  ;;  %4376 = vrot.lane.b32.xlu0 %v4375_v36, %s16607_s30  ;;  %v4050_v52 = vadd.f32 %v14598_v42, %v17961_v41  ;;  %v4393_v60 = vrot.slane %v17998_v39, 4  ;;  %v4141_v61 = vmax.f32 %v3911_v44, 0.0 }
 0x33f   : > { %v3913_v49 = vpop.f32.mrf.mxu0  ;;  %v4041_v50 = vpop.f32.mrf.mxu1  ;;  %v4173_v2 = vmax.f32 %v4039_v48, 0.0  ;;  %v4249_v13 = vrot.slane %v18011_v55, 4 }
 0x340   : > { %v3914_v53 = vadd.f32 %v17961_v41, %v3913_v49  ;;  %v4042_v54 = vadd.f32 %v17961_v41, %v4041_v50  ;;  %v4144_v56 = vmax.f32 %v3922_v45, 0.0  ;;  %v4176_v7 = vmax.f32 %v4050_v52, 0.0 }
 0x341   : > { %v14569_v57 = vpop.f32.mrf.mxu0  ;;  %v14601_v58 = vpop.f32.mrf.mxu1 }
 0x342   : > { %v4142_v62 = vmax.f32 %v3914_v53, 0.0  ;;  %v4174_v3 = vmax.f32 %v4042_v54, 0.0  ;;  %4403 = vrot.lane.b32.xlu1 %v4402_v59, %s16607_s30  ;;  %4394 = vrot.lane.b32.xlu0 %v4393_v60, %s16607_s30  ;;  %v18019_v10 = vpack.c.bf16 %v4144_v56, %v4143_v63  ;;  %v3935_v17 = vadd.f32 %v14569_v57, %v17961_v41 }
 0x343   : > { %v3926_v4 = vpop.f32.mrf.mxu0  ;;  %v4054_v5 = vpop.f32.mrf.mxu1  ;;  %v18030_v23 = vpack.c.bf16 %v4176_v7, %v4175_v6  ;;  %v4063_v26 = vadd.f32 %v14601_v58, %v17961_v41 }
 0x344   : > { %v18017_v9 = vpack.c.bf16 %v4142_v62, %v4141_v61  ;;  %v3927_v14 = vadd.f32 %v17961_v41, %v3926_v4  ;;  %v18024_v16 = vpack.c.bf16 %v4174_v3, %v4173_v2  ;;  %v4055_v18 = vadd.f32 %v17961_v41, %v4054_v5 }
 0x345   : > { %v14570_v11 = vpop.f32.mrf.mxu0  ;;  %v14602_v12 = vpop.f32.mrf.mxu1  ;;  %v4276_v32 = vrot.slane %v18019_v10, 4  ;;  %v4147_v35 = vmax.f32 %v3935_v17, 0.0  ;;  %v4179_v45 = vmax.f32 %v4063_v26, 0.0  ;;  %v4420_v50 = vrot.slane %v18030_v23, 4 }
 0x346   : > { %v3938_v15 = vadd.f32 %v14570_v11, %v17961_v41  ;;  %4250 = vrot.lane.b32.xlu1 %v4249_v13, %s16607_s30  ;;  %v4267_v22 = vrot.slane %v18017_v9, 4  ;;  %v4066_v28 = vadd.f32 %v14602_v12, %v17961_v41  ;;  %v4145_v33 = vmax.f32 %v3927_v14, 0.0 }
 0x347   : > { %v3929_v19 = vpop.f32.mrf.mxu0  ;;  %v4057_v21 = vpop.f32.mrf.mxu1  ;;  %v4177_v36 = vmax.f32 %v4055_v18, 0.0  ;;  %v4411_v43 = vrot.slane %v18024_v16, 4 }
 0x348   : > { %v3930_v24 = vadd.f32 %v17961_v41, %v3929_v19  ;;  %v4058_v25 = vadd.f32 %v17961_v41, %v4057_v21  ;;  %v4148_v27 = vmax.f32 %v3938_v15, 0.0  ;;  %4268 = vrot.lane.b32.xlu0 %v4267_v22, %s16607_s30  ;;  %v4180_v47 = vmax.f32 %v4066_v28, 0.0 }
 0x349   : > { %v14573_v29 = vpop.f32.mrf.mxu0  ;;  %v14605_v31 = vpop.f32.mrf.mxu1 }
 0x34a   : > { %v4146_v34 = vmax.f32 %v3930_v24, 0.0  ;;  %v4178_v38 = vmax.f32 %v4058_v25, 0.0  ;;  %4277 = vrot.lane.b32.xlu1 %v4276_v32, %s16607_s30  ;;  %v18042_v46 = vpack.c.bf16 %v4148_v27, %v4147_v35  ;;  %v3951_v54 = vadd.f32 %v14573_v29, %v17961_v41 }
 0x34b   : > { %v3942_v40 = vpop.f32.mrf.mxu0  ;;  %v4070_v42 = vpop.f32.mrf.mxu1  ;;  %v4079_v60 = vadd.f32 %v14605_v31, %v17961_v41  ;;  %v18058_v2 = vpack.c.bf16 %v4180_v47, %v4179_v45 }
 0x34c   : > { %v18040_v44 = vpack.c.bf16 %v4146_v34, %v4145_v33  ;;  %4412 = vrot.lane.b32.xlu0 %v4411_v43, %s16607_s30  ;;  %v3943_v51 = vadd.f32 %v17961_v41, %v3942_v40  ;;  %v18048_v53 = vpack.c.bf16 %v4178_v38, %v4177_v36  ;;  %v4071_v56 = vadd.f32 %v17961_v41, %v4070_v42 }
 0x34d   : > { %v14574_v48 = vpop.f32.mrf.mxu0  ;;  %v14606_v49 = vpop.f32.mrf.mxu1  ;;  %v4294_v6 = vrot.slane %v18042_v46, 4  ;;  %v4151_v12 = vmax.f32 %v3951_v54, 0.0  ;;  %v4183_v19 = vmax.f32 %v4079_v60, 0.0  ;;  %v4438_v27 = vrot.slane %v18058_v2, 4 }
 0x34e   : > { %v3954_v52 = vadd.f32 %v14574_v48, %v17961_v41  ;;  %4421 = vrot.lane.b32.xlu1 %v4420_v50, %s16607_s30  ;;  %v4285_v59 = vrot.slane %v18040_v44, 4  ;;  %v4082_v61 = vadd.f32 %v14606_v49, %v17961_v41  ;;  %v4149_v7 = vmax.f32 %v3943_v51, 0.0 }
 0x34f   : > { %v3945_v57 = vpop.f32.mrf.mxu0  ;;  %v4073_v58 = vpop.f32.mrf.mxu1  ;;  %v4181_v13 = vmax.f32 %v4071_v56, 0.0  ;;  %v4429_v18 = vrot.slane %v18048_v53, 4 }
 0x350   : > { %v3946_v62 = vadd.f32 %v17961_v41, %v3945_v57  ;;  %v4074_v63 = vadd.f32 %v17961_v41, %v4073_v58  ;;  %v4152_v3 = vmax.f32 %v3954_v52, 0.0  ;;  %4286 = vrot.lane.b32.xlu0 %v4285_v59, %s16607_s30  ;;  %v4184_v21 = vmax.f32 %v4082_v61, 0.0 }
 0x351   : > { %v14577_v4 = vpop.f32.mrf.mxu0  ;;  %v14609_v5 = vpop.f32.mrf.mxu1 }
 0x352   : > { %v4150_v11 = vmax.f32 %v3946_v62, 0.0  ;;  %v4182_v14 = vmax.f32 %v4074_v63, 0.0  ;;  %4295 = vrot.lane.b32.xlu1 %v4294_v6, %s16607_s30  ;;  %v18066_v24 = vpack.c.bf16 %v4152_v3, %v4151_v12  ;;  %v3967_v32 = vadd.f32 %v14577_v4, %v17961_v41 }
 0x353   : > { %v3958_v15 = vpop.f32.mrf.mxu0  ;;  %v4086_v17 = vpop.f32.mrf.mxu1  ;;  %v18078_v38 = vpack.c.bf16 %v4184_v21, %v4183_v19  ;;  %v4095_v43 = vadd.f32 %v14609_v5, %v17961_v41 }
 0x354   : > { %v18064_v22 = vpack.c.bf16 %v4150_v11, %v4149_v7  ;;  %4430 = vrot.lane.b32.xlu0 %v4429_v18, %s16607_s30  ;;  %v3959_v28 = vadd.f32 %v17961_v41, %v3958_v15  ;;  %v18072_v31 = vpack.c.bf16 %v4182_v14, %v4181_v13  ;;  %v4087_v33 = vadd.f32 %v17961_v41, %v4086_v17 }
 0x355   : > { %v14578_v25 = vpop.f32.mrf.mxu0  ;;  %v14610_v26 = vpop.f32.mrf.mxu1  ;;  %v4312_v50 = vrot.slane %v18066_v24, 4  ;;  %v4155_v54 = vmax.f32 %v3967_v32, 0.0  ;;  %v4187_v62 = vmax.f32 %v4095_v43, 0.0  ;;  %v4456_v6 = vrot.slane %v18078_v38, 4 }
 0x356   : > { %v3970_v29 = vadd.f32 %v14578_v25, %v17961_v41  ;;  %4439 = vrot.lane.b32.xlu1 %v4438_v27, %s16607_s30  ;;  %v4303_v36 = vrot.slane %v18064_v22, 4  ;;  %v4098_v47 = vadd.f32 %v14610_v26, %v17961_v41  ;;  %v4153_v51 = vmax.f32 %v3959_v28, 0.0 }
 0x357   : > { %v3961_v34 = vpop.f32.mrf.mxu0  ;;  %v4089_v35 = vpop.f32.mrf.mxu1  ;;  %v4185_v56 = vmax.f32 %v4087_v33, 0.0  ;;  %v4447_v60 = vrot.slane %v18072_v31, 4 }
 0x358   : > { %v3962_v40 = vadd.f32 %v17961_v41, %v3961_v34  ;;  %v4090_v42 = vadd.f32 %v17961_v41, %v4089_v35  ;;  %v4156_v45 = vmax.f32 %v3970_v29, 0.0  ;;  %4304 = vrot.lane.b32.xlu0 %v4303_v36, %s16607_s30  ;;  %v4188_v3 = vmax.f32 %v4098_v47, 0.0 }
 0x359   : > { %v14581_v48 = vpop.f32.mrf.mxu0  ;;  %v14613_v49 = vpop.f32.mrf.mxu1 }
 0x35a   : > { %v4154_v52 = vmax.f32 %v3962_v40, 0.0  ;;  %v4186_v57 = vmax.f32 %v4090_v42, 0.0  ;;  %4313 = vrot.lane.b32.xlu1 %v4312_v50, %s16607_s30  ;;  %v18090_v63 = vpack.c.bf16 %v4156_v45, %v4155_v54  ;;  %v3983_v13 = vadd.f32 %v14581_v48, %v17961_v41 }
 0x35b   : > { %v3974_v58 = vpop.f32.mrf.mxu0  ;;  %v4102_v59 = vpop.f32.mrf.mxu1  ;;  %v4111_v19 = vadd.f32 %v14613_v49, %v17961_v41  ;;  %v18106_v27 = vpack.c.bf16 %v4188_v3, %v4187_v62 }
 0x35c   : > { %v18088_v61 = vpack.c.bf16 %v4154_v52, %v4153_v51  ;;  %4448 = vrot.lane.b32.xlu0 %v4447_v60, %s16607_s30  ;;  %v3975_v7 = vadd.f32 %v17961_v41, %v3974_v58  ;;  %v18096_v12 = vpack.c.bf16 %v4186_v57, %v4185_v56  ;;  %v4103_v14 = vadd.f32 %v17961_v41, %v4102_v59 }
 0x35d   : > { %v14582_v4 = vpop.f32.mrf.mxu0  ;;  %v14614_v5 = vpop.f32.mrf.mxu1  ;;  %v4330_v33 = vrot.slane %v18090_v63, 4  ;;  %v4159_v36 = vmax.f32 %v3983_v13, 0.0  ;;  %v4191_v48 = vmax.f32 %v4111_v19, 0.0  ;;  %v4474_v56 = vrot.slane %v18106_v27, 4 }
 0x35e   : > { %v3986_v11 = vadd.f32 %v14582_v4, %v17961_v41  ;;  %4457 = vrot.lane.b32.xlu1 %v4456_v6, %s16607_s30  ;;  %v4321_v18 = vrot.slane %v18088_v61, 4  ;;  %v4114_v21 = vadd.f32 %v14614_v5, %v17961_v41  ;;  %v4157_v34 = vmax.f32 %v3975_v7, 0.0 }
 0x35f   : > { %v3977_v15 = vpop.f32.mrf.mxu0  ;;  %v4105_v17 = vpop.f32.mrf.mxu1  ;;  %v4189_v40 = vmax.f32 %v4103_v14, 0.0  ;;  %v4465_v47 = vrot.slane %v18096_v12, 4 }
 0x360   : > { %v3978_v25 = vadd.f32 %v17961_v41, %v3977_v15  ;;  %v4106_v26 = vadd.f32 %v17961_v41, %v4105_v17  ;;  %v4160_v28 = vmax.f32 %v3986_v11, 0.0  ;;  %4322 = vrot.lane.b32.xlu0 %v4321_v18, %s16607_s30  ;;  %v4192_v49 = vmax.f32 %v4114_v21, 0.0 }
 0x361   : > { %v14585_v29 = vpop.f32.mrf.mxu0  ;;  %v14617_v32 = vpop.f32.mrf.mxu1 }
 0x362   : > { %v4158_v35 = vmax.f32 %v3978_v25, 0.0  ;;  %v4190_v42 = vmax.f32 %v4106_v26, 0.0  ;;  %4331 = vrot.lane.b32.xlu1 %v4330_v33, %s16607_s30  ;;  %v18114_v51 = vpack.c.bf16 %v4160_v28, %v4159_v36  ;;  %v3999_v57 = vadd.f32 %v14585_v29, %v17961_v41 }
 0x363   : > { %v3990_v43 = vpop.f32.mrf.mxu0  ;;  %v4118_v45 = vpop.f32.mrf.mxu1  ;;  %v18126_v6 = vpack.c.bf16 %v4192_v49, %v4191_v48  ;;  %v4127_v13 = vadd.f32 %v14617_v32, %v17961_v41  ;;  %v16608_v33 = vmov 0.0  }
 0x364   : > { %v18112_v50 = vpack.c.bf16 %v4158_v35, %v4157_v34  ;;  %4466 = vrot.lane.b32.xlu0 %v4465_v47, %s16607_s30  ;;  %v3991_v58 = vadd.f32 %v17961_v41, %v3990_v43  ;;  %v18121_v60 = vpack.c.bf16 %v4190_v42, %v4189_v40  ;;  %v4119_v62 = vadd.f32 %v17961_v41, %v4118_v45 }
 0x365   : > { %v14586_v52 = vpop.f32.mrf.mxu0  ;;  %v14618_v54 = vpop.f32.mrf.mxu1  ;;  %v4348_v17 = vrot.slane %v18114_v51, 4  ;;  %v4163_v18 = vmax.f32 %v3999_v57, 0.0  ;;  %4518 = vst [vmem:[#allocation3 + $0x10] sm:$0xff] %v16608_v33  ;;  %4519 = vst [vmem:[#allocation3] sm:$0xff] %v16608_v33  ;;  %v4492_v35 = vrot.slane %v18126_v6, 4 }
 0x366   : > { %v4002_v59 = vadd.f32 %v14586_v52, %v17961_v41  ;;  %4475 = vrot.lane.b32.xlu1 %v4474_v56, %s16607_s30  ;;  %v4339_v5 = vrot.slane %v18112_v50, 4  ;;  %v4130_v15 = vadd.f32 %v14618_v54, %v17961_v41  ;;  %v4161_v19 = vmax.f32 %v3991_v58, 0.0  ;;  %4520 = vst [vmem:[#allocation3 + $0x18] sm:$0xff] %v16608_v33  ;;  %4521 = vst [vmem:[#allocation3 + $0x8] sm:$0xff] %v16608_v33 }
 0x367   : > { %v3993_v3 = vpop.f32.mrf.mxu0  ;;  %v4121_v4 = vpop.f32.mrf.mxu1  ;;  %v4193_v25 = vmax.f32 %v4119_v62, 0.0  ;;  %v4483_v28 = vrot.slane %v18121_v60, 4 }
 0x368   : > { %v3994_v7 = vadd.f32 %v17961_v41, %v3993_v3  ;;  %v4122_v11 = vadd.f32 %v17961_v41, %v4121_v4  ;;  %v4164_v14 = vmax.f32 %v4002_v59, 0.0  ;;  %4340 = vrot.lane.b32.xlu0 %v4339_v5, %s16607_s30  ;;  %v4195_v41 = vmax.f32 %v4127_v13, 0.0 }
 0x369   : > { %v4196_v34 = vmax.f32 %v4130_v15, 0.0 }
 0x36a   : > { %v4162_v21 = vmax.f32 %v3994_v7, 0.0  ;;  %v4194_v26 = vmax.f32 %v4122_v11, 0.0  ;;  %4349 = vrot.lane.b32.xlu1 %v4348_v17, %s16607_s30  ;;  %v18138_v32 = vpack.c.bf16 %v4164_v14, %v4163_v18 }
 0x36b   : > { %v18146_v42 = vpack.c.bf16 %v4196_v34, %v4195_v41 }
 0x36c   : > { %v18136_v29 = vpack.c.bf16 %v4162_v21, %v4161_v19  ;;  %4484 = vrot.lane.b32.xlu0 %v4483_v28, %s16607_s30  ;;  %v18143_v40 = vpack.c.bf16 %v4194_v26, %v4193_v25  ;;  %v4366_v43 = vrot.slane %v18138_v32, 4 }
 0x36d   : > { %v4510_v47 = vrot.slane %v18146_v42, 4 }
 0x36e   : > { %v4357_v36 = vrot.slane %v18136_v29, 4  ;;  %4493 = vrot.lane.b32.xlu1 %v4492_v35, %s16607_s30  ;;  %v4501_v45 = vrot.slane %v18143_v40, 4 }
 0x370   : > { %4358 = vrot.lane.b32.xlu0 %v4357_v36, %s16607_s30 }
 0x372   : > { %4367 = vrot.lane.b32.xlu1 %v4366_v43, %s16607_s30 }
 0x374   : > { %4502 = vrot.lane.b32.xlu0 %v4501_v45, %s16607_s30 }
 0x376   : > { %4511 = vrot.lane.b32.xlu1 %v4510_v47, %s16607_s30 }
 0x3a8   : > { %v4386_v48 = vpop.permute.xlu1 %4385  ;;  %v4242_v49 = vpop.permute.xlu0 %4241 }
 0x3a9   : > { %v4389_v52 = vsel %vm4233_vm0, %v17973_v1, %v4386_v48  ;;  %v4245_v54 = vsel %vm4233_vm0, %v17971_v0, %v4242_v49 }
 0x3aa   : > { %4391 = vst [vmem:[#allocation2 + $0x44] sm:$0xf] %v4389_v52  ;;  %4247 = vst [vmem:[#allocation2 + $0x4] sm:$0xf] %v4245_v54 }
 0x3ac   : > { %v4232_v56 = vpop.permute.xlu0 %4231 }
 0x3ad   : > { %v4236_v57 = vsel %vm4233_vm0, %v17976_v8, %v4232_v56 }
 0x3ae   : > { %4238 = vst [vmem:[#allocation2] sm:$0xf] %v4236_v57 }
 0x3b0   : > { %v4260_v58 = vpop.permute.xlu1 %4259  ;;  %v4377_v59 = vpop.permute.xlu0 %4376 }
 0x3b1   : > { %v4263_v62 = vsel %vm4233_vm0, %v17991_v30, %v4260_v58  ;;  %v4380_v3 = vsel %vm4233_vm0, %v17986_v20, %v4377_v59 }
 0x3b2   : > { %4265 = vst [vmem:[#allocation2 + $0xc] sm:$0xf] %v4263_v62  ;;  %4382 = vst [vmem:[#allocation2 + $0x40] sm:$0xf] %v4380_v3 }
 0x3b4   : > { %v4404_v1 = vpop.permute.xlu1 %4403  ;;  %v4395_v4 = vpop.permute.xlu0 %4394 }
 0x3b5   : > { %v4407_v0 = vsel %vm4233_vm0, %v17996_v37, %v4404_v1  ;;  %v4398_v5 = vsel %vm4233_vm0, %v17998_v39, %v4395_v4 }
 0x3b6   : > { %4409 = vst [vmem:[#allocation2 + $0x4c] sm:$0xf] %v4407_v0  ;;  %4400 = vst [vmem:[#allocation2 + $0x48] sm:$0xf] %v4398_v5 }
 0x3b8   : > { %v4251_v8 = vpop.permute.xlu1 %4250 }
 0x3b9   : > { %v4254_v7 = vsel %vm4233_vm0, %v18011_v55, %v4251_v8 }
 0x3ba   : > { %4256 = vst [vmem:[#allocation2 + $0x8] sm:$0xf] %v4254_v7  ;;  %v4269_v30 = vpop.permute.xlu0 %4268 }
 0x3bb   : > { %v4272_v20 = vsel %vm4233_vm0, %v18017_v9, %v4269_v30 }
 0x3bc   : > { %4274 = vst [vmem:[#allocation2 + $0x10] sm:$0xf] %v4272_v20  ;;  %v4278_v11 = vpop.permute.xlu1 %4277 }
 0x3bd   : > { %v4281_v13 = vsel %vm4233_vm0, %v18019_v10, %v4278_v11 }
 0x3be   : > { %4283 = vst [vmem:[#allocation2 + $0x14] sm:$0xf] %v4281_v13  ;;  %v4413_v37 = vpop.permute.xlu0 %4412 }
 0x3bf   : > { %v4416_v39 = vsel %vm4233_vm0, %v18024_v16, %v4413_v37 }
 0x3c0   : > { %4418 = vst [vmem:[#allocation2 + $0x50] sm:$0xf] %v4416_v39  ;;  %v4422_v14 = vpop.permute.xlu1 %4421 }
 0x3c1   : > { %v4425_v55 = vsel %vm4233_vm0, %v18030_v23, %v4422_v14 }
 0x3c2   : > { %4427 = vst [vmem:[#allocation2 + $0x54] sm:$0xf] %v4425_v55  ;;  %v4287_v15 = vpop.permute.xlu0 %4286 }
 0x3c3   : > { %v4290_v9 = vsel %vm4233_vm0, %v18040_v44, %v4287_v15 }
 0x3c4   : > { %4292 = vst [vmem:[#allocation2 + $0x18] sm:$0xf] %v4290_v9  ;;  %v4296_v17 = vpop.permute.xlu1 %4295 }
 0x3c5   : > { %v4299_v10 = vsel %vm4233_vm0, %v18042_v46, %v4296_v17 }
 0x3c6   : > { %4301 = vst [vmem:[#allocation2 + $0x1c] sm:$0xf] %v4299_v10  ;;  %v4431_v18 = vpop.permute.xlu0 %4430 }
 0x3c7   : > { %v4434_v16 = vsel %vm4233_vm0, %v18048_v53, %v4431_v18 }
 0x3c8   : > { %4436 = vst [vmem:[#allocation2 + $0x58] sm:$0xf] %v4434_v16  ;;  %v4440_v19 = vpop.permute.xlu1 %4439 }
 0x3c9   : > { %v4443_v23 = vsel %vm4233_vm0, %v18058_v2, %v4440_v19 }
 0x3ca   : > { %4445 = vst [vmem:[#allocation2 + $0x5c] sm:$0xf] %v4443_v23  ;;  %v4305_v21 = vpop.permute.xlu0 %4304 }
 0x3cb   : > { %v4308_v44 = vsel %vm4233_vm0, %v18064_v22, %v4305_v21 }
 0x3cc   : > { %4310 = vst [vmem:[#allocation2 + $0x20] sm:$0xf] %v4308_v44  ;;  %v4314_v25 = vpop.permute.xlu1 %4313 }
 0x3cd   : > { %v4317_v46 = vsel %vm4233_vm0, %v18066_v24, %v4314_v25 }
 0x3ce   : > { %4319 = vst [vmem:[#allocation2 + $0x24] sm:$0xf] %v4317_v46  ;;  %v4449_v26 = vpop.permute.xlu0 %4448 }
 0x3cf   : > { %v4452_v53 = vsel %vm4233_vm0, %v18072_v31, %v4449_v26 }
 0x3d0   : > { %4454 = vst [vmem:[#allocation2 + $0x60] sm:$0xf] %v4452_v53  ;;  %v4458_v28 = vpop.permute.xlu1 %4457 }
 0x3d1   : > { %v4461_v2 = vsel %vm4233_vm0, %v18078_v38, %v4458_v28 }
 0x3d2   : > { %4463 = vst [vmem:[#allocation2 + $0x64] sm:$0xf] %v4461_v2  ;;  %v4323_v33 = vpop.permute.xlu0 %4322 }
 0x3d3   : > { %v4326_v22 = vsel %vm4233_vm0, %v18088_v61, %v4323_v33 }
 0x3d4   : > { %4328 = vst [vmem:[#allocation2 + $0x28] sm:$0xf] %v4326_v22  ;;  %v4332_v41 = vpop.permute.xlu1 %4331 }
 0x3d5   : > { %v4335_v24 = vsel %vm4233_vm0, %v18090_v63, %v4332_v41 }
 0x3d6   : > { %4337 = vst [vmem:[#allocation2 + $0x2c] sm:$0xf] %v4335_v24  ;;  %v4467_v34 = vpop.permute.xlu0 %4466 }
 0x3d7   : > { %v4470_v31 = vsel %vm4233_vm0, %v18096_v12, %v4467_v34 }
 0x3d8   : > { %4472 = vst [vmem:[#allocation2 + $0x68] sm:$0xf] %v4470_v31  ;;  %v4476_v35 = vpop.permute.xlu1 %4475 }
 0x3d9   : > { %v4479_v38 = vsel %vm4233_vm0, %v18106_v27, %v4476_v35 }
 0x3da   : > { %4481 = vst [vmem:[#allocation2 + $0x6c] sm:$0xf] %v4479_v38  ;;  %v4341_v36 = vpop.permute.xlu0 %4340 }
 0x3db   : > { %v4344_v61 = vsel %vm4233_vm0, %v18112_v50, %v4341_v36 }
 0x3dc   : > { %4346 = vst [vmem:[#allocation2 + $0x30] sm:$0xf] %v4344_v61  ;;  %v4350_v43 = vpop.permute.xlu1 %4349 }
 0x3dd   : > { %v4353_v63 = vsel %vm4233_vm0, %v18114_v51, %v4350_v43 }
 0x3de   : > { %4355 = vst [vmem:[#allocation2 + $0x34] sm:$0xf] %v4353_v63  ;;  %v4485_v45 = vpop.permute.xlu0 %4484 }
 0x3df   : > { %v4488_v12 = vsel %vm4233_vm0, %v18121_v60, %v4485_v45 }
 0x3e0   : > { %4490 = vst [vmem:[#allocation2 + $0x70] sm:$0xf] %v4488_v12  ;;  %v4494_v47 = vpop.permute.xlu1 %4493 }
 0x3e1   : > { %v4497_v27 = vsel %vm4233_vm0, %v18126_v6, %v4494_v47 }
 0x3e2   : > { %4499 = vst [vmem:[#allocation2 + $0x74] sm:$0xf] %v4497_v27  ;;  %v4359_v48 = vpop.permute.xlu0 %4358 }
 0x3e3   : > { %v4362_v50 = vsel %vm4233_vm0, %v18136_v29, %v4359_v48 }
 0x3e4   : > { %4364 = vst [vmem:[#allocation2 + $0x38] sm:$0xf] %v4362_v50  ;;  %v4368_v49 = vpop.permute.xlu1 %4367 }
 0x3e5   : > { %v4371_v51 = vsel %vm4233_vm0, %v18138_v32, %v4368_v49 }
 0x3e6   : > { %4373 = vst [vmem:[#allocation2 + $0x3c] sm:$0xf] %v4371_v51  ;;  %v4503_v52 = vpop.permute.xlu0 %4502 }
 0x3e7   : > { %v4506_v60 = vsel %vm4233_vm0, %v18143_v40, %v4503_v52 }
 0x3e8   : > { %4508 = vst [vmem:[#allocation2 + $0x78] sm:$0xf] %v4506_v60  ;;  %v4512_v54 = vpop.permute.xlu1 %4511 }
 0x3e9   : > { %v4515_v6 = vsel %vm4233_vm0, %v18146_v42, %v4512_v54 }
 0x3ea   : > { %4517 = vst [vmem:[#allocation2 + $0x7c] sm:$0xf] %v4515_v6 }
 0x3eb PF: > { %v14745_v29 = vld [vmem:[%s17823_s27 + $0xe4] ss:$16 sps:$4 sm:$0xff]   ;;  %v14749_v40 = vld [vmem:[%s17823_s27 + $0xe0] ss:$16 sps:$4 sm:$0xff]   ;;  %p14491_p6 = scmp.ne.s32.totalorder %s16681_s8, 1 }
 0x3ec   : > { %v14747_v32 = vld [vmem:[%s17823_s27 + $0x2e4] ss:$16 sps:$4 sm:$0xff]   ;;  %10816 = vmatprep.subr.bf16.mxu0 %v14745_v29  ;;  %v14750_v56 = vld [vmem:[%s17823_s27 + $0x2e0] ss:$16 sps:$4 sm:$0xff]  }
 0x3ed   : > { %10857 = vmatprep.subr.bf16.mxu1 %v14747_v32  ;;  %v14751_v42 = vld [vmem:[%s17823_s27 + $0xc4] ss:$16 sps:$4 sm:$0xff]   ;;  %10817 = vmatpush1.bf16.msra.mxu0 %v14749_v40  ;;  %v14755_v58 = vld [vmem:[%s17823_s27 + $0xc0] ss:$16 sps:$4 sm:$0xff]  }
 0x3ee   : > { %10858 = vmatpush1.bf16.msra.mxu1 %v14750_v56  ;;  %v14753_v57 = vld [vmem:[%s17823_s27 + $0x2c4] ss:$16 sps:$4 sm:$0xff]   ;;  %10818 = vmatprep.subr.bf16.mxu0 %v14751_v42  ;;  %v14756_v59 = vld [vmem:[%s17823_s27 + $0x2c0] ss:$16 sps:$4 sm:$0xff]  }
 0x3ef   : > { %10859 = vmatprep.subr.bf16.mxu1 %v14753_v57  ;;  %v14757_v62 = vld [vmem:[%s17823_s27 + $0xa4] ss:$16 sps:$4 sm:$0xff]   ;;  %v14761_v1 = vld [vmem:[%s17823_s27 + $0xa0] ss:$16 sps:$4 sm:$0xff]  }
 0x3f0   : > { %v14759_v3 = vld [vmem:[%s17823_s27 + $0x2a4] ss:$16 sps:$4 sm:$0xff]   ;;  %v14762_v4 = vld [vmem:[%s17823_s27 + $0x2a0] ss:$16 sps:$4 sm:$0xff]  }
 0x3f1   : > { %10819 = vmatpush1.bf16.msra.mxu0 %v14755_v58  ;;  %v14763_v0 = vld [vmem:[%s17823_s27 + $0x84] ss:$16 sps:$4 sm:$0xff]   ;;  %v14767_v8 = vld [vmem:[%s17823_s27 + $0x80] ss:$16 sps:$4 sm:$0xff]  }
 0x3f2   : > { %10860 = vmatpush1.bf16.msra.mxu1 %v14756_v59  ;;  %10820 = vmatprep.subr.bf16.mxu0 %v14757_v62  ;;  %v14765_v5 = vld [vmem:[%s17823_s27 + $0x284] ss:$16 sps:$4 sm:$0xff]   ;;  %v14768_v7 = vld [vmem:[%s17823_s27 + $0x280] ss:$16 sps:$4 sm:$0xff]  }
 0x3f3   : > { %10861 = vmatprep.subr.bf16.mxu1 %v14759_v3  ;;  %v14769_v30 = vld [vmem:[%s17823_s27 + $0x64] ss:$16 sps:$4 sm:$0xff]   ;;  %v14773_v11 = vld [vmem:[%s17823_s27 + $0x60] ss:$16 sps:$4 sm:$0xff]  }
 0x3f4   : > { %v14771_v20 = vld [vmem:[%s17823_s27 + $0x264] ss:$16 sps:$4 sm:$0xff]   ;;  %v14774_v13 = vld [vmem:[%s17823_s27 + $0x260] ss:$16 sps:$4 sm:$0xff]  }
 0x3f5   : > { %10821 = vmatpush1.bf16.msra.mxu0 %v14761_v1  ;;  %v14775_v37 = vld [vmem:[%s17823_s27 + $0x44] ss:$16 sps:$4 sm:$0xff]   ;;  %v14779_v14 = vld [vmem:[%s17823_s27 + $0x40] ss:$16 sps:$4 sm:$0xff]  }
 0x3f6   : > { %10862 = vmatpush1.bf16.msra.mxu1 %v14762_v4  ;;  %10822 = vmatprep.subr.bf16.mxu0 %v14763_v0  ;;  %v14777_v39 = vld [vmem:[%s17823_s27 + $0x244] ss:$16 sps:$4 sm:$0xff]   ;;  %v14780_v55 = vld [vmem:[%s17823_s27 + $0x240] ss:$16 sps:$4 sm:$0xff]  }
 0x3f7   : > { %10863 = vmatprep.subr.bf16.mxu1 %v14765_v5  ;;  %v14781_v15 = vld [vmem:[%s17823_s27 + $0x24] ss:$16 sps:$4 sm:$0xff]   ;;  %v14785_v17 = vld [vmem:[%s17823_s27 + $0x20] ss:$16 sps:$4 sm:$0xff]  }
 0x3f8   : > { %v14783_v9 = vld [vmem:[%s17823_s27 + $0x224] ss:$16 sps:$4 sm:$0xff]   ;;  %v14786_v10 = vld [vmem:[%s17823_s27 + $0x220] ss:$16 sps:$4 sm:$0xff]  }
 0x3f9   : > { %10823 = vmatpush1.bf16.msra.mxu0 %v14767_v8  ;;  %v14787_v18 = vld [vmem:[%s17823_s27 + $0x4] ss:$16 sps:$4 sm:$0xff]   ;;  %v14791_v19 = vld [vmem:[%s17823_s27] ss:$16 sps:$4 sm:$0xff]  }
 0x3fa   : > { %10864 = vmatpush1.bf16.msra.mxu1 %v14768_v7  ;;  %10824 = vmatprep.subr.bf16.mxu0 %v14769_v30  ;;  %v14789_v16 = vld [vmem:[%s17823_s27 + $0x204] ss:$16 sps:$4 sm:$0xff]   ;;  %v14792_v23 = vld [vmem:[%s17823_s27 + $0x200] ss:$16 sps:$4 sm:$0xff]  }
 0x3fb   : > { %10865 = vmatprep.subr.bf16.mxu1 %v14771_v20  ;;  %v14793_v21 = vld [vmem:[%s17823_s27 + $0x1e4] ss:$16 sps:$4 sm:$0xff]   ;;  %v14797_v25 = vld [vmem:[%s17823_s27 + $0x1e0] ss:$16 sps:$4 sm:$0xff]  }
 0x3fc   : > { %v14795_v44 = vld [vmem:[%s17823_s27 + $0x3e4] ss:$16 sps:$4 sm:$0xff]   ;;  %v14798_v46 = vld [vmem:[%s17823_s27 + $0x3e0] ss:$16 sps:$4 sm:$0xff]  }
 0x3fd   : > { %10825 = vmatpush1.bf16.msra.mxu0 %v14773_v11  ;;  %v14799_v26 = vld [vmem:[%s17823_s27 + $0x1c4] ss:$16 sps:$4 sm:$0xff]   ;;  %v14803_v28 = vld [vmem:[%s17823_s27 + $0x1c0] ss:$16 sps:$4 sm:$0xff]  }
 0x3fe   : > { %10866 = vmatpush1.bf16.msra.mxu1 %v14774_v13  ;;  %10826 = vmatprep.subr.bf16.mxu0 %v14775_v37  ;;  %v14801_v53 = vld [vmem:[%s17823_s27 + $0x3c4] ss:$16 sps:$4 sm:$0xff]   ;;  %v14804_v2 = vld [vmem:[%s17823_s27 + $0x3c0] ss:$16 sps:$4 sm:$0xff]  }
 0x3ff   : > { %10867 = vmatprep.subr.bf16.mxu1 %v14777_v39  ;;  %v14805_v33 = vld [vmem:[%s17823_s27 + $0x1a4] ss:$16 sps:$4 sm:$0xff]   ;;  %v14809_v41 = vld [vmem:[%s17823_s27 + $0x1a0] ss:$16 sps:$4 sm:$0xff]  }
 0x400   : > { %v14807_v22 = vld [vmem:[%s17823_s27 + $0x3a4] ss:$16 sps:$4 sm:$0xff]   ;;  %v14810_v24 = vld [vmem:[%s17823_s27 + $0x3a0] ss:$16 sps:$4 sm:$0xff]  }
 0x401   : > { %10827 = vmatpush1.bf16.msra.mxu0 %v14779_v14  ;;  %v14811_v34 = vld [vmem:[%s17823_s27 + $0x184] ss:$16 sps:$4 sm:$0xff]   ;;  %v14815_v61 = vld [vmem:[%s17823_s27 + $0x180] ss:$16 sps:$4 sm:$0xff]  }
 0x402   : > { %10868 = vmatpush1.bf16.msra.mxu1 %v14780_v55  ;;  %10828 = vmatprep.subr.bf16.mxu0 %v14781_v15  ;;  %v14813_v31 = vld [vmem:[%s17823_s27 + $0x384] ss:$16 sps:$4 sm:$0xff]   ;;  %v14816_v43 = vld [vmem:[%s17823_s27 + $0x380] ss:$16 sps:$4 sm:$0xff]  }
 0x403   : > { %10869 = vmatprep.subr.bf16.mxu1 %v14783_v9  ;;  %v4522_v35 = vld [vmem:[#allocation2] sm:$0xff]  ;;  %v4523_v36 = vld [vmem:[#allocation2 + $0x8] sm:$0xff] }
 0x404   : > { %v18265_v38 = vcombine.high %v4522_v35, %v4522_v35  ;;  %v18269_v63 = vcombine.high %v4523_v36, %v4523_v36  ;;  %v14817_v45 = vld [vmem:[%s17823_s27 + $0x164] ss:$16 sps:$4 sm:$0xff]   ;;  %v14821_v47 = vld [vmem:[%s17823_s27 + $0x160] ss:$16 sps:$4 sm:$0xff]   ;;  %v18291_v58 = vcombine.low %v4522_v35, %v4522_v35  ;;  %v18293_v59 = vcombine.low %v4523_v36, %v4523_v36 }
 0x405   : > { %10829 = vmatpush1.bf16.msra.mxu0 %v14785_v17  ;;  %v14819_v12 = vld [vmem:[%s17823_s27 + $0x364] ss:$16 sps:$4 sm:$0xff]   ;;  %v14822_v27 = vld [vmem:[%s17823_s27 + $0x360] ss:$16 sps:$4 sm:$0xff]  }
 0x406   : > { %10870 = vmatpush1.bf16.msra.mxu1 %v14786_v10  ;;  %10830 = vmatprep.subr.bf16.mxu0 %v14787_v18  ;;  %v14823_v48 = vld [vmem:[%s17823_s27 + $0x144] ss:$16 sps:$4 sm:$0xff]   ;;  %v14827_v49 = vld [vmem:[%s17823_s27 + $0x140] ss:$16 sps:$4 sm:$0xff]  }
 0x407   : > { %10871 = vmatprep.subr.bf16.mxu1 %v14789_v16  ;;  %10848 = vmatprep.mubr.bf16.mxu0 %v18265_v38  ;;  %v14825_v50 = vld [vmem:[%s17823_s27 + $0x344] ss:$16 sps:$4 sm:$0xff]   ;;  %v14828_v51 = vld [vmem:[%s17823_s27 + $0x340] ss:$16 sps:$4 sm:$0xff]  }
 0x408   : > { %10889 = vmatprep.mubr.bf16.mxu1 %v18269_v63  ;;  %v14829_v52 = vld [vmem:[%s17823_s27 + $0x124] ss:$16 sps:$4 sm:$0xff]   ;;  %v14833_v54 = vld [vmem:[%s17823_s27 + $0x120] ss:$16 sps:$4 sm:$0xff]  }
 0x409   : > { %10831 = vmatpush1.bf16.msra.mxu0 %v14791_v19  ;;  %v14831_v60 = vld [vmem:[%s17823_s27 + $0x324] ss:$16 sps:$4 sm:$0xff]   ;;  %v14834_v6 = vld [vmem:[%s17823_s27 + $0x320] ss:$16 sps:$4 sm:$0xff]  }
 0x40a   : > { %10872 = vmatpush1.bf16.msra.mxu1 %v14792_v23  ;;  %10832 = vmatprep.subr.bf16.mxu0 %v14793_v21  ;;  %v14835_v29 = vld [vmem:[%s17823_s27 + $0x104] ss:$16 sps:$4 sm:$0xff]   ;;  %v14839_v40 = vld [vmem:[%s17823_s27 + $0x100] ss:$16 sps:$4 sm:$0xff]  }
 0x40b   : > { %10873 = vmatprep.subr.bf16.mxu1 %v14795_v44  ;;  %v14837_v32 = vld [vmem:[%s17823_s27 + $0x304] ss:$16 sps:$4 sm:$0xff]   ;;  %v14840_v56 = vld [vmem:[%s17823_s27 + $0x300] ss:$16 sps:$4 sm:$0xff]  }
 0x40c   : > { %v14847_v42 = vld [vmem:[%s17823_s27 + $0x4e4] ss:$16 sps:$4 sm:$0xff]   ;;  %v14845_v62 = vld [vmem:[%s17823_s27 + $0x4e0] ss:$16 sps:$4 sm:$0xff]  }
 0x40d   : > { %10833 = vmatpush2.bf16.msra.mxu0 %v14797_v25  ;;  %v14850_v57 = vld [vmem:[%s17823_s27 + $0x6e4] ss:$16 sps:$4 sm:$0xff]   ;;  %v14848_v3 = vld [vmem:[%s17823_s27 + $0x6e0] ss:$16 sps:$4 sm:$0xff]  }
 0x40e   : > { %10874 = vmatpush2.bf16.msra.mxu1 %v14798_v46  ;;  %10834 = vmatprep.subr.bf16.mxu0 %v14799_v26  ;;  %v14853_v1 = vld [vmem:[%s17823_s27 + $0x4c4] ss:$16 sps:$4 sm:$0xff]   ;;  %v14851_v0 = vld [vmem:[%s17823_s27 + $0x4c0] ss:$16 sps:$4 sm:$0xff]  }
 0x40f   : > { %10875 = vmatprep.subr.bf16.mxu1 %v14801_v53  ;;  %v14856_v4 = vld [vmem:[%s17823_s27 + $0x6c4] ss:$16 sps:$4 sm:$0xff]   ;;  %v14854_v5 = vld [vmem:[%s17823_s27 + $0x6c0] ss:$16 sps:$4 sm:$0xff]  }
 0x410   : > { %v14859_v8 = vld [vmem:[%s17823_s27 + $0x4a4] ss:$16 sps:$4 sm:$0xff]   ;;  %v14857_v30 = vld [vmem:[%s17823_s27 + $0x4a0] ss:$16 sps:$4 sm:$0xff]  }
 0x411   : > { %10835 = vmatpush2.bf16.msra.mxu0 %v14803_v28  ;;  %v14862_v7 = vld [vmem:[%s17823_s27 + $0x6a4] ss:$16 sps:$4 sm:$0xff]   ;;  %v14860_v20 = vld [vmem:[%s17823_s27 + $0x6a0] ss:$16 sps:$4 sm:$0xff]  }
 0x412   : > { %10876 = vmatpush2.bf16.msra.mxu1 %v14804_v2  ;;  %10836 = vmatprep.subr.bf16.mxu0 %v14805_v33  ;;  %v14865_v11 = vld [vmem:[%s17823_s27 + $0x484] ss:$16 sps:$4 sm:$0xff]   ;;  %v14863_v37 = vld [vmem:[%s17823_s27 + $0x480] ss:$16 sps:$4 sm:$0xff]  }
 0x413   : > { %10877 = vmatprep.subr.bf16.mxu1 %v14807_v22  ;;  %v14868_v13 = vld [vmem:[%s17823_s27 + $0x684] ss:$16 sps:$4 sm:$0xff]   ;;  %v14866_v39 = vld [vmem:[%s17823_s27 + $0x680] ss:$16 sps:$4 sm:$0xff]  }
 0x414   : > { %v14871_v14 = vld [vmem:[%s17823_s27 + $0x464] ss:$16 sps:$4 sm:$0xff]   ;;  %v14869_v15 = vld [vmem:[%s17823_s27 + $0x460] ss:$16 sps:$4 sm:$0xff]  }
 0x415   : > { %10837 = vmatpush2.bf16.msra.mxu0 %v14809_v41  ;;  %v14874_v55 = vld [vmem:[%s17823_s27 + $0x664] ss:$16 sps:$4 sm:$0xff]   ;;  %v14872_v9 = vld [vmem:[%s17823_s27 + $0x660] ss:$16 sps:$4 sm:$0xff]  }
 0x416   : > { %10878 = vmatpush2.bf16.msra.mxu1 %v14810_v24  ;;  %10838 = vmatprep.subr.bf16.mxu0 %v14811_v34  ;;  %v14877_v17 = vld [vmem:[%s17823_s27 + $0x444] ss:$16 sps:$4 sm:$0xff]   ;;  %v14875_v18 = vld [vmem:[%s17823_s27 + $0x440] ss:$16 sps:$4 sm:$0xff]  }
 0x417   : > { %10879 = vmatprep.subr.bf16.mxu1 %v14813_v31  ;;  %v14880_v10 = vld [vmem:[%s17823_s27 + $0x644] ss:$16 sps:$4 sm:$0xff]   ;;  %v14878_v16 = vld [vmem:[%s17823_s27 + $0x640] ss:$16 sps:$4 sm:$0xff]  }
 0x418   : > { %v14883_v19 = vld [vmem:[%s17823_s27 + $0x424] ss:$16 sps:$4 sm:$0xff]   ;;  %v14881_v25 = vld [vmem:[%s17823_s27 + $0x420] ss:$16 sps:$4 sm:$0xff]  }
 0x419   : > { %10839 = vmatpush2.bf16.msra.mxu0 %v14815_v61  ;;  %v14886_v23 = vld [vmem:[%s17823_s27 + $0x624] ss:$16 sps:$4 sm:$0xff]   ;;  %v14884_v46 = vld [vmem:[%s17823_s27 + $0x620] ss:$16 sps:$4 sm:$0xff]  }
 0x41a   : > { %10880 = vmatpush2.bf16.msra.mxu1 %v14816_v43  ;;  %10840 = vmatprep.subr.bf16.mxu0 %v14817_v45  ;;  %v18321_v21 = vld [vmem:[#allocation2 + $0x10] sm:$0xff]  ;;  %v18323_v44 = vld [vmem:[#allocation2 + $0x18] sm:$0xff] }
 0x41b   : > { %10881 = vmatprep.subr.bf16.mxu1 %v14819_v12  ;;  %v18329_v26 = vcombine.high %v18321_v21, %v18321_v21  ;;  %v18333_v53 = vcombine.high %v18323_v44, %v18323_v44  ;;  %v14889_v28 = vld [vmem:[%s17823_s27 + $0x404] ss:$16 sps:$4 sm:$0xff]   ;;  %v14887_v33 = vld [vmem:[%s17823_s27 + $0x400] ss:$16 sps:$4 sm:$0xff]  }
 0x41c   : > { %v14892_v2 = vld [vmem:[%s17823_s27 + $0x604] ss:$16 sps:$4 sm:$0xff]   ;;  %v14890_v22 = vld [vmem:[%s17823_s27 + $0x600] ss:$16 sps:$4 sm:$0xff]  }
 0x41d   : > { %10841 = vmatpush2.bf16.msra.mxu0 %v14821_v47  ;;  %v14895_v41 = vld [vmem:[%s17823_s27 + $0x5e4] ss:$16 sps:$4 sm:$0xff]   ;;  %v14893_v34 = vld [vmem:[%s17823_s27 + $0x5e0] ss:$16 sps:$4 sm:$0xff]  }
 0x41e   : > { %10882 = vmatpush2.bf16.msra.mxu1 %v14822_v27  ;;  %10842 = vmatprep.subr.bf16.mxu0 %v14823_v48  ;;  %v14898_v24 = vld [vmem:[%s17823_s27 + $0x7e4] ss:$16 sps:$4 sm:$0xff]   ;;  %v14896_v31 = vld [vmem:[%s17823_s27 + $0x7e0] ss:$16 sps:$4 sm:$0xff]  }
 0x41f   : > { %10883 = vmatprep.subr.bf16.mxu1 %v14825_v50  ;;  %v14901_v35 = vld [vmem:[%s17823_s27 + $0x5c4] ss:$16 sps:$4 sm:$0xff]   ;;  %v14899_v61 = vld [vmem:[%s17823_s27 + $0x5c0] ss:$16 sps:$4 sm:$0xff]  }
 0x420   : > { %v14904_v36 = vld [vmem:[%s17823_s27 + $0x7c4] ss:$16 sps:$4 sm:$0xff]   ;;  %v14902_v43 = vld [vmem:[%s17823_s27 + $0x7c0] ss:$16 sps:$4 sm:$0xff]  }
 0x421   : > { %10843 = vmatpush2.bf16.msra.mxu0 %v14827_v49  ;;  %v14907_v45 = vld [vmem:[%s17823_s27 + $0x5a4] ss:$16 sps:$4 sm:$0xff]   ;;  %v14905_v47 = vld [vmem:[%s17823_s27 + $0x5a0] ss:$16 sps:$4 sm:$0xff]  }
 0x422   : > { %10884 = vmatpush2.bf16.msra.mxu1 %v14828_v51  ;;  %10844 = vmatprep.subr.bf16.mxu0 %v14829_v52  ;;  %v14910_v12 = vld [vmem:[%s17823_s27 + $0x7a4] ss:$16 sps:$4 sm:$0xff]   ;;  %v14908_v27 = vld [vmem:[%s17823_s27 + $0x7a0] ss:$16 sps:$4 sm:$0xff]  }
 0x423   : > { %10885 = vmatprep.subr.bf16.mxu1 %v14831_v60  ;;  %v14913_v48 = vld [vmem:[%s17823_s27 + $0x584] ss:$16 sps:$4 sm:$0xff]   ;;  %v14911_v49 = vld [vmem:[%s17823_s27 + $0x580] ss:$16 sps:$4 sm:$0xff]  }
 0x424   : > { %v14916_v50 = vld [vmem:[%s17823_s27 + $0x784] ss:$16 sps:$4 sm:$0xff]   ;;  %v14914_v51 = vld [vmem:[%s17823_s27 + $0x780] ss:$16 sps:$4 sm:$0xff]  }
 0x425   : > { %10845 = vmatpush2.bf16.msra.mxu0 %v14833_v54  ;;  %v14919_v52 = vld [vmem:[%s17823_s27 + $0x564] ss:$16 sps:$4 sm:$0xff]   ;;  %v14917_v54 = vld [vmem:[%s17823_s27 + $0x560] ss:$16 sps:$4 sm:$0xff]  }
 0x426   : > { %10886 = vmatpush2.bf16.msra.mxu1 %v14834_v6  ;;  %10846 = vmatprep.subr.bf16.mxu0 %v14835_v29  ;;  %v14922_v60 = vld [vmem:[%s17823_s27 + $0x764] ss:$16 sps:$4 sm:$0xff]   ;;  %v14920_v6 = vld [vmem:[%s17823_s27 + $0x760] ss:$16 sps:$4 sm:$0xff]  }
 0x427   : > { %10887 = vmatprep.subr.bf16.mxu1 %v14837_v32  ;;  %v14925_v29 = vld [vmem:[%s17823_s27 + $0x544] ss:$16 sps:$4 sm:$0xff]  }
 0x428   : > { %v14928_v32 = vld [vmem:[%s17823_s27 + $0x744] ss:$16 sps:$4 sm:$0xff]  }
 0x429   : > { %10847 = vmatpush2.bf16.msra.mxu0 %v14839_v40  ;;  %v14923_v40 = vld [vmem:[%s17823_s27 + $0x540] ss:$16 sps:$4 sm:$0xff]  }
 0x42a   : > { %10888 = vmatpush2.bf16.msra.mxu1 %v14840_v56  ;;  %10898 = vmatprep.subr.bf16.mxu0 %v14847_v42  ;;  %v14926_v56 = vld [vmem:[%s17823_s27 + $0x740] ss:$16 sps:$4 sm:$0xff]   ;;  %v14931_v42 = vld [vmem:[%s17823_s27 + $0x524] ss:$16 sps:$4 sm:$0xff]  }
 0x42b   : > { %10939 = vmatprep.subr.bf16.mxu1 %v14850_v57  ;;  %v14934_v57 = vld [vmem:[%s17823_s27 + $0x724] ss:$16 sps:$4 sm:$0xff]  }
 0x42c   : > { %10849 = vmatmul.mubr.bf16.vlgmr.msra.gmra.mxu0 %v18291_v58 }
 0x42d   : > { %10890 = vmatmul.mubr.bf16.vlgmr.msra.gmra.mxu1 %v18293_v59  ;;  %10899 = vmatpush1.bf16.msra.mxu0 %v14845_v62  ;;  %v14929_v62 = vld [vmem:[%s17823_s27 + $0x520] ss:$16 sps:$4 sm:$0xff]  }
 0x42e   : > { %10940 = vmatpush1.bf16.msra.mxu1 %v14848_v3  ;;  %10900 = vmatprep.subr.bf16.mxu0 %v14853_v1  ;;  %v14932_v3 = vld [vmem:[%s17823_s27 + $0x720] ss:$16 sps:$4 sm:$0xff]   ;;  %v14937_v1 = vld [vmem:[%s17823_s27 + $0x504] ss:$16 sps:$4 sm:$0xff]  }
 0x42f   : > { %10941 = vmatprep.subr.bf16.mxu1 %v14856_v4  ;;  %10930 = vmatprep.mubr.bf16.mxu0 %v18329_v26  ;;  %v14940_v4 = vld [vmem:[%s17823_s27 + $0x704] ss:$16 sps:$4 sm:$0xff]  }
 0x430   : > { %10971 = vmatprep.mubr.bf16.mxu1 %v18333_v53 }
 0x431   : > { %10901 = vmatpush1.bf16.msra.mxu0 %v14851_v0  ;;  %v14935_v0 = vld [vmem:[%s17823_s27 + $0x500] ss:$16 sps:$4 sm:$0xff]  }
 0x432   : > { %10942 = vmatpush1.bf16.msra.mxu1 %v14854_v5  ;;  %10902 = vmatprep.subr.bf16.mxu0 %v14859_v8  ;;  %v14938_v5 = vld [vmem:[%s17823_s27 + $0x700] ss:$16 sps:$4 sm:$0xff]   ;;  %v14947_v8 = vld [vmem:[%s17823_s27 + $0x8e4] ss:$16 sps:$4 sm:$0xff]  }
 0x433   : > { %10943 = vmatprep.subr.bf16.mxu1 %v14862_v7  ;;  %v14950_v7 = vld [vmem:[%s17823_s27 + $0xae4] ss:$16 sps:$4 sm:$0xff]  }
 0x435   : > { %10903 = vmatpush1.bf16.msra.mxu0 %v14857_v30  ;;  %v18377_v30 = vcombine.low %v18321_v21, %v18321_v21  ;;  %v14965_v21 = vld [vmem:[%s17823_s27 + $0x884] ss:$16 sps:$4 sm:$0xff]  }
 0x436   : > { %10944 = vmatpush1.bf16.msra.mxu1 %v14860_v20  ;;  %10904 = vmatprep.subr.bf16.mxu0 %v14865_v11  ;;  %v18381_v20 = vcombine.low %v18323_v44, %v18323_v44  ;;  %v14945_v11 = vld [vmem:[%s17823_s27 + $0x8e0] ss:$16 sps:$4 sm:$0xff]   ;;  %v14968_v44 = vld [vmem:[%s17823_s27 + $0xa84] ss:$16 sps:$4 sm:$0xff]  }
 0x437   : > { %10945 = vmatprep.subr.bf16.mxu1 %v14868_v13  ;;  %v14948_v13 = vld [vmem:[%s17823_s27 + $0xae0] ss:$16 sps:$4 sm:$0xff]  }
 0x439   : > { %10905 = vmatpush1.bf16.msra.mxu0 %v14863_v37  ;;  %v14953_v37 = vld [vmem:[%s17823_s27 + $0x8c4] ss:$16 sps:$4 sm:$0xff]  }
 0x43a   : > { %10946 = vmatpush1.bf16.msra.mxu1 %v14866_v39  ;;  %10906 = vmatprep.subr.bf16.mxu0 %v14871_v14  ;;  %v14956_v39 = vld [vmem:[%s17823_s27 + $0xac4] ss:$16 sps:$4 sm:$0xff]  }
 0x43b   : > { %10947 = vmatprep.subr.bf16.mxu1 %v14874_v55  ;;  %v18387_v14 = vld [vmem:[#allocation2 + $0x20] sm:$0xff]  ;;  %v18389_v55 = vld [vmem:[#allocation2 + $0x28] sm:$0xff] }
 0x43d   : > { %10907 = vmatpush1.bf16.msra.mxu0 %v14869_v15  ;;  %v18393_v15 = vcombine.high %v18387_v14, %v18387_v14 }
 0x43e   : > { %10948 = vmatpush1.bf16.msra.mxu1 %v14872_v9  ;;  %10908 = vmatprep.subr.bf16.mxu0 %v14877_v17  ;;  %v18397_v9 = vcombine.high %v18389_v55, %v18389_v55  ;;  %v14951_v17 = vld [vmem:[%s17823_s27 + $0x8c0] ss:$16 sps:$4 sm:$0xff]  }
 0x43f   : > { %10949 = vmatprep.subr.bf16.mxu1 %v14880_v10  ;;  %v14954_v10 = vld [vmem:[%s17823_s27 + $0xac0] ss:$16 sps:$4 sm:$0xff]  }
 0x441   : > { %10909 = vmatpush1.bf16.msra.mxu0 %v14875_v18  ;;  %v14959_v18 = vld [vmem:[%s17823_s27 + $0x8a4] ss:$16 sps:$4 sm:$0xff]  }
 0x442   : > { %10950 = vmatpush1.bf16.msra.mxu1 %v14878_v16  ;;  %10910 = vmatprep.subr.bf16.mxu0 %v14883_v19  ;;  %v14962_v16 = vld [vmem:[%s17823_s27 + $0xaa4] ss:$16 sps:$4 sm:$0xff]   ;;  %v14957_v19 = vld [vmem:[%s17823_s27 + $0x8a0] ss:$16 sps:$4 sm:$0xff]  }
 0x443   : > { %10951 = vmatprep.subr.bf16.mxu1 %v14886_v23  ;;  %v14960_v23 = vld [vmem:[%s17823_s27 + $0xaa0] ss:$16 sps:$4 sm:$0xff]  }
 0x445   : > { %10911 = vmatpush1.bf16.msra.mxu0 %v14881_v25  ;;  %v14963_v25 = vld [vmem:[%s17823_s27 + $0x880] ss:$16 sps:$4 sm:$0xff]  }
 0x446   : > { %10952 = vmatpush1.bf16.msra.mxu1 %v14884_v46  ;;  %10912 = vmatprep.subr.bf16.mxu0 %v14889_v28  ;;  %v14966_v46 = vld [vmem:[%s17823_s27 + $0xa80] ss:$16 sps:$4 sm:$0xff]   ;;  %v14971_v28 = vld [vmem:[%s17823_s27 + $0x864] ss:$16 sps:$4 sm:$0xff]  }
 0x447   : > { %10953 = vmatprep.subr.bf16.mxu1 %v14892_v2  ;;  %v14974_v2 = vld [vmem:[%s17823_s27 + $0xa64] ss:$16 sps:$4 sm:$0xff]  }
 0x449   : > { %10913 = vmatpush1.bf16.msra.mxu0 %v14887_v33  ;;  %v14969_v33 = vld [vmem:[%s17823_s27 + $0x860] ss:$16 sps:$4 sm:$0xff]  }
 0x44a   : > { %10954 = vmatpush1.bf16.msra.mxu1 %v14890_v22  ;;  %10914 = vmatprep.subr.bf16.mxu0 %v14895_v41  ;;  %v14972_v22 = vld [vmem:[%s17823_s27 + $0xa60] ss:$16 sps:$4 sm:$0xff]   ;;  %v14977_v41 = vld [vmem:[%s17823_s27 + $0x844] ss:$16 sps:$4 sm:$0xff]  }
 0x44b   : > { %10955 = vmatprep.subr.bf16.mxu1 %v14898_v24  ;;  %v14980_v24 = vld [vmem:[%s17823_s27 + $0xa44] ss:$16 sps:$4 sm:$0xff]  }
 0x44d   : > { %10915 = vmatpush2.bf16.msra.mxu0 %v14893_v34  ;;  %v14975_v34 = vld [vmem:[%s17823_s27 + $0x840] ss:$16 sps:$4 sm:$0xff]  }
 0x44e   : > { %10956 = vmatpush2.bf16.msra.mxu1 %v14896_v31  ;;  %10916 = vmatprep.subr.bf16.mxu0 %v14901_v35  ;;  %v14978_v31 = vld [vmem:[%s17823_s27 + $0xa40] ss:$16 sps:$4 sm:$0xff]   ;;  %v14983_v35 = vld [vmem:[%s17823_s27 + $0x824] ss:$16 sps:$4 sm:$0xff]  }
 0x44f   : > { %10957 = vmatprep.subr.bf16.mxu1 %v14904_v36  ;;  %v14986_v36 = vld [vmem:[%s17823_s27 + $0xa24] ss:$16 sps:$4 sm:$0xff]  }
 0x451   : > { %10917 = vmatpush2.bf16.msra.mxu0 %v14899_v61  ;;  %v14981_v61 = vld [vmem:[%s17823_s27 + $0x820] ss:$16 sps:$4 sm:$0xff]  }
 0x452   : > { %10958 = vmatpush2.bf16.msra.mxu1 %v14902_v43  ;;  %10918 = vmatprep.subr.bf16.mxu0 %v14907_v45  ;;  %v14984_v43 = vld [vmem:[%s17823_s27 + $0xa20] ss:$16 sps:$4 sm:$0xff]   ;;  %v14989_v45 = vld [vmem:[%s17823_s27 + $0x804] ss:$16 sps:$4 sm:$0xff]  }
 0x453   : > { %10959 = vmatprep.subr.bf16.mxu1 %v14910_v12  ;;  %v14992_v12 = vld [vmem:[%s17823_s27 + $0xa04] ss:$16 sps:$4 sm:$0xff]  }
 0x455   : > { %10919 = vmatpush2.bf16.msra.mxu0 %v14905_v47  ;;  %v14987_v47 = vld [vmem:[%s17823_s27 + $0x800] ss:$16 sps:$4 sm:$0xff]  }
 0x456   : > { %10960 = vmatpush2.bf16.msra.mxu1 %v14908_v27  ;;  %10920 = vmatprep.subr.bf16.mxu0 %v14913_v48  ;;  %v14990_v27 = vld [vmem:[%s17823_s27 + $0xa00] ss:$16 sps:$4 sm:$0xff]   ;;  %v14995_v48 = vld [vmem:[%s17823_s27 + $0x9e4] ss:$16 sps:$4 sm:$0xff]  }
 0x457   : > { %10961 = vmatprep.subr.bf16.mxu1 %v14916_v50  ;;  %v14998_v50 = vld [vmem:[%s17823_s27 + $0xbe4] ss:$16 sps:$4 sm:$0xff]  }
 0x459   : > { %10921 = vmatpush2.bf16.msra.mxu0 %v14911_v49  ;;  %v14993_v49 = vld [vmem:[%s17823_s27 + $0x9e0] ss:$16 sps:$4 sm:$0xff]  }
 0x45a   : > { %10962 = vmatpush2.bf16.msra.mxu1 %v14914_v51  ;;  %10922 = vmatprep.subr.bf16.mxu0 %v14919_v52  ;;  %v14996_v51 = vld [vmem:[%s17823_s27 + $0xbe0] ss:$16 sps:$4 sm:$0xff]   ;;  %v15001_v52 = vld [vmem:[%s17823_s27 + $0x9c4] ss:$16 sps:$4 sm:$0xff]  }
 0x45b   : > { %10963 = vmatprep.subr.bf16.mxu1 %v14922_v60  ;;  %v15004_v60 = vld [vmem:[%s17823_s27 + $0xbc4] ss:$16 sps:$4 sm:$0xff]  }
 0x45d   : > { %10923 = vmatpush2.bf16.msra.mxu0 %v14917_v54  ;;  %v14999_v54 = vld [vmem:[%s17823_s27 + $0x9c0] ss:$16 sps:$4 sm:$0xff]  }
 0x45e   : > { %10964 = vmatpush2.bf16.msra.mxu1 %v14920_v6  ;;  %10924 = vmatprep.subr.bf16.mxu0 %v14925_v29  ;;  %v15002_v6 = vld [vmem:[%s17823_s27 + $0xbc0] ss:$16 sps:$4 sm:$0xff]   ;;  %v15007_v29 = vld [vmem:[%s17823_s27 + $0x9a4] ss:$16 sps:$4 sm:$0xff]  }
 0x45f   : > { %10965 = vmatprep.subr.bf16.mxu1 %v14928_v32  ;;  %v15010_v32 = vld [vmem:[%s17823_s27 + $0xba4] ss:$16 sps:$4 sm:$0xff]  }
 0x461   : > { %10925 = vmatpush2.bf16.msra.mxu0 %v14923_v40  ;;  %v15005_v40 = vld [vmem:[%s17823_s27 + $0x9a0] ss:$16 sps:$4 sm:$0xff]  }
 0x462   : > { %10966 = vmatpush2.bf16.msra.mxu1 %v14926_v56  ;;  %10926 = vmatprep.subr.bf16.mxu0 %v14931_v42  ;;  %v15008_v56 = vld [vmem:[%s17823_s27 + $0xba0] ss:$16 sps:$4 sm:$0xff]   ;;  %v15013_v42 = vld [vmem:[%s17823_s27 + $0x984] ss:$16 sps:$4 sm:$0xff]  }
 0x463   : > { %10967 = vmatprep.subr.bf16.mxu1 %v14934_v57  ;;  %v15016_v57 = vld [vmem:[%s17823_s27 + $0xb84] ss:$16 sps:$4 sm:$0xff]  }
 0x465   : > { %10927 = vmatpush2.bf16.msra.mxu0 %v14929_v62  ;;  %v15011_v62 = vld [vmem:[%s17823_s27 + $0x980] ss:$16 sps:$4 sm:$0xff]  }
 0x466   : > { %10968 = vmatpush2.bf16.msra.mxu1 %v14932_v3  ;;  %10928 = vmatprep.subr.bf16.mxu0 %v14937_v1  ;;  %v15014_v3 = vld [vmem:[%s17823_s27 + $0xb80] ss:$16 sps:$4 sm:$0xff]   ;;  %v15019_v1 = vld [vmem:[%s17823_s27 + $0x964] ss:$16 sps:$4 sm:$0xff]  }
 0x467   : > { %10969 = vmatprep.subr.bf16.mxu1 %v14940_v4  ;;  %v15022_v4 = vld [vmem:[%s17823_s27 + $0xb64] ss:$16 sps:$4 sm:$0xff]  }
 0x469   : > { %10929 = vmatpush2.bf16.msra.mxu0 %v14935_v0  ;;  %v15017_v0 = vld [vmem:[%s17823_s27 + $0x960] ss:$16 sps:$4 sm:$0xff]  }
 0x46a   : > { %10970 = vmatpush2.bf16.msra.mxu1 %v14938_v5  ;;  %10980 = vmatprep.subr.bf16.mxu0 %v14947_v8  ;;  %v15020_v5 = vld [vmem:[%s17823_s27 + $0xb60] ss:$16 sps:$4 sm:$0xff]   ;;  %v15025_v8 = vld [vmem:[%s17823_s27 + $0x944] ss:$16 sps:$4 sm:$0xff]  }
 0x46b   : > { %11021 = vmatprep.subr.bf16.mxu1 %v14950_v7  ;;  %v15028_v7 = vld [vmem:[%s17823_s27 + $0xb44] ss:$16 sps:$4 sm:$0xff]  }
 0x46c   : > { %10931 = vmatmul.mubr.bf16.vlgmr.msra.gmra.mxu0 %v18377_v30 }
 0x46d   : > { %10972 = vmatmul.mubr.bf16.vlgmr.msra.gmra.mxu1 %v18381_v20  ;;  %10981 = vmatpush1.bf16.msra.mxu0 %v14945_v11  ;;  %v15023_v11 = vld [vmem:[%s17823_s27 + $0x940] ss:$16 sps:$4 sm:$0xff]  }
 0x46e   : > { %11022 = vmatpush1.bf16.msra.mxu1 %v14948_v13  ;;  %10982 = vmatprep.subr.bf16.mxu0 %v14953_v37  ;;  %v15026_v13 = vld [vmem:[%s17823_s27 + $0xb40] ss:$16 sps:$4 sm:$0xff]   ;;  %v15031_v37 = vld [vmem:[%s17823_s27 + $0x924] ss:$16 sps:$4 sm:$0xff]  }
 0x46f   : > { %11023 = vmatprep.subr.bf16.mxu1 %v14956_v39  ;;  %11012 = vmatprep.mubr.bf16.mxu0 %v18393_v15  ;;  %v15034_v39 = vld [vmem:[%s17823_s27 + $0xb24] ss:$16 sps:$4 sm:$0xff]  }
 0x470   : > { %11053 = vmatprep.mubr.bf16.mxu1 %v18397_v9 }
 0x471   : > { %10983 = vmatpush1.bf16.msra.mxu0 %v14951_v17  ;;  %v15029_v17 = vld [vmem:[%s17823_s27 + $0x920] ss:$16 sps:$4 sm:$0xff]  }
 0x472   : > { %11024 = vmatpush1.bf16.msra.mxu1 %v14954_v10  ;;  %10984 = vmatprep.subr.bf16.mxu0 %v14959_v18  ;;  %v15032_v10 = vld [vmem:[%s17823_s27 + $0xb20] ss:$16 sps:$4 sm:$0xff]   ;;  %v15037_v18 = vld [vmem:[%s17823_s27 + $0x904] ss:$16 sps:$4 sm:$0xff]  }
 0x473   : > { %11025 = vmatprep.subr.bf16.mxu1 %v14962_v16  ;;  %v15040_v16 = vld [vmem:[%s17823_s27 + $0xb04] ss:$16 sps:$4 sm:$0xff]  }
 0x475   : > { %10985 = vmatpush1.bf16.msra.mxu0 %v14957_v19  ;;  %v15035_v19 = vld [vmem:[%s17823_s27 + $0x900] ss:$16 sps:$4 sm:$0xff]  }
 0x476   : > { %11026 = vmatpush1.bf16.msra.mxu1 %v14960_v23  ;;  %10986 = vmatprep.subr.bf16.mxu0 %v14965_v21  ;;  %v15038_v23 = vld [vmem:[%s17823_s27 + $0xb00] ss:$16 sps:$4 sm:$0xff]   ;;  %v15047_v21 = vld [vmem:[%s17823_s27 + $0xce4] ss:$16 sps:$4 sm:$0xff]  }
 0x477   : > { %11027 = vmatprep.subr.bf16.mxu1 %v14968_v44  ;;  %v15050_v44 = vld [vmem:[%s17823_s27 + $0xee4] ss:$16 sps:$4 sm:$0xff]  }
 0x479   : > { %10987 = vmatpush1.bf16.msra.mxu0 %v14963_v25  ;;  %v15045_v25 = vld [vmem:[%s17823_s27 + $0xce0] ss:$16 sps:$4 sm:$0xff]  }
 0x47a   : > { %11028 = vmatpush1.bf16.msra.mxu1 %v14966_v46  ;;  %10988 = vmatprep.subr.bf16.mxu0 %v14971_v28  ;;  %v18464_v46 = vld [vmem:[#allocation2 + $0x30] sm:$0xff]  ;;  %v18468_v28 = vcombine.low %v18387_v14, %v18387_v14 }
 0x47b   : > { %11029 = vmatprep.subr.bf16.mxu1 %v14974_v2  ;;  %v18472_v2 = vcombine.low %v18389_v55, %v18389_v55  ;;  %v18481_v14 = vcombine.high %v18464_v46, %v18464_v46 }
 0x47d   : > { %10989 = vmatpush1.bf16.msra.mxu0 %v14969_v33  ;;  %v18474_v33 = vld [vmem:[#allocation2 + $0x38] sm:$0xff] }
 0x47e   : > { %11030 = vmatpush1.bf16.msra.mxu1 %v14972_v22  ;;  %10990 = vmatprep.subr.bf16.mxu0 %v14977_v41  ;;  %v15048_v22 = vld [vmem:[%s17823_s27 + $0xee0] ss:$16 sps:$4 sm:$0xff]   ;;  %v15053_v41 = vld [vmem:[%s17823_s27 + $0xcc4] ss:$16 sps:$4 sm:$0xff]   ;;  %v18485_v55 = vcombine.high %v18474_v33, %v18474_v33 }
 0x47f   : > { %11031 = vmatprep.subr.bf16.mxu1 %v14980_v24  ;;  %v15056_v24 = vld [vmem:[%s17823_s27 + $0xec4] ss:$16 sps:$4 sm:$0xff]  }
 0x481   : > { %10991 = vmatpush1.bf16.msra.mxu0 %v14975_v34  ;;  %v15051_v34 = vld [vmem:[%s17823_s27 + $0xcc0] ss:$16 sps:$4 sm:$0xff]  }
 0x482   : > { %11032 = vmatpush1.bf16.msra.mxu1 %v14978_v31  ;;  %10992 = vmatprep.subr.bf16.mxu0 %v14983_v35  ;;  %v15054_v31 = vld [vmem:[%s17823_s27 + $0xec0] ss:$16 sps:$4 sm:$0xff]   ;;  %v15059_v35 = vld [vmem:[%s17823_s27 + $0xca4] ss:$16 sps:$4 sm:$0xff]  }
 0x483   : > { %11033 = vmatprep.subr.bf16.mxu1 %v14986_v36  ;;  %v15062_v36 = vld [vmem:[%s17823_s27 + $0xea4] ss:$16 sps:$4 sm:$0xff]  }
 0x485   : > { %10993 = vmatpush1.bf16.msra.mxu0 %v14981_v61  ;;  %v15057_v61 = vld [vmem:[%s17823_s27 + $0xca0] ss:$16 sps:$4 sm:$0xff]  }
 0x486   : > { %11034 = vmatpush1.bf16.msra.mxu1 %v14984_v43  ;;  %10994 = vmatprep.subr.bf16.mxu0 %v14989_v45  ;;  %v15060_v43 = vld [vmem:[%s17823_s27 + $0xea0] ss:$16 sps:$4 sm:$0xff]   ;;  %v15065_v45 = vld [vmem:[%s17823_s27 + $0xc84] ss:$16 sps:$4 sm:$0xff]  }
 0x487   : > { %11035 = vmatprep.subr.bf16.mxu1 %v14992_v12  ;;  %v15068_v12 = vld [vmem:[%s17823_s27 + $0xe84] ss:$16 sps:$4 sm:$0xff]  }
 0x489   : > { %10995 = vmatpush1.bf16.msra.mxu0 %v14987_v47  ;;  %v15063_v47 = vld [vmem:[%s17823_s27 + $0xc80] ss:$16 sps:$4 sm:$0xff]  }
 0x48a   : > { %11036 = vmatpush1.bf16.msra.mxu1 %v14990_v27  ;;  %10996 = vmatprep.subr.bf16.mxu0 %v14995_v48  ;;  %v15066_v27 = vld [vmem:[%s17823_s27 + $0xe80] ss:$16 sps:$4 sm:$0xff]   ;;  %v15071_v48 = vld [vmem:[%s17823_s27 + $0xc64] ss:$16 sps:$4 sm:$0xff]  }
 0x48b   : > { %11037 = vmatprep.subr.bf16.mxu1 %v14998_v50  ;;  %v15074_v50 = vld [vmem:[%s17823_s27 + $0xe64] ss:$16 sps:$4 sm:$0xff]  }
 0x48d   : > { %10997 = vmatpush2.bf16.msra.mxu0 %v14993_v49  ;;  %v15069_v49 = vld [vmem:[%s17823_s27 + $0xc60] ss:$16 sps:$4 sm:$0xff]  }
 0x48e   : > { %11038 = vmatpush2.bf16.msra.mxu1 %v14996_v51  ;;  %10998 = vmatprep.subr.bf16.mxu0 %v15001_v52  ;;  %v15072_v51 = vld [vmem:[%s17823_s27 + $0xe60] ss:$16 sps:$4 sm:$0xff]   ;;  %v15077_v52 = vld [vmem:[%s17823_s27 + $0xc44] ss:$16 sps:$4 sm:$0xff]  }
 0x48f   : > { %11039 = vmatprep.subr.bf16.mxu1 %v15004_v60  ;;  %v15080_v60 = vld [vmem:[%s17823_s27 + $0xe44] ss:$16 sps:$4 sm:$0xff]  }
 0x491   : > { %10999 = vmatpush2.bf16.msra.mxu0 %v14999_v54  ;;  %v15075_v54 = vld [vmem:[%s17823_s27 + $0xc40] ss:$16 sps:$4 sm:$0xff]  }
 0x492   : > { %11040 = vmatpush2.bf16.msra.mxu1 %v15002_v6  ;;  %11000 = vmatprep.subr.bf16.mxu0 %v15007_v29  ;;  %v15078_v6 = vld [vmem:[%s17823_s27 + $0xe40] ss:$16 sps:$4 sm:$0xff]   ;;  %v15083_v29 = vld [vmem:[%s17823_s27 + $0xc24] ss:$16 sps:$4 sm:$0xff]  }
 0x493   : > { %11041 = vmatprep.subr.bf16.mxu1 %v15010_v32  ;;  %v15086_v32 = vld [vmem:[%s17823_s27 + $0xe24] ss:$16 sps:$4 sm:$0xff]  }
 0x495   : > { %11001 = vmatpush2.bf16.msra.mxu0 %v15005_v40  ;;  %v15081_v40 = vld [vmem:[%s17823_s27 + $0xc20] ss:$16 sps:$4 sm:$0xff]  }
 0x496   : > { %11042 = vmatpush2.bf16.msra.mxu1 %v15008_v56  ;;  %11002 = vmatprep.subr.bf16.mxu0 %v15013_v42  ;;  %v15084_v56 = vld [vmem:[%s17823_s27 + $0xe20] ss:$16 sps:$4 sm:$0xff]   ;;  %v15089_v42 = vld [vmem:[%s17823_s27 + $0xc04] ss:$16 sps:$4 sm:$0xff]  }
 0x497   : > { %11043 = vmatprep.subr.bf16.mxu1 %v15016_v57  ;;  %v15092_v57 = vld [vmem:[%s17823_s27 + $0xe04] ss:$16 sps:$4 sm:$0xff]  }
 0x499   : > { %11003 = vmatpush2.bf16.msra.mxu0 %v15011_v62  ;;  %v15087_v62 = vld [vmem:[%s17823_s27 + $0xc00] ss:$16 sps:$4 sm:$0xff]  }
 0x49a   : > { %11044 = vmatpush2.bf16.msra.mxu1 %v15014_v3  ;;  %11004 = vmatprep.subr.bf16.mxu0 %v15019_v1  ;;  %v15090_v3 = vld [vmem:[%s17823_s27 + $0xe00] ss:$16 sps:$4 sm:$0xff]   ;;  %v15095_v1 = vld [vmem:[%s17823_s27 + $0xde4] ss:$16 sps:$4 sm:$0xff]  }
 0x49b   : > { %11045 = vmatprep.subr.bf16.mxu1 %v15022_v4  ;;  %v15098_v4 = vld [vmem:[%s17823_s27 + $0xfe4] ss:$16 sps:$4 sm:$0xff]  }
 0x49d   : > { %11005 = vmatpush2.bf16.msra.mxu0 %v15017_v0  ;;  %v15093_v0 = vld [vmem:[%s17823_s27 + $0xde0] ss:$16 sps:$4 sm:$0xff]  }
 0x49e   : > { %11046 = vmatpush2.bf16.msra.mxu1 %v15020_v5  ;;  %11006 = vmatprep.subr.bf16.mxu0 %v15025_v8  ;;  %v15096_v5 = vld [vmem:[%s17823_s27 + $0xfe0] ss:$16 sps:$4 sm:$0xff]   ;;  %v15101_v8 = vld [vmem:[%s17823_s27 + $0xdc4] ss:$16 sps:$4 sm:$0xff]  }
 0x49f   : > { %11047 = vmatprep.subr.bf16.mxu1 %v15028_v7  ;;  %v15104_v7 = vld [vmem:[%s17823_s27 + $0xfc4] ss:$16 sps:$4 sm:$0xff]  }
 0x4a1   : > { %11007 = vmatpush2.bf16.msra.mxu0 %v15023_v11  ;;  %v15099_v11 = vld [vmem:[%s17823_s27 + $0xdc0] ss:$16 sps:$4 sm:$0xff]  }
 0x4a2   : > { %11048 = vmatpush2.bf16.msra.mxu1 %v15026_v13  ;;  %11008 = vmatprep.subr.bf16.mxu0 %v15031_v37  ;;  %v15102_v13 = vld [vmem:[%s17823_s27 + $0xfc0] ss:$16 sps:$4 sm:$0xff]   ;;  %v15107_v37 = vld [vmem:[%s17823_s27 + $0xda4] ss:$16 sps:$4 sm:$0xff]  }
 0x4a3   : > { %11049 = vmatprep.subr.bf16.mxu1 %v15034_v39  ;;  %v15110_v39 = vld [vmem:[%s17823_s27 + $0xfa4] ss:$16 sps:$4 sm:$0xff]  }
 0x4a5   : > { %11009 = vmatpush2.bf16.msra.mxu0 %v15029_v17  ;;  %v15105_v17 = vld [vmem:[%s17823_s27 + $0xda0] ss:$16 sps:$4 sm:$0xff]  }
 0x4a6   : > { %11050 = vmatpush2.bf16.msra.mxu1 %v15032_v10  ;;  %11010 = vmatprep.subr.bf16.mxu0 %v15037_v18  ;;  %v15108_v10 = vld [vmem:[%s17823_s27 + $0xfa0] ss:$16 sps:$4 sm:$0xff]   ;;  %v15113_v18 = vld [vmem:[%s17823_s27 + $0xd84] ss:$16 sps:$4 sm:$0xff]  }
 0x4a7   : > { %11051 = vmatprep.subr.bf16.mxu1 %v15040_v16  ;;  %v15116_v16 = vld [vmem:[%s17823_s27 + $0xf84] ss:$16 sps:$4 sm:$0xff]  }
 0x4a9   : > { %11011 = vmatpush2.bf16.msra.mxu0 %v15035_v19  ;;  %v15111_v19 = vld [vmem:[%s17823_s27 + $0xd80] ss:$16 sps:$4 sm:$0xff]  }
 0x4aa   : > { %11052 = vmatpush2.bf16.msra.mxu1 %v15038_v23  ;;  %11062 = vmatprep.subr.bf16.mxu0 %v15047_v21  ;;  %v15114_v23 = vld [vmem:[%s17823_s27 + $0xf80] ss:$16 sps:$4 sm:$0xff]   ;;  %v15119_v21 = vld [vmem:[%s17823_s27 + $0xd64] ss:$16 sps:$4 sm:$0xff]  }
 0x4ab   : > { %11103 = vmatprep.subr.bf16.mxu1 %v15050_v44  ;;  %v15122_v44 = vld [vmem:[%s17823_s27 + $0xf64] ss:$16 sps:$4 sm:$0xff]  }
 0x4ac   : > { %11013 = vmatmul.mubr.bf16.vlgmr.msra.gmra.mxu0 %v18468_v28 }
 0x4ad   : > { %11054 = vmatmul.mubr.bf16.vlgmr.msra.gmra.mxu1 %v18472_v2  ;;  %11063 = vmatpush1.bf16.msra.mxu0 %v15045_v25  ;;  %v15117_v25 = vld [vmem:[%s17823_s27 + $0xd60] ss:$16 sps:$4 sm:$0xff]  }
 0x4ae   : > { %11104 = vmatpush1.bf16.msra.mxu1 %v15048_v22  ;;  %11064 = vmatprep.subr.bf16.mxu0 %v15053_v41  ;;  %v15120_v22 = vld [vmem:[%s17823_s27 + $0xf60] ss:$16 sps:$4 sm:$0xff]   ;;  %v15125_v41 = vld [vmem:[%s17823_s27 + $0xd44] ss:$16 sps:$4 sm:$0xff]  }
 0x4af   : > { %11105 = vmatprep.subr.bf16.mxu1 %v15056_v24  ;;  %11094 = vmatprep.mubr.bf16.mxu0 %v18481_v14  ;;  %v15128_v24 = vld [vmem:[%s17823_s27 + $0xf44] ss:$16 sps:$4 sm:$0xff]  }
 0x4b0   : > { %11135 = vmatprep.mubr.bf16.mxu1 %v18485_v55 }
 0x4b1   : > { %11065 = vmatpush1.bf16.msra.mxu0 %v15051_v34  ;;  %v15123_v34 = vld [vmem:[%s17823_s27 + $0xd40] ss:$16 sps:$4 sm:$0xff]  }
 0x4b2   : > { %11106 = vmatpush1.bf16.msra.mxu1 %v15054_v31  ;;  %11066 = vmatprep.subr.bf16.mxu0 %v15059_v35  ;;  %v15126_v31 = vld [vmem:[%s17823_s27 + $0xf40] ss:$16 sps:$4 sm:$0xff]   ;;  %v15131_v35 = vld [vmem:[%s17823_s27 + $0xd24] ss:$16 sps:$4 sm:$0xff]  }
 0x4b3   : > { %11107 = vmatprep.subr.bf16.mxu1 %v15062_v36  ;;  %v5564_v36 = vlaneseq }
 0x4b5   : > { %11067 = vmatpush1.bf16.msra.mxu0 %v15057_v61  ;;  %v15134_v61 = vld [vmem:[%s17823_s27 + $0xf24] ss:$16 sps:$4 sm:$0xff]  }
 0x4b6   : > { %11108 = vmatpush1.bf16.msra.mxu1 %v15060_v43  ;;  %11068 = vmatprep.subr.bf16.mxu0 %v15065_v45  ;;  %v15129_v43 = vld [vmem:[%s17823_s27 + $0xd20] ss:$16 sps:$4 sm:$0xff]  }
 0x4b7   : > { %11109 = vmatprep.subr.bf16.mxu1 %v15068_v12  ;;  %v15132_v45 = vld [vmem:[%s17823_s27 + $0xf20] ss:$16 sps:$4 sm:$0xff]   ;;  %v15137_v12 = vld [vmem:[%s17823_s27 + $0xd04] ss:$16 sps:$4 sm:$0xff]  }
 0x4b9   : > { %11069 = vmatpush1.bf16.msra.mxu0 %v15063_v47  ;;  %v18546_v47 = vshrl.u32 %v5564_v36, 7  ;;  %v15169_v36 = vld [vmem:[%s17823_s27 + $0x1060] ss:$16 sps:$4 sm:$0xff]  }
 0x4ba   : > { %11110 = vmatpush1.bf16.msra.mxu1 %v15066_v27  ;;  %11070 = vmatprep.subr.bf16.mxu0 %v15071_v48  ;;  %v15140_v27 = vld [vmem:[%s17823_s27 + $0xf04] ss:$16 sps:$4 sm:$0xff]   ;;  %v15135_v48 = vld [vmem:[%s17823_s27 + $0xd00] ss:$16 sps:$4 sm:$0xff]  }
 0x4bb   : > { %11111 = vmatprep.subr.bf16.mxu1 %v15074_v50  ;;  %v15138_v50 = vld [vmem:[%s17823_s27 + $0xf00] ss:$16 sps:$4 sm:$0xff]  }
 0x4bd   : > { %11071 = vmatpush1.bf16.msra.mxu0 %v15069_v49  ;;  %v5562_v49 = vld [vmem:[%s17835_s11] sm:$0xf] }
 0x4be   : > { %11112 = vmatpush1.bf16.msra.mxu1 %v15072_v51  ;;  %11072 = vmatprep.subr.bf16.mxu0 %v15077_v52  ;;  %v18553_v51 = vsub.s32 0, %v18546_v47  ;;  %v15147_v52 = vld [vmem:[%s17823_s27 + $0x10e4] ss:$16 sps:$4 sm:$0xff]  }
 0x4bf   : > { %11113 = vmatprep.subr.bf16.mxu1 %v15080_v60  ;;  %v15150_v60 = vld [vmem:[%s17823_s27 + $0x12e4] ss:$16 sps:$4 sm:$0xff]  }
 0x4c1   : > { %11073 = vmatpush1.bf16.msra.mxu0 %v15075_v54  ;;  %v15145_v54 = vld [vmem:[%s17823_s27 + $0x10e0] ss:$16 sps:$4 sm:$0xff]  }
 0x4c2   : > { %11114 = vmatpush1.bf16.msra.mxu1 %v15078_v6  ;;  %11074 = vmatprep.subr.bf16.mxu0 %v15083_v29  ;;  %v18559_v6 = vsub.s32 1, %v18546_v47  ;;  %v18563_v29 = vcombine.low %v18464_v46, %v18464_v46  ;;  %v15156_v46 = vld [vmem:[%s17823_s27 + $0x12c4] ss:$16 sps:$4 sm:$0xff]  }
 0x4c3   : > { %11115 = vmatprep.subr.bf16.mxu1 %v15086_v32  ;;  %v18567_v32 = vcombine.low %v18474_v33, %v18474_v33 }
 0x4c5   : > { %11075 = vmatpush1.bf16.msra.mxu0 %v15081_v40  ;;  %v18569_v40 = vld [vmem:[#allocation2 + $0x40] sm:$0xff] }
 0x4c6   : > { %11116 = vmatpush1.bf16.msra.mxu1 %v15084_v56  ;;  %11076 = vmatprep.subr.bf16.mxu0 %v15089_v42  ;;  %v18571_v56 = vld [vmem:[#allocation2 + $0x48] sm:$0xff]  ;;  %v5567_v42 = vrot.slane %v5562_v49, %v18553_v51  ;;  %v18580_v33 = vcombine.high %v18569_v40, %v18569_v40 }
 0x4c7   : > { %11117 = vmatprep.subr.bf16.mxu1 %v15092_v57  ;;  %v15148_v57 = vld [vmem:[%s17823_s27 + $0x12e0] ss:$16 sps:$4 sm:$0xff]  }
 0x4c9   : > { %11077 = vmatpush1.bf16.msra.mxu0 %v15087_v62  ;;  %v15153_v62 = vld [vmem:[%s17823_s27 + $0x10c4] ss:$16 sps:$4 sm:$0xff]  }
 0x4ca   : > { %11118 = vmatpush1.bf16.msra.mxu1 %v15090_v3  ;;  %11078 = vmatprep.subr.bf16.mxu0 %v15095_v1  ;;  %v5571_v3 = vrot.slane %v5562_v49, %v18559_v6  ;;  %v18584_v1 = vcombine.high %v18571_v56, %v18571_v56  ;;  %v15181_v49 = vld [vmem:[%s17823_s27 + $0x1020] ss:$16 sps:$4 sm:$0xff]  }
 0x4cb   : > { %11119 = vmatprep.subr.bf16.mxu1 %v15098_v4 }
 0x4cd   : > { %11079 = vmatpush2.bf16.msra.mxu0 %v15093_v0 }
 0x4ce   : > { %11120 = vmatpush2.bf16.msra.mxu1 %v15096_v5  ;;  %11080 = vmatprep.subr.bf16.mxu0 %v15101_v8  ;;  %v15151_v5 = vld [vmem:[%s17823_s27 + $0x10c0] ss:$16 sps:$4 sm:$0xff]  }
 0x4cf   : > { %11121 = vmatprep.subr.bf16.mxu1 %v15104_v7  ;;  %v15154_v7 = vld [vmem:[%s17823_s27 + $0x12c0] ss:$16 sps:$4 sm:$0xff]  }
 0x4d1   : > { %11081 = vmatpush2.bf16.msra.mxu0 %v15099_v11 }
 0x4d2   : > { %11122 = vmatpush2.bf16.msra.mxu1 %v15102_v13  ;;  %11082 = vmatprep.subr.bf16.mxu0 %v15107_v37  ;;  %v15159_v37 = vld [vmem:[%s17823_s27 + $0x10a4] ss:$16 sps:$4 sm:$0xff]  }
 0x4d3   : > { %11123 = vmatprep.subr.bf16.mxu1 %v15110_v39  ;;  %v15162_v39 = vld [vmem:[%s17823_s27 + $0x12a4] ss:$16 sps:$4 sm:$0xff]  }
 0x4d5   : > { %11083 = vmatpush2.bf16.msra.mxu0 %v15105_v17 }
 0x4d6   : > { %11124 = vmatpush2.bf16.msra.mxu1 %v15108_v10  ;;  %11084 = vmatprep.subr.bf16.mxu0 %v15113_v18 }
 0x4d7   : > { %11125 = vmatprep.subr.bf16.mxu1 %v15116_v16 }
 0x4d9   : > { %11085 = vmatpush2.bf16.msra.mxu0 %v15111_v19  ;;  %v15157_v19 = vld [vmem:[%s17823_s27 + $0x10a0] ss:$16 sps:$4 sm:$0xff]  }
 0x4da   : > { %11126 = vmatpush2.bf16.msra.mxu1 %v15114_v23  ;;  %11086 = vmatprep.subr.bf16.mxu0 %v15119_v21  ;;  %v15160_v21 = vld [vmem:[%s17823_s27 + $0x12a0] ss:$16 sps:$4 sm:$0xff]  }
 0x4db   : > { %11127 = vmatprep.subr.bf16.mxu1 %v15122_v44 }
 0x4dd   : > { %11087 = vmatpush2.bf16.msra.mxu0 %v15117_v25 }
 0x4de   : > { %11128 = vmatpush2.bf16.msra.mxu1 %v15120_v22  ;;  %11088 = vmatprep.subr.bf16.mxu0 %v15125_v41  ;;  %v15165_v22 = vld [vmem:[%s17823_s27 + $0x1084] ss:$16 sps:$4 sm:$0xff]  }
 0x4df   : > { %11129 = vmatprep.subr.bf16.mxu1 %v15128_v24  ;;  %v15168_v41 = vld [vmem:[%s17823_s27 + $0x1284] ss:$16 sps:$4 sm:$0xff]   ;;  %v15163_v24 = vld [vmem:[%s17823_s27 + $0x1080] ss:$16 sps:$4 sm:$0xff]  }
 0x4e1   : > { %11089 = vmatpush2.bf16.msra.mxu0 %v15123_v34  ;;  %v15166_v34 = vld [vmem:[%s17823_s27 + $0x1280] ss:$16 sps:$4 sm:$0xff]  }
 0x4e2   : > { %11130 = vmatpush2.bf16.msra.mxu1 %v15126_v31  ;;  %11090 = vmatprep.subr.bf16.mxu0 %v15131_v35  ;;  %v15171_v31 = vld [vmem:[%s17823_s27 + $0x1064] ss:$16 sps:$4 sm:$0xff]  }
 0x4e3   : > { %11131 = vmatprep.subr.bf16.mxu1 %v15134_v61  ;;  %v15174_v35 = vld [vmem:[%s17823_s27 + $0x1264] ss:$16 sps:$4 sm:$0xff]   ;;  %v15172_v61 = vld [vmem:[%s17823_s27 + $0x1260] ss:$16 sps:$4 sm:$0xff]  }
 0x4e5   : > { %11091 = vmatpush2.bf16.msra.mxu0 %v15129_v43  ;;  %v15177_v43 = vld [vmem:[%s17823_s27 + $0x1044] ss:$16 sps:$4 sm:$0xff]  }
 0x4e6   : > { %11132 = vmatpush2.bf16.msra.mxu1 %v15132_v45  ;;  %11092 = vmatprep.subr.bf16.mxu0 %v15137_v12  ;;  %v15180_v45 = vld [vmem:[%s17823_s27 + $0x1244] ss:$16 sps:$4 sm:$0xff]   ;;  %v15175_v12 = vld [vmem:[%s17823_s27 + $0x1040] ss:$16 sps:$4 sm:$0xff]  }
 0x4e7   : > { %11133 = vmatprep.subr.bf16.mxu1 %v15140_v27  ;;  %v15178_v27 = vld [vmem:[%s17823_s27 + $0x1240] ss:$16 sps:$4 sm:$0xff]  }
 0x4e9   : > { %11093 = vmatpush2.bf16.msra.mxu0 %v15135_v48  ;;  %v15183_v48 = vld [vmem:[%s17823_s27 + $0x1024] ss:$16 sps:$4 sm:$0xff]  }
 0x4ea   : > { %11134 = vmatpush2.bf16.msra.mxu1 %v15138_v50  ;;  %11144 = vmatprep.subr.bf16.mxu0 %v15147_v52  ;;  %v15186_v50 = vld [vmem:[%s17823_s27 + $0x1224] ss:$16 sps:$4 sm:$0xff]   ;;  %v15184_v52 = vld [vmem:[%s17823_s27 + $0x1220] ss:$16 sps:$4 sm:$0xff]  }
 0x4eb   : > { %11185 = vmatprep.subr.bf16.mxu1 %v15150_v60  ;;  %v15189_v60 = vld [vmem:[%s17823_s27 + $0x1004] ss:$16 sps:$4 sm:$0xff]  }
 0x4ec   : > { %v10850_v4 = vpop.f32.mrf.mxu0  ;;  %11095 = vmatmul.mubr.bf16.vlgmr.msra.gmra.mxu0 %v18563_v29 }
 0x4ed   : > { %v10891_v0 = vpop.f32.mrf.mxu1  ;;  %11136 = vmatmul.mubr.bf16.vlgmr.msra.gmra.mxu1 %v18567_v32  ;;  %v10851_v8 = vadd.f32 %v10850_v4, %v5567_v42  ;;  %11145 = vmatpush1.bf16.msra.mxu0 %v15145_v54  ;;  %v15192_v54 = vld [vmem:[%s17823_s27 + $0x1204] ss:$16 sps:$4 sm:$0xff]   ;;  %v15187_v42 = vld [vmem:[%s17823_s27 + $0x1000] ss:$16 sps:$4 sm:$0xff]  }
 0x4ee   : > { %11186 = vmatpush1.bf16.msra.mxu1 %v15148_v57  ;;  %v10852_v11 = vpop.f32.mrf.mxu0  ;;  %11146 = vmatprep.subr.bf16.mxu0 %v15153_v62  ;;  %v15190_v57 = vld [vmem:[%s17823_s27 + $0x1200] ss:$16 sps:$4 sm:$0xff]   ;;  %v15195_v62 = vld [vmem:[%s17823_s27 + $0x11e4] ss:$16 sps:$4 sm:$0xff]  }
 0x4ef   : > { %v10893_v13 = vpop.f32.mrf.mxu1  ;;  %11187 = vmatprep.subr.bf16.mxu1 %v15156_v46  ;;  %v18592_v17 = vadd.f32 %v10891_v0, %v10851_v8  ;;  %v10853_v10 = vadd.f32 %v10852_v11, %v5571_v3  ;;  %11176 = vmatprep.mubr.bf16.mxu0 %v18580_v33  ;;  %v15198_v46 = vld [vmem:[%s17823_s27 + $0x13e4] ss:$16 sps:$4 sm:$0xff]   ;;  %v15193_v3 = vld [vmem:[%s17823_s27 + $0x11e0] ss:$16 sps:$4 sm:$0xff]  }
 0x4f0   : > { %11217 = vmatprep.mubr.bf16.mxu1 %v18584_v1  ;;  %v10854_v18 = vpop.f32.mrf.mxu0  ;;  %v15196_v4 = vld [vmem:[%s17823_s27 + $0x13e0] ss:$16 sps:$4 sm:$0xff]   ;;  %v15201_v0 = vld [vmem:[%s17823_s27 + $0x11c4] ss:$16 sps:$4 sm:$0xff]  }
 0x4f1   : > { %v10895_v16 = vpop.f32.mrf.mxu1  ;;  %v18597_v23 = vadd.f32 %v10893_v13, %v10853_v10  ;;  %11147 = vmatpush1.bf16.msra.mxu0 %v15151_v5  ;;  %v15204_v5 = vld [vmem:[%s17823_s27 + $0x13c4] ss:$16 sps:$4 sm:$0xff]   ;;  %v15199_v8 = vld [vmem:[%s17823_s27 + $0x11c0] ss:$16 sps:$4 sm:$0xff]  }
 0x4f2   : > { %11188 = vmatpush1.bf16.msra.mxu1 %v15154_v7  ;;  %v10855_v44 = vpop.f32.mrf.mxu0  ;;  %11148 = vmatprep.subr.bf16.mxu0 %v15159_v37  ;;  %v15202_v7 = vld [vmem:[%s17823_s27 + $0x13c0] ss:$16 sps:$4 sm:$0xff]   ;;  %v15207_v11 = vld [vmem:[%s17823_s27 + $0x11a4] ss:$16 sps:$4 sm:$0xff]  }
 0x4f3   : > { %v10896_v25 = vpop.f32.mrf.mxu1  ;;  %11189 = vmatprep.subr.bf16.mxu1 %v15162_v39  ;;  %v15210_v13 = vld [vmem:[%s17823_s27 + $0x13a4] ss:$16 sps:$4 sm:$0xff]   ;;  %v15205_v37 = vld [vmem:[%s17823_s27 + $0x11a0] ss:$16 sps:$4 sm:$0xff]  }
 0x4f4   : > { %v15208_v39 = vld [vmem:[%s17823_s27 + $0x13a0] ss:$16 sps:$4 sm:$0xff]   ;;  %v15213_v10 = vld [vmem:[%s17823_s27 + $0x1184] ss:$16 sps:$4 sm:$0xff]  }
 0x4f5   : > { %11149 = vmatpush1.bf16.msra.mxu0 %v15157_v19  ;;  %v15216_v18 = vld [vmem:[%s17823_s27 + $0x1384] ss:$16 sps:$4 sm:$0xff]   ;;  %v15211_v16 = vld [vmem:[%s17823_s27 + $0x1180] ss:$16 sps:$4 sm:$0xff]  }
 0x4f6   : > { %11190 = vmatpush1.bf16.msra.mxu1 %v15160_v21  ;;  %11150 = vmatprep.subr.bf16.mxu0 %v15165_v22  ;;  %v15214_v19 = vld [vmem:[%s17823_s27 + $0x1380] ss:$16 sps:$4 sm:$0xff]   ;;  %v15219_v21 = vld [vmem:[%s17823_s27 + $0x1164] ss:$16 sps:$4 sm:$0xff]  }
 0x4f7   : > { %11191 = vmatprep.subr.bf16.mxu1 %v15168_v41  ;;  %v15222_v44 = vld [vmem:[%s17823_s27 + $0x1364] ss:$16 sps:$4 sm:$0xff]   ;;  %v15217_v25 = vld [vmem:[%s17823_s27 + $0x1160] ss:$16 sps:$4 sm:$0xff]  }
 0x4f8   : > { %v15220_v22 = vld [vmem:[%s17823_s27 + $0x1360] ss:$16 sps:$4 sm:$0xff]   ;;  %v15225_v41 = vld [vmem:[%s17823_s27 + $0x1144] ss:$16 sps:$4 sm:$0xff]  }
 0x4f9   : > { %11151 = vmatpush1.bf16.msra.mxu0 %v15163_v24  ;;  %v15228_v24 = vld [vmem:[%s17823_s27 + $0x1344] ss:$16 sps:$4 sm:$0xff]  }
 0x4fa   : > { %11192 = vmatpush1.bf16.msra.mxu1 %v15166_v34  ;;  %11152 = vmatprep.subr.bf16.mxu0 %v15171_v31  ;;  %v15223_v34 = vld [vmem:[%s17823_s27 + $0x1140] ss:$16 sps:$4 sm:$0xff]  }
 0x4fb   : > { %11193 = vmatprep.subr.bf16.mxu1 %v15174_v35  ;;  %v15226_v31 = vld [vmem:[%s17823_s27 + $0x1340] ss:$16 sps:$4 sm:$0xff]   ;;  %v15231_v35 = vld [vmem:[%s17823_s27 + $0x1124] ss:$16 sps:$4 sm:$0xff]  }
 0x4fd   : > { %11153 = vmatpush1.bf16.msra.mxu0 %v15169_v36  ;;  %v15234_v36 = vld [vmem:[%s17823_s27 + $0x1324] ss:$16 sps:$4 sm:$0xff]  }
 0x4fe   : > { %11194 = vmatpush1.bf16.msra.mxu1 %v15172_v61  ;;  %11154 = vmatprep.subr.bf16.mxu0 %v15177_v43  ;;  %v15229_v61 = vld [vmem:[%s17823_s27 + $0x1120] ss:$16 sps:$4 sm:$0xff]  }
 0x4ff   : > { %11195 = vmatprep.subr.bf16.mxu1 %v15180_v45  ;;  %v15232_v43 = vld [vmem:[%s17823_s27 + $0x1320] ss:$16 sps:$4 sm:$0xff]   ;;  %v15237_v45 = vld [vmem:[%s17823_s27 + $0x1104] ss:$16 sps:$4 sm:$0xff]  }
 0x501   : > { %11155 = vmatpush1.bf16.msra.mxu0 %v15175_v12  ;;  %v15240_v12 = vld [vmem:[%s17823_s27 + $0x1304] ss:$16 sps:$4 sm:$0xff]  }
 0x502   : > { %11196 = vmatpush1.bf16.msra.mxu1 %v15178_v27  ;;  %11156 = vmatprep.subr.bf16.mxu0 %v15183_v48  ;;  %v15235_v27 = vld [vmem:[%s17823_s27 + $0x1100] ss:$16 sps:$4 sm:$0xff]  }
 0x503   : > { %11197 = vmatprep.subr.bf16.mxu1 %v15186_v50  ;;  %v15238_v48 = vld [vmem:[%s17823_s27 + $0x1300] ss:$16 sps:$4 sm:$0xff]   ;;  %v15247_v50 = vld [vmem:[%s17823_s27 + $0x14e4] ss:$16 sps:$4 sm:$0xff]  }
 0x505   : > { %11157 = vmatpush1.bf16.msra.mxu0 %v15181_v49  ;;  %v15250_v49 = vld [vmem:[%s17823_s27 + $0x16e4] ss:$16 sps:$4 sm:$0xff]  }
 0x506   : > { %11198 = vmatpush1.bf16.msra.mxu1 %v15184_v52  ;;  %11158 = vmatprep.subr.bf16.mxu0 %v15189_v60  ;;  %v15245_v52 = vld [vmem:[%s17823_s27 + $0x14e0] ss:$16 sps:$4 sm:$0xff]  }
 0x507   : > { %11199 = vmatprep.subr.bf16.mxu1 %v15192_v54  ;;  %v15248_v60 = vld [vmem:[%s17823_s27 + $0x16e0] ss:$16 sps:$4 sm:$0xff]   ;;  %v18658_v54 = vcombine.low %v18569_v40, %v18569_v40 }
 0x509   : > { %11159 = vmatpush1.bf16.msra.mxu0 %v15187_v42  ;;  %v18662_v42 = vcombine.low %v18571_v56, %v18571_v56 }
 0x50a   : > { %11200 = vmatpush1.bf16.msra.mxu1 %v15190_v57  ;;  %11160 = vmatprep.subr.bf16.mxu0 %v15195_v62  ;;  %v18664_v57 = vld [vmem:[#allocation2 + $0x50] sm:$0xff]  ;;  %v18666_v62 = vld [vmem:[#allocation2 + $0x58] sm:$0xff] }
 0x50b   : > { %11201 = vmatprep.subr.bf16.mxu1 %v15198_v46  ;;  %v15253_v46 = vld [vmem:[%s17823_s27 + $0x14c4] ss:$16 sps:$4 sm:$0xff]   ;;  %v18674_v40 = vcombine.high %v18664_v57, %v18664_v57  ;;  %v18678_v56 = vcombine.high %v18666_v62, %v18666_v62 }
 0x50d   : > { %11161 = vmatpush2.bf16.msra.mxu0 %v15193_v3  ;;  %v15256_v3 = vld [vmem:[%s17823_s27 + $0x16c4] ss:$16 sps:$4 sm:$0xff]  }
 0x50e   : > { %11202 = vmatpush2.bf16.msra.mxu1 %v15196_v4  ;;  %11162 = vmatprep.subr.bf16.mxu0 %v15201_v0  ;;  %v15251_v4 = vld [vmem:[%s17823_s27 + $0x14c0] ss:$16 sps:$4 sm:$0xff]  }
 0x50f   : > { %11203 = vmatprep.subr.bf16.mxu1 %v15204_v5  ;;  %v15254_v0 = vld [vmem:[%s17823_s27 + $0x16c0] ss:$16 sps:$4 sm:$0xff]  }
 0x511   : > { %11163 = vmatpush2.bf16.msra.mxu0 %v15199_v8 }
 0x512   : > { %11204 = vmatpush2.bf16.msra.mxu1 %v15202_v7  ;;  %11164 = vmatprep.subr.bf16.mxu0 %v15207_v11 }
 0x513   : > { %11205 = vmatprep.subr.bf16.mxu1 %v15210_v13 }
 0x515   : > { %11165 = vmatpush2.bf16.msra.mxu0 %v15205_v37  ;;  %v15259_v37 = vld [vmem:[%s17823_s27 + $0x14a4] ss:$16 sps:$4 sm:$0xff]  }
 0x516   : > { %11206 = vmatpush2.bf16.msra.mxu1 %v15208_v39  ;;  %11166 = vmatprep.subr.bf16.mxu0 %v15213_v10  ;;  %v15262_v39 = vld [vmem:[%s17823_s27 + $0x16a4] ss:$16 sps:$4 sm:$0xff]  }
 0x517   : > { %11207 = vmatprep.subr.bf16.mxu1 %v15216_v18 }
 0x519   : > { %11167 = vmatpush2.bf16.msra.mxu0 %v15211_v16  ;;  %v15257_v16 = vld [vmem:[%s17823_s27 + $0x14a0] ss:$16 sps:$4 sm:$0xff]  }
 0x51a   : > { %11208 = vmatpush2.bf16.msra.mxu1 %v15214_v19  ;;  %11168 = vmatprep.subr.bf16.mxu0 %v15219_v21  ;;  %v15260_v19 = vld [vmem:[%s17823_s27 + $0x16a0] ss:$16 sps:$4 sm:$0xff]  }
 0x51b   : > { %11209 = vmatprep.subr.bf16.mxu1 %v15222_v44 }
 0x51d   : > { %11169 = vmatpush2.bf16.msra.mxu0 %v15217_v25 }
 0x51e   : > { %11210 = vmatpush2.bf16.msra.mxu1 %v15220_v22  ;;  %11170 = vmatprep.subr.bf16.mxu0 %v15225_v41  ;;  %v15268_v41 = vld [vmem:[%s17823_s27 + $0x1684] ss:$16 sps:$4 sm:$0xff]  }
 0x51f   : > { %11211 = vmatprep.subr.bf16.mxu1 %v15228_v24  ;;  %v15263_v24 = vld [vmem:[%s17823_s27 + $0x1480] ss:$16 sps:$4 sm:$0xff]  }
 0x521   : > { %11171 = vmatpush2.bf16.msra.mxu0 %v15223_v34  ;;  %v15266_v34 = vld [vmem:[%s17823_s27 + $0x1680] ss:$16 sps:$4 sm:$0xff]  }
 0x522   : > { %11212 = vmatpush2.bf16.msra.mxu1 %v15226_v31  ;;  %11172 = vmatprep.subr.bf16.mxu0 %v15231_v35  ;;  %v15271_v31 = vld [vmem:[%s17823_s27 + $0x1464] ss:$16 sps:$4 sm:$0xff]  }
 0x523   : > { %11213 = vmatprep.subr.bf16.mxu1 %v15234_v36  ;;  %v15274_v35 = vld [vmem:[%s17823_s27 + $0x1664] ss:$16 sps:$4 sm:$0xff]   ;;  %v15269_v36 = vld [vmem:[%s17823_s27 + $0x1460] ss:$16 sps:$4 sm:$0xff]  }
 0x525   : > { %11173 = vmatpush2.bf16.msra.mxu0 %v15229_v61  ;;  %v15272_v61 = vld [vmem:[%s17823_s27 + $0x1660] ss:$16 sps:$4 sm:$0xff]  }
 0x526   : > { %11214 = vmatpush2.bf16.msra.mxu1 %v15232_v43  ;;  %11174 = vmatprep.subr.bf16.mxu0 %v15237_v45  ;;  %v15277_v43 = vld [vmem:[%s17823_s27 + $0x1444] ss:$16 sps:$4 sm:$0xff]  }
 0x527   : > { %11215 = vmatprep.subr.bf16.mxu1 %v15240_v12  ;;  %v15280_v45 = vld [vmem:[%s17823_s27 + $0x1644] ss:$16 sps:$4 sm:$0xff]   ;;  %v15275_v12 = vld [vmem:[%s17823_s27 + $0x1440] ss:$16 sps:$4 sm:$0xff]  }
 0x529   : > { %11175 = vmatpush2.bf16.msra.mxu0 %v15235_v27  ;;  %v15278_v27 = vld [vmem:[%s17823_s27 + $0x1640] ss:$16 sps:$4 sm:$0xff]  }
 0x52a   : > { %11216 = vmatpush2.bf16.msra.mxu1 %v15238_v48  ;;  %11226 = vmatprep.subr.bf16.mxu0 %v15247_v50  ;;  %v15283_v48 = vld [vmem:[%s17823_s27 + $0x1424] ss:$16 sps:$4 sm:$0xff]  }
 0x52b   : > { %11267 = vmatprep.subr.bf16.mxu1 %v15250_v49  ;;  %v15286_v50 = vld [vmem:[%s17823_s27 + $0x1624] ss:$16 sps:$4 sm:$0xff]   ;;  %v15281_v49 = vld [vmem:[%s17823_s27 + $0x1420] ss:$16 sps:$4 sm:$0xff]  }
 0x52c   : > { %v10932_v5 = vpop.f32.mrf.mxu0  ;;  %11177 = vmatmul.mubr.bf16.vlgmr.msra.gmra.mxu0 %v18658_v54 }
 0x52d   : > { %v10973_v8 = vpop.f32.mrf.mxu1  ;;  %11218 = vmatmul.mubr.bf16.vlgmr.msra.gmra.mxu1 %v18662_v42  ;;  %v10933_v7 = vadd.f32 %v10932_v5, %v18592_v17  ;;  %11227 = vmatpush1.bf16.msra.mxu0 %v15245_v52  ;;  %v15284_v52 = vld [vmem:[%s17823_s27 + $0x1620] ss:$16 sps:$4 sm:$0xff]   ;;  %v15298_v5 = vld [vmem:[%s17823_s27 + $0x17e4] ss:$16 sps:$4 sm:$0xff]  }
 0x52e   : > { %11268 = vmatpush1.bf16.msra.mxu1 %v15248_v60  ;;  %v10934_v11 = vpop.f32.mrf.mxu0  ;;  %11228 = vmatprep.subr.bf16.mxu0 %v15253_v46  ;;  %v15289_v60 = vld [vmem:[%s17823_s27 + $0x1404] ss:$16 sps:$4 sm:$0xff]  }
 0x52f   : > { %v10975_v13 = vpop.f32.mrf.mxu1  ;;  %11269 = vmatprep.subr.bf16.mxu1 %v15256_v3  ;;  %v18685_v10 = vadd.f32 %v10973_v8, %v10933_v7  ;;  %v10935_v18 = vadd.f32 %v10934_v11, %v18597_v23  ;;  %11258 = vmatprep.mubr.bf16.mxu0 %v18674_v40  ;;  %v15265_v23 = vld [vmem:[%s17823_s27 + $0x1484] ss:$16 sps:$4 sm:$0xff]   ;;  %v15287_v3 = vld [vmem:[%s17823_s27 + $0x1400] ss:$16 sps:$4 sm:$0xff]  }
 0x530   : > { %11299 = vmatprep.mubr.bf16.mxu1 %v18678_v56  ;;  %v10936_v17 = vpop.f32.mrf.mxu0  ;;  %v15292_v46 = vld [vmem:[%s17823_s27 + $0x1604] ss:$16 sps:$4 sm:$0xff]   ;;  %v15293_v8 = vld [vmem:[%s17823_s27 + $0x15e0] ss:$16 sps:$4 sm:$0xff]  }
 0x531   : > { %v10977_v21 = vpop.f32.mrf.mxu1  ;;  %v18692_v44 = vadd.f32 %v10975_v13, %v10935_v18  ;;  %11229 = vmatpush1.bf16.msra.mxu0 %v15251_v4  ;;  %v15290_v4 = vld [vmem:[%s17823_s27 + $0x1600] ss:$16 sps:$4 sm:$0xff]   ;;  %v15301_v11 = vld [vmem:[%s17823_s27 + $0x15c4] ss:$16 sps:$4 sm:$0xff]  }
 0x532   : > { %11270 = vmatpush1.bf16.msra.mxu1 %v15254_v0  ;;  %v10937_v25 = vpop.f32.mrf.mxu0  ;;  %11230 = vmatprep.subr.bf16.mxu0 %v15259_v37  ;;  %v15295_v0 = vld [vmem:[%s17823_s27 + $0x15e4] ss:$16 sps:$4 sm:$0xff]   ;;  %v15296_v7 = vld [vmem:[%s17823_s27 + $0x17e0] ss:$16 sps:$4 sm:$0xff]  }
 0x533   : > { %v10978_v22 = vpop.f32.mrf.mxu1  ;;  %11271 = vmatprep.subr.bf16.mxu1 %v15262_v39  ;;  %v15304_v13 = vld [vmem:[%s17823_s27 + $0x17c4] ss:$16 sps:$4 sm:$0xff]   ;;  %v15299_v37 = vld [vmem:[%s17823_s27 + $0x15c0] ss:$16 sps:$4 sm:$0xff]  }
 0x534   : > { %v15302_v39 = vld [vmem:[%s17823_s27 + $0x17c0] ss:$16 sps:$4 sm:$0xff]   ;;  %v15307_v18 = vld [vmem:[%s17823_s27 + $0x15a4] ss:$16 sps:$4 sm:$0xff]  }
 0x535   : > { %11231 = vmatpush1.bf16.msra.mxu0 %v15257_v16  ;;  %v15310_v16 = vld [vmem:[%s17823_s27 + $0x17a4] ss:$16 sps:$4 sm:$0xff]   ;;  %v15308_v17 = vld [vmem:[%s17823_s27 + $0x17a0] ss:$16 sps:$4 sm:$0xff]  }
 0x536   : > { %11272 = vmatpush1.bf16.msra.mxu1 %v15260_v19  ;;  %11232 = vmatprep.subr.bf16.mxu0 %v15265_v23  ;;  %v15305_v19 = vld [vmem:[%s17823_s27 + $0x15a0] ss:$16 sps:$4 sm:$0xff]   ;;  %v15313_v21 = vld [vmem:[%s17823_s27 + $0x1584] ss:$16 sps:$4 sm:$0xff]  }
 0x537   : > { %11273 = vmatprep.subr.bf16.mxu1 %v15268_v41  ;;  %v15316_v25 = vld [vmem:[%s17823_s27 + $0x1784] ss:$16 sps:$4 sm:$0xff]   ;;  %v15311_v22 = vld [vmem:[%s17823_s27 + $0x1580] ss:$16 sps:$4 sm:$0xff]  }
 0x538   : > { %v15314_v23 = vld [vmem:[%s17823_s27 + $0x1780] ss:$16 sps:$4 sm:$0xff]   ;;  %v15319_v41 = vld [vmem:[%s17823_s27 + $0x1564] ss:$16 sps:$4 sm:$0xff]  }
 0x539   : > { %11233 = vmatpush1.bf16.msra.mxu0 %v15263_v24  ;;  %v15322_v24 = vld [vmem:[%s17823_s27 + $0x1764] ss:$16 sps:$4 sm:$0xff]  }
 0x53a   : > { %11274 = vmatpush1.bf16.msra.mxu1 %v15266_v34  ;;  %11234 = vmatprep.subr.bf16.mxu0 %v15271_v31  ;;  %v15317_v34 = vld [vmem:[%s17823_s27 + $0x1560] ss:$16 sps:$4 sm:$0xff]  }
 0x53b   : > { %11275 = vmatprep.subr.bf16.mxu1 %v15274_v35  ;;  %v15320_v31 = vld [vmem:[%s17823_s27 + $0x1760] ss:$16 sps:$4 sm:$0xff]   ;;  %v15325_v35 = vld [vmem:[%s17823_s27 + $0x1544] ss:$16 sps:$4 sm:$0xff]  }
 0x53d   : > { %11235 = vmatpush1.bf16.msra.mxu0 %v15269_v36  ;;  %v15328_v36 = vld [vmem:[%s17823_s27 + $0x1744] ss:$16 sps:$4 sm:$0xff]  }
 0x53e   : > { %11276 = vmatpush1.bf16.msra.mxu1 %v15272_v61  ;;  %11236 = vmatprep.subr.bf16.mxu0 %v15277_v43  ;;  %v15323_v61 = vld [vmem:[%s17823_s27 + $0x1540] ss:$16 sps:$4 sm:$0xff]  }
 0x53f   : > { %11277 = vmatprep.subr.bf16.mxu1 %v15280_v45  ;;  %v15326_v43 = vld [vmem:[%s17823_s27 + $0x1740] ss:$16 sps:$4 sm:$0xff]   ;;  %v15331_v45 = vld [vmem:[%s17823_s27 + $0x1524] ss:$16 sps:$4 sm:$0xff]  }
 0x541   : > { %11237 = vmatpush1.bf16.msra.mxu0 %v15275_v12  ;;  %v15334_v12 = vld [vmem:[%s17823_s27 + $0x1724] ss:$16 sps:$4 sm:$0xff]  }
 0x542   : > { %11278 = vmatpush1.bf16.msra.mxu1 %v15278_v27  ;;  %11238 = vmatprep.subr.bf16.mxu0 %v15283_v48  ;;  %v15329_v27 = vld [vmem:[%s17823_s27 + $0x1520] ss:$16 sps:$4 sm:$0xff]  }
 0x543   : > { %11279 = vmatprep.subr.bf16.mxu1 %v15286_v50  ;;  %v15332_v48 = vld [vmem:[%s17823_s27 + $0x1720] ss:$16 sps:$4 sm:$0xff]   ;;  %v15337_v50 = vld [vmem:[%s17823_s27 + $0x1504] ss:$16 sps:$4 sm:$0xff]  }
 0x545   : > { %11239 = vmatpush1.bf16.msra.mxu0 %v15281_v49  ;;  %v15340_v49 = vld [vmem:[%s17823_s27 + $0x1704] ss:$16 sps:$4 sm:$0xff]  }
 0x546   : > { %11280 = vmatpush1.bf16.msra.mxu1 %v15284_v52  ;;  %11240 = vmatprep.subr.bf16.mxu0 %v15289_v60  ;;  %v15335_v52 = vld [vmem:[%s17823_s27 + $0x1500] ss:$16 sps:$4 sm:$0xff]  }
 0x547   : > { %11281 = vmatprep.subr.bf16.mxu1 %v15292_v46  ;;  %v15338_v60 = vld [vmem:[%s17823_s27 + $0x1700] ss:$16 sps:$4 sm:$0xff]   ;;  %v15347_v46 = vld [vmem:[%s17823_s27 + $0x18e4] ss:$16 sps:$4 sm:$0xff]  }
 0x549   : > { %11241 = vmatpush1.bf16.msra.mxu0 %v15287_v3  ;;  %v15350_v3 = vld [vmem:[%s17823_s27 + $0x1ae4] ss:$16 sps:$4 sm:$0xff]  }
 0x54a   : > { %11282 = vmatpush1.bf16.msra.mxu1 %v15290_v4  ;;  %11242 = vmatprep.subr.bf16.mxu0 %v15295_v0  ;;  %v15345_v4 = vld [vmem:[%s17823_s27 + $0x18e0] ss:$16 sps:$4 sm:$0xff]  }
 0x54b   : > { %11283 = vmatprep.subr.bf16.mxu1 %v15298_v5  ;;  %v15348_v0 = vld [vmem:[%s17823_s27 + $0x1ae0] ss:$16 sps:$4 sm:$0xff]   ;;  %v18752_v5 = vcombine.low %v18664_v57, %v18664_v57 }
 0x54d   : > { %11243 = vmatpush2.bf16.msra.mxu0 %v15293_v8  ;;  %v18756_v8 = vcombine.low %v18666_v62, %v18666_v62 }
 0x54e   : > { %11284 = vmatpush2.bf16.msra.mxu1 %v15296_v7  ;;  %11244 = vmatprep.subr.bf16.mxu0 %v15301_v11  ;;  %v18758_v7 = vld [vmem:[#allocation2 + $0x60] sm:$0xff]  ;;  %v18760_v11 = vld [vmem:[#allocation2 + $0x68] sm:$0xff] }
 0x54f   : > { %11285 = vmatprep.subr.bf16.mxu1 %v15304_v13  ;;  %v15353_v13 = vld [vmem:[%s17823_s27 + $0x18c4] ss:$16 sps:$4 sm:$0xff]   ;;  %v18768_v57 = vcombine.high %v18758_v7, %v18758_v7  ;;  %v18772_v62 = vcombine.high %v18760_v11, %v18760_v11 }
 0x551   : > { %11245 = vmatpush2.bf16.msra.mxu0 %v15299_v37  ;;  %v15356_v37 = vld [vmem:[%s17823_s27 + $0x1ac4] ss:$16 sps:$4 sm:$0xff]  }
 0x552   : > { %11286 = vmatpush2.bf16.msra.mxu1 %v15302_v39  ;;  %11246 = vmatprep.subr.bf16.mxu0 %v15307_v18  ;;  %v15351_v39 = vld [vmem:[%s17823_s27 + $0x18c0] ss:$16 sps:$4 sm:$0xff]  }
 0x553   : > { %11287 = vmatprep.subr.bf16.mxu1 %v15310_v16  ;;  %v15354_v18 = vld [vmem:[%s17823_s27 + $0x1ac0] ss:$16 sps:$4 sm:$0xff]  }
 0x555   : > { %11247 = vmatpush2.bf16.msra.mxu0 %v15305_v19 }
 0x556   : > { %11288 = vmatpush2.bf16.msra.mxu1 %v15308_v17  ;;  %11248 = vmatprep.subr.bf16.mxu0 %v15313_v21 }
 0x557   : > { %11289 = vmatprep.subr.bf16.mxu1 %v15316_v25 }
 0x559   : > { %11249 = vmatpush2.bf16.msra.mxu0 %v15311_v22  ;;  %v15359_v22 = vld [vmem:[%s17823_s27 + $0x18a4] ss:$16 sps:$4 sm:$0xff]  }
 0x55a   : > { %11290 = vmatpush2.bf16.msra.mxu1 %v15314_v23  ;;  %11250 = vmatprep.subr.bf16.mxu0 %v15319_v41  ;;  %v15362_v23 = vld [vmem:[%s17823_s27 + $0x1aa4] ss:$16 sps:$4 sm:$0xff]  }
 0x55b   : > { %11291 = vmatprep.subr.bf16.mxu1 %v15322_v24 }
 0x55d   : > { %11251 = vmatpush2.bf16.msra.mxu0 %v15317_v34  ;;  %v15357_v34 = vld [vmem:[%s17823_s27 + $0x18a0] ss:$16 sps:$4 sm:$0xff]  }
 0x55e   : > { %11292 = vmatpush2.bf16.msra.mxu1 %v15320_v31  ;;  %11252 = vmatprep.subr.bf16.mxu0 %v15325_v35  ;;  %v15360_v31 = vld [vmem:[%s17823_s27 + $0x1aa0] ss:$16 sps:$4 sm:$0xff]  }
 0x55f   : > { %11293 = vmatprep.subr.bf16.mxu1 %v15328_v36 }
 0x561   : > { %11253 = vmatpush2.bf16.msra.mxu0 %v15323_v61 }
 0x562   : > { %11294 = vmatpush2.bf16.msra.mxu1 %v15326_v43  ;;  %11254 = vmatprep.subr.bf16.mxu0 %v15331_v45  ;;  %v15368_v45 = vld [vmem:[%s17823_s27 + $0x1a84] ss:$16 sps:$4 sm:$0xff]  }
 0x563   : > { %11295 = vmatprep.subr.bf16.mxu1 %v15334_v12  ;;  %v15363_v12 = vld [vmem:[%s17823_s27 + $0x1880] ss:$16 sps:$4 sm:$0xff]  }
 0x565   : > { %11255 = vmatpush2.bf16.msra.mxu0 %v15329_v27  ;;  %v15366_v27 = vld [vmem:[%s17823_s27 + $0x1a80] ss:$16 sps:$4 sm:$0xff]  }
 0x566   : > { %11296 = vmatpush2.bf16.msra.mxu1 %v15332_v48  ;;  %11256 = vmatprep.subr.bf16.mxu0 %v15337_v50  ;;  %v15371_v48 = vld [vmem:[%s17823_s27 + $0x1864] ss:$16 sps:$4 sm:$0xff]  }
 0x567   : > { %11297 = vmatprep.subr.bf16.mxu1 %v15340_v49  ;;  %v15374_v50 = vld [vmem:[%s17823_s27 + $0x1a64] ss:$16 sps:$4 sm:$0xff]   ;;  %v15369_v49 = vld [vmem:[%s17823_s27 + $0x1860] ss:$16 sps:$4 sm:$0xff]  }
 0x569   : > { %11257 = vmatpush2.bf16.msra.mxu0 %v15335_v52  ;;  %v15372_v52 = vld [vmem:[%s17823_s27 + $0x1a60] ss:$16 sps:$4 sm:$0xff]  }
 0x56a   : > { %11298 = vmatpush2.bf16.msra.mxu1 %v15338_v60  ;;  %11308 = vmatprep.subr.bf16.mxu0 %v15347_v46  ;;  %v15377_v60 = vld [vmem:[%s17823_s27 + $0x1844] ss:$16 sps:$4 sm:$0xff]  }
 0x56b   : > { %11349 = vmatprep.subr.bf16.mxu1 %v15350_v3  ;;  %v15380_v46 = vld [vmem:[%s17823_s27 + $0x1a44] ss:$16 sps:$4 sm:$0xff]   ;;  %v15375_v3 = vld [vmem:[%s17823_s27 + $0x1840] ss:$16 sps:$4 sm:$0xff]  }
 0x56c   : > { %v11014_v16 = vpop.f32.mrf.mxu0  ;;  %11259 = vmatmul.mubr.bf16.vlgmr.msra.gmra.mxu0 %v18752_v5 }
 0x56d   : > { %v11055_v19 = vpop.f32.mrf.mxu1  ;;  %11300 = vmatmul.mubr.bf16.vlgmr.msra.gmra.mxu1 %v18756_v8  ;;  %v11015_v17 = vadd.f32 %v11014_v16, %v18685_v10  ;;  %11309 = vmatpush1.bf16.msra.mxu0 %v15345_v4  ;;  %v15378_v4 = vld [vmem:[%s17823_s27 + $0x1a40] ss:$16 sps:$4 sm:$0xff]   ;;  %v15392_v16 = vld [vmem:[%s17823_s27 + $0x1a04] ss:$16 sps:$4 sm:$0xff]  }
 0x56e   : > { %11350 = vmatpush1.bf16.msra.mxu1 %v15348_v0  ;;  %v11016_v21 = vpop.f32.mrf.mxu0  ;;  %11310 = vmatprep.subr.bf16.mxu0 %v15353_v13  ;;  %v15383_v0 = vld [vmem:[%s17823_s27 + $0x1824] ss:$16 sps:$4 sm:$0xff]  }
 0x56f   : > { %v11057_v25 = vpop.f32.mrf.mxu1  ;;  %11351 = vmatprep.subr.bf16.mxu1 %v15356_v37  ;;  %v18779_v41 = vadd.f32 %v11055_v19, %v11015_v17  ;;  %v11017_v24 = vadd.f32 %v11016_v21, %v18692_v44  ;;  %11340 = vmatprep.mubr.bf16.mxu0 %v18768_v57  ;;  %v15365_v44 = vld [vmem:[%s17823_s27 + $0x1884] ss:$16 sps:$4 sm:$0xff]   ;;  %v15381_v37 = vld [vmem:[%s17823_s27 + $0x1820] ss:$16 sps:$4 sm:$0xff]  }
 0x570   : > { %11381 = vmatprep.mubr.bf16.mxu1 %v18772_v62  ;;  %v11018_v10 = vpop.f32.mrf.mxu0  ;;  %v15386_v13 = vld [vmem:[%s17823_s27 + $0x1a24] ss:$16 sps:$4 sm:$0xff]   ;;  %v15387_v19 = vld [vmem:[%s17823_s27 + $0x1800] ss:$16 sps:$4 sm:$0xff]  }
 0x571   : > { %v11059_v35 = vpop.f32.mrf.mxu1  ;;  %v18786_v36 = vadd.f32 %v11057_v25, %v11017_v24  ;;  %11311 = vmatpush1.bf16.msra.mxu0 %v15351_v39  ;;  %v15384_v39 = vld [vmem:[%s17823_s27 + $0x1a20] ss:$16 sps:$4 sm:$0xff]   ;;  %v15395_v21 = vld [vmem:[%s17823_s27 + $0x19e4] ss:$16 sps:$4 sm:$0xff]  }
 0x572   : > { %11352 = vmatpush1.bf16.msra.mxu1 %v15354_v18  ;;  %v11019_v61 = vpop.f32.mrf.mxu0  ;;  %11312 = vmatprep.subr.bf16.mxu0 %v15359_v22  ;;  %v15389_v18 = vld [vmem:[%s17823_s27 + $0x1804] ss:$16 sps:$4 sm:$0xff]   ;;  %v15390_v17 = vld [vmem:[%s17823_s27 + $0x1a00] ss:$16 sps:$4 sm:$0xff]  }
 0x573   : > { %v11060_v43 = vpop.f32.mrf.mxu1  ;;  %11353 = vmatprep.subr.bf16.mxu1 %v15362_v23  ;;  %v15398_v25 = vld [vmem:[%s17823_s27 + $0x1be4] ss:$16 sps:$4 sm:$0xff]   ;;  %v15393_v22 = vld [vmem:[%s17823_s27 + $0x19e0] ss:$16 sps:$4 sm:$0xff]  }
 0x574   : > { %v15396_v23 = vld [vmem:[%s17823_s27 + $0x1be0] ss:$16 sps:$4 sm:$0xff]   ;;  %v15401_v24 = vld [vmem:[%s17823_s27 + $0x19c4] ss:$16 sps:$4 sm:$0xff]  }
 0x575   : > { %11313 = vmatpush1.bf16.msra.mxu0 %v15357_v34  ;;  %v15404_v34 = vld [vmem:[%s17823_s27 + $0x1bc4] ss:$16 sps:$4 sm:$0xff]   ;;  %v15402_v10 = vld [vmem:[%s17823_s27 + $0x1bc0] ss:$16 sps:$4 sm:$0xff]  }
 0x576   : > { %11354 = vmatpush1.bf16.msra.mxu1 %v15360_v31  ;;  %11314 = vmatprep.subr.bf16.mxu0 %v15365_v44  ;;  %v15399_v31 = vld [vmem:[%s17823_s27 + $0x19c0] ss:$16 sps:$4 sm:$0xff]   ;;  %v15407_v35 = vld [vmem:[%s17823_s27 + $0x19a4] ss:$16 sps:$4 sm:$0xff]  }
 0x577   : > { %11355 = vmatprep.subr.bf16.mxu1 %v15368_v45  ;;  %v15410_v61 = vld [vmem:[%s17823_s27 + $0x1ba4] ss:$16 sps:$4 sm:$0xff]   ;;  %v15405_v43 = vld [vmem:[%s17823_s27 + $0x19a0] ss:$16 sps:$4 sm:$0xff]  }
 0x578   : > { %v15408_v44 = vld [vmem:[%s17823_s27 + $0x1ba0] ss:$16 sps:$4 sm:$0xff]   ;;  %v15413_v45 = vld [vmem:[%s17823_s27 + $0x1984] ss:$16 sps:$4 sm:$0xff]  }
 0x579   : > { %11315 = vmatpush1.bf16.msra.mxu0 %v15363_v12  ;;  %v15416_v12 = vld [vmem:[%s17823_s27 + $0x1b84] ss:$16 sps:$4 sm:$0xff]  }
 0x57a   : > { %11356 = vmatpush1.bf16.msra.mxu1 %v15366_v27  ;;  %11316 = vmatprep.subr.bf16.mxu0 %v15371_v48  ;;  %v15411_v27 = vld [vmem:[%s17823_s27 + $0x1980] ss:$16 sps:$4 sm:$0xff]  }
 0x57b   : > { %11357 = vmatprep.subr.bf16.mxu1 %v15374_v50  ;;  %v15414_v48 = vld [vmem:[%s17823_s27 + $0x1b80] ss:$16 sps:$4 sm:$0xff]   ;;  %v15419_v50 = vld [vmem:[%s17823_s27 + $0x1964] ss:$16 sps:$4 sm:$0xff]  }
 0x57d   : > { %11317 = vmatpush1.bf16.msra.mxu0 %v15369_v49  ;;  %v15422_v49 = vld [vmem:[%s17823_s27 + $0x1b64] ss:$16 sps:$4 sm:$0xff]  }
 0x57e   : > { %11358 = vmatpush1.bf16.msra.mxu1 %v15372_v52  ;;  %11318 = vmatprep.subr.bf16.mxu0 %v15377_v60  ;;  %v15417_v52 = vld [vmem:[%s17823_s27 + $0x1960] ss:$16 sps:$4 sm:$0xff]  }
 0x57f   : > { %11359 = vmatprep.subr.bf16.mxu1 %v15380_v46  ;;  %v15420_v60 = vld [vmem:[%s17823_s27 + $0x1b60] ss:$16 sps:$4 sm:$0xff]   ;;  %v15425_v46 = vld [vmem:[%s17823_s27 + $0x1944] ss:$16 sps:$4 sm:$0xff]  }
 0x581   : > { %11319 = vmatpush1.bf16.msra.mxu0 %v15375_v3  ;;  %v15428_v3 = vld [vmem:[%s17823_s27 + $0x1b44] ss:$16 sps:$4 sm:$0xff]  }
 0x582   : > { %11360 = vmatpush1.bf16.msra.mxu1 %v15378_v4  ;;  %11320 = vmatprep.subr.bf16.mxu0 %v15383_v0  ;;  %v15423_v4 = vld [vmem:[%s17823_s27 + $0x1940] ss:$16 sps:$4 sm:$0xff]  }
 0x583   : > { %11361 = vmatprep.subr.bf16.mxu1 %v15386_v13  ;;  %v15426_v0 = vld [vmem:[%s17823_s27 + $0x1b40] ss:$16 sps:$4 sm:$0xff]   ;;  %v15431_v13 = vld [vmem:[%s17823_s27 + $0x1924] ss:$16 sps:$4 sm:$0xff]  }
 0x585   : > { %11321 = vmatpush1.bf16.msra.mxu0 %v15381_v37  ;;  %v15434_v37 = vld [vmem:[%s17823_s27 + $0x1b24] ss:$16 sps:$4 sm:$0xff]  }
 0x586   : > { %11362 = vmatpush1.bf16.msra.mxu1 %v15384_v39  ;;  %11322 = vmatprep.subr.bf16.mxu0 %v15389_v18  ;;  %v15429_v39 = vld [vmem:[%s17823_s27 + $0x1920] ss:$16 sps:$4 sm:$0xff]  }
 0x587   : > { %11363 = vmatprep.subr.bf16.mxu1 %v15392_v16  ;;  %v15432_v18 = vld [vmem:[%s17823_s27 + $0x1b20] ss:$16 sps:$4 sm:$0xff]   ;;  %v15437_v16 = vld [vmem:[%s17823_s27 + $0x1904] ss:$16 sps:$4 sm:$0xff]  }
 0x589   : > { %11323 = vmatpush1.bf16.msra.mxu0 %v15387_v19  ;;  %v15440_v19 = vld [vmem:[%s17823_s27 + $0x1b04] ss:$16 sps:$4 sm:$0xff]  }
 0x58a   : > { %11364 = vmatpush1.bf16.msra.mxu1 %v15390_v17  ;;  %11324 = vmatprep.subr.bf16.mxu0 %v15395_v21  ;;  %v15435_v17 = vld [vmem:[%s17823_s27 + $0x1900] ss:$16 sps:$4 sm:$0xff]  }
 0x58b   : > { %11365 = vmatprep.subr.bf16.mxu1 %v15398_v25  ;;  %v15438_v21 = vld [vmem:[%s17823_s27 + $0x1b00] ss:$16 sps:$4 sm:$0xff]   ;;  %v15447_v25 = vld [vmem:[%s17823_s27 + $0x1ce4] ss:$16 sps:$4 sm:$0xff]  }
 0x58d   : > { %11325 = vmatpush2.bf16.msra.mxu0 %v15393_v22  ;;  %v15450_v22 = vld [vmem:[%s17823_s27 + $0x1ee4] ss:$16 sps:$4 sm:$0xff]  }
 0x58e   : > { %11366 = vmatpush2.bf16.msra.mxu1 %v15396_v23  ;;  %11326 = vmatprep.subr.bf16.mxu0 %v15401_v24  ;;  %v18842_v23 = vld [vmem:[#allocation2 + $0x70] sm:$0xff]  ;;  %v18844_v24 = vld [vmem:[#allocation2 + $0x78] sm:$0xff] }
 0x58f   : > { %11367 = vmatprep.subr.bf16.mxu1 %v15404_v34  ;;  %v15445_v34 = vld [vmem:[%s17823_s27 + $0x1ce0] ss:$16 sps:$4 sm:$0xff]  }
 0x591   : > { %11327 = vmatpush2.bf16.msra.mxu0 %v15399_v31  ;;  %v15448_v31 = vld [vmem:[%s17823_s27 + $0x1ee0] ss:$16 sps:$4 sm:$0xff]  }
 0x592   : > { %11368 = vmatpush2.bf16.msra.mxu1 %v15402_v10  ;;  %11328 = vmatprep.subr.bf16.mxu0 %v15407_v35  ;;  %v18850_v10 = vcombine.low %v18758_v7, %v18758_v7  ;;  %v18854_v35 = vcombine.low %v18760_v11, %v18760_v11  ;;  %v18866_v7 = vcombine.high %v18844_v24, %v18844_v24 }
 0x593   : > { %11369 = vmatprep.subr.bf16.mxu1 %v15410_v61  ;;  %v15453_v61 = vld [vmem:[%s17823_s27 + $0x1cc4] ss:$16 sps:$4 sm:$0xff]  }
 0x595   : > { %11329 = vmatpush2.bf16.msra.mxu0 %v15405_v43  ;;  %v15456_v43 = vld [vmem:[%s17823_s27 + $0x1ec4] ss:$16 sps:$4 sm:$0xff]  }
 0x596   : > { %11370 = vmatpush2.bf16.msra.mxu1 %v15408_v44  ;;  %11330 = vmatprep.subr.bf16.mxu0 %v15413_v45  ;;  %v15451_v44 = vld [vmem:[%s17823_s27 + $0x1cc0] ss:$16 sps:$4 sm:$0xff]  }
 0x597   : > { %11371 = vmatprep.subr.bf16.mxu1 %v15416_v12  ;;  %v15454_v45 = vld [vmem:[%s17823_s27 + $0x1ec0] ss:$16 sps:$4 sm:$0xff]   ;;  %v18862_v12 = vcombine.high %v18842_v23, %v18842_v23 }
 0x599   : > { %11331 = vmatpush2.bf16.msra.mxu0 %v15411_v27 }
 0x59a   : > { %11372 = vmatpush2.bf16.msra.mxu1 %v15414_v48  ;;  %11332 = vmatprep.subr.bf16.mxu0 %v15419_v50 }
 0x59b   : > { %11373 = vmatprep.subr.bf16.mxu1 %v15422_v49 }
 0x59d   : > { %11333 = vmatpush2.bf16.msra.mxu0 %v15417_v52  ;;  %v15459_v52 = vld [vmem:[%s17823_s27 + $0x1ca4] ss:$16 sps:$4 sm:$0xff]  }
 0x59e   : > { %11374 = vmatpush2.bf16.msra.mxu1 %v15420_v60  ;;  %11334 = vmatprep.subr.bf16.mxu0 %v15425_v46  ;;  %v15462_v60 = vld [vmem:[%s17823_s27 + $0x1ea4] ss:$16 sps:$4 sm:$0xff]  }
 0x59f   : > { %11375 = vmatprep.subr.bf16.mxu1 %v15428_v3 }
 0x5a1   : > { %11335 = vmatpush2.bf16.msra.mxu0 %v15423_v4  ;;  %v15457_v4 = vld [vmem:[%s17823_s27 + $0x1ca0] ss:$16 sps:$4 sm:$0xff]  }
 0x5a2   : > { %11376 = vmatpush2.bf16.msra.mxu1 %v15426_v0  ;;  %11336 = vmatprep.subr.bf16.mxu0 %v15431_v13  ;;  %v15460_v0 = vld [vmem:[%s17823_s27 + $0x1ea0] ss:$16 sps:$4 sm:$0xff]  }
 0x5a3   : > { %11377 = vmatprep.subr.bf16.mxu1 %v15434_v37 }
 0x5a5   : > { %11337 = vmatpush2.bf16.msra.mxu0 %v15429_v39 }
 0x5a6   : > { %11378 = vmatpush2.bf16.msra.mxu1 %v15432_v18  ;;  %11338 = vmatprep.subr.bf16.mxu0 %v15437_v16  ;;  %v15468_v16 = vld [vmem:[%s17823_s27 + $0x1e84] ss:$16 sps:$4 sm:$0xff]  }
 0x5a7   : > { %11379 = vmatprep.subr.bf16.mxu1 %v15440_v19  ;;  %v15463_v19 = vld [vmem:[%s17823_s27 + $0x1c80] ss:$16 sps:$4 sm:$0xff]  }
 0x5a9   : > { %11339 = vmatpush2.bf16.msra.mxu0 %v15435_v17  ;;  %v15466_v17 = vld [vmem:[%s17823_s27 + $0x1e80] ss:$16 sps:$4 sm:$0xff]  }
 0x5aa   : > { %11380 = vmatpush2.bf16.msra.mxu1 %v15438_v21  ;;  %11390 = vmatprep.subr.bf16.mxu0 %v15447_v25  ;;  %v15471_v21 = vld [vmem:[%s17823_s27 + $0x1c64] ss:$16 sps:$4 sm:$0xff]  }
 0x5ab   : > { %11431 = vmatprep.subr.bf16.mxu1 %v15450_v22  ;;  %v15474_v25 = vld [vmem:[%s17823_s27 + $0x1e64] ss:$16 sps:$4 sm:$0xff]   ;;  %v15469_v22 = vld [vmem:[%s17823_s27 + $0x1c60] ss:$16 sps:$4 sm:$0xff]  }
 0x5ac   : > { %v11096_v11 = vpop.f32.mrf.mxu0  ;;  %11341 = vmatmul.mubr.bf16.vlgmr.msra.gmra.mxu0 %v18850_v10 }
 0x5ad   : > { %v11137_v27 = vpop.f32.mrf.mxu1  ;;  %11382 = vmatmul.mubr.bf16.vlgmr.msra.gmra.mxu1 %v18854_v35  ;;  %v11097_v48 = vadd.f32 %v11096_v11, %v18779_v41  ;;  %11391 = vmatpush1.bf16.msra.mxu0 %v15445_v34  ;;  %v15472_v34 = vld [vmem:[%s17823_s27 + $0x1e60] ss:$16 sps:$4 sm:$0xff]   ;;  %v15486_v11 = vld [vmem:[%s17823_s27 + $0x1e24] ss:$16 sps:$4 sm:$0xff]  }
 0x5ae   : > { %11432 = vmatpush1.bf16.msra.mxu1 %v15448_v31  ;;  %v11098_v50 = vpop.f32.mrf.mxu0  ;;  %11392 = vmatprep.subr.bf16.mxu0 %v15453_v61  ;;  %v15477_v31 = vld [vmem:[%s17823_s27 + $0x1c44] ss:$16 sps:$4 sm:$0xff]  }
 0x5af   : > { %v11139_v49 = vpop.f32.mrf.mxu1  ;;  %11433 = vmatprep.subr.bf16.mxu1 %v15456_v43  ;;  %v18873_v46 = vadd.f32 %v11137_v27, %v11097_v48  ;;  %v11099_v3 = vadd.f32 %v11098_v50, %v18786_v36  ;;  %11422 = vmatprep.mubr.bf16.mxu0 %v18862_v12  ;;  %v15465_v36 = vld [vmem:[%s17823_s27 + $0x1c84] ss:$16 sps:$4 sm:$0xff]   ;;  %v15475_v43 = vld [vmem:[%s17823_s27 + $0x1c40] ss:$16 sps:$4 sm:$0xff]  }
 0x5b0   : > { %11463 = vmatprep.mubr.bf16.mxu1 %v18866_v7  ;;  %v11100_v41 = vpop.f32.mrf.mxu0  ;;  %v15480_v61 = vld [vmem:[%s17823_s27 + $0x1e44] ss:$16 sps:$4 sm:$0xff]   ;;  %v15481_v27 = vld [vmem:[%s17823_s27 + $0x1c20] ss:$16 sps:$4 sm:$0xff]  }
 0x5b1   : > { %v11141_v13 = vpop.f32.mrf.mxu1  ;;  %v18880_v37 = vadd.f32 %v11139_v49, %v11099_v3  ;;  %11393 = vmatpush1.bf16.msra.mxu0 %v15451_v44  ;;  %v15478_v44 = vld [vmem:[%s17823_s27 + $0x1e40] ss:$16 sps:$4 sm:$0xff]   ;;  %v15489_v50 = vld [vmem:[%s17823_s27 + $0x1c04] ss:$16 sps:$4 sm:$0xff]  }
 0x5b2   : > { %11434 = vmatpush1.bf16.msra.mxu1 %v15454_v45  ;;  %v11101_v39 = vpop.f32.mrf.mxu0  ;;  %11394 = vmatprep.subr.bf16.mxu0 %v15459_v52  ;;  %v15483_v45 = vld [vmem:[%s17823_s27 + $0x1c24] ss:$16 sps:$4 sm:$0xff]   ;;  %v15484_v48 = vld [vmem:[%s17823_s27 + $0x1e20] ss:$16 sps:$4 sm:$0xff]  }
 0x5b3   : > { %v11142_v18 = vpop.f32.mrf.mxu1  ;;  %11435 = vmatprep.subr.bf16.mxu1 %v15462_v60  ;;  %v15492_v49 = vld [vmem:[%s17823_s27 + $0x1e04] ss:$16 sps:$4 sm:$0xff]   ;;  %v15487_v52 = vld [vmem:[%s17823_s27 + $0x1c00] ss:$16 sps:$4 sm:$0xff]  }
 0x5b4   : > { %v15490_v60 = vld [vmem:[%s17823_s27 + $0x1e00] ss:$16 sps:$4 sm:$0xff]   ;;  %v15495_v3 = vld [vmem:[%s17823_s27 + $0x1de4] ss:$16 sps:$4 sm:$0xff]  }
 0x5b5   : > { %11395 = vmatpush1.bf16.msra.mxu0 %v15457_v4  ;;  %v15498_v4 = vld [vmem:[%s17823_s27 + $0x1fe4] ss:$16 sps:$4 sm:$0xff]   ;;  %v15496_v41 = vld [vmem:[%s17823_s27 + $0x1fe0] ss:$16 sps:$4 sm:$0xff]  }
 0x5b6   : > { %11436 = vmatpush1.bf16.msra.mxu1 %v15460_v0  ;;  %11396 = vmatprep.subr.bf16.mxu0 %v15465_v36  ;;  %v15493_v0 = vld [vmem:[%s17823_s27 + $0x1de0] ss:$16 sps:$4 sm:$0xff]   ;;  %v15501_v13 = vld [vmem:[%s17823_s27 + $0x1dc4] ss:$16 sps:$4 sm:$0xff]  }
 0x5b7   : > { %11437 = vmatprep.subr.bf16.mxu1 %v15468_v16  ;;  %v15504_v39 = vld [vmem:[%s17823_s27 + $0x1fc4] ss:$16 sps:$4 sm:$0xff]   ;;  %v15499_v18 = vld [vmem:[%s17823_s27 + $0x1dc0] ss:$16 sps:$4 sm:$0xff]  }
 0x5b8   : > { %v15502_v36 = vld [vmem:[%s17823_s27 + $0x1fc0] ss:$16 sps:$4 sm:$0xff]   ;;  %v15507_v16 = vld [vmem:[%s17823_s27 + $0x1da4] ss:$16 sps:$4 sm:$0xff]  }
 0x5b9   : > { %11397 = vmatpush1.bf16.msra.mxu0 %v15463_v19  ;;  %v15510_v19 = vld [vmem:[%s17823_s27 + $0x1fa4] ss:$16 sps:$4 sm:$0xff]  }
 0x5ba   : > { %11438 = vmatpush1.bf16.msra.mxu1 %v15466_v17  ;;  %11398 = vmatprep.subr.bf16.mxu0 %v15471_v21  ;;  %v15505_v17 = vld [vmem:[%s17823_s27 + $0x1da0] ss:$16 sps:$4 sm:$0xff]  }
 0x5bb   : > { %11439 = vmatprep.subr.bf16.mxu1 %v15474_v25  ;;  %v15508_v21 = vld [vmem:[%s17823_s27 + $0x1fa0] ss:$16 sps:$4 sm:$0xff]   ;;  %v15513_v25 = vld [vmem:[%s17823_s27 + $0x1d84] ss:$16 sps:$4 sm:$0xff]  }
 0x5bd   : > { %11399 = vmatpush1.bf16.msra.mxu0 %v15469_v22  ;;  %v15516_v22 = vld [vmem:[%s17823_s27 + $0x1f84] ss:$16 sps:$4 sm:$0xff]  }
 0x5be   : > { %11440 = vmatpush1.bf16.msra.mxu1 %v15472_v34  ;;  %11400 = vmatprep.subr.bf16.mxu0 %v15477_v31  ;;  %v15511_v34 = vld [vmem:[%s17823_s27 + $0x1d80] ss:$16 sps:$4 sm:$0xff]  }
 0x5bf   : > { %11441 = vmatprep.subr.bf16.mxu1 %v15480_v61  ;;  %v15514_v31 = vld [vmem:[%s17823_s27 + $0x1f80] ss:$16 sps:$4 sm:$0xff]   ;;  %v15519_v61 = vld [vmem:[%s17823_s27 + $0x1d64] ss:$16 sps:$4 sm:$0xff]  }
 0x5c1   : > { %11401 = vmatpush1.bf16.msra.mxu0 %v15475_v43  ;;  %v15522_v43 = vld [vmem:[%s17823_s27 + $0x1f64] ss:$16 sps:$4 sm:$0xff]  }
 0x5c2   : > { %11442 = vmatpush1.bf16.msra.mxu1 %v15478_v44  ;;  %11402 = vmatprep.subr.bf16.mxu0 %v15483_v45  ;;  %v15517_v44 = vld [vmem:[%s17823_s27 + $0x1d60] ss:$16 sps:$4 sm:$0xff]  }
 0x5c3   : > { %11443 = vmatprep.subr.bf16.mxu1 %v15486_v11  ;;  %v15520_v45 = vld [vmem:[%s17823_s27 + $0x1f60] ss:$16 sps:$4 sm:$0xff]   ;;  %v15525_v11 = vld [vmem:[%s17823_s27 + $0x1d44] ss:$16 sps:$4 sm:$0xff]  }
 0x5c5   : > { %11403 = vmatpush1.bf16.msra.mxu0 %v15481_v27  ;;  %v15528_v27 = vld [vmem:[%s17823_s27 + $0x1f44] ss:$16 sps:$4 sm:$0xff]  }
 0x5c6   : > { %11444 = vmatpush1.bf16.msra.mxu1 %v15484_v48  ;;  %11404 = vmatprep.subr.bf16.mxu0 %v15489_v50  ;;  %v15523_v48 = vld [vmem:[%s17823_s27 + $0x1d40] ss:$16 sps:$4 sm:$0xff]  }
 0x5c7   : > { %11445 = vmatprep.subr.bf16.mxu1 %v15492_v49  ;;  %v15526_v50 = vld [vmem:[%s17823_s27 + $0x1f40] ss:$16 sps:$4 sm:$0xff]   ;;  %v15531_v49 = vld [vmem:[%s17823_s27 + $0x1d24] ss:$16 sps:$4 sm:$0xff]  }
 0x5c9   : > { %11405 = vmatpush1.bf16.msra.mxu0 %v15487_v52  ;;  %v15534_v52 = vld [vmem:[%s17823_s27 + $0x1f24] ss:$16 sps:$4 sm:$0xff]  }
 0x5ca   : > { %11446 = vmatpush1.bf16.msra.mxu1 %v15490_v60  ;;  %11406 = vmatprep.subr.bf16.mxu0 %v15495_v3  ;;  %v15529_v60 = vld [vmem:[%s17823_s27 + $0x1d20] ss:$16 sps:$4 sm:$0xff]  }
 0x5cb   : > { %11447 = vmatprep.subr.bf16.mxu1 %v15498_v4  ;;  %v15532_v3 = vld [vmem:[%s17823_s27 + $0x1f20] ss:$16 sps:$4 sm:$0xff]   ;;  %v15537_v4 = vld [vmem:[%s17823_s27 + $0x1d04] ss:$16 sps:$4 sm:$0xff]  }
 0x5cd   : > { %11407 = vmatpush2.bf16.msra.mxu0 %v15493_v0  ;;  %v15540_v0 = vld [vmem:[%s17823_s27 + $0x1f04] ss:$16 sps:$4 sm:$0xff]  }
 0x5ce   : > { %11448 = vmatpush2.bf16.msra.mxu1 %v15496_v41  ;;  %11408 = vmatprep.subr.bf16.mxu0 %v15501_v13  ;;  %v15535_v41 = vld [vmem:[%s17823_s27 + $0x1d00] ss:$16 sps:$4 sm:$0xff]  }
 0x5cf   : > { %11449 = vmatprep.subr.bf16.mxu1 %v15504_v39  ;;  %v15538_v13 = vld [vmem:[%s17823_s27 + $0x1f00] ss:$16 sps:$4 sm:$0xff]   ;;  %v15547_v39 = vld [vmem:[%s17823_s27 + $0xec] ss:$16 sps:$4 sm:$0xff]  }
 0x5d1   : > { %11409 = vmatpush2.bf16.msra.mxu0 %v15499_v18  ;;  %v15550_v18 = vld [vmem:[%s17823_s27 + $0x2ec] ss:$16 sps:$4 sm:$0xff]  }
 0x5d2   : > { %11450 = vmatpush2.bf16.msra.mxu1 %v15502_v36  ;;  %11410 = vmatprep.subr.bf16.mxu0 %v15507_v16  ;;  %v15545_v36 = vld [vmem:[%s17823_s27 + $0xe8] ss:$16 sps:$4 sm:$0xff]  }
 0x5d3   : > { %11451 = vmatprep.subr.bf16.mxu1 %v15510_v19  ;;  %v15548_v16 = vld [vmem:[%s17823_s27 + $0x2e8] ss:$16 sps:$4 sm:$0xff]   ;;  %v18940_v19 = vcombine.low %v18842_v23, %v18842_v23 }
 0x5d5   : > { %11411 = vmatpush2.bf16.msra.mxu0 %v15505_v17  ;;  %v18944_v17 = vcombine.low %v18844_v24, %v18844_v24 }
 0x5d6   : > { %11452 = vmatpush2.bf16.msra.mxu1 %v15508_v21  ;;  %11412 = vmatprep.subr.bf16.mxu0 %v15513_v25  ;;  %v15553_v21 = vld [vmem:[%s17823_s27 + $0xcc] ss:$16 sps:$4 sm:$0xff]  }
 0x5d7   : > { %11453 = vmatprep.subr.bf16.mxu1 %v15516_v22  ;;  %v15556_v25 = vld [vmem:[%s17823_s27 + $0x2cc] ss:$16 sps:$4 sm:$0xff]   ;;  %v15551_v22 = vld [vmem:[%s17823_s27 + $0xc8] ss:$16 sps:$4 sm:$0xff]  }
 0x5d9   : > { %11413 = vmatpush2.bf16.msra.mxu0 %v15511_v34  ;;  %v15554_v34 = vld [vmem:[%s17823_s27 + $0x2c8] ss:$16 sps:$4 sm:$0xff]  }
 0x5da   : > { %11454 = vmatpush2.bf16.msra.mxu1 %v15514_v31  ;;  %11414 = vmatprep.subr.bf16.mxu0 %v15519_v61 }
 0x5db   : > { %11455 = vmatprep.subr.bf16.mxu1 %v15522_v43 }
 0x5dd   : > { %11415 = vmatpush2.bf16.msra.mxu0 %v15517_v44  ;;  %v15559_v44 = vld [vmem:[%s17823_s27 + $0xac] ss:$16 sps:$4 sm:$0xff]  }
 0x5de   : > { %11456 = vmatpush2.bf16.msra.mxu1 %v15520_v45  ;;  %11416 = vmatprep.subr.bf16.mxu0 %v15525_v11  ;;  %v15562_v45 = vld [vmem:[%s17823_s27 + $0x2ac] ss:$16 sps:$4 sm:$0xff]  }
 0x5df   : > { %11457 = vmatprep.subr.bf16.mxu1 %v15528_v27 }
 0x5e1   : > { %11417 = vmatpush2.bf16.msra.mxu0 %v15523_v48  ;;  %v15557_v48 = vld [vmem:[%s17823_s27 + $0xa8] ss:$16 sps:$4 sm:$0xff]  }
 0x5e2   : > { %11458 = vmatpush2.bf16.msra.mxu1 %v15526_v50  ;;  %11418 = vmatprep.subr.bf16.mxu0 %v15531_v49  ;;  %v15560_v50 = vld [vmem:[%s17823_s27 + $0x2a8] ss:$16 sps:$4 sm:$0xff]  }
 0x5e3   : > { %11459 = vmatprep.subr.bf16.mxu1 %v15534_v52 }
 0x5e5   : > { %11419 = vmatpush2.bf16.msra.mxu0 %v15529_v60 }
 0x5e6   : > { %11460 = vmatpush2.bf16.msra.mxu1 %v15532_v3  ;;  %11420 = vmatprep.subr.bf16.mxu0 %v15537_v4  ;;  %v15566_v4 = vld [vmem:[%s17823_s27 + $0x288] ss:$16 sps:$4 sm:$0xff]  }
 0x5e7   : > { %11461 = vmatprep.subr.bf16.mxu1 %v15540_v0  ;;  %v15571_v0 = vld [vmem:[%s17823_s27 + $0x6c] ss:$16 sps:$4 sm:$0xff]  }
 0x5e9   : > { %11421 = vmatpush2.bf16.msra.mxu0 %v15535_v41  ;;  %v15574_v41 = vld [vmem:[%s17823_s27 + $0x26c] ss:$16 sps:$4 sm:$0xff]  }
 0x5ea   : > { %11462 = vmatpush2.bf16.msra.mxu1 %v15538_v13  ;;  %11472 = vmatprep.subr.bf16.mxu0 %v15547_v39  ;;  %v15569_v13 = vld [vmem:[%s17823_s27 + $0x68] ss:$16 sps:$4 sm:$0xff]  }
 0x5eb   : > { %11513 = vmatprep.subr.bf16.mxu1 %v15550_v18  ;;  %v15572_v39 = vld [vmem:[%s17823_s27 + $0x268] ss:$16 sps:$4 sm:$0xff]   ;;  %v15577_v18 = vld [vmem:[%s17823_s27 + $0x4c] ss:$16 sps:$4 sm:$0xff]  }
 0x5ec   : > { %v11178_v31 = vpop.f32.mrf.mxu0  ;;  %11423 = vmatmul.mubr.bf16.vlgmr.msra.gmra.mxu0 %v18940_v19 }
 0x5ed   : > { %v11219_v61 = vpop.f32.mrf.mxu1  ;;  %11464 = vmatmul.mubr.bf16.vlgmr.msra.gmra.mxu1 %v18944_v17  ;;  %v11179_v23 = vadd.f32 %v11178_v31, %v18873_v46  ;;  %11473 = vmatpush1.bf16.msra.mxu0 %v15545_v36  ;;  %v15580_v36 = vld [vmem:[%s17823_s27 + $0x24c] ss:$16 sps:$4 sm:$0xff]   ;;  %v15584_v31 = vld [vmem:[%s17823_s27 + $0x228] ss:$16 sps:$4 sm:$0xff]  }
 0x5ee   : > { %11514 = vmatpush1.bf16.msra.mxu1 %v15548_v16  ;;  %v11180_v24 = vpop.f32.mrf.mxu0  ;;  %11474 = vmatprep.subr.bf16.mxu0 %v15553_v21  ;;  %v15575_v16 = vld [vmem:[%s17823_s27 + $0x48] ss:$16 sps:$4 sm:$0xff]  }
 0x5ef   : > { %v11221_v43 = vpop.f32.mrf.mxu1  ;;  %11515 = vmatprep.subr.bf16.mxu1 %v15556_v25  ;;  %v18955_v11 = vadd.f32 %v11219_v61, %v11179_v23  ;;  %v11181_v27 = vadd.f32 %v11180_v24, %v18880_v37  ;;  %11504 = vmatprep.mubr.bf16.mxu0 %v18265_v38  ;;  %v15565_v37 = vld [vmem:[%s17823_s27 + $0x8c] ss:$16 sps:$4 sm:$0xff]   ;;  %v15578_v21 = vld [vmem:[%s17823_s27 + $0x248] ss:$16 sps:$4 sm:$0xff]  }
 0x5f0   : > { %11545 = vmatprep.mubr.bf16.mxu1 %v18269_v63  ;;  %v11182_v46 = vpop.f32.mrf.mxu0  ;;  %v15568_v38 = vld [vmem:[%s17823_s27 + $0x28c] ss:$16 sps:$4 sm:$0xff]   ;;  %v15563_v63 = vld [vmem:[%s17823_s27 + $0x88] ss:$16 sps:$4 sm:$0xff]  }
 0x5f1   : > { %v11223_v49 = vpop.f32.mrf.mxu1  ;;  %v18962_v52 = vadd.f32 %v11221_v43, %v11181_v27  ;;  %11475 = vmatpush1.bf16.msra.mxu0 %v15551_v22  ;;  %v15583_v25 = vld [vmem:[%s17823_s27 + $0x2c] ss:$16 sps:$4 sm:$0xff]   ;;  %v15587_v24 = vld [vmem:[%s17823_s27 + $0x8] ss:$16 sps:$4 sm:$0xff]  }
 0x5f2   : > { %11516 = vmatpush1.bf16.msra.mxu1 %v15554_v34  ;;  %v11183_v60 = vpop.f32.mrf.mxu0  ;;  %11476 = vmatprep.subr.bf16.mxu0 %v15559_v44  ;;  %v15586_v22 = vld [vmem:[%s17823_s27 + $0x22c] ss:$16 sps:$4 sm:$0xff]   ;;  %v15581_v34 = vld [vmem:[%s17823_s27 + $0x28] ss:$16 sps:$4 sm:$0xff]  }
 0x5f3   : > { %v11224_v3 = vpop.f32.mrf.mxu1  ;;  %11517 = vmatprep.subr.bf16.mxu1 %v15562_v45  ;;  %v15589_v61 = vld [vmem:[%s17823_s27 + $0xc] ss:$16 sps:$4 sm:$0xff]   ;;  %v15590_v43 = vld [vmem:[%s17823_s27 + $0x208] ss:$16 sps:$4 sm:$0xff]  }
 0x5f4   : > { %v15592_v23 = vld [vmem:[%s17823_s27 + $0x20c] ss:$16 sps:$4 sm:$0xff]   ;;  %v15593_v27 = vld [vmem:[%s17823_s27 + $0x1e8] ss:$16 sps:$4 sm:$0xff]  }
 0x5f5   : > { %11477 = vmatpush1.bf16.msra.mxu0 %v15557_v48  ;;  %v15595_v44 = vld [vmem:[%s17823_s27 + $0x1ec] ss:$16 sps:$4 sm:$0xff]   ;;  %v15596_v48 = vld [vmem:[%s17823_s27 + $0x3e8] ss:$16 sps:$4 sm:$0xff]  }
 0x5f6   : > { %11518 = vmatpush1.bf16.msra.mxu1 %v15560_v50  ;;  %11478 = vmatprep.subr.bf16.mxu0 %v15565_v37  ;;  %v15598_v45 = vld [vmem:[%s17823_s27 + $0x3ec] ss:$16 sps:$4 sm:$0xff]   ;;  %v15599_v49 = vld [vmem:[%s17823_s27 + $0x1c8] ss:$16 sps:$4 sm:$0xff]  }
 0x5f7   : > { %11519 = vmatprep.subr.bf16.mxu1 %v15568_v38  ;;  %v15601_v50 = vld [vmem:[%s17823_s27 + $0x1cc] ss:$16 sps:$4 sm:$0xff]   ;;  %v15602_v60 = vld [vmem:[%s17823_s27 + $0x3c8] ss:$16 sps:$4 sm:$0xff]  }
 0x5f8   : > { %v15604_v46 = vld [vmem:[%s17823_s27 + $0x3cc] ss:$16 sps:$4 sm:$0xff]   ;;  %v15605_v38 = vld [vmem:[%s17823_s27 + $0x1a8] ss:$16 sps:$4 sm:$0xff]  }
 0x5f9   : > { %11479 = vmatpush1.bf16.msra.mxu0 %v15563_v63  ;;  %v15607_v3 = vld [vmem:[%s17823_s27 + $0x1ac] ss:$16 sps:$4 sm:$0xff]   ;;  %v15608_v63 = vld [vmem:[%s17823_s27 + $0x3a8] ss:$16 sps:$4 sm:$0xff]  }
 0x5fa   : > { %11520 = vmatpush1.bf16.msra.mxu1 %v15566_v4  ;;  %11480 = vmatprep.subr.bf16.mxu0 %v15571_v0  ;;  %v15610_v37 = vld [vmem:[%s17823_s27 + $0x3ac] ss:$16 sps:$4 sm:$0xff]  }
 0x5fb   : > { %11521 = vmatprep.subr.bf16.mxu1 %v15574_v41  ;;  %v15613_v4 = vld [vmem:[%s17823_s27 + $0x18c] ss:$16 sps:$4 sm:$0xff]   ;;  %v15611_v41 = vld [vmem:[%s17823_s27 + $0x188] ss:$16 sps:$4 sm:$0xff]  }
 0x5fc   : > { %v15616_v0 = vld [vmem:[%s17823_s27 + $0x38c] ss:$16 sps:$4 sm:$0xff]  }
 0x5fd   : > { %11481 = vmatpush1.bf16.msra.mxu0 %v15569_v13  ;;  %v15614_v13 = vld [vmem:[%s17823_s27 + $0x388] ss:$16 sps:$4 sm:$0xff]  }
 0x5fe   : > { %11522 = vmatpush1.bf16.msra.mxu1 %v15572_v39  ;;  %11482 = vmatprep.subr.bf16.mxu0 %v15577_v18  ;;  %v15619_v39 = vld [vmem:[%s17823_s27 + $0x16c] ss:$16 sps:$4 sm:$0xff]  }
 0x5ff   : > { %11523 = vmatprep.subr.bf16.mxu1 %v15580_v36  ;;  %v15622_v18 = vld [vmem:[%s17823_s27 + $0x36c] ss:$16 sps:$4 sm:$0xff]   ;;  %v15617_v36 = vld [vmem:[%s17823_s27 + $0x168] ss:$16 sps:$4 sm:$0xff]  }
 0x601   : > { %11483 = vmatpush1.bf16.msra.mxu0 %v15575_v16  ;;  %v15620_v16 = vld [vmem:[%s17823_s27 + $0x368] ss:$16 sps:$4 sm:$0xff]  }
 0x602   : > { %11524 = vmatpush1.bf16.msra.mxu1 %v15578_v21  ;;  %11484 = vmatprep.subr.bf16.mxu0 %v15583_v25  ;;  %v15625_v21 = vld [vmem:[%s17823_s27 + $0x14c] ss:$16 sps:$4 sm:$0xff]  }
 0x603   : > { %11525 = vmatprep.subr.bf16.mxu1 %v15586_v22  ;;  %v15628_v25 = vld [vmem:[%s17823_s27 + $0x34c] ss:$16 sps:$4 sm:$0xff]   ;;  %v15623_v22 = vld [vmem:[%s17823_s27 + $0x148] ss:$16 sps:$4 sm:$0xff]  }
 0x605   : > { %11485 = vmatpush1.bf16.msra.mxu0 %v15581_v34  ;;  %v15626_v34 = vld [vmem:[%s17823_s27 + $0x348] ss:$16 sps:$4 sm:$0xff]  }
 0x606   : > { %11526 = vmatpush1.bf16.msra.mxu1 %v15584_v31  ;;  %11486 = vmatprep.subr.bf16.mxu0 %v15589_v61  ;;  %v15631_v31 = vld [vmem:[%s17823_s27 + $0x12c] ss:$16 sps:$4 sm:$0xff]  }
 0x607   : > { %11527 = vmatprep.subr.bf16.mxu1 %v15592_v23  ;;  %v15634_v61 = vld [vmem:[%s17823_s27 + $0x32c] ss:$16 sps:$4 sm:$0xff]   ;;  %v15629_v23 = vld [vmem:[%s17823_s27 + $0x128] ss:$16 sps:$4 sm:$0xff]  }
 0x609   : > { %11487 = vmatpush1.bf16.msra.mxu0 %v15587_v24  ;;  %v15632_v24 = vld [vmem:[%s17823_s27 + $0x328] ss:$16 sps:$4 sm:$0xff]  }
 0x60a   : > { %11528 = vmatpush1.bf16.msra.mxu1 %v15590_v43  ;;  %11488 = vmatprep.subr.bf16.mxu0 %v15595_v44  ;;  %v15637_v43 = vld [vmem:[%s17823_s27 + $0x10c] ss:$16 sps:$4 sm:$0xff]  }
 0x60b   : > { %11529 = vmatprep.subr.bf16.mxu1 %v15598_v45  ;;  %v15640_v44 = vld [vmem:[%s17823_s27 + $0x30c] ss:$16 sps:$4 sm:$0xff]   ;;  %v15635_v45 = vld [vmem:[%s17823_s27 + $0x108] ss:$16 sps:$4 sm:$0xff]  }
 0x60d   : > { %11489 = vmatpush2.bf16.msra.mxu0 %v15593_v27  ;;  %v15638_v27 = vld [vmem:[%s17823_s27 + $0x308] ss:$16 sps:$4 sm:$0xff]  }
 0x60e   : > { %11530 = vmatpush2.bf16.msra.mxu1 %v15596_v48  ;;  %11490 = vmatprep.subr.bf16.mxu0 %v15601_v50  ;;  %v15643_v48 = vld [vmem:[%s17823_s27 + $0x4ec] ss:$16 sps:$4 sm:$0xff]  }
 0x60f   : > { %11531 = vmatprep.subr.bf16.mxu1 %v15604_v46  ;;  %v15646_v50 = vld [vmem:[%s17823_s27 + $0x6ec] ss:$16 sps:$4 sm:$0xff]   ;;  %v15641_v46 = vld [vmem:[%s17823_s27 + $0x4e8] ss:$16 sps:$4 sm:$0xff]  }
 0x611   : > { %11491 = vmatpush2.bf16.msra.mxu0 %v15599_v49  ;;  %v15644_v49 = vld [vmem:[%s17823_s27 + $0x6e8] ss:$16 sps:$4 sm:$0xff]  }
 0x612   : > { %11532 = vmatpush2.bf16.msra.mxu1 %v15602_v60  ;;  %11492 = vmatprep.subr.bf16.mxu0 %v15607_v3  ;;  %v15649_v60 = vld [vmem:[%s17823_s27 + $0x4cc] ss:$16 sps:$4 sm:$0xff]  }
 0x613   : > { %11533 = vmatprep.subr.bf16.mxu1 %v15610_v37  ;;  %v15652_v3 = vld [vmem:[%s17823_s27 + $0x6cc] ss:$16 sps:$4 sm:$0xff]   ;;  %v15647_v37 = vld [vmem:[%s17823_s27 + $0x4c8] ss:$16 sps:$4 sm:$0xff]  }
 0x615   : > { %11493 = vmatpush2.bf16.msra.mxu0 %v15605_v38  ;;  %v15650_v38 = vld [vmem:[%s17823_s27 + $0x6c8] ss:$16 sps:$4 sm:$0xff]  }
 0x616   : > { %11534 = vmatpush2.bf16.msra.mxu1 %v15608_v63  ;;  %11494 = vmatprep.subr.bf16.mxu0 %v15613_v4 }
 0x617   : > { %11535 = vmatprep.subr.bf16.mxu1 %v15616_v0 }
 0x619   : > { %11495 = vmatpush2.bf16.msra.mxu0 %v15611_v41 }
 0x61a   : > { %11536 = vmatpush2.bf16.msra.mxu1 %v15614_v13  ;;  %11496 = vmatprep.subr.bf16.mxu0 %v15619_v39  ;;  %v15655_v39 = vld [vmem:[%s17823_s27 + $0x4ac] ss:$16 sps:$4 sm:$0xff]  }
 0x61b   : > { %11537 = vmatprep.subr.bf16.mxu1 %v15622_v18  ;;  %v15658_v18 = vld [vmem:[%s17823_s27 + $0x6ac] ss:$16 sps:$4 sm:$0xff]  }
 0x61d   : > { %11497 = vmatpush2.bf16.msra.mxu0 %v15617_v36 }
 0x61e   : > { %11538 = vmatpush2.bf16.msra.mxu1 %v15620_v16  ;;  %11498 = vmatprep.subr.bf16.mxu0 %v15625_v21  ;;  %v15653_v21 = vld [vmem:[%s17823_s27 + $0x4a8] ss:$16 sps:$4 sm:$0xff]  }
 0x61f   : > { %11539 = vmatprep.subr.bf16.mxu1 %v15628_v25 }
 0x621   : > { %11499 = vmatpush2.bf16.msra.mxu0 %v15623_v22 }
 0x622   : > { %11540 = vmatpush2.bf16.msra.mxu1 %v15626_v34  ;;  %11500 = vmatprep.subr.bf16.mxu0 %v15631_v31  ;;  %v15662_v31 = vld [vmem:[%s17823_s27 + $0x688] ss:$16 sps:$4 sm:$0xff]  }
 0x623   : > { %11541 = vmatprep.subr.bf16.mxu1 %v15634_v61  ;;  %v15667_v61 = vld [vmem:[%s17823_s27 + $0x46c] ss:$16 sps:$4 sm:$0xff]  }
 0x625   : > { %11501 = vmatpush2.bf16.msra.mxu0 %v15629_v23  ;;  %v15670_v23 = vld [vmem:[%s17823_s27 + $0x66c] ss:$16 sps:$4 sm:$0xff]  }
 0x626   : > { %11542 = vmatpush2.bf16.msra.mxu1 %v15632_v24  ;;  %11502 = vmatprep.subr.bf16.mxu0 %v15637_v43  ;;  %v15665_v24 = vld [vmem:[%s17823_s27 + $0x468] ss:$16 sps:$4 sm:$0xff]  }
 0x627   : > { %11543 = vmatprep.subr.bf16.mxu1 %v15640_v44  ;;  %v15668_v43 = vld [vmem:[%s17823_s27 + $0x668] ss:$16 sps:$4 sm:$0xff]   ;;  %v15673_v44 = vld [vmem:[%s17823_s27 + $0x44c] ss:$16 sps:$4 sm:$0xff]  }
 0x629   : > { %11503 = vmatpush2.bf16.msra.mxu0 %v15635_v45  ;;  %v15676_v45 = vld [vmem:[%s17823_s27 + $0x64c] ss:$16 sps:$4 sm:$0xff]  }
 0x62a   : > { %11544 = vmatpush2.bf16.msra.mxu1 %v15638_v27  ;;  %11554 = vmatprep.subr.bf16.mxu0 %v15643_v48  ;;  %v15671_v27 = vld [vmem:[%s17823_s27 + $0x448] ss:$16 sps:$4 sm:$0xff]  }
 0x62b   : > { %11595 = vmatprep.subr.bf16.mxu1 %v15646_v50  ;;  %v15674_v48 = vld [vmem:[%s17823_s27 + $0x648] ss:$16 sps:$4 sm:$0xff]   ;;  %v15679_v50 = vld [vmem:[%s17823_s27 + $0x42c] ss:$16 sps:$4 sm:$0xff]  }
 0x62c   : > { %v11260_v63 = vpop.f32.mrf.mxu0  ;;  %11505 = vmatmul.mubr.bf16.vlgmr.msra.gmra.mxu0 %v18291_v58  ;;  %v15656_v58 = vld [vmem:[%s17823_s27 + $0x6a8] ss:$16 sps:$4 sm:$0xff]  }
 0x62d   : > { %v11301_v4 = vpop.f32.mrf.mxu1  ;;  %11546 = vmatmul.mubr.bf16.vlgmr.msra.gmra.mxu1 %v18293_v59  ;;  %v11261_v0 = vadd.f32 %v11260_v63, %v18955_v11  ;;  %11555 = vmatpush1.bf16.msra.mxu0 %v15641_v46  ;;  %v15682_v46 = vld [vmem:[%s17823_s27 + $0x62c] ss:$16 sps:$4 sm:$0xff]   ;;  %v15686_v63 = vld [vmem:[%s17823_s27 + $0x608] ss:$16 sps:$4 sm:$0xff]  }
 0x62e   : > { %11596 = vmatpush1.bf16.msra.mxu1 %v15644_v49  ;;  %v11262_v41 = vpop.f32.mrf.mxu0  ;;  %11556 = vmatprep.subr.bf16.mxu0 %v15649_v60  ;;  %v15677_v49 = vld [vmem:[%s17823_s27 + $0x428] ss:$16 sps:$4 sm:$0xff]  }
 0x62f   : > { %v11303_v13 = vpop.f32.mrf.mxu1  ;;  %11597 = vmatprep.subr.bf16.mxu1 %v15652_v3  ;;  %v19029_v36 = vadd.f32 %v11301_v4, %v11261_v0  ;;  %v11263_v16 = vadd.f32 %v11262_v41, %v18962_v52  ;;  %11586 = vmatprep.mubr.bf16.mxu0 %v18329_v26  ;;  %v15661_v52 = vld [vmem:[%s17823_s27 + $0x48c] ss:$16 sps:$4 sm:$0xff]   ;;  %v15680_v60 = vld [vmem:[%s17823_s27 + $0x628] ss:$16 sps:$4 sm:$0xff]  }
 0x630   : > { %11627 = vmatprep.mubr.bf16.mxu1 %v18333_v53  ;;  %v11264_v59 = vpop.f32.mrf.mxu0  ;;  %v15664_v26 = vld [vmem:[%s17823_s27 + $0x68c] ss:$16 sps:$4 sm:$0xff]   ;;  %v15659_v53 = vld [vmem:[%s17823_s27 + $0x488] ss:$16 sps:$4 sm:$0xff]  }
 0x631   : > { %v11305_v11 = vpop.f32.mrf.mxu1  ;;  %v19036_v25 = vadd.f32 %v11303_v13, %v11263_v16  ;;  %11557 = vmatpush1.bf16.msra.mxu0 %v15647_v37  ;;  %v15685_v3 = vld [vmem:[%s17823_s27 + $0x40c] ss:$16 sps:$4 sm:$0xff]   ;;  %v15689_v41 = vld [vmem:[%s17823_s27 + $0x5e8] ss:$16 sps:$4 sm:$0xff]  }
 0x632   : > { %11598 = vmatpush1.bf16.msra.mxu1 %v15650_v38  ;;  %v11265_v22 = vpop.f32.mrf.mxu0  ;;  %11558 = vmatprep.subr.bf16.mxu0 %v15655_v39  ;;  %v15688_v37 = vld [vmem:[%s17823_s27 + $0x60c] ss:$16 sps:$4 sm:$0xff]   ;;  %v15683_v38 = vld [vmem:[%s17823_s27 + $0x408] ss:$16 sps:$4 sm:$0xff]  }
 0x633   : > { %v11306_v34 = vpop.f32.mrf.mxu1  ;;  %11599 = vmatprep.subr.bf16.mxu1 %v15658_v18  ;;  %v15691_v4 = vld [vmem:[%s17823_s27 + $0x5ec] ss:$16 sps:$4 sm:$0xff]   ;;  %v15692_v13 = vld [vmem:[%s17823_s27 + $0x7e8] ss:$16 sps:$4 sm:$0xff]  }
 0x634   : > { %v15694_v0 = vld [vmem:[%s17823_s27 + $0x7ec] ss:$16 sps:$4 sm:$0xff]   ;;  %v15695_v16 = vld [vmem:[%s17823_s27 + $0x5c8] ss:$16 sps:$4 sm:$0xff]  }
 0x635   : > { %11559 = vmatpush1.bf16.msra.mxu0 %v15653_v21  ;;  %v15697_v39 = vld [vmem:[%s17823_s27 + $0x5cc] ss:$16 sps:$4 sm:$0xff]   ;;  %v15698_v21 = vld [vmem:[%s17823_s27 + $0x7c8] ss:$16 sps:$4 sm:$0xff]  }
 0x636   : > { %11600 = vmatpush1.bf16.msra.mxu1 %v15656_v58  ;;  %11560 = vmatprep.subr.bf16.mxu0 %v15661_v52  ;;  %v15700_v18 = vld [vmem:[%s17823_s27 + $0x7cc] ss:$16 sps:$4 sm:$0xff]   ;;  %v15701_v11 = vld [vmem:[%s17823_s27 + $0x5a8] ss:$16 sps:$4 sm:$0xff]  }
 0x637   : > { %11601 = vmatprep.subr.bf16.mxu1 %v15664_v26  ;;  %v15703_v58 = vld [vmem:[%s17823_s27 + $0x5ac] ss:$16 sps:$4 sm:$0xff]   ;;  %v15704_v22 = vld [vmem:[%s17823_s27 + $0x7a8] ss:$16 sps:$4 sm:$0xff]  }
 0x638   : > { %v15706_v59 = vld [vmem:[%s17823_s27 + $0x7ac] ss:$16 sps:$4 sm:$0xff]   ;;  %v15707_v26 = vld [vmem:[%s17823_s27 + $0x588] ss:$16 sps:$4 sm:$0xff]  }
 0x639   : > { %11561 = vmatpush1.bf16.msra.mxu0 %v15659_v53  ;;  %v15709_v34 = vld [vmem:[%s17823_s27 + $0x58c] ss:$16 sps:$4 sm:$0xff]   ;;  %v15710_v53 = vld [vmem:[%s17823_s27 + $0x788] ss:$16 sps:$4 sm:$0xff]  }
 0x63a   : > { %11602 = vmatpush1.bf16.msra.mxu1 %v15662_v31  ;;  %11562 = vmatprep.subr.bf16.mxu0 %v15667_v61  ;;  %v15712_v52 = vld [vmem:[%s17823_s27 + $0x78c] ss:$16 sps:$4 sm:$0xff]  }
 0x63b   : > { %11603 = vmatprep.subr.bf16.mxu1 %v15670_v23  ;;  %v15715_v31 = vld [vmem:[%s17823_s27 + $0x56c] ss:$16 sps:$4 sm:$0xff]   ;;  %v15713_v23 = vld [vmem:[%s17823_s27 + $0x568] ss:$16 sps:$4 sm:$0xff]  }
 0x63c   : > { %v15718_v61 = vld [vmem:[%s17823_s27 + $0x76c] ss:$16 sps:$4 sm:$0xff]  }
 0x63d   : > { %11563 = vmatpush1.bf16.msra.mxu0 %v15665_v24  ;;  %v15716_v24 = vld [vmem:[%s17823_s27 + $0x768] ss:$16 sps:$4 sm:$0xff]  }
 0x63e   : > { %11604 = vmatpush1.bf16.msra.mxu1 %v15668_v43  ;;  %11564 = vmatprep.subr.bf16.mxu0 %v15673_v44  ;;  %v15721_v43 = vld [vmem:[%s17823_s27 + $0x54c] ss:$16 sps:$4 sm:$0xff]  }
 0x63f   : > { %11605 = vmatprep.subr.bf16.mxu1 %v15676_v45  ;;  %v15724_v44 = vld [vmem:[%s17823_s27 + $0x74c] ss:$16 sps:$4 sm:$0xff]   ;;  %v15719_v45 = vld [vmem:[%s17823_s27 + $0x548] ss:$16 sps:$4 sm:$0xff]  }
 0x641   : > { %11565 = vmatpush1.bf16.msra.mxu0 %v15671_v27  ;;  %v15722_v27 = vld [vmem:[%s17823_s27 + $0x748] ss:$16 sps:$4 sm:$0xff]  }
 0x642   : > { %11606 = vmatpush1.bf16.msra.mxu1 %v15674_v48  ;;  %11566 = vmatprep.subr.bf16.mxu0 %v15679_v50  ;;  %v15727_v48 = vld [vmem:[%s17823_s27 + $0x52c] ss:$16 sps:$4 sm:$0xff]  }
 0x643   : > { %11607 = vmatprep.subr.bf16.mxu1 %v15682_v46  ;;  %v15730_v50 = vld [vmem:[%s17823_s27 + $0x72c] ss:$16 sps:$4 sm:$0xff]   ;;  %v15725_v46 = vld [vmem:[%s17823_s27 + $0x528] ss:$16 sps:$4 sm:$0xff]  }
 0x645   : > { %11567 = vmatpush1.bf16.msra.mxu0 %v15677_v49  ;;  %v15728_v49 = vld [vmem:[%s17823_s27 + $0x728] ss:$16 sps:$4 sm:$0xff]  }
 0x646   : > { %11608 = vmatpush1.bf16.msra.mxu1 %v15680_v60  ;;  %11568 = vmatprep.subr.bf16.mxu0 %v15685_v3  ;;  %v15733_v60 = vld [vmem:[%s17823_s27 + $0x50c] ss:$16 sps:$4 sm:$0xff]  }
 0x647   : > { %11609 = vmatprep.subr.bf16.mxu1 %v15688_v37  ;;  %v15736_v3 = vld [vmem:[%s17823_s27 + $0x70c] ss:$16 sps:$4 sm:$0xff]   ;;  %v15731_v37 = vld [vmem:[%s17823_s27 + $0x508] ss:$16 sps:$4 sm:$0xff]  }
 0x649   : > { %11569 = vmatpush1.bf16.msra.mxu0 %v15683_v38  ;;  %v15734_v38 = vld [vmem:[%s17823_s27 + $0x708] ss:$16 sps:$4 sm:$0xff]  }
 0x64a   : > { %11610 = vmatpush1.bf16.msra.mxu1 %v15686_v63  ;;  %11570 = vmatprep.subr.bf16.mxu0 %v15691_v4  ;;  %v15739_v63 = vld [vmem:[%s17823_s27 + $0x8ec] ss:$16 sps:$4 sm:$0xff]  }
 0x64b   : > { %11611 = vmatprep.subr.bf16.mxu1 %v15694_v0  ;;  %v15742_v4 = vld [vmem:[%s17823_s27 + $0xaec] ss:$16 sps:$4 sm:$0xff]   ;;  %v15737_v0 = vld [vmem:[%s17823_s27 + $0x8e8] ss:$16 sps:$4 sm:$0xff]  }
 0x64d   : > { %11571 = vmatpush2.bf16.msra.mxu0 %v15689_v41  ;;  %v15740_v41 = vld [vmem:[%s17823_s27 + $0xae8] ss:$16 sps:$4 sm:$0xff]  }
 0x64e   : > { %11612 = vmatpush2.bf16.msra.mxu1 %v15692_v13  ;;  %11572 = vmatprep.subr.bf16.mxu0 %v15697_v39  ;;  %v15745_v13 = vld [vmem:[%s17823_s27 + $0x8cc] ss:$16 sps:$4 sm:$0xff]  }
 0x64f   : > { %11613 = vmatprep.subr.bf16.mxu1 %v15700_v18  ;;  %v15748_v39 = vld [vmem:[%s17823_s27 + $0xacc] ss:$16 sps:$4 sm:$0xff]   ;;  %v15743_v18 = vld [vmem:[%s17823_s27 + $0x8c8] ss:$16 sps:$4 sm:$0xff]  }
 0x651   : > { %11573 = vmatpush2.bf16.msra.mxu0 %v15695_v16  ;;  %v15746_v16 = vld [vmem:[%s17823_s27 + $0xac8] ss:$16 sps:$4 sm:$0xff]  }
 0x652   : > { %11614 = vmatpush2.bf16.msra.mxu1 %v15698_v21  ;;  %11574 = vmatprep.subr.bf16.mxu0 %v15703_v58 }
 0x653   : > { %11615 = vmatprep.subr.bf16.mxu1 %v15706_v59 }
 0x655   : > { %11575 = vmatpush2.bf16.msra.mxu0 %v15701_v11 }
 0x656   : > { %11616 = vmatpush2.bf16.msra.mxu1 %v15704_v22  ;;  %11576 = vmatprep.subr.bf16.mxu0 %v15709_v34  ;;  %v15751_v34 = vld [vmem:[%s17823_s27 + $0x8ac] ss:$16 sps:$4 sm:$0xff]  }
 0x657   : > { %11617 = vmatprep.subr.bf16.mxu1 %v15712_v52  ;;  %v15754_v52 = vld [vmem:[%s17823_s27 + $0xaac] ss:$16 sps:$4 sm:$0xff]  }
 0x659   : > { %11577 = vmatpush2.bf16.msra.mxu0 %v15707_v26 }
 0x65a   : > { %11618 = vmatpush2.bf16.msra.mxu1 %v15710_v53  ;;  %11578 = vmatprep.subr.bf16.mxu0 %v15715_v31  ;;  %v15749_v31 = vld [vmem:[%s17823_s27 + $0x8a8] ss:$16 sps:$4 sm:$0xff]  }
 0x65b   : > { %11619 = vmatprep.subr.bf16.mxu1 %v15718_v61  ;;  %v15752_v61 = vld [vmem:[%s17823_s27 + $0xaa8] ss:$16 sps:$4 sm:$0xff]  }
 0x65d   : > { %11579 = vmatpush2.bf16.msra.mxu0 %v15713_v23 }
 0x65e   : > { %11620 = vmatpush2.bf16.msra.mxu1 %v15716_v24  ;;  %11580 = vmatprep.subr.bf16.mxu0 %v15721_v43  ;;  %v15758_v43 = vld [vmem:[%s17823_s27 + $0xa88] ss:$16 sps:$4 sm:$0xff]  }
 0x65f   : > { %11621 = vmatprep.subr.bf16.mxu1 %v15724_v44  ;;  %v15763_v44 = vld [vmem:[%s17823_s27 + $0x86c] ss:$16 sps:$4 sm:$0xff]  }
 0x661   : > { %11581 = vmatpush2.bf16.msra.mxu0 %v15719_v45  ;;  %v15766_v45 = vld [vmem:[%s17823_s27 + $0xa6c] ss:$16 sps:$4 sm:$0xff]  }
 0x662   : > { %11622 = vmatpush2.bf16.msra.mxu1 %v15722_v27  ;;  %11582 = vmatprep.subr.bf16.mxu0 %v15727_v48  ;;  %v15761_v27 = vld [vmem:[%s17823_s27 + $0x868] ss:$16 sps:$4 sm:$0xff]  }
 0x663   : > { %11623 = vmatprep.subr.bf16.mxu1 %v15730_v50  ;;  %v15764_v48 = vld [vmem:[%s17823_s27 + $0xa68] ss:$16 sps:$4 sm:$0xff]   ;;  %v15769_v50 = vld [vmem:[%s17823_s27 + $0x84c] ss:$16 sps:$4 sm:$0xff]  }
 0x665   : > { %11583 = vmatpush2.bf16.msra.mxu0 %v15725_v46  ;;  %v15772_v46 = vld [vmem:[%s17823_s27 + $0xa4c] ss:$16 sps:$4 sm:$0xff]  }
 0x666   : > { %11624 = vmatpush2.bf16.msra.mxu1 %v15728_v49  ;;  %11584 = vmatprep.subr.bf16.mxu0 %v15733_v60  ;;  %v15767_v49 = vld [vmem:[%s17823_s27 + $0x848] ss:$16 sps:$4 sm:$0xff]  }
 0x667   : > { %11625 = vmatprep.subr.bf16.mxu1 %v15736_v3  ;;  %v15770_v60 = vld [vmem:[%s17823_s27 + $0xa48] ss:$16 sps:$4 sm:$0xff]   ;;  %v15775_v3 = vld [vmem:[%s17823_s27 + $0x82c] ss:$16 sps:$4 sm:$0xff]  }
 0x669   : > { %11585 = vmatpush2.bf16.msra.mxu0 %v15731_v37  ;;  %v15778_v37 = vld [vmem:[%s17823_s27 + $0xa2c] ss:$16 sps:$4 sm:$0xff]  }
 0x66a   : > { %11626 = vmatpush2.bf16.msra.mxu1 %v15734_v38  ;;  %11636 = vmatprep.subr.bf16.mxu0 %v15739_v63  ;;  %v15773_v38 = vld [vmem:[%s17823_s27 + $0x828] ss:$16 sps:$4 sm:$0xff]  }
 0x66b   : > { %11677 = vmatprep.subr.bf16.mxu1 %v15742_v4  ;;  %v15776_v63 = vld [vmem:[%s17823_s27 + $0xa28] ss:$16 sps:$4 sm:$0xff]   ;;  %v15781_v4 = vld [vmem:[%s17823_s27 + $0x80c] ss:$16 sps:$4 sm:$0xff]  }
 0x66c   : > { %v11342_v21 = vpop.f32.mrf.mxu0  ;;  %11587 = vmatmul.mubr.bf16.vlgmr.msra.gmra.mxu0 %v18377_v30 }
 0x66d   : > { %v11383_v58 = vpop.f32.mrf.mxu1  ;;  %11628 = vmatmul.mubr.bf16.vlgmr.msra.gmra.mxu1 %v18381_v20  ;;  %v11343_v59 = vadd.f32 %v11342_v21, %v19029_v36  ;;  %11637 = vmatpush1.bf16.msra.mxu0 %v15737_v0  ;;  %v15784_v0 = vld [vmem:[%s17823_s27 + $0xa0c] ss:$16 sps:$4 sm:$0xff]   ;;  %v15788_v21 = vld [vmem:[%s17823_s27 + $0xbe8] ss:$16 sps:$4 sm:$0xff]  }
 0x66e   : > { %11678 = vmatpush1.bf16.msra.mxu1 %v15740_v41  ;;  %v11344_v11 = vpop.f32.mrf.mxu0  ;;  %11638 = vmatprep.subr.bf16.mxu0 %v15745_v13  ;;  %v15779_v41 = vld [vmem:[%s17823_s27 + $0x808] ss:$16 sps:$4 sm:$0xff]  }
 0x66f   : > { %v11385_v22 = vpop.f32.mrf.mxu1  ;;  %11679 = vmatprep.subr.bf16.mxu1 %v15748_v39  ;;  %v19103_v26 = vadd.f32 %v11383_v58, %v11343_v59  ;;  %v11345_v30 = vadd.f32 %v11344_v11, %v19036_v25  ;;  %11668 = vmatprep.mubr.bf16.mxu0 %v18393_v15  ;;  %v15757_v15 = vld [vmem:[%s17823_s27 + $0x88c] ss:$16 sps:$4 sm:$0xff]   ;;  %v15755_v25 = vld [vmem:[%s17823_s27 + $0x888] ss:$16 sps:$4 sm:$0xff]  }
 0x670   : > { %11709 = vmatprep.mubr.bf16.mxu1 %v18397_v9  ;;  %v11346_v20 = vpop.f32.mrf.mxu0  ;;  %v15760_v9 = vld [vmem:[%s17823_s27 + $0xa8c] ss:$16 sps:$4 sm:$0xff]   ;;  %v15782_v13 = vld [vmem:[%s17823_s27 + $0xa08] ss:$16 sps:$4 sm:$0xff]  }
 0x671   : > { %v11387_v36 = vpop.f32.mrf.mxu1  ;;  %v19108_v53 = vadd.f32 %v11385_v22, %v11345_v30  ;;  %11639 = vmatpush1.bf16.msra.mxu0 %v15743_v18  ;;  %v15787_v39 = vld [vmem:[%s17823_s27 + $0x9ec] ss:$16 sps:$4 sm:$0xff]   ;;  %v15791_v11 = vld [vmem:[%s17823_s27 + $0x9c8] ss:$16 sps:$4 sm:$0xff]  }
 0x672   : > { %11680 = vmatpush1.bf16.msra.mxu1 %v15746_v16  ;;  %v11347_v23 = vpop.f32.mrf.mxu0  ;;  %11640 = vmatprep.subr.bf16.mxu0 %v15751_v34  ;;  %v15790_v18 = vld [vmem:[%s17823_s27 + $0xbec] ss:$16 sps:$4 sm:$0xff]   ;;  %v15785_v16 = vld [vmem:[%s17823_s27 + $0x9e8] ss:$16 sps:$4 sm:$0xff]  }
 0x673   : > { %v11388_v24 = vpop.f32.mrf.mxu1  ;;  %11681 = vmatprep.subr.bf16.mxu1 %v15754_v52  ;;  %v15793_v58 = vld [vmem:[%s17823_s27 + $0x9cc] ss:$16 sps:$4 sm:$0xff]   ;;  %v15794_v22 = vld [vmem:[%s17823_s27 + $0xbc8] ss:$16 sps:$4 sm:$0xff]  }
 0x674   : > { %v15796_v59 = vld [vmem:[%s17823_s27 + $0xbcc] ss:$16 sps:$4 sm:$0xff]   ;;  %v15797_v30 = vld [vmem:[%s17823_s27 + $0x9a8] ss:$16 sps:$4 sm:$0xff]  }
 0x675   : > { %11641 = vmatpush1.bf16.msra.mxu0 %v15749_v31  ;;  %v15799_v34 = vld [vmem:[%s17823_s27 + $0x9ac] ss:$16 sps:$4 sm:$0xff]   ;;  %v15800_v20 = vld [vmem:[%s17823_s27 + $0xba8] ss:$16 sps:$4 sm:$0xff]  }
 0x676   : > { %11682 = vmatpush1.bf16.msra.mxu1 %v15752_v61  ;;  %11642 = vmatprep.subr.bf16.mxu0 %v15757_v15  ;;  %v15802_v52 = vld [vmem:[%s17823_s27 + $0xbac] ss:$16 sps:$4 sm:$0xff]   ;;  %v15803_v61 = vld [vmem:[%s17823_s27 + $0x988] ss:$16 sps:$4 sm:$0xff]  }
 0x677   : > { %11683 = vmatprep.subr.bf16.mxu1 %v15760_v9  ;;  %v15805_v36 = vld [vmem:[%s17823_s27 + $0x98c] ss:$16 sps:$4 sm:$0xff]   ;;  %v15806_v23 = vld [vmem:[%s17823_s27 + $0xb88] ss:$16 sps:$4 sm:$0xff]  }
 0x678   : > { %v15808_v31 = vld [vmem:[%s17823_s27 + $0xb8c] ss:$16 sps:$4 sm:$0xff]   ;;  %v15809_v9 = vld [vmem:[%s17823_s27 + $0x968] ss:$16 sps:$4 sm:$0xff]  }
 0x679   : > { %11643 = vmatpush1.bf16.msra.mxu0 %v15755_v25  ;;  %v15811_v24 = vld [vmem:[%s17823_s27 + $0x96c] ss:$16 sps:$4 sm:$0xff]   ;;  %v15812_v25 = vld [vmem:[%s17823_s27 + $0xb68] ss:$16 sps:$4 sm:$0xff]  }
 0x67a   : > { %11684 = vmatpush1.bf16.msra.mxu1 %v15758_v43  ;;  %11644 = vmatprep.subr.bf16.mxu0 %v15763_v44  ;;  %v15814_v15 = vld [vmem:[%s17823_s27 + $0xb6c] ss:$16 sps:$4 sm:$0xff]  }
 0x67b   : > { %11685 = vmatprep.subr.bf16.mxu1 %v15766_v45  ;;  %v15817_v43 = vld [vmem:[%s17823_s27 + $0x94c] ss:$16 sps:$4 sm:$0xff]   ;;  %v15815_v45 = vld [vmem:[%s17823_s27 + $0x948] ss:$16 sps:$4 sm:$0xff]  }
 0x67c   : > { %v15820_v44 = vld [vmem:[%s17823_s27 + $0xb4c] ss:$16 sps:$4 sm:$0xff]  }
 0x67d   : > { %11645 = vmatpush1.bf16.msra.mxu0 %v15761_v27  ;;  %v15818_v27 = vld [vmem:[%s17823_s27 + $0xb48] ss:$16 sps:$4 sm:$0xff]  }
 0x67e   : > { %11686 = vmatpush1.bf16.msra.mxu1 %v15764_v48  ;;  %11646 = vmatprep.subr.bf16.mxu0 %v15769_v50  ;;  %v15823_v48 = vld [vmem:[%s17823_s27 + $0x92c] ss:$16 sps:$4 sm:$0xff]  }
 0x67f   : > { %11687 = vmatprep.subr.bf16.mxu1 %v15772_v46  ;;  %v15826_v50 = vld [vmem:[%s17823_s27 + $0xb2c] ss:$16 sps:$4 sm:$0xff]   ;;  %v15821_v46 = vld [vmem:[%s17823_s27 + $0x928] ss:$16 sps:$4 sm:$0xff]  }
 0x681   : > { %11647 = vmatpush1.bf16.msra.mxu0 %v15767_v49  ;;  %v15824_v49 = vld [vmem:[%s17823_s27 + $0xb28] ss:$16 sps:$4 sm:$0xff]  }
 0x682   : > { %11688 = vmatpush1.bf16.msra.mxu1 %v15770_v60  ;;  %11648 = vmatprep.subr.bf16.mxu0 %v15775_v3  ;;  %v15829_v60 = vld [vmem:[%s17823_s27 + $0x90c] ss:$16 sps:$4 sm:$0xff]  }
 0x683   : > { %11689 = vmatprep.subr.bf16.mxu1 %v15778_v37  ;;  %v15832_v3 = vld [vmem:[%s17823_s27 + $0xb0c] ss:$16 sps:$4 sm:$0xff]   ;;  %v15827_v37 = vld [vmem:[%s17823_s27 + $0x908] ss:$16 sps:$4 sm:$0xff]  }
 0x685   : > { %11649 = vmatpush1.bf16.msra.mxu0 %v15773_v38  ;;  %v15830_v38 = vld [vmem:[%s17823_s27 + $0xb08] ss:$16 sps:$4 sm:$0xff]  }
 0x686   : > { %11690 = vmatpush1.bf16.msra.mxu1 %v15776_v63  ;;  %11650 = vmatprep.subr.bf16.mxu0 %v15781_v4  ;;  %v15835_v63 = vld [vmem:[%s17823_s27 + $0xcec] ss:$16 sps:$4 sm:$0xff]  }
 0x687   : > { %11691 = vmatprep.subr.bf16.mxu1 %v15784_v0  ;;  %v15838_v4 = vld [vmem:[%s17823_s27 + $0xeec] ss:$16 sps:$4 sm:$0xff]   ;;  %v15833_v0 = vld [vmem:[%s17823_s27 + $0xce8] ss:$16 sps:$4 sm:$0xff]  }
 0x689   : > { %11651 = vmatpush1.bf16.msra.mxu0 %v15779_v41  ;;  %v15836_v41 = vld [vmem:[%s17823_s27 + $0xee8] ss:$16 sps:$4 sm:$0xff]  }
 0x68a   : > { %11692 = vmatpush1.bf16.msra.mxu1 %v15782_v13  ;;  %11652 = vmatprep.subr.bf16.mxu0 %v15787_v39  ;;  %v15841_v13 = vld [vmem:[%s17823_s27 + $0xccc] ss:$16 sps:$4 sm:$0xff]  }
 0x68b   : > { %11693 = vmatprep.subr.bf16.mxu1 %v15790_v18  ;;  %v15844_v39 = vld [vmem:[%s17823_s27 + $0xecc] ss:$16 sps:$4 sm:$0xff]  }
 0x68d   : > { %11653 = vmatpush2.bf16.msra.mxu0 %v15785_v16 }
 0x68e   : > { %11694 = vmatpush2.bf16.msra.mxu1 %v15788_v21  ;;  %11654 = vmatprep.subr.bf16.mxu0 %v15793_v58  ;;  %v15839_v58 = vld [vmem:[%s17823_s27 + $0xcc8] ss:$16 sps:$4 sm:$0xff]  }
 0x68f   : > { %11695 = vmatprep.subr.bf16.mxu1 %v15796_v59  ;;  %v15842_v59 = vld [vmem:[%s17823_s27 + $0xec8] ss:$16 sps:$4 sm:$0xff]  }
 0x691   : > { %11655 = vmatpush2.bf16.msra.mxu0 %v15791_v11 }
 0x692   : > { %11696 = vmatpush2.bf16.msra.mxu1 %v15794_v22  ;;  %11656 = vmatprep.subr.bf16.mxu0 %v15799_v34  ;;  %v15847_v34 = vld [vmem:[%s17823_s27 + $0xcac] ss:$16 sps:$4 sm:$0xff]  }
 0x693   : > { %11697 = vmatprep.subr.bf16.mxu1 %v15802_v52  ;;  %v15850_v52 = vld [vmem:[%s17823_s27 + $0xeac] ss:$16 sps:$4 sm:$0xff]  }
 0x695   : > { %11657 = vmatpush2.bf16.msra.mxu0 %v15797_v30 }
 0x696   : > { %11698 = vmatpush2.bf16.msra.mxu1 %v15800_v20  ;;  %11658 = vmatprep.subr.bf16.mxu0 %v15805_v36  ;;  %v15845_v36 = vld [vmem:[%s17823_s27 + $0xca8] ss:$16 sps:$4 sm:$0xff]  }
 0x697   : > { %11699 = vmatprep.subr.bf16.mxu1 %v15808_v31  ;;  %v15848_v31 = vld [vmem:[%s17823_s27 + $0xea8] ss:$16 sps:$4 sm:$0xff]  }
 0x699   : > { %11659 = vmatpush2.bf16.msra.mxu0 %v15803_v61 }
 0x69a   : > { %11700 = vmatpush2.bf16.msra.mxu1 %v15806_v23  ;;  %11660 = vmatprep.subr.bf16.mxu0 %v15811_v24  ;;  %v15854_v24 = vld [vmem:[%s17823_s27 + $0xe88] ss:$16 sps:$4 sm:$0xff]  }
 0x69b   : > { %11701 = vmatprep.subr.bf16.mxu1 %v15814_v15  ;;  %v15859_v15 = vld [vmem:[%s17823_s27 + $0xc6c] ss:$16 sps:$4 sm:$0xff]  }
 0x69d   : > { %11661 = vmatpush2.bf16.msra.mxu0 %v15809_v9  ;;  %v15862_v9 = vld [vmem:[%s17823_s27 + $0xe6c] ss:$16 sps:$4 sm:$0xff]  }
 0x69e   : > { %11702 = vmatpush2.bf16.msra.mxu1 %v15812_v25  ;;  %11662 = vmatprep.subr.bf16.mxu0 %v15817_v43  ;;  %v15857_v25 = vld [vmem:[%s17823_s27 + $0xc68] ss:$16 sps:$4 sm:$0xff]  }
 0x69f   : > { %11703 = vmatprep.subr.bf16.mxu1 %v15820_v44  ;;  %v15860_v43 = vld [vmem:[%s17823_s27 + $0xe68] ss:$16 sps:$4 sm:$0xff]   ;;  %v15865_v44 = vld [vmem:[%s17823_s27 + $0xc4c] ss:$16 sps:$4 sm:$0xff]  }
 0x6a1   : > { %11663 = vmatpush2.bf16.msra.mxu0 %v15815_v45  ;;  %v15868_v45 = vld [vmem:[%s17823_s27 + $0xe4c] ss:$16 sps:$4 sm:$0xff]  }
 0x6a2   : > { %11704 = vmatpush2.bf16.msra.mxu1 %v15818_v27  ;;  %11664 = vmatprep.subr.bf16.mxu0 %v15823_v48  ;;  %v15863_v27 = vld [vmem:[%s17823_s27 + $0xc48] ss:$16 sps:$4 sm:$0xff]  }
 0x6a3   : > { %11705 = vmatprep.subr.bf16.mxu1 %v15826_v50  ;;  %v15866_v48 = vld [vmem:[%s17823_s27 + $0xe48] ss:$16 sps:$4 sm:$0xff]   ;;  %v15871_v50 = vld [vmem:[%s17823_s27 + $0xc2c] ss:$16 sps:$4 sm:$0xff]  }
 0x6a5   : > { %11665 = vmatpush2.bf16.msra.mxu0 %v15821_v46  ;;  %v15874_v46 = vld [vmem:[%s17823_s27 + $0xe2c] ss:$16 sps:$4 sm:$0xff]  }
 0x6a6   : > { %11706 = vmatpush2.bf16.msra.mxu1 %v15824_v49  ;;  %11666 = vmatprep.subr.bf16.mxu0 %v15829_v60  ;;  %v15869_v49 = vld [vmem:[%s17823_s27 + $0xc28] ss:$16 sps:$4 sm:$0xff]  }
 0x6a7   : > { %11707 = vmatprep.subr.bf16.mxu1 %v15832_v3  ;;  %v15872_v60 = vld [vmem:[%s17823_s27 + $0xe28] ss:$16 sps:$4 sm:$0xff]   ;;  %v15877_v3 = vld [vmem:[%s17823_s27 + $0xc0c] ss:$16 sps:$4 sm:$0xff]  }
 0x6a9   : > { %11667 = vmatpush2.bf16.msra.mxu0 %v15827_v37  ;;  %v15880_v37 = vld [vmem:[%s17823_s27 + $0xe0c] ss:$16 sps:$4 sm:$0xff]  }
 0x6aa   : > { %11708 = vmatpush2.bf16.msra.mxu1 %v15830_v38  ;;  %11718 = vmatprep.subr.bf16.mxu0 %v15835_v63  ;;  %v15875_v38 = vld [vmem:[%s17823_s27 + $0xc08] ss:$16 sps:$4 sm:$0xff]  }
 0x6ab   : > { %11759 = vmatprep.subr.bf16.mxu1 %v15838_v4  ;;  %v15878_v63 = vld [vmem:[%s17823_s27 + $0xe08] ss:$16 sps:$4 sm:$0xff]   ;;  %v15883_v4 = vld [vmem:[%s17823_s27 + $0xdec] ss:$16 sps:$4 sm:$0xff]  }
 0x6ac   : > { %v11424_v18 = vpop.f32.mrf.mxu0  ;;  %11669 = vmatmul.mubr.bf16.vlgmr.msra.gmra.mxu0 %v18468_v28 }
 0x6ad   : > { %v11465_v16 = vpop.f32.mrf.mxu1  ;;  %11710 = vmatmul.mubr.bf16.vlgmr.msra.gmra.mxu1 %v18472_v2  ;;  %v11425_v21 = vadd.f32 %v11424_v18, %v19103_v26  ;;  %11719 = vmatpush1.bf16.msra.mxu0 %v15833_v0  ;;  %v15886_v0 = vld [vmem:[%s17823_s27 + $0xfec] ss:$16 sps:$4 sm:$0xff]  }
 0x6ae   : > { %11760 = vmatpush1.bf16.msra.mxu1 %v15836_v41  ;;  %v11426_v11 = vpop.f32.mrf.mxu0  ;;  %11720 = vmatprep.subr.bf16.mxu0 %v15841_v13  ;;  %v15881_v41 = vld [vmem:[%s17823_s27 + $0xde8] ss:$16 sps:$4 sm:$0xff]   ;;  %v15892_v18 = vld [vmem:[%s17823_s27 + $0xfcc] ss:$16 sps:$4 sm:$0xff]  }
 0x6af   : > { %v11467_v22 = vpop.f32.mrf.mxu1  ;;  %11761 = vmatprep.subr.bf16.mxu1 %v15844_v39  ;;  %v19177_v30 = vadd.f32 %v11465_v16, %v11425_v21  ;;  %v11427_v28 = vadd.f32 %v11426_v11, %v19108_v53  ;;  %11750 = vmatprep.mubr.bf16.mxu0 %v18481_v14  ;;  %v15853_v14 = vld [vmem:[%s17823_s27 + $0xc8c] ss:$16 sps:$4 sm:$0xff]   ;;  %v15851_v53 = vld [vmem:[%s17823_s27 + $0xc88] ss:$16 sps:$4 sm:$0xff]  }
 0x6b0   : > { %11791 = vmatprep.mubr.bf16.mxu1 %v18485_v55  ;;  %v11428_v2 = vpop.f32.mrf.mxu0  ;;  %v15856_v55 = vld [vmem:[%s17823_s27 + $0xe8c] ss:$16 sps:$4 sm:$0xff]   ;;  %v15884_v13 = vld [vmem:[%s17823_s27 + $0xfe8] ss:$16 sps:$4 sm:$0xff]  }
 0x6b1   : > { %v11469_v26 = vpop.f32.mrf.mxu1  ;;  %v19182_v20 = vadd.f32 %v11467_v22, %v11427_v28  ;;  %11721 = vmatpush1.bf16.msra.mxu0 %v15839_v58  ;;  %v15889_v39 = vld [vmem:[%s17823_s27 + $0xdcc] ss:$16 sps:$4 sm:$0xff]   ;;  %v15887_v16 = vld [vmem:[%s17823_s27 + $0xdc8] ss:$16 sps:$4 sm:$0xff]  }
 0x6b2   : > { %11762 = vmatpush1.bf16.msra.mxu1 %v15842_v59  ;;  %v11429_v61 = vpop.f32.mrf.mxu0  ;;  %11722 = vmatprep.subr.bf16.mxu0 %v15847_v34  ;;  %v15890_v21 = vld [vmem:[%s17823_s27 + $0xfc8] ss:$16 sps:$4 sm:$0xff]   ;;  %v15895_v58 = vld [vmem:[%s17823_s27 + $0xdac] ss:$16 sps:$4 sm:$0xff]  }
 0x6b3   : > { %v11470_v23 = vpop.f32.mrf.mxu1  ;;  %11763 = vmatprep.subr.bf16.mxu1 %v15850_v52  ;;  %v15898_v59 = vld [vmem:[%s17823_s27 + $0xfac] ss:$16 sps:$4 sm:$0xff]   ;;  %v15893_v11 = vld [vmem:[%s17823_s27 + $0xda8] ss:$16 sps:$4 sm:$0xff]  }
 0x6b4   : > { %v15896_v22 = vld [vmem:[%s17823_s27 + $0xfa8] ss:$16 sps:$4 sm:$0xff]   ;;  %v15901_v34 = vld [vmem:[%s17823_s27 + $0xd8c] ss:$16 sps:$4 sm:$0xff]  }
 0x6b5   : > { %11723 = vmatpush1.bf16.msra.mxu0 %v15845_v36  ;;  %v15904_v52 = vld [vmem:[%s17823_s27 + $0xf8c] ss:$16 sps:$4 sm:$0xff]   ;;  %v15899_v28 = vld [vmem:[%s17823_s27 + $0xd88] ss:$16 sps:$4 sm:$0xff]  }
 0x6b6   : > { %11764 = vmatpush1.bf16.msra.mxu1 %v15848_v31  ;;  %11724 = vmatprep.subr.bf16.mxu0 %v15853_v14  ;;  %v15902_v2 = vld [vmem:[%s17823_s27 + $0xf88] ss:$16 sps:$4 sm:$0xff]   ;;  %v15907_v26 = vld [vmem:[%s17823_s27 + $0xd6c] ss:$16 sps:$4 sm:$0xff]  }
 0x6b7   : > { %11765 = vmatprep.subr.bf16.mxu1 %v15856_v55  ;;  %v15910_v36 = vld [vmem:[%s17823_s27 + $0xf6c] ss:$16 sps:$4 sm:$0xff]   ;;  %v15905_v31 = vld [vmem:[%s17823_s27 + $0xd68] ss:$16 sps:$4 sm:$0xff]  }
 0x6b8   : > { %v15908_v61 = vld [vmem:[%s17823_s27 + $0xf68] ss:$16 sps:$4 sm:$0xff]   ;;  %v15913_v23 = vld [vmem:[%s17823_s27 + $0xd4c] ss:$16 sps:$4 sm:$0xff]  }
 0x6b9   : > { %11725 = vmatpush1.bf16.msra.mxu0 %v15851_v53  ;;  %v15916_v14 = vld [vmem:[%s17823_s27 + $0xf4c] ss:$16 sps:$4 sm:$0xff]   ;;  %v15911_v55 = vld [vmem:[%s17823_s27 + $0xd48] ss:$16 sps:$4 sm:$0xff]  }
 0x6ba   : > { %11766 = vmatpush1.bf16.msra.mxu1 %v15854_v24  ;;  %11726 = vmatprep.subr.bf16.mxu0 %v15859_v15  ;;  %v15914_v53 = vld [vmem:[%s17823_s27 + $0xf48] ss:$16 sps:$4 sm:$0xff]   ;;  %v15919_v24 = vld [vmem:[%s17823_s27 + $0xd2c] ss:$16 sps:$4 sm:$0xff]  }
 0x6bb   : > { %11767 = vmatprep.subr.bf16.mxu1 %v15862_v9  ;;  %v15922_v15 = vld [vmem:[%s17823_s27 + $0xf2c] ss:$16 sps:$4 sm:$0xff]   ;;  %v15917_v9 = vld [vmem:[%s17823_s27 + $0xd28] ss:$16 sps:$4 sm:$0xff]  }
 0x6bd   : > { %11727 = vmatpush1.bf16.msra.mxu0 %v15857_v25  ;;  %v15920_v25 = vld [vmem:[%s17823_s27 + $0xf28] ss:$16 sps:$4 sm:$0xff]  }
 0x6be   : > { %11768 = vmatpush1.bf16.msra.mxu1 %v15860_v43  ;;  %11728 = vmatprep.subr.bf16.mxu0 %v15865_v44  ;;  %v15925_v43 = vld [vmem:[%s17823_s27 + $0xd0c] ss:$16 sps:$4 sm:$0xff]  }
 0x6bf   : > { %11769 = vmatprep.subr.bf16.mxu1 %v15868_v45  ;;  %v15928_v44 = vld [vmem:[%s17823_s27 + $0xf0c] ss:$16 sps:$4 sm:$0xff]   ;;  %v15923_v45 = vld [vmem:[%s17823_s27 + $0xd08] ss:$16 sps:$4 sm:$0xff]  }
 0x6c1   : > { %11729 = vmatpush1.bf16.msra.mxu0 %v15863_v27  ;;  %v15926_v27 = vld [vmem:[%s17823_s27 + $0xf08] ss:$16 sps:$4 sm:$0xff]  }
 0x6c2   : > { %11770 = vmatpush1.bf16.msra.mxu1 %v15866_v48  ;;  %11730 = vmatprep.subr.bf16.mxu0 %v15871_v50  ;;  %v19239_v48 = vsub.s32 2, %v18546_v47  ;;  %v15931_v50 = vld [vmem:[%s17823_s27 + $0x10ec] ss:$16 sps:$4 sm:$0xff]  }
 0x6c3   : > { %11771 = vmatprep.subr.bf16.mxu1 %v15874_v46  ;;  %v15934_v46 = vld [vmem:[%s17823_s27 + $0x12ec] ss:$16 sps:$4 sm:$0xff]  }
 0x6c5   : > { %11731 = vmatpush1.bf16.msra.mxu0 %v15869_v49  ;;  %v19244_v49 = vsub.s32 3, %v18546_v47 }
 0x6c6   : > { %11772 = vmatpush1.bf16.msra.mxu1 %v15872_v60  ;;  %11732 = vmatprep.subr.bf16.mxu0 %v15877_v3  ;;  %v16505_v60 = vld [vmem:[%s17835_s11] sm:$0xf] }
 0x6c7   : > { %11773 = vmatprep.subr.bf16.mxu1 %v15880_v37  ;;  %v5575_v3 = vrot.slane %v16505_v60, %v19239_v48  ;;  %v15929_v37 = vld [vmem:[%s17823_s27 + $0x10e8] ss:$16 sps:$4 sm:$0xff]  }
 0x6c9   : > { %11733 = vmatpush1.bf16.msra.mxu0 %v15875_v38  ;;  %v15932_v38 = vld [vmem:[%s17823_s27 + $0x12e8] ss:$16 sps:$4 sm:$0xff]  }
 0x6ca   : > { %11774 = vmatpush1.bf16.msra.mxu1 %v15878_v63  ;;  %11734 = vmatprep.subr.bf16.mxu0 %v15883_v4  ;;  %v15937_v63 = vld [vmem:[%s17823_s27 + $0x10cc] ss:$16 sps:$4 sm:$0xff]  }
 0x6cb   : > { %11775 = vmatprep.subr.bf16.mxu1 %v15886_v0  ;;  %v15940_v4 = vld [vmem:[%s17823_s27 + $0x12cc] ss:$16 sps:$4 sm:$0xff]   ;;  %v5579_v0 = vrot.slane %v16505_v60, %v19244_v49  ;;  %v15974_v60 = vld [vmem:[%s17823_s27 + $0x1208] ss:$16 sps:$4 sm:$0xff]  }
 0x6cd   : > { %11735 = vmatpush2.bf16.msra.mxu0 %v15881_v41 }
 0x6ce   : > { %11776 = vmatpush2.bf16.msra.mxu1 %v15884_v13  ;;  %11736 = vmatprep.subr.bf16.mxu0 %v15889_v39  ;;  %v15935_v39 = vld [vmem:[%s17823_s27 + $0x10c8] ss:$16 sps:$4 sm:$0xff]  }
 0x6cf   : > { %11777 = vmatprep.subr.bf16.mxu1 %v15892_v18  ;;  %v15938_v18 = vld [vmem:[%s17823_s27 + $0x12c8] ss:$16 sps:$4 sm:$0xff]  }
 0x6d1   : > { %11737 = vmatpush2.bf16.msra.mxu0 %v15887_v16 }
 0x6d2   : > { %11778 = vmatpush2.bf16.msra.mxu1 %v15890_v21  ;;  %11738 = vmatprep.subr.bf16.mxu0 %v15895_v58  ;;  %v15943_v58 = vld [vmem:[%s17823_s27 + $0x10ac] ss:$16 sps:$4 sm:$0xff]  }
 0x6d3   : > { %11779 = vmatprep.subr.bf16.mxu1 %v15898_v59  ;;  %v15946_v59 = vld [vmem:[%s17823_s27 + $0x12ac] ss:$16 sps:$4 sm:$0xff]  }
 0x6d5   : > { %11739 = vmatpush2.bf16.msra.mxu0 %v15893_v11 }
 0x6d6   : > { %11780 = vmatpush2.bf16.msra.mxu1 %v15896_v22  ;;  %11740 = vmatprep.subr.bf16.mxu0 %v15901_v34 }
 0x6d7   : > { %11781 = vmatprep.subr.bf16.mxu1 %v15904_v52  ;;  %v15941_v52 = vld [vmem:[%s17823_s27 + $0x10a8] ss:$16 sps:$4 sm:$0xff]  }
 0x6d9   : > { %11741 = vmatpush2.bf16.msra.mxu0 %v15899_v28  ;;  %v15944_v28 = vld [vmem:[%s17823_s27 + $0x12a8] ss:$16 sps:$4 sm:$0xff]  }
 0x6da   : > { %11782 = vmatpush2.bf16.msra.mxu1 %v15902_v2  ;;  %11742 = vmatprep.subr.bf16.mxu0 %v15907_v26 }
 0x6db   : > { %11783 = vmatprep.subr.bf16.mxu1 %v15910_v36  ;;  %v15947_v36 = vld [vmem:[%s17823_s27 + $0x1088] ss:$16 sps:$4 sm:$0xff]  }
 0x6dd   : > { %11743 = vmatpush2.bf16.msra.mxu0 %v15905_v31  ;;  %v15950_v31 = vld [vmem:[%s17823_s27 + $0x1288] ss:$16 sps:$4 sm:$0xff]  }
 0x6de   : > { %11784 = vmatpush2.bf16.msra.mxu1 %v15908_v61  ;;  %11744 = vmatprep.subr.bf16.mxu0 %v15913_v23  ;;  %v15955_v61 = vld [vmem:[%s17823_s27 + $0x106c] ss:$16 sps:$4 sm:$0xff]  }
 0x6df   : > { %11785 = vmatprep.subr.bf16.mxu1 %v15916_v14  ;;  %v15958_v23 = vld [vmem:[%s17823_s27 + $0x126c] ss:$16 sps:$4 sm:$0xff]   ;;  %v15953_v14 = vld [vmem:[%s17823_s27 + $0x1068] ss:$16 sps:$4 sm:$0xff]  }
 0x6e1   : > { %11745 = vmatpush2.bf16.msra.mxu0 %v15911_v55  ;;  %v15956_v55 = vld [vmem:[%s17823_s27 + $0x1268] ss:$16 sps:$4 sm:$0xff]  }
 0x6e2   : > { %11786 = vmatpush2.bf16.msra.mxu1 %v15914_v53  ;;  %11746 = vmatprep.subr.bf16.mxu0 %v15919_v24  ;;  %v15961_v53 = vld [vmem:[%s17823_s27 + $0x104c] ss:$16 sps:$4 sm:$0xff]  }
 0x6e3   : > { %11787 = vmatprep.subr.bf16.mxu1 %v15922_v15  ;;  %v15964_v24 = vld [vmem:[%s17823_s27 + $0x124c] ss:$16 sps:$4 sm:$0xff]   ;;  %v15959_v15 = vld [vmem:[%s17823_s27 + $0x1048] ss:$16 sps:$4 sm:$0xff]  }
 0x6e5   : > { %11747 = vmatpush2.bf16.msra.mxu0 %v15917_v9  ;;  %v15962_v9 = vld [vmem:[%s17823_s27 + $0x1248] ss:$16 sps:$4 sm:$0xff]  }
 0x6e6   : > { %11788 = vmatpush2.bf16.msra.mxu1 %v15920_v25  ;;  %11748 = vmatprep.subr.bf16.mxu0 %v15925_v43  ;;  %v15967_v25 = vld [vmem:[%s17823_s27 + $0x102c] ss:$16 sps:$4 sm:$0xff]  }
 0x6e7   : > { %11789 = vmatprep.subr.bf16.mxu1 %v15928_v44  ;;  %v15970_v43 = vld [vmem:[%s17823_s27 + $0x122c] ss:$16 sps:$4 sm:$0xff]   ;;  %v15965_v44 = vld [vmem:[%s17823_s27 + $0x1028] ss:$16 sps:$4 sm:$0xff]  }
 0x6e9   : > { %11749 = vmatpush2.bf16.msra.mxu0 %v15923_v45  ;;  %v15968_v45 = vld [vmem:[%s17823_s27 + $0x1228] ss:$16 sps:$4 sm:$0xff]  }
 0x6ea   : > { %11790 = vmatpush2.bf16.msra.mxu1 %v15926_v27  ;;  %11800 = vmatprep.subr.bf16.mxu0 %v15931_v50  ;;  %v15973_v27 = vld [vmem:[%s17823_s27 + $0x100c] ss:$16 sps:$4 sm:$0xff]  }
 0x6eb   : > { %11841 = vmatprep.subr.bf16.mxu1 %v15934_v46  ;;  %v15976_v50 = vld [vmem:[%s17823_s27 + $0x120c] ss:$16 sps:$4 sm:$0xff]   ;;  %v15971_v46 = vld [vmem:[%s17823_s27 + $0x1008] ss:$16 sps:$4 sm:$0xff]  }
 0x6ec   : > { %v11506_v41 = vpop.f32.mrf.mxu0  ;;  %11751 = vmatmul.mubr.bf16.vlgmr.msra.gmra.mxu0 %v18563_v29 }
 0x6ed   : > { %v11547_v47 = vpop.f32.mrf.mxu1  ;;  %11792 = vmatmul.mubr.bf16.vlgmr.msra.gmra.mxu1 %v18567_v32  ;;  %v11507_v13 = vadd.f32 %v11506_v41, %v5575_v3  ;;  %11801 = vmatpush1.bf16.msra.mxu0 %v15929_v37  ;;  %v15979_v3 = vld [vmem:[%s17823_s27 + $0x11ec] ss:$16 sps:$4 sm:$0xff]   ;;  %v15983_v41 = vld [vmem:[%s17823_s27 + $0x11c8] ss:$16 sps:$4 sm:$0xff]  }
 0x6ee   : > { %11842 = vmatpush1.bf16.msra.mxu1 %v15932_v38  ;;  %v11508_v16 = vpop.f32.mrf.mxu0  ;;  %11802 = vmatprep.subr.bf16.mxu0 %v15937_v63  ;;  %v15982_v37 = vld [vmem:[%s17823_s27 + $0x13ec] ss:$16 sps:$4 sm:$0xff]   ;;  %v15977_v38 = vld [vmem:[%s17823_s27 + $0x11e8] ss:$16 sps:$4 sm:$0xff]  }
 0x6ef   : > { %v11549_v21 = vpop.f32.mrf.mxu1  ;;  %11843 = vmatprep.subr.bf16.mxu1 %v15940_v4  ;;  %v19259_v11 = vadd.f32 %v11547_v47, %v11507_v13  ;;  %v11509_v29 = vadd.f32 %v11508_v16, %v5579_v0  ;;  %11832 = vmatprep.mubr.bf16.mxu0 %v18580_v33  ;;  %v15949_v33 = vld [vmem:[%s17823_s27 + $0x108c] ss:$16 sps:$4 sm:$0xff]   ;;  %v15980_v63 = vld [vmem:[%s17823_s27 + $0x13e8] ss:$16 sps:$4 sm:$0xff]  }
 0x6f0   : > { %11873 = vmatprep.mubr.bf16.mxu1 %v18584_v1  ;;  %v11510_v32 = vpop.f32.mrf.mxu0  ;;  %v15952_v1 = vld [vmem:[%s17823_s27 + $0x128c] ss:$16 sps:$4 sm:$0xff]   ;;  %v15986_v47 = vld [vmem:[%s17823_s27 + $0x13c8] ss:$16 sps:$4 sm:$0xff]  }
 0x6f1   : > { %v11551_v22 = vpop.f32.mrf.mxu1  ;;  %v19263_v34 = vadd.f32 %v11549_v21, %v11509_v29  ;;  %11803 = vmatpush1.bf16.msra.mxu0 %v15935_v39  ;;  %v15985_v4 = vld [vmem:[%s17823_s27 + $0x11cc] ss:$16 sps:$4 sm:$0xff]   ;;  %v15992_v16 = vld [vmem:[%s17823_s27 + $0x13a8] ss:$16 sps:$4 sm:$0xff]  }
 0x6f2   : > { %11844 = vmatpush1.bf16.msra.mxu1 %v15938_v18  ;;  %v11511_v2 = vpop.f32.mrf.mxu0  ;;  %11804 = vmatprep.subr.bf16.mxu0 %v15943_v58  ;;  %v15988_v0 = vld [vmem:[%s17823_s27 + $0x13cc] ss:$16 sps:$4 sm:$0xff]   ;;  %v15989_v18 = vld [vmem:[%s17823_s27 + $0x11a8] ss:$16 sps:$4 sm:$0xff]  }
 0x6f3   : > { %v11552_v26 = vpop.f32.mrf.mxu1  ;;  %11845 = vmatprep.subr.bf16.mxu1 %v15946_v59  ;;  %v15991_v13 = vld [vmem:[%s17823_s27 + $0x11ac] ss:$16 sps:$4 sm:$0xff]   ;;  %v15995_v59 = vld [vmem:[%s17823_s27 + $0x1188] ss:$16 sps:$4 sm:$0xff]  }
 0x6f4   : > { %v15994_v39 = vld [vmem:[%s17823_s27 + $0x13ac] ss:$16 sps:$4 sm:$0xff]   ;;  %v15998_v29 = vld [vmem:[%s17823_s27 + $0x1388] ss:$16 sps:$4 sm:$0xff]  }
 0x6f5   : > { %11805 = vmatpush1.bf16.msra.mxu0 %v15941_v52  ;;  %v15997_v21 = vld [vmem:[%s17823_s27 + $0x118c] ss:$16 sps:$4 sm:$0xff]   ;;  %v16001_v52 = vld [vmem:[%s17823_s27 + $0x1168] ss:$16 sps:$4 sm:$0xff]  }
 0x6f6   : > { %11846 = vmatpush1.bf16.msra.mxu1 %v15944_v28  ;;  %11806 = vmatprep.subr.bf16.mxu0 %v15949_v33  ;;  %v16000_v58 = vld [vmem:[%s17823_s27 + $0x138c] ss:$16 sps:$4 sm:$0xff]   ;;  %v16004_v28 = vld [vmem:[%s17823_s27 + $0x1368] ss:$16 sps:$4 sm:$0xff]  }
 0x6f7   : > { %11847 = vmatprep.subr.bf16.mxu1 %v15952_v1  ;;  %v16003_v32 = vld [vmem:[%s17823_s27 + $0x116c] ss:$16 sps:$4 sm:$0xff]   ;;  %v16007_v33 = vld [vmem:[%s17823_s27 + $0x1148] ss:$16 sps:$4 sm:$0xff]  }
 0x6f8   : > { %v16006_v22 = vld [vmem:[%s17823_s27 + $0x136c] ss:$16 sps:$4 sm:$0xff]   ;;  %v16010_v1 = vld [vmem:[%s17823_s27 + $0x1348] ss:$16 sps:$4 sm:$0xff]  }
 0x6f9   : > { %11807 = vmatpush1.bf16.msra.mxu0 %v15947_v36  ;;  %v16009_v2 = vld [vmem:[%s17823_s27 + $0x114c] ss:$16 sps:$4 sm:$0xff]  }
 0x6fa   : > { %11848 = vmatpush1.bf16.msra.mxu1 %v15950_v31  ;;  %11808 = vmatprep.subr.bf16.mxu0 %v15955_v61  ;;  %v16012_v26 = vld [vmem:[%s17823_s27 + $0x134c] ss:$16 sps:$4 sm:$0xff]   ;;  %v16013_v61 = vld [vmem:[%s17823_s27 + $0x1128] ss:$16 sps:$4 sm:$0xff]  }
 0x6fb   : > { %11849 = vmatprep.subr.bf16.mxu1 %v15958_v23  ;;  %v16015_v36 = vld [vmem:[%s17823_s27 + $0x112c] ss:$16 sps:$4 sm:$0xff]   ;;  %v16016_v23 = vld [vmem:[%s17823_s27 + $0x1328] ss:$16 sps:$4 sm:$0xff]  }
 0x6fc   : > { %v16018_v31 = vld [vmem:[%s17823_s27 + $0x132c] ss:$16 sps:$4 sm:$0xff]  }
 0x6fd   : > { %11809 = vmatpush1.bf16.msra.mxu0 %v15953_v14  ;;  %v16021_v14 = vld [vmem:[%s17823_s27 + $0x110c] ss:$16 sps:$4 sm:$0xff]  }
 0x6fe   : > { %11850 = vmatpush1.bf16.msra.mxu1 %v15956_v55  ;;  %11810 = vmatprep.subr.bf16.mxu0 %v15961_v53  ;;  %v16024_v55 = vld [vmem:[%s17823_s27 + $0x130c] ss:$16 sps:$4 sm:$0xff]   ;;  %v16019_v53 = vld [vmem:[%s17823_s27 + $0x1108] ss:$16 sps:$4 sm:$0xff]  }
 0x6ff   : > { %11851 = vmatprep.subr.bf16.mxu1 %v15964_v24  ;;  %v16022_v24 = vld [vmem:[%s17823_s27 + $0x1308] ss:$16 sps:$4 sm:$0xff]  }
 0x701   : > { %11811 = vmatpush1.bf16.msra.mxu0 %v15959_v15  ;;  %v16027_v15 = vld [vmem:[%s17823_s27 + $0x14ec] ss:$16 sps:$4 sm:$0xff]  }
 0x702   : > { %11852 = vmatpush1.bf16.msra.mxu1 %v15962_v9  ;;  %11812 = vmatprep.subr.bf16.mxu0 %v15967_v25  ;;  %v16030_v9 = vld [vmem:[%s17823_s27 + $0x16ec] ss:$16 sps:$4 sm:$0xff]   ;;  %v16025_v25 = vld [vmem:[%s17823_s27 + $0x14e8] ss:$16 sps:$4 sm:$0xff]  }
 0x703   : > { %11853 = vmatprep.subr.bf16.mxu1 %v15970_v43  ;;  %v16028_v43 = vld [vmem:[%s17823_s27 + $0x16e8] ss:$16 sps:$4 sm:$0xff]  }
 0x705   : > { %11813 = vmatpush1.bf16.msra.mxu0 %v15965_v44  ;;  %v16033_v44 = vld [vmem:[%s17823_s27 + $0x14cc] ss:$16 sps:$4 sm:$0xff]  }
 0x706   : > { %11854 = vmatpush1.bf16.msra.mxu1 %v15968_v45  ;;  %11814 = vmatprep.subr.bf16.mxu0 %v15973_v27  ;;  %v16036_v45 = vld [vmem:[%s17823_s27 + $0x16cc] ss:$16 sps:$4 sm:$0xff]  }
 0x707   : > { %11855 = vmatprep.subr.bf16.mxu1 %v15976_v50 }
 0x709   : > { %11815 = vmatpush1.bf16.msra.mxu0 %v15971_v46 }
 0x70a   : > { %11856 = vmatpush1.bf16.msra.mxu1 %v15974_v60  ;;  %11816 = vmatprep.subr.bf16.mxu0 %v15979_v3  ;;  %v16031_v60 = vld [vmem:[%s17823_s27 + $0x14c8] ss:$16 sps:$4 sm:$0xff]  }
 0x70b   : > { %11857 = vmatprep.subr.bf16.mxu1 %v15982_v37  ;;  %v16034_v3 = vld [vmem:[%s17823_s27 + $0x16c8] ss:$16 sps:$4 sm:$0xff]  }
 0x70d   : > { %11817 = vmatpush2.bf16.msra.mxu0 %v15977_v38 }
 0x70e   : > { %11858 = vmatpush2.bf16.msra.mxu1 %v15980_v63  ;;  %11818 = vmatprep.subr.bf16.mxu0 %v15985_v4  ;;  %v16039_v63 = vld [vmem:[%s17823_s27 + $0x14ac] ss:$16 sps:$4 sm:$0xff]  }
 0x70f   : > { %11859 = vmatprep.subr.bf16.mxu1 %v15988_v0  ;;  %v16042_v4 = vld [vmem:[%s17823_s27 + $0x16ac] ss:$16 sps:$4 sm:$0xff]  }
 0x711   : > { %11819 = vmatpush2.bf16.msra.mxu0 %v15983_v41 }
 0x712   : > { %11860 = vmatpush2.bf16.msra.mxu1 %v15986_v47  ;;  %11820 = vmatprep.subr.bf16.mxu0 %v15991_v13  ;;  %v16037_v47 = vld [vmem:[%s17823_s27 + $0x14a8] ss:$16 sps:$4 sm:$0xff]  }
 0x713   : > { %11861 = vmatprep.subr.bf16.mxu1 %v15994_v39  ;;  %v16040_v13 = vld [vmem:[%s17823_s27 + $0x16a8] ss:$16 sps:$4 sm:$0xff]  }
 0x715   : > { %11821 = vmatpush2.bf16.msra.mxu0 %v15989_v18 }
 0x716   : > { %11862 = vmatpush2.bf16.msra.mxu1 %v15992_v16  ;;  %11822 = vmatprep.subr.bf16.mxu0 %v15997_v21  ;;  %v16046_v16 = vld [vmem:[%s17823_s27 + $0x1688] ss:$16 sps:$4 sm:$0xff]   ;;  %v16051_v21 = vld [vmem:[%s17823_s27 + $0x146c] ss:$16 sps:$4 sm:$0xff]  }
 0x717   : > { %11863 = vmatprep.subr.bf16.mxu1 %v16000_v58  ;;  %v16054_v58 = vld [vmem:[%s17823_s27 + $0x166c] ss:$16 sps:$4 sm:$0xff]  }
 0x719   : > { %11823 = vmatpush2.bf16.msra.mxu0 %v15995_v59  ;;  %v16049_v59 = vld [vmem:[%s17823_s27 + $0x1468] ss:$16 sps:$4 sm:$0xff]  }
 0x71a   : > { %11864 = vmatpush2.bf16.msra.mxu1 %v15998_v29  ;;  %11824 = vmatprep.subr.bf16.mxu0 %v16003_v32  ;;  %v16052_v29 = vld [vmem:[%s17823_s27 + $0x1668] ss:$16 sps:$4 sm:$0xff]   ;;  %v16057_v32 = vld [vmem:[%s17823_s27 + $0x144c] ss:$16 sps:$4 sm:$0xff]  }
 0x71b   : > { %11865 = vmatprep.subr.bf16.mxu1 %v16006_v22  ;;  %v16060_v22 = vld [vmem:[%s17823_s27 + $0x164c] ss:$16 sps:$4 sm:$0xff]  }
 0x71d   : > { %11825 = vmatpush2.bf16.msra.mxu0 %v16001_v52  ;;  %v16055_v52 = vld [vmem:[%s17823_s27 + $0x1448] ss:$16 sps:$4 sm:$0xff]  }
 0x71e   : > { %11866 = vmatpush2.bf16.msra.mxu1 %v16004_v28  ;;  %11826 = vmatprep.subr.bf16.mxu0 %v16009_v2  ;;  %v16058_v28 = vld [vmem:[%s17823_s27 + $0x1648] ss:$16 sps:$4 sm:$0xff]   ;;  %v16063_v2 = vld [vmem:[%s17823_s27 + $0x142c] ss:$16 sps:$4 sm:$0xff]  }
 0x71f   : > { %11867 = vmatprep.subr.bf16.mxu1 %v16012_v26  ;;  %v16066_v26 = vld [vmem:[%s17823_s27 + $0x162c] ss:$16 sps:$4 sm:$0xff]  }
 0x721   : > { %11827 = vmatpush2.bf16.msra.mxu0 %v16007_v33  ;;  %v16061_v33 = vld [vmem:[%s17823_s27 + $0x1428] ss:$16 sps:$4 sm:$0xff]  }
 0x722   : > { %11868 = vmatpush2.bf16.msra.mxu1 %v16010_v1  ;;  %11828 = vmatprep.subr.bf16.mxu0 %v16015_v36  ;;  %v16064_v1 = vld [vmem:[%s17823_s27 + $0x1628] ss:$16 sps:$4 sm:$0xff]   ;;  %v16069_v36 = vld [vmem:[%s17823_s27 + $0x140c] ss:$16 sps:$4 sm:$0xff]  }
 0x723   : > { %11869 = vmatprep.subr.bf16.mxu1 %v16018_v31  ;;  %v16072_v31 = vld [vmem:[%s17823_s27 + $0x160c] ss:$16 sps:$4 sm:$0xff]  }
 0x725   : > { %11829 = vmatpush2.bf16.msra.mxu0 %v16013_v61  ;;  %v16067_v61 = vld [vmem:[%s17823_s27 + $0x1408] ss:$16 sps:$4 sm:$0xff]  }
 0x726   : > { %11870 = vmatpush2.bf16.msra.mxu1 %v16016_v23  ;;  %11830 = vmatprep.subr.bf16.mxu0 %v16021_v14  ;;  %v16070_v23 = vld [vmem:[%s17823_s27 + $0x1608] ss:$16 sps:$4 sm:$0xff]   ;;  %v16075_v14 = vld [vmem:[%s17823_s27 + $0x15ec] ss:$16 sps:$4 sm:$0xff]  }
 0x727   : > { %11871 = vmatprep.subr.bf16.mxu1 %v16024_v55  ;;  %v16078_v55 = vld [vmem:[%s17823_s27 + $0x17ec] ss:$16 sps:$4 sm:$0xff]  }
 0x729   : > { %11831 = vmatpush2.bf16.msra.mxu0 %v16019_v53  ;;  %v16073_v53 = vld [vmem:[%s17823_s27 + $0x15e8] ss:$16 sps:$4 sm:$0xff]  }
 0x72a   : > { %11872 = vmatpush2.bf16.msra.mxu1 %v16022_v24  ;;  %11882 = vmatprep.subr.bf16.mxu0 %v16027_v15  ;;  %v16076_v24 = vld [vmem:[%s17823_s27 + $0x17e8] ss:$16 sps:$4 sm:$0xff]   ;;  %v16081_v15 = vld [vmem:[%s17823_s27 + $0x15cc] ss:$16 sps:$4 sm:$0xff]  }
 0x72b   : > { %11923 = vmatprep.subr.bf16.mxu1 %v16030_v9  ;;  %v16084_v9 = vld [vmem:[%s17823_s27 + $0x17cc] ss:$16 sps:$4 sm:$0xff]  }
 0x72c   : > { %v11588_v27 = vpop.f32.mrf.mxu0  ;;  %11833 = vmatmul.mubr.bf16.vlgmr.msra.gmra.mxu0 %v18658_v54 }
 0x72d   : > { %v11629_v50 = vpop.f32.mrf.mxu1  ;;  %11874 = vmatmul.mubr.bf16.vlgmr.msra.gmra.mxu1 %v18662_v42  ;;  %v11589_v46 = vadd.f32 %v11588_v27, %v19259_v11  ;;  %11883 = vmatpush1.bf16.msra.mxu0 %v16025_v25  ;;  %v16079_v25 = vld [vmem:[%s17823_s27 + $0x15c8] ss:$16 sps:$4 sm:$0xff]  }
 0x72e   : > { %11924 = vmatpush1.bf16.msra.mxu1 %v16028_v43  ;;  %v11590_v37 = vpop.f32.mrf.mxu0  ;;  %11884 = vmatprep.subr.bf16.mxu0 %v16033_v44  ;;  %v16082_v43 = vld [vmem:[%s17823_s27 + $0x17c8] ss:$16 sps:$4 sm:$0xff]   ;;  %v16087_v44 = vld [vmem:[%s17823_s27 + $0x15ac] ss:$16 sps:$4 sm:$0xff]  }
 0x72f   : > { %v11631_v38 = vpop.f32.mrf.mxu1  ;;  %11925 = vmatprep.subr.bf16.mxu1 %v16036_v45  ;;  %v19332_v0 = vadd.f32 %v11629_v50, %v11589_v46  ;;  %v11591_v54 = vadd.f32 %v11590_v37, %v19263_v34  ;;  %11914 = vmatprep.mubr.bf16.mxu0 %v18674_v40  ;;  %v16045_v40 = vld [vmem:[%s17823_s27 + $0x148c] ss:$16 sps:$4 sm:$0xff]   ;;  %v16043_v34 = vld [vmem:[%s17823_s27 + $0x1488] ss:$16 sps:$4 sm:$0xff]  }
 0x730   : > { %11955 = vmatprep.mubr.bf16.mxu1 %v18678_v56  ;;  %v11592_v42 = vpop.f32.mrf.mxu0  ;;  %v16048_v56 = vld [vmem:[%s17823_s27 + $0x168c] ss:$16 sps:$4 sm:$0xff]   ;;  %v16085_v27 = vld [vmem:[%s17823_s27 + $0x15a8] ss:$16 sps:$4 sm:$0xff]  }
 0x731   : > { %v11633_v11 = vpop.f32.mrf.mxu1  ;;  %v19337_v41 = vadd.f32 %v11631_v38, %v11591_v54  ;;  %11885 = vmatpush1.bf16.msra.mxu0 %v16031_v60  ;;  %v16090_v45 = vld [vmem:[%s17823_s27 + $0x17ac] ss:$16 sps:$4 sm:$0xff]   ;;  %v16088_v50 = vld [vmem:[%s17823_s27 + $0x17a8] ss:$16 sps:$4 sm:$0xff]  }
 0x732   : > { %11926 = vmatpush1.bf16.msra.mxu1 %v16034_v3  ;;  %v11593_v39 = vpop.f32.mrf.mxu0  ;;  %11886 = vmatprep.subr.bf16.mxu0 %v16039_v63  ;;  %v16093_v46 = vld [vmem:[%s17823_s27 + $0x158c] ss:$16 sps:$4 sm:$0xff]   ;;  %v16091_v3 = vld [vmem:[%s17823_s27 + $0x1588] ss:$16 sps:$4 sm:$0xff]  }
 0x733   : > { %v11634_v18 = vpop.f32.mrf.mxu1  ;;  %11927 = vmatprep.subr.bf16.mxu1 %v16042_v4  ;;  %v16096_v60 = vld [vmem:[%s17823_s27 + $0x178c] ss:$16 sps:$4 sm:$0xff]   ;;  %v16094_v37 = vld [vmem:[%s17823_s27 + $0x1788] ss:$16 sps:$4 sm:$0xff]  }
 0x734   : > { %v16099_v38 = vld [vmem:[%s17823_s27 + $0x156c] ss:$16 sps:$4 sm:$0xff]   ;;  %v16097_v4 = vld [vmem:[%s17823_s27 + $0x1568] ss:$16 sps:$4 sm:$0xff]  }
 0x735   : > { %11887 = vmatpush1.bf16.msra.mxu0 %v16037_v47  ;;  %v16102_v63 = vld [vmem:[%s17823_s27 + $0x176c] ss:$16 sps:$4 sm:$0xff]   ;;  %v16100_v54 = vld [vmem:[%s17823_s27 + $0x1768] ss:$16 sps:$4 sm:$0xff]  }
 0x736   : > { %11928 = vmatpush1.bf16.msra.mxu1 %v16040_v13  ;;  %11888 = vmatprep.subr.bf16.mxu0 %v16045_v40  ;;  %v16105_v42 = vld [vmem:[%s17823_s27 + $0x154c] ss:$16 sps:$4 sm:$0xff]   ;;  %v16103_v47 = vld [vmem:[%s17823_s27 + $0x1548] ss:$16 sps:$4 sm:$0xff]  }
 0x737   : > { %11929 = vmatprep.subr.bf16.mxu1 %v16048_v56  ;;  %v16108_v11 = vld [vmem:[%s17823_s27 + $0x174c] ss:$16 sps:$4 sm:$0xff]   ;;  %v16106_v13 = vld [vmem:[%s17823_s27 + $0x1748] ss:$16 sps:$4 sm:$0xff]  }
 0x738   : > { %v16111_v39 = vld [vmem:[%s17823_s27 + $0x152c] ss:$16 sps:$4 sm:$0xff]   ;;  %v16109_v40 = vld [vmem:[%s17823_s27 + $0x1528] ss:$16 sps:$4 sm:$0xff]  }
 0x739   : > { %11889 = vmatpush1.bf16.msra.mxu0 %v16043_v34  ;;  %v16114_v18 = vld [vmem:[%s17823_s27 + $0x172c] ss:$16 sps:$4 sm:$0xff]   ;;  %v16112_v56 = vld [vmem:[%s17823_s27 + $0x1728] ss:$16 sps:$4 sm:$0xff]  }
 0x73a   : > { %11930 = vmatpush1.bf16.msra.mxu1 %v16046_v16  ;;  %11890 = vmatprep.subr.bf16.mxu0 %v16051_v21  ;;  %v16117_v34 = vld [vmem:[%s17823_s27 + $0x150c] ss:$16 sps:$4 sm:$0xff]   ;;  %v16115_v21 = vld [vmem:[%s17823_s27 + $0x1508] ss:$16 sps:$4 sm:$0xff]  }
 0x73b   : > { %11931 = vmatprep.subr.bf16.mxu1 %v16054_v58  ;;  %v16120_v16 = vld [vmem:[%s17823_s27 + $0x170c] ss:$16 sps:$4 sm:$0xff]   ;;  %v16118_v58 = vld [vmem:[%s17823_s27 + $0x1708] ss:$16 sps:$4 sm:$0xff]  }
 0x73d   : > { %11891 = vmatpush1.bf16.msra.mxu0 %v16049_v59  ;;  %v16123_v59 = vld [vmem:[%s17823_s27 + $0x18ec] ss:$16 sps:$4 sm:$0xff]  }
 0x73e   : > { %11932 = vmatpush1.bf16.msra.mxu1 %v16052_v29  ;;  %11892 = vmatprep.subr.bf16.mxu0 %v16057_v32  ;;  %v16126_v29 = vld [vmem:[%s17823_s27 + $0x1aec] ss:$16 sps:$4 sm:$0xff]   ;;  %v16121_v32 = vld [vmem:[%s17823_s27 + $0x18e8] ss:$16 sps:$4 sm:$0xff]  }
 0x73f   : > { %11933 = vmatprep.subr.bf16.mxu1 %v16060_v22  ;;  %v16124_v22 = vld [vmem:[%s17823_s27 + $0x1ae8] ss:$16 sps:$4 sm:$0xff]  }
 0x741   : > { %11893 = vmatpush1.bf16.msra.mxu0 %v16055_v52  ;;  %v16129_v52 = vld [vmem:[%s17823_s27 + $0x18cc] ss:$16 sps:$4 sm:$0xff]  }
 0x742   : > { %11934 = vmatpush1.bf16.msra.mxu1 %v16058_v28  ;;  %11894 = vmatprep.subr.bf16.mxu0 %v16063_v2  ;;  %v16132_v28 = vld [vmem:[%s17823_s27 + $0x1acc] ss:$16 sps:$4 sm:$0xff]  }
 0x743   : > { %11935 = vmatprep.subr.bf16.mxu1 %v16066_v26 }
 0x745   : > { %11895 = vmatpush1.bf16.msra.mxu0 %v16061_v33 }
 0x746   : > { %11936 = vmatpush1.bf16.msra.mxu1 %v16064_v1  ;;  %11896 = vmatprep.subr.bf16.mxu0 %v16069_v36  ;;  %v16127_v1 = vld [vmem:[%s17823_s27 + $0x18c8] ss:$16 sps:$4 sm:$0xff]  }
 0x747   : > { %11937 = vmatprep.subr.bf16.mxu1 %v16072_v31  ;;  %v16130_v36 = vld [vmem:[%s17823_s27 + $0x1ac8] ss:$16 sps:$4 sm:$0xff]  }
 0x749   : > { %11897 = vmatpush1.bf16.msra.mxu0 %v16067_v61 }
 0x74a   : > { %11938 = vmatpush1.bf16.msra.mxu1 %v16070_v23  ;;  %11898 = vmatprep.subr.bf16.mxu0 %v16075_v14  ;;  %v16135_v23 = vld [vmem:[%s17823_s27 + $0x18ac] ss:$16 sps:$4 sm:$0xff]  }
 0x74b   : > { %11939 = vmatprep.subr.bf16.mxu1 %v16078_v55  ;;  %v16138_v14 = vld [vmem:[%s17823_s27 + $0x1aac] ss:$16 sps:$4 sm:$0xff]  }
 0x74d   : > { %11899 = vmatpush2.bf16.msra.mxu0 %v16073_v53 }
 0x74e   : > { %11940 = vmatpush2.bf16.msra.mxu1 %v16076_v24  ;;  %11900 = vmatprep.subr.bf16.mxu0 %v16081_v15  ;;  %v16133_v24 = vld [vmem:[%s17823_s27 + $0x18a8] ss:$16 sps:$4 sm:$0xff]  }
 0x74f   : > { %11941 = vmatprep.subr.bf16.mxu1 %v16084_v9  ;;  %v16136_v15 = vld [vmem:[%s17823_s27 + $0x1aa8] ss:$16 sps:$4 sm:$0xff]  }
 0x751   : > { %11901 = vmatpush2.bf16.msra.mxu0 %v16079_v25 }
 0x752   : > { %11942 = vmatpush2.bf16.msra.mxu1 %v16082_v43  ;;  %11902 = vmatprep.subr.bf16.mxu0 %v16087_v44  ;;  %v16142_v43 = vld [vmem:[%s17823_s27 + $0x1a88] ss:$16 sps:$4 sm:$0xff]   ;;  %v16147_v44 = vld [vmem:[%s17823_s27 + $0x186c] ss:$16 sps:$4 sm:$0xff]  }
 0x753   : > { %11943 = vmatprep.subr.bf16.mxu1 %v16090_v45  ;;  %v16150_v45 = vld [vmem:[%s17823_s27 + $0x1a6c] ss:$16 sps:$4 sm:$0xff]  }
 0x755   : > { %11903 = vmatpush2.bf16.msra.mxu0 %v16085_v27  ;;  %v16145_v27 = vld [vmem:[%s17823_s27 + $0x1868] ss:$16 sps:$4 sm:$0xff]  }
 0x756   : > { %11944 = vmatpush2.bf16.msra.mxu1 %v16088_v50  ;;  %11904 = vmatprep.subr.bf16.mxu0 %v16093_v46  ;;  %v16148_v50 = vld [vmem:[%s17823_s27 + $0x1a68] ss:$16 sps:$4 sm:$0xff]   ;;  %v16153_v46 = vld [vmem:[%s17823_s27 + $0x184c] ss:$16 sps:$4 sm:$0xff]  }
 0x757   : > { %11945 = vmatprep.subr.bf16.mxu1 %v16096_v60  ;;  %v16156_v60 = vld [vmem:[%s17823_s27 + $0x1a4c] ss:$16 sps:$4 sm:$0xff]  }
 0x759   : > { %11905 = vmatpush2.bf16.msra.mxu0 %v16091_v3  ;;  %v16151_v3 = vld [vmem:[%s17823_s27 + $0x1848] ss:$16 sps:$4 sm:$0xff]  }
 0x75a   : > { %11946 = vmatpush2.bf16.msra.mxu1 %v16094_v37  ;;  %11906 = vmatprep.subr.bf16.mxu0 %v16099_v38  ;;  %v16154_v37 = vld [vmem:[%s17823_s27 + $0x1a48] ss:$16 sps:$4 sm:$0xff]   ;;  %v16159_v38 = vld [vmem:[%s17823_s27 + $0x182c] ss:$16 sps:$4 sm:$0xff]  }
 0x75b   : > { %11947 = vmatprep.subr.bf16.mxu1 %v16102_v63  ;;  %v16162_v63 = vld [vmem:[%s17823_s27 + $0x1a2c] ss:$16 sps:$4 sm:$0xff]  }
 0x75d   : > { %11907 = vmatpush2.bf16.msra.mxu0 %v16097_v4  ;;  %v16157_v4 = vld [vmem:[%s17823_s27 + $0x1828] ss:$16 sps:$4 sm:$0xff]  }
 0x75e   : > { %11948 = vmatpush2.bf16.msra.mxu1 %v16100_v54  ;;  %11908 = vmatprep.subr.bf16.mxu0 %v16105_v42  ;;  %v16160_v54 = vld [vmem:[%s17823_s27 + $0x1a28] ss:$16 sps:$4 sm:$0xff]   ;;  %v16165_v42 = vld [vmem:[%s17823_s27 + $0x180c] ss:$16 sps:$4 sm:$0xff]  }
 0x75f   : > { %11949 = vmatprep.subr.bf16.mxu1 %v16108_v11  ;;  %v16168_v11 = vld [vmem:[%s17823_s27 + $0x1a0c] ss:$16 sps:$4 sm:$0xff]  }
 0x761   : > { %11909 = vmatpush2.bf16.msra.mxu0 %v16103_v47  ;;  %v16163_v47 = vld [vmem:[%s17823_s27 + $0x1808] ss:$16 sps:$4 sm:$0xff]  }
 0x762   : > { %11950 = vmatpush2.bf16.msra.mxu1 %v16106_v13  ;;  %11910 = vmatprep.subr.bf16.mxu0 %v16111_v39  ;;  %v16166_v13 = vld [vmem:[%s17823_s27 + $0x1a08] ss:$16 sps:$4 sm:$0xff]   ;;  %v16171_v39 = vld [vmem:[%s17823_s27 + $0x19ec] ss:$16 sps:$4 sm:$0xff]  }
 0x763   : > { %11951 = vmatprep.subr.bf16.mxu1 %v16114_v18  ;;  %v16174_v18 = vld [vmem:[%s17823_s27 + $0x1bec] ss:$16 sps:$4 sm:$0xff]  }
 0x765   : > { %11911 = vmatpush2.bf16.msra.mxu0 %v16109_v40  ;;  %v16169_v40 = vld [vmem:[%s17823_s27 + $0x19e8] ss:$16 sps:$4 sm:$0xff]  }
 0x766   : > { %11952 = vmatpush2.bf16.msra.mxu1 %v16112_v56  ;;  %11912 = vmatprep.subr.bf16.mxu0 %v16117_v34  ;;  %v16172_v56 = vld [vmem:[%s17823_s27 + $0x1be8] ss:$16 sps:$4 sm:$0xff]   ;;  %v16177_v34 = vld [vmem:[%s17823_s27 + $0x19cc] ss:$16 sps:$4 sm:$0xff]  }
 0x767   : > { %11953 = vmatprep.subr.bf16.mxu1 %v16120_v16  ;;  %v16180_v16 = vld [vmem:[%s17823_s27 + $0x1bcc] ss:$16 sps:$4 sm:$0xff]  }
 0x769   : > { %11913 = vmatpush2.bf16.msra.mxu0 %v16115_v21  ;;  %v16175_v21 = vld [vmem:[%s17823_s27 + $0x19c8] ss:$16 sps:$4 sm:$0xff]  }
 0x76a   : > { %11954 = vmatpush2.bf16.msra.mxu1 %v16118_v58  ;;  %11964 = vmatprep.subr.bf16.mxu0 %v16123_v59  ;;  %v16178_v58 = vld [vmem:[%s17823_s27 + $0x1bc8] ss:$16 sps:$4 sm:$0xff]   ;;  %v16183_v59 = vld [vmem:[%s17823_s27 + $0x19ac] ss:$16 sps:$4 sm:$0xff]  }
 0x76b   : > { %12005 = vmatprep.subr.bf16.mxu1 %v16126_v29  ;;  %v16186_v29 = vld [vmem:[%s17823_s27 + $0x1bac] ss:$16 sps:$4 sm:$0xff]  }
 0x76c   : > { %v11670_v2 = vpop.f32.mrf.mxu0  ;;  %11915 = vmatmul.mubr.bf16.vlgmr.msra.gmra.mxu0 %v18752_v5 }
 0x76d   : > { %v11711_v26 = vpop.f32.mrf.mxu1  ;;  %11956 = vmatmul.mubr.bf16.vlgmr.msra.gmra.mxu1 %v18756_v8  ;;  %v11671_v33 = vadd.f32 %v11670_v2, %v19332_v0  ;;  %11965 = vmatpush1.bf16.msra.mxu0 %v16121_v32  ;;  %v16181_v32 = vld [vmem:[%s17823_s27 + $0x19a8] ss:$16 sps:$4 sm:$0xff]  }
 0x76e   : > { %12006 = vmatpush1.bf16.msra.mxu1 %v16124_v22  ;;  %v11672_v31 = vpop.f32.mrf.mxu0  ;;  %11966 = vmatprep.subr.bf16.mxu0 %v16129_v52  ;;  %v16184_v22 = vld [vmem:[%s17823_s27 + $0x1ba8] ss:$16 sps:$4 sm:$0xff]   ;;  %v16189_v52 = vld [vmem:[%s17823_s27 + $0x198c] ss:$16 sps:$4 sm:$0xff]  }
 0x76f   : > { %v11713_v61 = vpop.f32.mrf.mxu1  ;;  %12007 = vmatprep.subr.bf16.mxu1 %v16132_v28  ;;  %v19406_v55 = vadd.f32 %v11711_v26, %v11671_v33  ;;  %v11673_v5 = vadd.f32 %v11672_v31, %v19337_v41  ;;  %11996 = vmatprep.mubr.bf16.mxu0 %v18768_v57  ;;  %v16141_v57 = vld [vmem:[%s17823_s27 + $0x188c] ss:$16 sps:$4 sm:$0xff]   ;;  %v16139_v41 = vld [vmem:[%s17823_s27 + $0x1888] ss:$16 sps:$4 sm:$0xff]  }
 0x770   : > { %12037 = vmatprep.mubr.bf16.mxu1 %v18772_v62  ;;  %v11674_v8 = vpop.f32.mrf.mxu0  ;;  %v16144_v62 = vld [vmem:[%s17823_s27 + $0x1a8c] ss:$16 sps:$4 sm:$0xff]   ;;  %v16187_v2 = vld [vmem:[%s17823_s27 + $0x1988] ss:$16 sps:$4 sm:$0xff]  }
 0x771   : > { %v11715_v0 = vpop.f32.mrf.mxu1  ;;  %v19411_v53 = vadd.f32 %v11713_v61, %v11673_v5  ;;  %11967 = vmatpush1.bf16.msra.mxu0 %v16127_v1  ;;  %v16192_v28 = vld [vmem:[%s17823_s27 + $0x1b8c] ss:$16 sps:$4 sm:$0xff]   ;;  %v16190_v26 = vld [vmem:[%s17823_s27 + $0x1b88] ss:$16 sps:$4 sm:$0xff]  }
 0x772   : > { %12008 = vmatpush1.bf16.msra.mxu1 %v16130_v36  ;;  %v11675_v9 = vpop.f32.mrf.mxu0  ;;  %11968 = vmatprep.subr.bf16.mxu0 %v16135_v23  ;;  %v16195_v33 = vld [vmem:[%s17823_s27 + $0x196c] ss:$16 sps:$4 sm:$0xff]   ;;  %v16193_v36 = vld [vmem:[%s17823_s27 + $0x1968] ss:$16 sps:$4 sm:$0xff]  }
 0x773   : > { %v11716_v25 = vpop.f32.mrf.mxu1  ;;  %12009 = vmatprep.subr.bf16.mxu1 %v16138_v14  ;;  %v16198_v1 = vld [vmem:[%s17823_s27 + $0x1b6c] ss:$16 sps:$4 sm:$0xff]   ;;  %v16196_v31 = vld [vmem:[%s17823_s27 + $0x1b68] ss:$16 sps:$4 sm:$0xff]  }
 0x774   : > { %v16201_v61 = vld [vmem:[%s17823_s27 + $0x194c] ss:$16 sps:$4 sm:$0xff]   ;;  %v16199_v14 = vld [vmem:[%s17823_s27 + $0x1948] ss:$16 sps:$4 sm:$0xff]  }
 0x775   : > { %11969 = vmatpush1.bf16.msra.mxu0 %v16133_v24  ;;  %v16204_v23 = vld [vmem:[%s17823_s27 + $0x1b4c] ss:$16 sps:$4 sm:$0xff]   ;;  %v16202_v5 = vld [vmem:[%s17823_s27 + $0x1b48] ss:$16 sps:$4 sm:$0xff]  }
 0x776   : > { %12010 = vmatpush1.bf16.msra.mxu1 %v16136_v15  ;;  %11970 = vmatprep.subr.bf16.mxu0 %v16141_v57  ;;  %v16207_v8 = vld [vmem:[%s17823_s27 + $0x192c] ss:$16 sps:$4 sm:$0xff]   ;;  %v16205_v24 = vld [vmem:[%s17823_s27 + $0x1928] ss:$16 sps:$4 sm:$0xff]  }
 0x777   : > { %12011 = vmatprep.subr.bf16.mxu1 %v16144_v62  ;;  %v16210_v0 = vld [vmem:[%s17823_s27 + $0x1b2c] ss:$16 sps:$4 sm:$0xff]   ;;  %v16208_v15 = vld [vmem:[%s17823_s27 + $0x1b28] ss:$16 sps:$4 sm:$0xff]  }
 0x778   : > { %v16213_v9 = vld [vmem:[%s17823_s27 + $0x190c] ss:$16 sps:$4 sm:$0xff]   ;;  %v16211_v57 = vld [vmem:[%s17823_s27 + $0x1908] ss:$16 sps:$4 sm:$0xff]  }
 0x779   : > { %11971 = vmatpush1.bf16.msra.mxu0 %v16139_v41  ;;  %v16216_v25 = vld [vmem:[%s17823_s27 + $0x1b0c] ss:$16 sps:$4 sm:$0xff]   ;;  %v16214_v62 = vld [vmem:[%s17823_s27 + $0x1b08] ss:$16 sps:$4 sm:$0xff]  }
 0x77a   : > { %12012 = vmatpush1.bf16.msra.mxu1 %v16142_v43  ;;  %11972 = vmatprep.subr.bf16.mxu0 %v16147_v44  ;;  %v16219_v41 = vld [vmem:[%s17823_s27 + $0x1cec] ss:$16 sps:$4 sm:$0xff]   ;;  %v16217_v44 = vld [vmem:[%s17823_s27 + $0x1ce8] ss:$16 sps:$4 sm:$0xff]  }
 0x77b   : > { %12013 = vmatprep.subr.bf16.mxu1 %v16150_v45  ;;  %v16222_v43 = vld [vmem:[%s17823_s27 + $0x1eec] ss:$16 sps:$4 sm:$0xff]   ;;  %v16220_v45 = vld [vmem:[%s17823_s27 + $0x1ee8] ss:$16 sps:$4 sm:$0xff]  }
 0x77d   : > { %11973 = vmatpush1.bf16.msra.mxu0 %v16145_v27  ;;  %v16225_v27 = vld [vmem:[%s17823_s27 + $0x1ccc] ss:$16 sps:$4 sm:$0xff]  }
 0x77e   : > { %12014 = vmatpush1.bf16.msra.mxu1 %v16148_v50  ;;  %11974 = vmatprep.subr.bf16.mxu0 %v16153_v46  ;;  %v16228_v50 = vld [vmem:[%s17823_s27 + $0x1ecc] ss:$16 sps:$4 sm:$0xff]  }
 0x77f   : > { %12015 = vmatprep.subr.bf16.mxu1 %v16156_v60 }
 0x781   : > { %11975 = vmatpush1.bf16.msra.mxu0 %v16151_v3 }
 0x782   : > { %12016 = vmatpush1.bf16.msra.mxu1 %v16154_v37  ;;  %11976 = vmatprep.subr.bf16.mxu0 %v16159_v38  ;;  %v16223_v37 = vld [vmem:[%s17823_s27 + $0x1cc8] ss:$16 sps:$4 sm:$0xff]  }
 0x783   : > { %12017 = vmatprep.subr.bf16.mxu1 %v16162_v63  ;;  %v16226_v38 = vld [vmem:[%s17823_s27 + $0x1ec8] ss:$16 sps:$4 sm:$0xff]  }
 0x785   : > { %11977 = vmatpush1.bf16.msra.mxu0 %v16157_v4 }
 0x786   : > { %12018 = vmatpush1.bf16.msra.mxu1 %v16160_v54  ;;  %11978 = vmatprep.subr.bf16.mxu0 %v16165_v42  ;;  %v16231_v54 = vld [vmem:[%s17823_s27 + $0x1cac] ss:$16 sps:$4 sm:$0xff]  }
 0x787   : > { %12019 = vmatprep.subr.bf16.mxu1 %v16168_v11  ;;  %v16234_v42 = vld [vmem:[%s17823_s27 + $0x1eac] ss:$16 sps:$4 sm:$0xff]  }
 0x789   : > { %11979 = vmatpush1.bf16.msra.mxu0 %v16163_v47 }
 0x78a   : > { %12020 = vmatpush1.bf16.msra.mxu1 %v16166_v13  ;;  %11980 = vmatprep.subr.bf16.mxu0 %v16171_v39  ;;  %v16229_v13 = vld [vmem:[%s17823_s27 + $0x1ca8] ss:$16 sps:$4 sm:$0xff]  }
 0x78b   : > { %12021 = vmatprep.subr.bf16.mxu1 %v16174_v18  ;;  %v16232_v39 = vld [vmem:[%s17823_s27 + $0x1ea8] ss:$16 sps:$4 sm:$0xff]  }
 0x78d   : > { %11981 = vmatpush2.bf16.msra.mxu0 %v16169_v40 }
 0x78e   : > { %12022 = vmatpush2.bf16.msra.mxu1 %v16172_v56  ;;  %11982 = vmatprep.subr.bf16.mxu0 %v16177_v34  ;;  %v16238_v56 = vld [vmem:[%s17823_s27 + $0x1e88] ss:$16 sps:$4 sm:$0xff]   ;;  %v16243_v34 = vld [vmem:[%s17823_s27 + $0x1c6c] ss:$16 sps:$4 sm:$0xff]  }
 0x78f   : > { %12023 = vmatprep.subr.bf16.mxu1 %v16180_v16  ;;  %v16246_v16 = vld [vmem:[%s17823_s27 + $0x1e6c] ss:$16 sps:$4 sm:$0xff]  }
 0x791   : > { %11983 = vmatpush2.bf16.msra.mxu0 %v16175_v21  ;;  %v16241_v21 = vld [vmem:[%s17823_s27 + $0x1c68] ss:$16 sps:$4 sm:$0xff]  }
 0x792   : > { %12024 = vmatpush2.bf16.msra.mxu1 %v16178_v58  ;;  %11984 = vmatprep.subr.bf16.mxu0 %v16183_v59  ;;  %v16244_v58 = vld [vmem:[%s17823_s27 + $0x1e68] ss:$16 sps:$4 sm:$0xff]   ;;  %v16249_v59 = vld [vmem:[%s17823_s27 + $0x1c4c] ss:$16 sps:$4 sm:$0xff]  }
 0x793   : > { %12025 = vmatprep.subr.bf16.mxu1 %v16186_v29  ;;  %v16252_v29 = vld [vmem:[%s17823_s27 + $0x1e4c] ss:$16 sps:$4 sm:$0xff]  }
 0x795   : > { %11985 = vmatpush2.bf16.msra.mxu0 %v16181_v32  ;;  %v16247_v32 = vld [vmem:[%s17823_s27 + $0x1c48] ss:$16 sps:$4 sm:$0xff]  }
 0x796   : > { %12026 = vmatpush2.bf16.msra.mxu1 %v16184_v22  ;;  %11986 = vmatprep.subr.bf16.mxu0 %v16189_v52  ;;  %v16250_v22 = vld [vmem:[%s17823_s27 + $0x1e48] ss:$16 sps:$4 sm:$0xff]   ;;  %v16255_v52 = vld [vmem:[%s17823_s27 + $0x1c2c] ss:$16 sps:$4 sm:$0xff]  }
 0x797   : > { %12027 = vmatprep.subr.bf16.mxu1 %v16192_v28  ;;  %v16258_v28 = vld [vmem:[%s17823_s27 + $0x1e2c] ss:$16 sps:$4 sm:$0xff]  }
 0x799   : > { %11987 = vmatpush2.bf16.msra.mxu0 %v16187_v2  ;;  %v16253_v2 = vld [vmem:[%s17823_s27 + $0x1c28] ss:$16 sps:$4 sm:$0xff]  }
 0x79a   : > { %12028 = vmatpush2.bf16.msra.mxu1 %v16190_v26  ;;  %11988 = vmatprep.subr.bf16.mxu0 %v16195_v33  ;;  %v16256_v26 = vld [vmem:[%s17823_s27 + $0x1e28] ss:$16 sps:$4 sm:$0xff]   ;;  %v16261_v33 = vld [vmem:[%s17823_s27 + $0x1c0c] ss:$16 sps:$4 sm:$0xff]  }
 0x79b   : > { %12029 = vmatprep.subr.bf16.mxu1 %v16198_v1  ;;  %v16264_v1 = vld [vmem:[%s17823_s27 + $0x1e0c] ss:$16 sps:$4 sm:$0xff]  }
 0x79d   : > { %11989 = vmatpush2.bf16.msra.mxu0 %v16193_v36  ;;  %v16259_v36 = vld [vmem:[%s17823_s27 + $0x1c08] ss:$16 sps:$4 sm:$0xff]  }
 0x79e   : > { %12030 = vmatpush2.bf16.msra.mxu1 %v16196_v31  ;;  %11990 = vmatprep.subr.bf16.mxu0 %v16201_v61  ;;  %v16262_v31 = vld [vmem:[%s17823_s27 + $0x1e08] ss:$16 sps:$4 sm:$0xff]   ;;  %v16267_v61 = vld [vmem:[%s17823_s27 + $0x1dec] ss:$16 sps:$4 sm:$0xff]  }
 0x79f   : > { %12031 = vmatprep.subr.bf16.mxu1 %v16204_v23  ;;  %v16270_v23 = vld [vmem:[%s17823_s27 + $0x1fec] ss:$16 sps:$4 sm:$0xff]  }
 0x7a1   : > { %11991 = vmatpush2.bf16.msra.mxu0 %v16199_v14  ;;  %v16265_v14 = vld [vmem:[%s17823_s27 + $0x1de8] ss:$16 sps:$4 sm:$0xff]  }
 0x7a2   : > { %12032 = vmatpush2.bf16.msra.mxu1 %v16202_v5  ;;  %11992 = vmatprep.subr.bf16.mxu0 %v16207_v8  ;;  %v16268_v5 = vld [vmem:[%s17823_s27 + $0x1fe8] ss:$16 sps:$4 sm:$0xff]   ;;  %v16273_v8 = vld [vmem:[%s17823_s27 + $0x1dcc] ss:$16 sps:$4 sm:$0xff]  }
 0x7a3   : > { %12033 = vmatprep.subr.bf16.mxu1 %v16210_v0  ;;  %v16276_v0 = vld [vmem:[%s17823_s27 + $0x1fcc] ss:$16 sps:$4 sm:$0xff]  }
 0x7a5   : > { %11993 = vmatpush2.bf16.msra.mxu0 %v16205_v24  ;;  %v16271_v24 = vld [vmem:[%s17823_s27 + $0x1dc8] ss:$16 sps:$4 sm:$0xff]  }
 0x7a6   : > { %12034 = vmatpush2.bf16.msra.mxu1 %v16208_v15  ;;  %11994 = vmatprep.subr.bf16.mxu0 %v16213_v9  ;;  %v16274_v15 = vld [vmem:[%s17823_s27 + $0x1fc8] ss:$16 sps:$4 sm:$0xff]   ;;  %v16279_v9 = vld [vmem:[%s17823_s27 + $0x1dac] ss:$16 sps:$4 sm:$0xff]  }
 0x7a7   : > { %12035 = vmatprep.subr.bf16.mxu1 %v16216_v25  ;;  %v16282_v25 = vld [vmem:[%s17823_s27 + $0x1fac] ss:$16 sps:$4 sm:$0xff]  }
 0x7a9   : > { %11995 = vmatpush2.bf16.msra.mxu0 %v16211_v57  ;;  %v16277_v57 = vld [vmem:[%s17823_s27 + $0x1da8] ss:$16 sps:$4 sm:$0xff]  }
 0x7aa   : > { %12036 = vmatpush2.bf16.msra.mxu1 %v16214_v62  ;;  %12046 = vmatprep.subr.bf16.mxu0 %v16219_v41  ;;  %v16280_v62 = vld [vmem:[%s17823_s27 + $0x1fa8] ss:$16 sps:$4 sm:$0xff]   ;;  %v16285_v41 = vld [vmem:[%s17823_s27 + $0x1d8c] ss:$16 sps:$4 sm:$0xff]  }
 0x7ab   : > { %12087 = vmatprep.subr.bf16.mxu1 %v16222_v43  ;;  %v16288_v43 = vld [vmem:[%s17823_s27 + $0x1f8c] ss:$16 sps:$4 sm:$0xff]  }
 0x7ac   : > { %v11752_v46 = vpop.f32.mrf.mxu0  ;;  %11997 = vmatmul.mubr.bf16.vlgmr.msra.gmra.mxu0 %v18850_v10 }
 0x7ad   : > { %v11793_v60 = vpop.f32.mrf.mxu1  ;;  %12038 = vmatmul.mubr.bf16.vlgmr.msra.gmra.mxu1 %v18854_v35  ;;  %v11753_v3 = vadd.f32 %v11752_v46, %v19406_v55  ;;  %12047 = vmatpush1.bf16.msra.mxu0 %v16217_v44  ;;  %v16283_v44 = vld [vmem:[%s17823_s27 + $0x1d88] ss:$16 sps:$4 sm:$0xff]  }
 0x7ae   : > { %12088 = vmatpush1.bf16.msra.mxu1 %v16220_v45  ;;  %v11754_v63 = vpop.f32.mrf.mxu0  ;;  %12048 = vmatprep.subr.bf16.mxu0 %v16225_v27  ;;  %v16286_v45 = vld [vmem:[%s17823_s27 + $0x1f88] ss:$16 sps:$4 sm:$0xff]   ;;  %v16291_v27 = vld [vmem:[%s17823_s27 + $0x1d6c] ss:$16 sps:$4 sm:$0xff]  }
 0x7af   : > { %v11795_v4 = vpop.f32.mrf.mxu1  ;;  %12089 = vmatprep.subr.bf16.mxu1 %v16228_v50  ;;  %v19480_v11 = vadd.f32 %v11793_v60, %v11753_v3  ;;  %v11755_v10 = vadd.f32 %v11754_v63, %v19411_v53  ;;  %12078 = vmatprep.mubr.bf16.mxu0 %v18862_v12  ;;  %v16237_v12 = vld [vmem:[%s17823_s27 + $0x1c8c] ss:$16 sps:$4 sm:$0xff]   ;;  %v16235_v53 = vld [vmem:[%s17823_s27 + $0x1c88] ss:$16 sps:$4 sm:$0xff]  }
 0x7b0   : > { %12119 = vmatprep.mubr.bf16.mxu1 %v18866_v7  ;;  %v11756_v35 = vpop.f32.mrf.mxu0  ;;  %v16240_v7 = vld [vmem:[%s17823_s27 + $0x1e8c] ss:$16 sps:$4 sm:$0xff]   ;;  %v16289_v46 = vld [vmem:[%s17823_s27 + $0x1d68] ss:$16 sps:$4 sm:$0xff]  }
 0x7b1   : > { %v11797_v55 = vpop.f32.mrf.mxu1  ;;  %v19485_v47 = vadd.f32 %v11795_v4, %v11755_v10  ;;  %12049 = vmatpush1.bf16.msra.mxu0 %v16223_v37  ;;  %v16294_v50 = vld [vmem:[%s17823_s27 + $0x1f6c] ss:$16 sps:$4 sm:$0xff]   ;;  %v16292_v60 = vld [vmem:[%s17823_s27 + $0x1f68] ss:$16 sps:$4 sm:$0xff]  }
 0x7b2   : > { %12090 = vmatpush1.bf16.msra.mxu1 %v16226_v38  ;;  %v11757_v18 = vpop.f32.mrf.mxu0  ;;  %12050 = vmatprep.subr.bf16.mxu0 %v16231_v54  ;;  %v16297_v3 = vld [vmem:[%s17823_s27 + $0x1d4c] ss:$16 sps:$4 sm:$0xff]   ;;  %v16295_v38 = vld [vmem:[%s17823_s27 + $0x1d48] ss:$16 sps:$4 sm:$0xff]  }
 0x7b3   : > { %v11798_v40 = vpop.f32.mrf.mxu1  ;;  %12091 = vmatprep.subr.bf16.mxu1 %v16234_v42  ;;  %v16300_v37 = vld [vmem:[%s17823_s27 + $0x1f4c] ss:$16 sps:$4 sm:$0xff]   ;;  %v16298_v63 = vld [vmem:[%s17823_s27 + $0x1f48] ss:$16 sps:$4 sm:$0xff]   ;;  %v16315_v18 = vld [vmem:[%s17825_s28 + $0xe4] ss:$16 sps:$4 sm:$0xff]  }
 0x7b4   : > { %v16303_v4 = vld [vmem:[%s17823_s27 + $0x1d2c] ss:$16 sps:$4 sm:$0xff]   ;;  %v16301_v42 = vld [vmem:[%s17823_s27 + $0x1d28] ss:$16 sps:$4 sm:$0xff]   ;;  %v12129_v40 = vmax.f32 %v19182_v20, 0.0 }
 0x7b5   : > { %12051 = vmatpush1.bf16.msra.mxu0 %v16229_v13  ;;  %v16306_v54 = vld [vmem:[%s17823_s27 + $0x1f2c] ss:$16 sps:$4 sm:$0xff]   ;;  %v16304_v10 = vld [vmem:[%s17823_s27 + $0x1f28] ss:$16 sps:$4 sm:$0xff]   ;;  %v16316_v20 = vld [vmem:[%s17825_s28 + $0xc0] ss:$16 sps:$4 sm:$0xff]  }
 0x7b6   : > { %12092 = vmatpush1.bf16.msra.mxu1 %v16232_v39  ;;  %12052 = vmatprep.subr.bf16.mxu0 %v16237_v12  ;;  %v16309_v35 = vld [vmem:[%s17823_s27 + $0x1d0c] ss:$16 sps:$4 sm:$0xff]   ;;  %v16307_v13 = vld [vmem:[%s17823_s27 + $0x1d08] ss:$16 sps:$4 sm:$0xff]   ;;  %v16313_v12 = vld [vmem:[%s17825_s28 + $0xe0] ss:$16 sps:$4 sm:$0xff]  }
 0x7b7   : > { %12093 = vmatprep.subr.bf16.mxu1 %v16240_v7  ;;  %v16312_v55 = vld [vmem:[%s17823_s27 + $0x1f0c] ss:$16 sps:$4 sm:$0xff]   ;;  %v16310_v39 = vld [vmem:[%s17823_s27 + $0x1f08] ss:$16 sps:$4 sm:$0xff]   ;;  %v16318_v7 = vld [vmem:[%s17825_s28 + $0xc4] ss:$16 sps:$4 sm:$0xff]  }
 0x7b9   : > { %12053 = vmatpush1.bf16.msra.mxu0 %v16235_v53  ;;  %v19545_v53 = vpack.c.bf16 %v12129_v40, %v12129_v40  ;;  %v16349_v40 = vld [vmem:[%s17825_s28 + $0x160] ss:$16 sps:$4 sm:$0xff]  }
 0x7ba   : > { %12094 = vmatpush1.bf16.msra.mxu1 %v16238_v56  ;;  %12054 = vmatprep.subr.bf16.mxu0 %v16243_v34 }
 0x7bb   : > { %12095 = vmatprep.subr.bf16.mxu1 %v16246_v16 }
 0x7bd   : > { %12055 = vmatpush1.bf16.msra.mxu0 %v16241_v21 }
 0x7be   : > { %12096 = vmatpush1.bf16.msra.mxu1 %v16244_v58  ;;  %12056 = vmatprep.subr.bf16.mxu0 %v16249_v59  ;;  %v16321_v59 = vld [vmem:[%s17825_s28 + $0xa4] ss:$16 sps:$4 sm:$0xff]  }
 0x7bf   : > { %12097 = vmatprep.subr.bf16.mxu1 %v16252_v29 }
 0x7c1   : > { %12057 = vmatpush1.bf16.msra.mxu0 %v16247_v32 }
 0x7c2   : > { %12098 = vmatpush1.bf16.msra.mxu1 %v16250_v22  ;;  %12058 = vmatprep.subr.bf16.mxu0 %v16255_v52  ;;  %v16319_v22 = vld [vmem:[%s17825_s28 + $0xa0] ss:$16 sps:$4 sm:$0xff]  }
 0x7c3   : > { %12099 = vmatprep.subr.bf16.mxu1 %v16258_v28 }
 0x7c5   : > { %12059 = vmatpush1.bf16.msra.mxu0 %v16253_v2  ;;  %v16324_v2 = vld [vmem:[%s17825_s28 + $0x84] ss:$16 sps:$4 sm:$0xff]  }
 0x7c6   : > { %12100 = vmatpush1.bf16.msra.mxu1 %v16256_v26  ;;  %12060 = vmatprep.subr.bf16.mxu0 %v16261_v33  ;;  %v16409_v26 = vld [vmem:[%s17825_s28 + $0x2e0] ss:$16 sps:$4 sm:$0xff]   ;;  %v16411_v33 = vld [vmem:[%s17825_s28 + $0x2e4] ss:$16 sps:$4 sm:$0xff]  }
 0x7c7   : > { %12101 = vmatprep.subr.bf16.mxu1 %v16264_v1  ;;  %v16414_v1 = vld [vmem:[%s17825_s28 + $0x2c4] ss:$16 sps:$4 sm:$0xff]  }
 0x7c9   : > { %12061 = vmatpush1.bf16.msra.mxu0 %v16259_v36  ;;  %v16412_v36 = vld [vmem:[%s17825_s28 + $0x2c0] ss:$16 sps:$4 sm:$0xff]  }
 0x7ca   : > { %12102 = vmatpush1.bf16.msra.mxu1 %v16262_v31  ;;  %12062 = vmatprep.subr.bf16.mxu0 %v16267_v61  ;;  %v16327_v31 = vld [vmem:[%s17825_s28 + $0x64] ss:$16 sps:$4 sm:$0xff]  }
 0x7cb   : > { %12103 = vmatprep.subr.bf16.mxu1 %v16270_v23  ;;  %v16417_v61 = vld [vmem:[%s17825_s28 + $0x2a4] ss:$16 sps:$4 sm:$0xff]   ;;  %v16325_v23 = vld [vmem:[%s17825_s28 + $0x60] ss:$16 sps:$4 sm:$0xff]  }
 0x7cd   : > { %12063 = vmatpush2.bf16.msra.mxu0 %v16265_v14  ;;  %v16415_v14 = vld [vmem:[%s17825_s28 + $0x2a0] ss:$16 sps:$4 sm:$0xff]  }
 0x7ce   : > { %12104 = vmatpush2.bf16.msra.mxu1 %v16268_v5  ;;  %12064 = vmatprep.subr.bf16.mxu0 %v16273_v8  ;;  %v16330_v5 = vld [vmem:[%s17825_s28 + $0x44] ss:$16 sps:$4 sm:$0xff]  }
 0x7cf   : > { %12105 = vmatprep.subr.bf16.mxu1 %v16276_v0  ;;  %v16420_v8 = vld [vmem:[%s17825_s28 + $0x284] ss:$16 sps:$4 sm:$0xff]   ;;  %v16328_v0 = vld [vmem:[%s17825_s28 + $0x40] ss:$16 sps:$4 sm:$0xff]  }
 0x7d1   : > { %12065 = vmatpush2.bf16.msra.mxu0 %v16271_v24  ;;  %v16418_v24 = vld [vmem:[%s17825_s28 + $0x280] ss:$16 sps:$4 sm:$0xff]  }
 0x7d2   : > { %12106 = vmatpush2.bf16.msra.mxu1 %v16274_v15  ;;  %12066 = vmatprep.subr.bf16.mxu0 %v16279_v9  ;;  %v16333_v15 = vld [vmem:[%s17825_s28 + $0x24] ss:$16 sps:$4 sm:$0xff]  }
 0x7d3   : > { %12107 = vmatprep.subr.bf16.mxu1 %v16282_v25  ;;  %v16423_v9 = vld [vmem:[%s17825_s28 + $0x264] ss:$16 sps:$4 sm:$0xff]   ;;  %v16331_v25 = vld [vmem:[%s17825_s28 + $0x20] ss:$16 sps:$4 sm:$0xff]  }
 0x7d5   : > { %12067 = vmatpush2.bf16.msra.mxu0 %v16277_v57  ;;  %v16421_v57 = vld [vmem:[%s17825_s28 + $0x260] ss:$16 sps:$4 sm:$0xff]  }
 0x7d6   : > { %12108 = vmatpush2.bf16.msra.mxu1 %v16280_v62  ;;  %12068 = vmatprep.subr.bf16.mxu0 %v16285_v41  ;;  %v16336_v62 = vld [vmem:[%s17825_s28 + $0x4] ss:$16 sps:$4 sm:$0xff]  }
 0x7d7   : > { %12109 = vmatprep.subr.bf16.mxu1 %v16288_v43  ;;  %v16426_v41 = vld [vmem:[%s17825_s28 + $0x244] ss:$16 sps:$4 sm:$0xff]   ;;  %v16334_v43 = vld [vmem:[%s17825_s28] ss:$16 sps:$4 sm:$0xff]  }
 0x7d9   : > { %12069 = vmatpush2.bf16.msra.mxu0 %v16283_v44  ;;  %v16424_v44 = vld [vmem:[%s17825_s28 + $0x240] ss:$16 sps:$4 sm:$0xff]  }
 0x7da   : > { %12110 = vmatpush2.bf16.msra.mxu1 %v16286_v45  ;;  %12070 = vmatprep.subr.bf16.mxu0 %v16291_v27  ;;  %v16339_v45 = vld [vmem:[%s17825_s28 + $0x1e4] ss:$16 sps:$4 sm:$0xff]  }
 0x7db   : > { %12111 = vmatprep.subr.bf16.mxu1 %v16294_v50  ;;  %v16429_v27 = vld [vmem:[%s17825_s28 + $0x224] ss:$16 sps:$4 sm:$0xff]   ;;  %v16337_v50 = vld [vmem:[%s17825_s28 + $0x1e0] ss:$16 sps:$4 sm:$0xff]  }
 0x7dd   : > { %12071 = vmatpush2.bf16.msra.mxu0 %v16289_v46  ;;  %v16427_v46 = vld [vmem:[%s17825_s28 + $0x220] ss:$16 sps:$4 sm:$0xff]  }
 0x7de   : > { %12112 = vmatpush2.bf16.msra.mxu1 %v16292_v60  ;;  %12072 = vmatprep.subr.bf16.mxu0 %v16297_v3  ;;  %v16342_v60 = vld [vmem:[%s17825_s28 + $0x1c4] ss:$16 sps:$4 sm:$0xff]  }
 0x7df   : > { %12113 = vmatprep.subr.bf16.mxu1 %v16300_v37  ;;  %v16432_v3 = vld [vmem:[%s17825_s28 + $0x204] ss:$16 sps:$4 sm:$0xff]   ;;  %v16340_v37 = vld [vmem:[%s17825_s28 + $0x1c0] ss:$16 sps:$4 sm:$0xff]  }
 0x7e1   : > { %12073 = vmatpush2.bf16.msra.mxu0 %v16295_v38  ;;  %v16430_v38 = vld [vmem:[%s17825_s28 + $0x200] ss:$16 sps:$4 sm:$0xff]  }
 0x7e2   : > { %12114 = vmatpush2.bf16.msra.mxu1 %v16298_v63  ;;  %12074 = vmatprep.subr.bf16.mxu0 %v16303_v4  ;;  %v16345_v63 = vld [vmem:[%s17825_s28 + $0x1a4] ss:$16 sps:$4 sm:$0xff]  }
 0x7e3   : > { %12115 = vmatprep.subr.bf16.mxu1 %v16306_v54  ;;  %v16435_v4 = vld [vmem:[%s17825_s28 + $0x3e4] ss:$16 sps:$4 sm:$0xff]   ;;  %v16343_v54 = vld [vmem:[%s17825_s28 + $0x1a0] ss:$16 sps:$4 sm:$0xff]  }
 0x7e5   : > { %12075 = vmatpush2.bf16.msra.mxu0 %v16301_v42  ;;  %v16433_v42 = vld [vmem:[%s17825_s28 + $0x3e0] ss:$16 sps:$4 sm:$0xff]  }
 0x7e6   : > { %12116 = vmatpush2.bf16.msra.mxu1 %v16304_v10  ;;  %12076 = vmatprep.subr.bf16.mxu0 %v16309_v35  ;;  %v16348_v10 = vld [vmem:[%s17825_s28 + $0x184] ss:$16 sps:$4 sm:$0xff]  }
 0x7e7   : > { %12117 = vmatprep.subr.bf16.mxu1 %v16312_v55  ;;  %v16438_v35 = vld [vmem:[%s17825_s28 + $0x3c4] ss:$16 sps:$4 sm:$0xff]   ;;  %v16346_v55 = vld [vmem:[%s17825_s28 + $0x180] ss:$16 sps:$4 sm:$0xff]  }
 0x7e9   : > { %12077 = vmatpush2.bf16.msra.mxu0 %v16307_v13  ;;  %v16436_v13 = vld [vmem:[%s17825_s28 + $0x3c0] ss:$16 sps:$4 sm:$0xff]  }
 0x7ea   : > { %12118 = vmatpush2.bf16.msra.mxu1 %v16310_v39  ;;  %12908 = vmatprep.subr.bf16.mxu0 %v16315_v18  ;;  %v16351_v39 = vld [vmem:[%s17825_s28 + $0x164] ss:$16 sps:$4 sm:$0xff]  }
 0x7eb   : > { %12949 = vmatprep.subr.bf16.mxu1 %v16411_v33  ;;  %v16441_v18 = vld [vmem:[%s17825_s28 + $0x3a4] ss:$16 sps:$4 sm:$0xff]   ;;  %v16366_v33 = vld [vmem:[%s17825_s28 + $0xcc] ss:$16 sps:$4 sm:$0xff]  }
 0x7ec   : > { %v11834_v56 = vpop.f32.mrf.mxu0  ;;  %12079 = vmatmul.mubr.bf16.vlgmr.msra.gmra.mxu0 %v18940_v19 }
 0x7ed   : > { %v11875_v34 = vpop.f32.mrf.mxu1  ;;  %12120 = vmatmul.mubr.bf16.vlgmr.msra.gmra.mxu1 %v18944_v17  ;;  %v11835_v16 = vadd.f32 %v11834_v56, %v19480_v11  ;;  %12909 = vmatpush1.bf16.msra.mxu0 %v16313_v12  ;;  %v16439_v12 = vld [vmem:[%s17825_s28 + $0x3a0] ss:$16 sps:$4 sm:$0xff]   ;;  %v16444_v56 = vld [vmem:[%s17825_s28 + $0x384] ss:$16 sps:$4 sm:$0xff]  }
 0x7ee   : > { %12940 = vmatprep.mubr.bf16.mxu0 %v19545_v53  ;;  %v11836_v21 = vpop.f32.mrf.mxu0  ;;  %12910 = vmatprep.subr.bf16.mxu0 %v16318_v7  ;;  %v16354_v7 = vld [vmem:[%s17825_s28 + $0x144] ss:$16 sps:$4 sm:$0xff]  }
 0x7ef   : > { %v11877_v58 = vpop.f32.mrf.mxu1  ;;  %v19553_v29 = vadd.f32 %v11875_v34, %v11835_v16  ;;  %v11837_v19 = vadd.f32 %v11836_v21, %v19485_v47  ;;  %v16322_v47 = vld [vmem:[%s17825_s28 + $0x80] ss:$16 sps:$4 sm:$0xff]   ;;  %12950 = vmatpush1.bf16.msra.mxu1 %v16409_v26  ;;  %v16447_v21 = vld [vmem:[%s17825_s28 + $0x364] ss:$16 sps:$4 sm:$0xff]  }
 0x7f0   : > { %v11838_v17 = vpop.f32.mrf.mxu0  ;;  %12951 = vmatprep.subr.bf16.mxu1 %v16414_v1  ;;  %v16352_v34 = vld [vmem:[%s17825_s28 + $0x140] ss:$16 sps:$4 sm:$0xff]  }
 0x7f1   : > { %v11879_v11 = vpop.f32.mrf.mxu1  ;;  %v19556_v32 = vadd.f32 %v11877_v58, %v11837_v19  ;;  %12911 = vmatpush1.bf16.msra.mxu0 %v16316_v20  ;;  %v16442_v16 = vld [vmem:[%s17825_s28 + $0x380] ss:$16 sps:$4 sm:$0xff]   ;;  %v16357_v20 = vld [vmem:[%s17825_s28 + $0x124] ss:$16 sps:$4 sm:$0xff]  }
 0x7f2   : > { %v11839_v52 = vpop.f32.mrf.mxu0  ;;  %12912 = vmatprep.subr.bf16.mxu0 %v16321_v59  ;;  %v16355_v58 = vld [vmem:[%s17825_s28 + $0x120] ss:$16 sps:$4 sm:$0xff]   ;;  %v16360_v19 = vld [vmem:[%s17825_s28 + $0x104] ss:$16 sps:$4 sm:$0xff]  }
 0x7f3   : > { %v11880_v28 = vpop.f32.mrf.mxu1  ;;  %12952 = vmatpush1.bf16.msra.mxu1 %v16412_v36  ;;  %v16445_v59 = vld [vmem:[%s17825_s28 + $0x360] ss:$16 sps:$4 sm:$0xff]   ;;  %v16450_v17 = vld [vmem:[%s17825_s28 + $0x344] ss:$16 sps:$4 sm:$0xff]   ;;  %v12128_v52 = vmax.f32 %v19177_v30, 0.0 }
 0x7f4   : > { %12953 = vmatprep.subr.bf16.mxu1 %v16417_v61  ;;  %v16358_v11 = vld [vmem:[%s17825_s28 + $0x100] ss:$16 sps:$4 sm:$0xff]   ;;  %v16363_v28 = vld [vmem:[%s17825_s28 + $0xec] ss:$16 sps:$4 sm:$0xff]   ;;  %v16364_v36 = vld [vmem:[%s17825_s28 + $0xc8] ss:$16 sps:$4 sm:$0xff]  }
 0x7f5   : > { %12913 = vmatpush1.bf16.msra.mxu0 %v16319_v22  ;;  %v16448_v22 = vld [vmem:[%s17825_s28 + $0x340] ss:$16 sps:$4 sm:$0xff]   ;;  %v19616_v26 = vpack.c.bf16 %v12128_v52, %v12128_v52 }
 0x7f6   : > { %12914 = vmatprep.subr.bf16.mxu0 %v16324_v2  ;;  %v16361_v2 = vld [vmem:[%s17825_s28 + $0xe8] ss:$16 sps:$4 sm:$0xff]  }
 0x7f7   : > { %12954 = vmatpush1.bf16.msra.mxu1 %v16415_v14  ;;  %v16369_v14 = vld [vmem:[%s17825_s28 + $0xac] ss:$16 sps:$4 sm:$0xff]  }
 0x7f8   : > { %12955 = vmatprep.subr.bf16.mxu1 %v16420_v8 }
 0x7f9   : > { %12915 = vmatpush1.bf16.msra.mxu0 %v16322_v47 }
 0x7fa   : > { %12916 = vmatprep.subr.bf16.mxu0 %v16327_v31  ;;  %v16453_v31 = vld [vmem:[%s17825_s28 + $0x324] ss:$16 sps:$4 sm:$0xff]  }
 0x7fb   : > { %12956 = vmatpush1.bf16.msra.mxu1 %v16418_v24 }
 0x7fc   : > { %12957 = vmatprep.subr.bf16.mxu1 %v16423_v9  ;;  %v16456_v9 = vld [vmem:[%s17825_s28 + $0x304] ss:$16 sps:$4 sm:$0xff]  }
 0x7fd   : > { %12917 = vmatpush1.bf16.msra.mxu0 %v16325_v23 }
 0x7fe   : > { %12918 = vmatprep.subr.bf16.mxu0 %v16330_v5  ;;  %v16451_v5 = vld [vmem:[%s17825_s28 + $0x320] ss:$16 sps:$4 sm:$0xff]  }
 0x7ff   : > { %12958 = vmatpush1.bf16.msra.mxu1 %v16421_v57 }
 0x800   : > { %12959 = vmatprep.subr.bf16.mxu1 %v16426_v41  ;;  %v16370_v41 = vld [vmem:[%s17825_s28 + $0x88] ss:$16 sps:$4 sm:$0xff]  }
 0x801   : > { %12919 = vmatpush1.bf16.msra.mxu0 %v16328_v0 }
 0x802   : > { %12920 = vmatprep.subr.bf16.mxu0 %v16333_v15  ;;  %v16367_v15 = vld [vmem:[%s17825_s28 + $0xa8] ss:$16 sps:$4 sm:$0xff]  }
 0x803   : > { %12960 = vmatpush1.bf16.msra.mxu1 %v16424_v44  ;;  %v16375_v44 = vld [vmem:[%s17825_s28 + $0x6c] ss:$16 sps:$4 sm:$0xff]  }
 0x804   : > { %12961 = vmatprep.subr.bf16.mxu1 %v16429_v27  ;;  %v16378_v27 = vld [vmem:[%s17825_s28 + $0x4c] ss:$16 sps:$4 sm:$0xff]  }
 0x805   : > { %12921 = vmatpush1.bf16.msra.mxu0 %v16331_v25 }
 0x806   : > { %12922 = vmatprep.subr.bf16.mxu0 %v16336_v62  ;;  %v16372_v62 = vld [vmem:[%s17825_s28 + $0x8c] ss:$16 sps:$4 sm:$0xff]  }
 0x807   : > { %12962 = vmatpush1.bf16.msra.mxu1 %v16427_v46  ;;  %v16381_v46 = vld [vmem:[%s17825_s28 + $0x2c] ss:$16 sps:$4 sm:$0xff]  }
 0x808   : > { %12963 = vmatprep.subr.bf16.mxu1 %v16432_v3  ;;  %v16384_v3 = vld [vmem:[%s17825_s28 + $0xc] ss:$16 sps:$4 sm:$0xff]  }
 0x809   : > { %12923 = vmatpush1.bf16.msra.mxu0 %v16334_v43  ;;  %v16459_v43 = vld [vmem:[%s17825_s28 + $0x2ec] ss:$16 sps:$4 sm:$0xff]  }
 0x80a   : > { %12924 = vmatprep.subr.bf16.mxu0 %v16339_v45  ;;  %v16373_v45 = vld [vmem:[%s17825_s28 + $0x68] ss:$16 sps:$4 sm:$0xff]  }
 0x80b   : > { %12964 = vmatpush1.bf16.msra.mxu1 %v16430_v38  ;;  %v16387_v38 = vld [vmem:[%s17825_s28 + $0x1ec] ss:$16 sps:$4 sm:$0xff]  }
 0x80c   : > { %12965 = vmatprep.subr.bf16.mxu1 %v16435_v4  ;;  %v16390_v4 = vld [vmem:[%s17825_s28 + $0x1cc] ss:$16 sps:$4 sm:$0xff]  }
 0x80d   : > { %12925 = vmatpush2.bf16.msra.mxu0 %v16337_v50  ;;  %v16376_v50 = vld [vmem:[%s17825_s28 + $0x48] ss:$16 sps:$4 sm:$0xff]  }
 0x80e   : > { %12926 = vmatprep.subr.bf16.mxu0 %v16342_v60  ;;  %v16379_v60 = vld [vmem:[%s17825_s28 + $0x28] ss:$16 sps:$4 sm:$0xff]  }
 0x80f   : > { %12966 = vmatpush2.bf16.msra.mxu1 %v16433_v42  ;;  %v16393_v42 = vld [vmem:[%s17825_s28 + $0x1ac] ss:$16 sps:$4 sm:$0xff]  }
 0x810   : > { %12967 = vmatprep.subr.bf16.mxu1 %v16438_v35  ;;  %v16396_v35 = vld [vmem:[%s17825_s28 + $0x18c] ss:$16 sps:$4 sm:$0xff]  }
 0x811   : > { %12927 = vmatpush2.bf16.msra.mxu0 %v16340_v37  ;;  %v16382_v37 = vld [vmem:[%s17825_s28 + $0x8] ss:$16 sps:$4 sm:$0xff]  }
 0x812   : > { %12928 = vmatprep.subr.bf16.mxu0 %v16345_v63  ;;  %v16385_v63 = vld [vmem:[%s17825_s28 + $0x1e8] ss:$16 sps:$4 sm:$0xff]  }
 0x813   : > { %12968 = vmatpush2.bf16.msra.mxu1 %v16436_v13  ;;  %v16399_v13 = vld [vmem:[%s17825_s28 + $0x16c] ss:$16 sps:$4 sm:$0xff]  }
 0x814   : > { %12969 = vmatprep.subr.bf16.mxu1 %v16441_v18  ;;  %v16402_v18 = vld [vmem:[%s17825_s28 + $0x14c] ss:$16 sps:$4 sm:$0xff]  }
 0x815   : > { %12929 = vmatpush2.bf16.msra.mxu0 %v16343_v54  ;;  %v16388_v54 = vld [vmem:[%s17825_s28 + $0x1c8] ss:$16 sps:$4 sm:$0xff]  }
 0x816   : > { %12930 = vmatprep.subr.bf16.mxu0 %v16348_v10  ;;  %v16391_v10 = vld [vmem:[%s17825_s28 + $0x1a8] ss:$16 sps:$4 sm:$0xff]  }
 0x817   : > { %12970 = vmatpush2.bf16.msra.mxu1 %v16439_v12  ;;  %v16405_v12 = vld [vmem:[%s17825_s28 + $0x12c] ss:$16 sps:$4 sm:$0xff]  }
 0x818   : > { %12971 = vmatprep.subr.bf16.mxu1 %v16444_v56  ;;  %v16408_v56 = vld [vmem:[%s17825_s28 + $0x10c] ss:$16 sps:$4 sm:$0xff]  }
 0x819   : > { %12931 = vmatpush2.bf16.msra.mxu0 %v16346_v55  ;;  %v16394_v55 = vld [vmem:[%s17825_s28 + $0x188] ss:$16 sps:$4 sm:$0xff]  }
 0x81a   : > { %12932 = vmatprep.subr.bf16.mxu0 %v16351_v39  ;;  %v16397_v39 = vld [vmem:[%s17825_s28 + $0x168] ss:$16 sps:$4 sm:$0xff]  }
 0x81b   : > { %12972 = vmatpush2.bf16.msra.mxu1 %v16442_v16 }
 0x81c   : > { %12973 = vmatprep.subr.bf16.mxu1 %v16447_v21 }
 0x81d   : > { %12933 = vmatpush2.bf16.msra.mxu0 %v16349_v40  ;;  %v16400_v40 = vld [vmem:[%s17825_s28 + $0x148] ss:$16 sps:$4 sm:$0xff]  }
 0x81e   : > { %12934 = vmatprep.subr.bf16.mxu0 %v16354_v7  ;;  %v16403_v7 = vld [vmem:[%s17825_s28 + $0x128] ss:$16 sps:$4 sm:$0xff]  }
 0x81f   : > { %12974 = vmatpush2.bf16.msra.mxu1 %v16445_v59 }
 0x820   : > { %12975 = vmatprep.subr.bf16.mxu1 %v16450_v17 }
 0x821   : > { %12935 = vmatpush2.bf16.msra.mxu0 %v16352_v34  ;;  %v16406_v34 = vld [vmem:[%s17825_s28 + $0x108] ss:$16 sps:$4 sm:$0xff]  }
 0x822   : > { %12936 = vmatprep.subr.bf16.mxu0 %v16357_v20 }
 0x823   : > { %12976 = vmatpush2.bf16.msra.mxu1 %v16448_v22 }
 0x824   : > { %12977 = vmatprep.subr.bf16.mxu1 %v16453_v31 }
 0x825   : > { %12937 = vmatpush2.bf16.msra.mxu0 %v16355_v58 }
 0x826   : > { %12938 = vmatprep.subr.bf16.mxu0 %v16360_v19 }
 0x827   : > { %12978 = vmatpush2.bf16.msra.mxu1 %v16451_v5 }
 0x828   : > { %12979 = vmatprep.subr.bf16.mxu1 %v16456_v9  ;;  %v16462_v9 = vld [vmem:[%s17825_s28 + $0x2cc] ss:$16 sps:$4 sm:$0xff]  }
 0x829   : > { %12939 = vmatpush2.bf16.msra.mxu0 %v16358_v11 }
 0x82a   : > { %12990 = vmatprep.subr.bf16.mxu0 %v16363_v28 }
 0x82c   : > { %v11916_v1 = vpop.f32.mrf.mxu0  ;;  %12941 = vmatmul.mubr.bf16.vlgmr.msra.gmra.mxu0 %v19616_v26 }
 0x82d   : > { %v11957_v47 = vpop.f32.mrf.mxu1  ;;  %v11917_v30 = vadd.f32 %v11916_v1, %v19553_v29  ;;  %12991 = vmatpush1.bf16.msra.mxu0 %v16361_v2  ;;  %13022 = vmatprep.mubr.bf16.mxu0 %v19545_v53 }
 0x82e   : > { %v11918_v61 = vpop.f32.mrf.mxu0  ;;  %12992 = vmatprep.subr.bf16.mxu0 %v16366_v33 }
 0x82f   : > { %v11959_v23 = vpop.f32.mrf.mxu1  ;;  %v19626_v8 = vadd.f32 %v11957_v47, %v11917_v30  ;;  %v11919_v0 = vadd.f32 %v11918_v61, %v19556_v32  ;;  %v16454_v32 = vld [vmem:[%s17825_s28 + $0x300] ss:$16 sps:$4 sm:$0xff]  }
 0x830   : > { %v11920_v29 = vpop.f32.mrf.mxu0  ;;  %12980 = vmatpush2.bf16.msra.mxu1 %v16454_v32  ;;  %v16468_v32 = vld [vmem:[%s17825_s28 + $0x28c] ss:$16 sps:$4 sm:$0xff]  }
 0x831   : > { %v11961_v53 = vpop.f32.mrf.mxu1  ;;  %v19629_v24 = vadd.f32 %v11959_v23, %v11919_v0  ;;  %12993 = vmatpush1.bf16.msra.mxu0 %v16364_v36  ;;  %13031 = vmatprep.subr.bf16.mxu1 %v16459_v43  ;;  %v16471_v43 = vld [vmem:[%s17825_s28 + $0x26c] ss:$16 sps:$4 sm:$0xff]  }
 0x832   : > { %v11921_v25 = vpop.f32.mrf.mxu0  ;;  %12994 = vmatprep.subr.bf16.mxu0 %v16369_v14 }
 0x833   : > { %v11962_v57 = vpop.f32.mrf.mxu1  ;;  %v16460_v25 = vld [vmem:[%s17825_s28 + $0x2c8] ss:$16 sps:$4 sm:$0xff]  }
 0x834   : > { %v16465_v57 = vld [vmem:[%s17825_s28 + $0x2ac] ss:$16 sps:$4 sm:$0xff]  }
 0x835   : > { %12995 = vmatpush1.bf16.msra.mxu0 %v16367_v15 }
 0x836   : > { %12996 = vmatprep.subr.bf16.mxu0 %v16372_v62  ;;  %v16463_v62 = vld [vmem:[%s17825_s28 + $0x2a8] ss:$16 sps:$4 sm:$0xff]  }
 0x839   : > { %12997 = vmatpush1.bf16.msra.mxu0 %v16370_v41  ;;  %v16466_v41 = vld [vmem:[%s17825_s28 + $0x288] ss:$16 sps:$4 sm:$0xff]  }
 0x83a   : > { %12998 = vmatprep.subr.bf16.mxu0 %v16375_v44  ;;  %v16469_v44 = vld [vmem:[%s17825_s28 + $0x268] ss:$16 sps:$4 sm:$0xff]  }
 0x83d   : > { %12999 = vmatpush1.bf16.msra.mxu0 %v16373_v45  ;;  %v16474_v45 = vld [vmem:[%s17825_s28 + $0x24c] ss:$16 sps:$4 sm:$0xff]  }
 0x83e   : > { %13000 = vmatprep.subr.bf16.mxu0 %v16378_v27  ;;  %v16472_v27 = vld [vmem:[%s17825_s28 + $0x248] ss:$16 sps:$4 sm:$0xff]  }
 0x841   : > { %13001 = vmatpush1.bf16.msra.mxu0 %v16376_v50  ;;  %v16477_v50 = vld [vmem:[%s17825_s28 + $0x22c] ss:$16 sps:$4 sm:$0xff]  }
 0x842   : > { %13002 = vmatprep.subr.bf16.mxu0 %v16381_v46  ;;  %v16475_v46 = vld [vmem:[%s17825_s28 + $0x228] ss:$16 sps:$4 sm:$0xff]  }
 0x845   : > { %13003 = vmatpush1.bf16.msra.mxu0 %v16379_v60  ;;  %v16480_v60 = vld [vmem:[%s17825_s28 + $0x20c] ss:$16 sps:$4 sm:$0xff]  }
 0x846   : > { %13004 = vmatprep.subr.bf16.mxu0 %v16384_v3  ;;  %v16478_v3 = vld [vmem:[%s17825_s28 + $0x208] ss:$16 sps:$4 sm:$0xff]  }
 0x849   : > { %13005 = vmatpush1.bf16.msra.mxu0 %v16382_v37  ;;  %v16483_v37 = vld [vmem:[%s17825_s28 + $0x3ec] ss:$16 sps:$4 sm:$0xff]  }
 0x84a   : > { %13006 = vmatprep.subr.bf16.mxu0 %v16387_v38  ;;  %v16481_v38 = vld [vmem:[%s17825_s28 + $0x3e8] ss:$16 sps:$4 sm:$0xff]  }
 0x84d   : > { %13007 = vmatpush2.bf16.msra.mxu0 %v16385_v63  ;;  %v16486_v63 = vld [vmem:[%s17825_s28 + $0x3cc] ss:$16 sps:$4 sm:$0xff]  }
 0x84e   : > { %13008 = vmatprep.subr.bf16.mxu0 %v16390_v4  ;;  %v16484_v4 = vld [vmem:[%s17825_s28 + $0x3c8] ss:$16 sps:$4 sm:$0xff]  }
 0x851   : > { %13009 = vmatpush2.bf16.msra.mxu0 %v16388_v54  ;;  %v16489_v54 = vld [vmem:[%s17825_s28 + $0x3ac] ss:$16 sps:$4 sm:$0xff]  }
 0x852   : > { %13010 = vmatprep.subr.bf16.mxu0 %v16393_v42  ;;  %v16487_v42 = vld [vmem:[%s17825_s28 + $0x3a8] ss:$16 sps:$4 sm:$0xff]  }
 0x855   : > { %13011 = vmatpush2.bf16.msra.mxu0 %v16391_v10  ;;  %v16492_v10 = vld [vmem:[%s17825_s28 + $0x38c] ss:$16 sps:$4 sm:$0xff]  }
 0x856   : > { %13012 = vmatprep.subr.bf16.mxu0 %v16396_v35  ;;  %v16490_v35 = vld [vmem:[%s17825_s28 + $0x388] ss:$16 sps:$4 sm:$0xff]  }
 0x859   : > { %13013 = vmatpush2.bf16.msra.mxu0 %v16394_v55  ;;  %v16495_v55 = vld [vmem:[%s17825_s28 + $0x36c] ss:$16 sps:$4 sm:$0xff]  }
 0x85a   : > { %13014 = vmatprep.subr.bf16.mxu0 %v16399_v13  ;;  %v16493_v13 = vld [vmem:[%s17825_s28 + $0x368] ss:$16 sps:$4 sm:$0xff]  }
 0x85d   : > { %13015 = vmatpush2.bf16.msra.mxu0 %v16397_v39  ;;  %v16498_v39 = vld [vmem:[%s17825_s28 + $0x34c] ss:$16 sps:$4 sm:$0xff]  }
 0x85e   : > { %13016 = vmatprep.subr.bf16.mxu0 %v16402_v18  ;;  %v16496_v18 = vld [vmem:[%s17825_s28 + $0x348] ss:$16 sps:$4 sm:$0xff]  }
 0x861   : > { %13017 = vmatpush2.bf16.msra.mxu0 %v16400_v40  ;;  %v16501_v40 = vld [vmem:[%s17825_s28 + $0x32c] ss:$16 sps:$4 sm:$0xff]  }
 0x862   : > { %13018 = vmatprep.subr.bf16.mxu0 %v16405_v12 }
 0x865   : > { %13019 = vmatpush2.bf16.msra.mxu0 %v16403_v7  ;;  %v16499_v7 = vld [vmem:[%s17825_s28 + $0x328] ss:$16 sps:$4 sm:$0xff]  }
 0x866   : > { %13020 = vmatprep.subr.bf16.mxu0 %v16408_v56 }
 0x869   : > { %13021 = vmatpush2.bf16.msra.mxu0 %v16406_v34  ;;  %v16504_v34 = vld [vmem:[%s17825_s28 + $0x30c] ss:$16 sps:$4 sm:$0xff]  }
 0x86c   : > { %v11998_v16 = vpop.f32.mrf.mxu0  ;;  %13023 = vmatmul.mubr.bf16.vlgmr.msra.gmra.mxu0 %v19616_v26 }
 0x86d   : > { %v12039_v20 = vpop.f32.mrf.mxu1  ;;  %v11999_v21 = vadd.f32 %v11998_v16, %v19626_v8 }
 0x86e   : > { %v12000_v58 = vpop.f32.mrf.mxu0 }
 0x86f   : > { %v12041_v59 = vpop.f32.mrf.mxu1  ;;  %v12040_v19 = vadd.f32 %v12039_v20, %v11999_v21  ;;  %v12001_v28 = vadd.f32 %v12000_v58, %v19629_v24  ;;  %v16457_v24 = vld [vmem:[%s17825_s28 + $0x2e8] ss:$16 sps:$4 sm:$0xff]  }
 0x870   : > { %v12002_v17 = vpop.f32.mrf.mxu0  ;;  %v16502_v20 = vld [vmem:[%s17825_s28 + $0x308] ss:$16 sps:$4 sm:$0xff]  }
 0x871   : > { %v12043_v11 = vpop.f32.mrf.mxu1  ;;  %v12042_v1 = vadd.f32 %v12041_v59, %v12001_v28  ;;  %v12133_v28 = vld [vmem:[#allocation3] sm:$0xff] }
 0x872   : > { %v12003_v22 = vpop.f32.mrf.mxu0  ;;  %v12132_v11 = vld [vmem:[#allocation3 + $0x10] sm:$0xff] }
 0x873   : > { %v12044_v52 = vpop.f32.mrf.mxu1 }
 0x8ac   : > { %v12080_v2 = vpop.f32.mrf.mxu0 }
 0x8ad   : > { %v12121_v33 = vpop.f32.mrf.mxu1  ;;  %v12081_v47 = vadd.f32 %v12080_v2, %v12040_v19 }
 0x8ae   : > { %v12082_v30 = vpop.f32.mrf.mxu0 }
 0x8af   : > { %v12123_v36 = vpop.f32.mrf.mxu1  ;;  %v12122_v26 = vadd.f32 %v12121_v33, %v12081_v47  ;;  %v12083_v31 = vadd.f32 %v12082_v30, %v12042_v1 }
 0x8b0   : > { %v12084_v61 = vpop.f32.mrf.mxu0 }
 0x8b1   : > { %v12125_v23 = vpop.f32.mrf.mxu1  ;;  %v12124_v14 = vadd.f32 %v12123_v36, %v12083_v31  ;;  %v12130_v5 = vmax.f32 %v12122_v26, 0.0  ;;  %v12134_v26 = vld [vmem:[#allocation3 + $0x18] sm:$0xff] }
 0x8b2   : > { %v12085_v8 = vpop.f32.mrf.mxu0  ;;  %v12135_v23 = vld [vmem:[#allocation3 + $0x8] sm:$0xff] }
 0x8b3   : > { %v12126_v0 = vpop.f32.mrf.mxu1  ;;  %v12131_v29 = vmax.f32 %v12124_v14, 0.0  ;;  %v19665_v15 = vpack.c.bf16 %v12130_v5, %v12130_v5 }
 0x8b5   : > { %v12139_v53 = vpack.c.bf16 %v12131_v29, %v12131_v29 }
 0x8b7   : > { %12981 = vmatprep.mubr.bf16.mxu1 %v12139_v53 }
 0x8b8   : > { %12982 = vmatmul.mubr.bf16.vlgmr.msra.gmra.mxu1 %v19665_v15 }
 0x8b9   : > { %13032 = vmatpush1.bf16.msra.mxu1 %v16457_v24  ;;  %13063 = vmatprep.mubr.bf16.mxu1 %v12139_v53 }
 0x8ba   : > { %13033 = vmatprep.subr.bf16.mxu1 %v16462_v9 }
 0x8bd   : > { %13034 = vmatpush1.bf16.msra.mxu1 %v16460_v25 }
 0x8be   : > { %13035 = vmatprep.subr.bf16.mxu1 %v16465_v57 }
 0x8c1   : > { %13036 = vmatpush1.bf16.msra.mxu1 %v16463_v62 }
 0x8c2   : > { %13037 = vmatprep.subr.bf16.mxu1 %v16468_v32 }
 0x8c5   : > { %13038 = vmatpush1.bf16.msra.mxu1 %v16466_v41 }
 0x8c6   : > { %13039 = vmatprep.subr.bf16.mxu1 %v16471_v43 }
 0x8c9   : > { %13040 = vmatpush1.bf16.msra.mxu1 %v16469_v44 }
 0x8ca   : > { %13041 = vmatprep.subr.bf16.mxu1 %v16474_v45 }
 0x8cd   : > { %13042 = vmatpush1.bf16.msra.mxu1 %v16472_v27 }
 0x8ce   : > { %13043 = vmatprep.subr.bf16.mxu1 %v16477_v50 }
 0x8d1   : > { %13044 = vmatpush1.bf16.msra.mxu1 %v16475_v46 }
 0x8d2   : > { %13045 = vmatprep.subr.bf16.mxu1 %v16480_v60 }
 0x8d5   : > { %13046 = vmatpush1.bf16.msra.mxu1 %v16478_v3 }
 0x8d6   : > { %13047 = vmatprep.subr.bf16.mxu1 %v16483_v37 }
 0x8d9   : > { %13048 = vmatpush2.bf16.msra.mxu1 %v16481_v38 }
 0x8da   : > { %13049 = vmatprep.subr.bf16.mxu1 %v16486_v63 }
 0x8dd   : > { %13050 = vmatpush2.bf16.msra.mxu1 %v16484_v4 }
 0x8de   : > { %13051 = vmatprep.subr.bf16.mxu1 %v16489_v54 }
 0x8e1   : > { %13052 = vmatpush2.bf16.msra.mxu1 %v16487_v42 }
 0x8e2   : > { %13053 = vmatprep.subr.bf16.mxu1 %v16492_v10 }
 0x8e5   : > { %13054 = vmatpush2.bf16.msra.mxu1 %v16490_v35 }
 0x8e6   : > { %13055 = vmatprep.subr.bf16.mxu1 %v16495_v55 }
 0x8e9   : > { %13056 = vmatpush2.bf16.msra.mxu1 %v16493_v13 }
 0x8ea   : > { %13057 = vmatprep.subr.bf16.mxu1 %v16498_v39 }
 0x8ec   : > { %v12942_v12 = vpop.f32.mrf.mxu0 }
 0x8ed   : > { %13058 = vmatpush2.bf16.msra.mxu1 %v16496_v18 }
 0x8ee   : > { %v12944_v56 = vpop.f32.mrf.mxu0  ;;  %13059 = vmatprep.subr.bf16.mxu1 %v16501_v40 }
 0x8f0   : > { %v12946_v16 = vpop.f32.mrf.mxu0 }
 0x8f1   : > { %13060 = vmatpush2.bf16.msra.mxu1 %v16499_v7 }
 0x8f2   : > { %v12947_v21 = vpop.f32.mrf.mxu0  ;;  %13061 = vmatprep.subr.bf16.mxu1 %v16504_v34 }
 0x8f5   : > { %13062 = vmatpush2.bf16.msra.mxu1 %v16502_v20 }
 0x8f8   : > { %13064 = vmatmul.mubr.bf16.vlgmr.msra.gmra.mxu1 %v19665_v15 }
 0x92c   : > { %v13024_v58 = vpop.f32.mrf.mxu0 }
 0x92e   : > { %v13026_v59 = vpop.f32.mrf.mxu0 }
 0x930   : > { %v13028_v19 = vpop.f32.mrf.mxu0 }
 0x932   : > { %v13029_v17 = vpop.f32.mrf.mxu0 }
 0x978   : > { %v12983_v22 = vpop.f32.mrf.mxu1 }
 0x979   : > { %v12984_v52 = vadd.f32 %v12983_v22, %v12942_v12 }
 0x97a   : > { %v12985_v2 = vpop.f32.mrf.mxu1 }
 0x97b   : > { %v13072_v33 = vadd.f32 %v12984_v52, %v12132_v11  ;;  %v12986_v1 = vadd.f32 %v12985_v2, %v12944_v56 }
 0x97c   : > { %v12987_v47 = vpop.f32.mrf.mxu1 }
 0x97d   : > { %13076 = vst [vmem:[#allocation3 + $0x10] sm:$0xff] %v13072_v33  ;;  %v13073_v30 = vadd.f32 %v12986_v1, %v12133_v28 }
 0x97e   : > { %v12988_v36 = vpop.f32.mrf.mxu1 }
 0x97f   : > { %13077 = vst [vmem:[#allocation3] sm:$0xff] %v13073_v30 }
 0x9b8   : > { %v13065_v31 = vpop.f32.mrf.mxu1 }
 0x9b9   : > { %v13066_v61 = vadd.f32 %v13065_v31, %v13024_v58 }
 0x9ba   : > { %v13067_v14 = vpop.f32.mrf.mxu1 }
 0x9bb   : > { %v13074_v5 = vadd.f32 %v13066_v61, %v12134_v26  ;;  %v13068_v8 = vadd.f32 %v13067_v14, %v13026_v59  ;;  %13083 = sbr.rel (%p14491_p6) target bundleno = 2685 (0xa7d), region = 105 }
 0x9bc   : > { %v13069_v0 = vpop.f32.mrf.mxu1 }
 0x9bd   : > { %13078 = vst [vmem:[#allocation3 + $0x18] sm:$0xff] %v13074_v5  ;;  %v13075_v29 = vadd.f32 %v13068_v8, %v12135_v23 }
 0x9be   : > { %v13070_v53 = vpop.f32.mrf.mxu1 }
 0x9bf   : > { %13079 = vst [vmem:[#allocation3 + $0x8] sm:$0xff] %v13075_v29 }
 0x9c0   : > { %v13084_v24 = vld [vmem:[#allocation3 + $0x10] sm:$0xff]  ;;  %v13085_v15 = vld [vmem:[#allocation3] sm:$0xff]  ;;  %vm13163_vm1 = vcmask 1024  }
 0x9c1   : > { %v13088_v57 = vld [vmem:[%s19736_s6] sm:$0xf] }
 0x9c2   : > { %v13118_v62 = vld [vmem:[%s19737_s7] sm:$0xf]  ;;  %v13093_v32 = vrot.slane %v13088_v57, %v18553_v51  ;;  %v13097_v41 = vrot.slane %v13088_v57, %v18559_v6  ;;  %v13101_v43 = vrot.slane %v13088_v57, %v19239_v48  ;;  %v13105_v44 = vrot.slane %v13088_v57, %v19244_v49 }
 0x9c3   : > { %v13123_v45 = vrot.slane %v13118_v62, %v18553_v51  ;;  %v13127_v27 = vrot.slane %v13118_v62, %v18559_v6  ;;  %v13131_v50 = vrot.slane %v13118_v62, %v19239_v48  ;;  %v13135_v38 = vrot.slane %v13118_v62, %v19244_v49  ;;  %v14492_v6 = vld [vmem:[#allocation4] ss:$0 sm:$0xff] }
 0x9c4   : > { %v13086_v9 = vld [vmem:[#allocation3 + $0x18] sm:$0xff]  ;;  %v13110_v46 = vadd.f32 %v13093_v32, %v13084_v24  ;;  %v13111_v60 = vadd.f32 %v13097_v41, %v13085_v15 }
 0x9c5   : > { %v13112_v3 = vadd.f32 %v13101_v43, %v13086_v9 }
 0x9c6   : > { %v13087_v25 = vld [vmem:[#allocation3 + $0x8] sm:$0xff]  ;;  %v13114_v63 = vmax.f32 %v13110_v46, 0.0  ;;  %v13115_v4 = vmax.f32 %v13111_v60, 0.0 }
 0x9c7   : > { %v13113_v37 = vadd.f32 %v13105_v44, %v13087_v25  ;;  %v13116_v54 = vmax.f32 %v13112_v3, 0.0 }
 0x9c8   : > { %v13140_v10 = vmul.f32 %v13123_v45, %v13114_v63  ;;  %v13141_v35 = vmul.f32 %v13127_v27, %v13115_v4 }
 0x9c9   : > { %v13117_v42 = vmax.f32 %v13113_v37, 0.0  ;;  %v13142_v55 = vmul.f32 %v13131_v50, %v13116_v54 }
 0x9ca   : > { %v13144_v39 = vadd.f32 %v13141_v35, %v13140_v10 }
 0x9cb   : > { %v13143_v13 = vmul.f32 %v13135_v38, %v13117_v42 }
 0x9cc   : > { %v13145_v51 = vadd.f32 %v13144_v39, %v13142_v55 }
 0x9ce   : > { %v13146_v18 = vadd.f32 %v13145_v51, %v13143_v13 }
 0x9d0   : > { %13147 = vadd.xlane.f32.xlu0 %v13146_v18 }
 0xa59   : > { %v13148_v48 = vpop.xlane.xlu0 %13147 }
 0xa5a   : > { %v13156_v40 = vadd.f32 %v14492_v6, %v13148_v48 }
 0xa5c   : > { %v14493_v12 = vmul.f32 -1.442695, %v13156_v40 }
 0xa5e   : > { %16506 = vpow2.f32 %v14493_v12 }
 0xa6b   : > { %v16507_v7 = vpop.eup %16506 }
 0xa6c   : > { %v13160_v56 = vadd.f32 1.0, %v16507_v7 }
 0xa6e   : > { %16508 = vrcp.f32 %v13160_v56 }
 0xa7b   : > { %v16509_v49 = vpop.eup %16508 }
 0xa7c   : > { %13164 = vst.msk [vmem:[%s19739_s9] sm:$0x3] %vm13163_vm1, %v16509_v49 }
 0xa7d PF: > { %s19750_s22 = sld [smem:[#allocation9_spill]]  ;;  %p21_p2 = scmp.ge.s32.totalorder %s16684_s15, 4  }
 0xa7e   : > { %s19751_s11 = smov %s16578_s12  ;;  %s19752_s12 = smov %s16582_s13 }
 0xa7f   : > { %s19754_s14 = smov %s16684_s15  ;;  %23 = sbr.rel (!%p21_p2) target bundleno = 6 (0x6), region = 161 }
 0xa83   : > { %s19753_s13 = smov %s19750_s22 }
 0xa84   :  { %13176 = vsyncpa [#allocation7], 1 }
 0xa85   :  { %13178 = vsyncpa [#allocation7 + $0x1], 1 }

</bundles_post_ra>
